<compile_context>
chip_gen: v7x
topology: tpu7x:2x2x1
jax: 0.10.0
libtpu: 0.0.40
codegen_flags: <defaults>
</compile_context>

<pallas_src>
import functools
import math

import jax
import jax.numpy as jnp
import numpy as np
from jax import lax
from jax.experimental import pallas as pl
from jax.experimental.pallas import tpu as pltpu

# ---- tiling / dtype knobs ---------------------------------------------------
MXU_DTYPE = jnp.bfloat16   # operand dtype for all MXU matmuls (f32 accumulation)
TILE_E = 256               # edges per chunk; fills 256x256 MXU on v6e/v7x
                           # (use 128 on v5e's 128x128 MXU)
TILE_NODE = 256            # node rows per tile for kernels 1 and 3
_NEG_BIG = -1e30


def _default_vmem_limit():
    # Generation-dependent scoped-VMEM limit: ~3/4 of per-core capacity, capped
    # at 100 MiB (v5e/v6e: 128 MiB; v7x: 64 MiB per TensorCore).
    try:
        cap = int(pltpu.get_tpu_info().vmem_capacity_bytes)
    except Exception:
        cap = 64 * 1024 * 1024
    return min(cap * 3 // 4, 100 * 1024 * 1024)


_VMEM_LIMIT = _default_vmem_limit()


def _gelu_tanh(x):
    # TODO(synk): torch.nn.GELU defaults to the exact erf form; erf has no clean
    # Mosaic lowering here, so the tanh approximation is used (also in the ref).
    c = math.sqrt(2.0 / math.pi)
    return 0.5 * x * (1.0 + jnp.tanh(c * (x + 0.044715 * x * x * x)))


def _layernorm(x, g, b, eps=1e-5):
    mu = jnp.mean(x, axis=-1, keepdims=True)
    xc = x - mu
    var = jnp.mean(xc * xc, axis=-1, keepdims=True)
    return xc * lax.rsqrt(var + eps) * g + b


def _round_up(x, m):
    return (x + m - 1) // m * m


# -----------------------------------------------------------------------------
# Kernel 1: LayerNorm + two Linear projections, tiled over node rows.
# -----------------------------------------------------------------------------
def _ln_dual_linear_kernel(x_ref, g_ref, b_ref, w1_ref, b1_ref, w2_ref, b2_ref,
                           o1_ref, o2_ref):
    f32 = jnp.float32
    xn = _layernorm(x_ref[...].astype(f32), g_ref[...], b_ref[...]).astype(MXU_DTYPE)
    o1 = jnp.dot(xn, w1_ref[...], preferred_element_type=f32) + b1_ref[...]
    o2 = jnp.dot(xn, w2_ref[...], preferred_element_type=f32) + b2_ref[...]
    o1_ref[...] = o1.astype(o1_ref.dtype)
    o2_ref[...] = o2.astype(o2_ref.dtype)


def _ln_dual_linear(x, g, b, w1, b1, w2, b2, tile, out_dtypes):
    n, cin = x.shape
    d1, d2 = w1.shape[1], w2.shape[1]
    row = lambda i: (i, 0)
    full = lambda i: (0, 0)
    # TODO(synk): at production hc/hidden, mark the constant weight BlockSpecs
    # pipeline_mode=pl.Buffered(1) so they are single-buffered in VMEM.
    return pl.pallas_call(
        _ln_dual_linear_kernel,
        grid=(n // tile,),
        in_specs=[
            pl.BlockSpec((tile, cin), row),
            pl.BlockSpec((1, cin), full), pl.BlockSpec((1, cin), full),
            pl.BlockSpec((cin, d1), full), pl.BlockSpec((1, d1), full),
            pl.BlockSpec((cin, d2), full), pl.BlockSpec((1, d2), full),
        ],
        out_specs=(pl.BlockSpec((tile, d1), row), pl.BlockSpec((tile, d2), row)),
        out_shape=(jax.ShapeDtypeStruct((n, d1), out_dtypes[0]),
                   jax.ShapeDtypeStruct((n, d2), out_dtypes[1])),
        compiler_params=pltpu.CompilerParams(
            dimension_semantics=("parallel",),
            vmem_limit_bytes=_VMEM_LIMIT),
    )(x, g, b, w1, b1, w2, b2)


# -----------------------------------------------------------------------------
# Kernel 2: edge attention with online segment softmax, accumulated per dst.
# Grid: (head_groups "parallel", edge_chunks "arbitrary").
# -----------------------------------------------------------------------------
def _edge_attn_kernel(src_ref, dst_ref, eattr_ref, q_ref, k_ref, v_ref,
                      w_e_ref, b_e_ref, sh_ref,
                      acc_ref,                 # output: VMEM-resident accumulator
                      den_ref, m_ref,          # VMEM scratch (den, running max)
                      *, head_dim):
    f32 = jnp.float32
    nd = q_ref.shape[0]
    ns = k_ref.shape[0]
    e_blk = src_ref.shape[0]
    t = pl.program_id(1)

    @pl.when(t == 0)
    def _init():
        acc_ref[...] = jnp.zeros(acc_ref.shape, acc_ref.dtype)
        den_ref[...] = jnp.zeros(den_ref.shape, den_ref.dtype)
        m_ref[...] = jnp.full(m_ref.shape, _NEG_BIG, m_ref.dtype)

    # Edge-feature projection for this chunk (bf16 operands, f32 accumulate).
    e = jnp.dot(eattr_ref[...], w_e_ref[...], preferred_element_type=f32) + b_e_ref[...]

    # One-hot gather/scatter matrices ({0,1} exact in bf16 -> exact gathers).
    # TODO(synk): at production graph sizes replace the O(E*N) one-hot matmuls
    # with scalar-prefetched (dst-sorted) index maps / manual DMA gathers with
    # edge ids in SMEM; kept one-hot (tiled) here.
    src = src_ref[...]                                             # (e_blk, 1) int32
    dst = dst_ref[...]
    S = (src == lax.broadcasted_iota(jnp.int32, (e_blk, ns), 1)).astype(MXU_DTYPE)
    D = (dst == lax.broadcasted_iota(jnp.int32, (e_blk, nd), 1)).astype(MXU_DTYPE)

    q_e = jnp.dot(D, q_ref[...], preferred_element_type=f32)              # query_i
    k_e = jnp.dot(S, k_ref[...], preferred_element_type=f32) + e          # key_j + e
    v_e = jnp.dot(S, v_ref[...], preferred_element_type=f32) + e          # value_j + e

    # Per-head scores replicated lane-dense across each head's columns via the
    # precomputed block-diagonal same-head mask (hoisted out of the kernel).
    alpha = jnp.dot((q_e * k_e).astype(MXU_DTYPE), sh_ref[...],
                    preferred_element_type=f32) * (1.0 / math.sqrt(head_dim))
    # Mask padded edges (dst sentinel == nd) so they cannot inflate the chunk max.
    alpha = jnp.where(dst >= nd, _NEG_BIG, alpha)

    # Online segment softmax with a per-head (not per-dst) running max: the
    # chunk max is an upper bound on every score, so exp() never overflows.
    m_old = m_ref[...]                                          # (1, HCg)
    g = jnp.max(alpha, axis=0, keepdims=True)                   # (1, HCg)
    m_new = jnp.maximum(m_old, g)
    m_ref[...] = m_new

    @pl.when(jnp.max(g - m_old) > 0.0)      # skip the (nd, HCg) sweeps if max unchanged
    def _rescale():
        s = jnp.exp(m_old - m_new)          # (1, HCg), <= 1
        acc_ref[...] = acc_ref[...] * s
        den_ref[...] = den_ref[...] * s

    p = jnp.exp(alpha - m_new)              # (e_blk, HCg), <= 1; padded edges -> 0
    dn = (((0,), (0,)), ((), ()))           # contract the edge axis (D^T @ .)
    den_ref[...] += lax.dot_general(D, p.astype(MXU_DTYPE), dn,
                                    preferred_element_type=f32)
    acc_ref[...] += lax.dot_general(D, (p * v_e).astype(MXU_DTYPE), dn,
                                    preferred_element_type=f32)

    # Last chunk: normalize in place (den never round-trips through HBM).
    @pl.when(t == pl.num_programs(1) - 1)
    def _finalize():
        den = den_ref[...]
        inv = pl.reciprocal(jnp.maximum(den, 1e-30), approx=True)
        acc_ref[...] = jnp.where(den > 0.0, acc_ref[...] * inv, 0.0)


# -----------------------------------------------------------------------------
# Kernel 3: per-dst finalize: projection + residual, LayerNorm + MLP + residual.
# -----------------------------------------------------------------------------
def _dst_out_kernel(attn_ref, xr_ref, xdst_ref,
                    w_p_ref, b_p_ref, g_mlp_ref, b_mlp_ref,
                    w1_ref, b1_ref, w2_ref, b2_ref, out_ref):
    f32 = jnp.float32
    h_in = (attn_ref[...] + xr_ref[...]).astype(MXU_DTYPE)
    out = jnp.dot(h_in, w_p_ref[...], preferred_element_type=f32) + b_p_ref[...]
    out = out + xdst_ref[...].astype(f32)                       # residual with x_skip[1]
    h = _layernorm(out, g_mlp_ref[...], b_mlp_ref[...]).astype(MXU_DTYPE)
    h1 = _gelu_tanh(jnp.dot(h, w1_ref[...], preferred_element_type=f32) + b1_ref[...])
    h2 = jnp.dot(h1.astype(MXU_DTYPE), w2_ref[...], preferred_element_type=f32) + b2_ref[...]
    out_ref[...] = (h2 + out).astype(out_ref.dtype)


# -----------------------------------------------------------------------------
# Wrapper
# -----------------------------------------------------------------------------
@functools.partial(jax.jit, static_argnames=("num_heads",))
def graph_transformer_mapper_block(x_src, x_dst, edge_attr, edge_index, params,
                                   *, num_heads):
    f32, bf16 = jnp.float32, MXU_DTYPE
    n_src, c_in = x_src.shape
    n_dst = x_dst.shape[0]
    n_edges, c_edge = edge_attr.shape
    hc = params["w_q"].shape[1]
    hidden = params["w_mlp1"].shape[1]
    head_dim = hc // num_heads
    assert c_in == hc, "residual connection requires in_channels == out_channels"

    # Head-group partition: leading "parallel" grid axis so the edge loop splits
    # across the two v7x TensorCores (extent 1 when hc is too small for 128-wide
    # lane-aligned column groups, e.g. at this test size).
    n_hgrp = 2 if (num_heads % 2 == 0 and (hc // 2) % 128 == 0) else 1
    hcg = hc // n_hgrp

    # ---- pad to tile multiples; padded edges use dst id == nd_p (never matched) ----
    ns_p = _round_up(n_src, TILE_NODE)
    nd_p = _round_up(n_dst, TILE_NODE)
    e_p = _round_up(n_edges, TILE_E)

    x_src_p = jnp.zeros((ns_p, c_in), f32).at[:n_src].set(x_src)
    x_dst_p = jnp.zeros((nd_p, c_in), f32).at[:n_dst].set(x_dst)
    eattr_p = jnp.zeros((e_p, c_edge), bf16).at[:n_edges].set(edge_attr.astype(bf16))
    src_idx = jnp.zeros((e_p, 1), jnp.int32).at[:n_edges, 0].set(
        edge_index[0].astype(jnp.int32))
    dst_idx = jnp.full((e_p, 1), nd_p, jnp.int32).at[:n_edges, 0].set(
        edge_index[1].astype(jnp.int32))

    # bf16 operands for all weight matmuls (f32 accumulation; biases stay f32).
    wb = {k: params[k].astype(bf16)
          for k in ("w_q", "w_k", "w_v", "w_self", "w_e", "w_proj", "w_mlp1", "w_mlp2")}

    # Same-head replication mask (block diagonal), hoisted out of the edge kernel.
    hrow = lax.broadcasted_iota(jnp.int32, (hc, hc), 0) // head_dim
    hcol = lax.broadcasted_iota(jnp.int32, (hc, hc), 1) // head_dim
    same_head = (hrow == hcol).astype(bf16)

    # ---- node projections (LayerNorm + Linear x2), tiled & parallel ----
    q, x_r = _ln_dual_linear(x_dst_p, params["ln_dst_g"], params["ln_dst_b"],
                             wb["w_q"], params["b_q"],
                             wb["w_self"], params["b_self"],
                             TILE_NODE, (bf16, f32))
    k, v = _ln_dual_linear(x_src_p, params["ln_src_g"], params["ln_src_b"],
                           wb["w_k"], params["b_k"],
                           wb["w_v"], params["b_v"],
                           TILE_NODE, (bf16, bf16))

    # ---- edge attention: chunks over edges, accumulate into resident output ----
    n_chunks = e_p // TILE_E
    edge_blk = lambda h, t: (t, 0)
    col_blk = lambda h, t: (0, h)
    diag_blk = lambda h, t: (h, h)
    # TODO(synk): at production node counts tile the dst/src axes (or move q/k/v
    # to memory_space=pl.ANY with per-chunk DMA gathers) so residency fits v7x's
    # 64 MiB VMEM instead of keeping them fully resident.
    attn = pl.pallas_call(
        functools.partial(_edge_attn_kernel, head_dim=head_dim),
        grid=(n_hgrp, n_chunks),
        in_specs=[
            pl.BlockSpec((TILE_E, 1), edge_blk),        # src ids
            pl.BlockSpec((TILE_E, 1), edge_blk),        # dst ids
            pl.BlockSpec((TILE_E, c_edge), edge_blk),   # edge features (bf16)
            pl.BlockSpec((nd_p, hcg), col_blk),         # q  (resident per head group)
            pl.BlockSpec((ns_p, hcg), col_blk),         # k
            pl.BlockSpec((ns_p, hcg), col_blk),         # v
            pl.BlockSpec((c_edge, hcg), col_blk),       # w_e
            pl.BlockSpec((1, hcg), col_blk),            # b_e
            pl.BlockSpec((hcg, hcg), diag_blk),         # same-head mask
        ],
        out_specs=pl.BlockSpec((nd_p, hcg), col_blk),   # normalized attention output
        out_shape=jax.ShapeDtypeStruct((nd_p, hc), f32),
        scratch_shapes=[pltpu.VMEM((nd_p, hcg), f32),   # den (never hits HBM)
                        pltpu.VMEM((1, hcg), f32)],     # running max (per head)
        compiler_params=pltpu.CompilerParams(
            dimension_semantics=("parallel", "arbitrary"),
            vmem_limit_bytes=_VMEM_LIMIT),
    )(src_idx, dst_idx, eattr_p, q, k, v, wb["w_e"], params["b_e"], same_head)

    # ---- per-dst finalize: projection + residual + MLP, tiled & parallel ----
    blk = lambda i: (i, 0)
    full = lambda i: (0, 0)
    nodes_new_dst = pl.pallas_call(
        _dst_out_kernel,
        grid=(nd_p // TILE_NODE,),
        in_specs=[
            pl.BlockSpec((TILE_NODE, hc), blk),         # attention output
            pl.BlockSpec((TILE_NODE, hc), blk),         # x_r
            pl.BlockSpec((TILE_NODE, c_in), blk),       # x_dst (skip)
            pl.BlockSpec((hc, hc), full), pl.BlockSpec((1, hc), full),
            pl.BlockSpec((1, hc), full), pl.BlockSpec((1, hc), full),
            pl.BlockSpec((hc, hidden), full), pl.BlockSpec((1, hidden), full),
            pl.BlockSpec((hidden, hc), full), pl.BlockSpec((1, hc), full),
        ],
        out_specs=pl.BlockSpec((TILE_NODE, hc), blk),
        out_shape=jax.ShapeDtypeStruct((nd_p, hc), f32),
        compiler_params=pltpu.CompilerParams(
            dimension_semantics=("parallel",),
            vmem_limit_bytes=_VMEM_LIMIT),
    )(attn, x_r, x_dst_p, wb["w_proj"], params["b_proj"],
      params["ln_mlp_g"], params["ln_mlp_b"],
      wb["w_mlp1"], params["b_mlp1"], wb["w_mlp2"], params["b_mlp2"])

    # update_src_nodes=False -> src nodes pass through; edge_attr returned unchanged.
    return (x_src, nodes_new_dst[:n_dst]), edge_attr


# -----------------------------------------------------------------------------
# Parameter init (torch defaults) and pure-JAX reference.
# -----------------------------------------------------------------------------
def init_params(key, c_in, hidden, c_out, c_edge):
    def linear(k, fan_in, fan_out):
        kw, kb = jax.random.split(k)
        bound = 1.0 / math.sqrt(fan_in)
        w = jax.random.uniform(kw, (fan_in, fan_out), jnp.float32, -bound, bound)
        b = jax.random.uniform(kb, (1, fan_out), jnp.float32, -bound, bound)
        return w, b

    keys = jax.random.split(key, 8)
    p = {}
    p["w_q"], p["b_q"] = linear(keys[0], c_in, c_out)
    p["w_k"], p["b_k"] = linear(keys[1], c_in, c_out)
    p["w_v"], p["b_v"] = linear(keys[2], c_in, c_out)
    p["w_self"], p["b_self"] = linear(keys[3], c_in, c_out)
    p["w_e"], p["b_e"] = linear(keys[4], c_edge, c_out)
    p["w_proj"], p["b_proj"] = linear(keys[5], c_out, c_out)
    p["w_mlp1"], p["b_mlp1"] = linear(keys[6], c_out, hidden)
    p["w_mlp2"], p["b_mlp2"] = linear(keys[7], hidden, c_out)
    p["ln_src_g"] = jnp.ones((1, c_in), jnp.float32)
    p["ln_src_b"] = jnp.zeros((1, c_in), jnp.float32)
    p["ln_dst_g"] = jnp.ones((1, c_in), jnp.float32)
    p["ln_dst_b"] = jnp.zeros((1, c_in), jnp.float32)
    p["ln_mlp_g"] = jnp.ones((1, c_out), jnp.float32)
    p["ln_mlp_b"] = jnp.zeros((1, c_out), jnp.float32)
    return p


def reference(x_src, x_dst, edge_attr, edge_index, params, num_heads):
    """Pure-JAX (f32, exact per-dst segment softmax) reference of the torch forward."""
    def ln(x, g, b, eps=1e-5):
        mu = jnp.mean(x, axis=-1, keepdims=True)
        xc = x - mu
        var = jnp.mean(xc * xc, axis=-1, keepdims=True)
        return xc / jnp.sqrt(var + eps) * g + b

    xs = ln(x_src, params["ln_src_g"], params["ln_src_b"])
    xd = ln(x_dst, params["ln_dst_g"], params["ln_dst_b"])
    x_r = xd @ params["w_self"] + params["b_self"]
    q = xd @ params["w_q"] + params["b_q"]
    k = xs @ params["w_k"] + params["b_k"]
    v = xs @ params["w_v"] + params["b_v"]
    e = edge_attr @ params["w_e"] + params["b_e"]

    src, dst = edge_index[0], edge_index[1]
    E = src.shape[0]
    H = num_heads
    C = q.shape[1] // H
    Nd = x_dst.shape[0]

    q_e = q[dst].reshape(E, H, C)
    k_e = (k[src] + e).reshape(E, H, C)
    v_e = (v[src] + e).reshape(E, H, C)
    alpha = (q_e * k_e).sum(-1) / math.sqrt(C)
    m = jax.ops.segment_max(alpha, dst, num_segments=Nd)
    p_ = jnp.exp(alpha - m[dst])
    den = jax.ops.segment_sum(p_, dst, num_segments=Nd)
    attn = p_ / den[dst]
    msg = v_e * attn[:, :, None]
    out_attn = jax.ops.segment_sum(msg.reshape(E, H * C), dst, num_segments=Nd)

    out = (out_attn + x_r) @ params["w_proj"] + params["b_proj"]
    out = out + x_dst
    hgn = ln(out, params["ln_mlp_g"], params["ln_mlp_b"])
    h1 = _gelu_tanh(hgn @ params["w_mlp1"] + params["b_mlp1"])
    h2 = h1 @ params["w_mlp2"] + params["b_mlp2"]
    return h2 + out


if __name__ == "__main__":
    # Non-tile-multiple sizes on purpose: exercises padding, multi-chunk online
    # softmax (E -> 2 edge chunks of 256) and the parallel node grids.
    n_src, n_dst, n_edges = 150, 100, 400
    c_in = c_out = 32           # in_channels == out_channels (residual)
    hidden = 64
    n_heads = 4                 # head_dim = 8
    c_edge = 16

    key = jax.random.PRNGKey(0)
    k_xs, k_xd, k_ea, k_ei, k_p = jax.random.split(key, 5)
    x_src = jax.random.normal(k_xs, (n_src, c_in), jnp.float32)
    x_dst = jax.random.normal(k_xd, (n_dst, c_in), jnp.float32)
    edge_attr = jax.random.normal(k_ea, (n_edges, c_edge), jnp.float32)
    k_s, k_d = jax.random.split(k_ei)
    edge_index = jnp.stack([
        jax.random.randint(k_s, (n_edges,), 0, n_src),
        jax.random.randint(k_d, (n_edges,), 0, n_dst),
    ]).astype(jnp.int32)

    params = init_params(k_p, c_in, hidden, c_out, c_edge)

    (src_out, dst_out), e_out = graph_transformer_mapper_block(
        x_src, x_dst, edge_attr, edge_index, params, num_heads=n_heads)
    jax.block_until_ready(dst_out)

    ref = reference(x_src, x_dst, edge_attr, edge_index, params, n_heads)
    # bf16 matmul operands (weights, scores, scatter terms) introduce ~1e-2
    # absolute deviation vs the f32 reference; tolerance chosen accordingly.
    np.testing.assert_allclose(np.asarray(dst_out), np.asarray(ref),
                               rtol=3e-2, atol=3e-2)
    np.testing.assert_allclose(np.asarray(src_out), np.asarray(x_src))    # passthrough
    np.testing.assert_allclose(np.asarray(e_out), np.asarray(edge_attr))  # unchanged

    print("KERNEL_OK")
</pallas_src>

<mosaic_0001>
module attributes {stable_mosaic.version = 11 : i64} {
  func.func @_ln_dual_linear_kernel(%arg0: i32, %arg1: memref<256x32xf32, #tpu.memory_space<vmem>>, %arg2: memref<1x32xf32, #tpu.memory_space<vmem>>, %arg3: memref<1x32xf32, #tpu.memory_space<vmem>>, %arg4: memref<32x32xbf16, #tpu.memory_space<vmem>>, %arg5: memref<1x32xf32, #tpu.memory_space<vmem>>, %arg6: memref<32x32xbf16, #tpu.memory_space<vmem>>, %arg7: memref<1x32xf32, #tpu.memory_space<vmem>>, %arg8: memref<256x32xbf16, #tpu.memory_space<vmem>>, %arg9: memref<256x32xf32, #tpu.memory_space<vmem>>) attributes {dimension_semantics = [#tpu.dimension_semantics<parallel>], iteration_bounds = array<i64: 1>, scalar_prefetch = 0 : i64, scratch_operands = 0 : i64, tpu.core_type = #tpu.core_type<tc>, window_params = [{transform_indices = @transform_0, window_bounds = array<i64: 256, 32>}, {pipeline_mode = #tpu.pipeline_mode<synchronous>, transform_indices = @transform_1, window_bounds = array<i64: 1, 32>}, {pipeline_mode = #tpu.pipeline_mode<synchronous>, transform_indices = @transform_2, window_bounds = array<i64: 1, 32>}, {pipeline_mode = #tpu.pipeline_mode<synchronous>, transform_indices = @transform_3, window_bounds = array<i64: 32, 32>}, {pipeline_mode = #tpu.pipeline_mode<synchronous>, transform_indices = @transform_4, window_bounds = array<i64: 1, 32>}, {pipeline_mode = #tpu.pipeline_mode<synchronous>, transform_indices = @transform_5, window_bounds = array<i64: 32, 32>}, {pipeline_mode = #tpu.pipeline_mode<synchronous>, transform_indices = @transform_6, window_bounds = array<i64: 1, 32>}, {transform_indices = @transform_7, window_bounds = array<i64: 256, 32>}, {transform_indices = @transform_8, window_bounds = array<i64: 256, 32>}]} {
    %c0 = arith.constant 0 : index
    %c0_0 = arith.constant 0 : index
    %0 = vector.load %arg1[%c0, %c0_0] : memref<256x32xf32, #tpu.memory_space<vmem>>, vector<256x32xf32>
    %c0_1 = arith.constant 0 : index
    %c0_2 = arith.constant 0 : index
    %1 = vector.load %arg2[%c0_1, %c0_2] : memref<1x32xf32, #tpu.memory_space<vmem>>, vector<1x32xf32>
    %c0_3 = arith.constant 0 : index
    %c0_4 = arith.constant 0 : index
    %2 = vector.load %arg3[%c0_3, %c0_4] : memref<1x32xf32, #tpu.memory_space<vmem>>, vector<1x32xf32>
    %cst = arith.constant dense<0.000000e+00> : vector<256xf32>
    %3 = vector.multi_reduction <add>, %0, %cst [1] : vector<256x32xf32> to vector<256xf32>
    %4 = vector.shape_cast %3 : vector<256xf32> to vector<256x1xf32>
    %cst_5 = arith.constant 3.200000e+01 : f32
    %5 = vector.broadcast %cst_5 : f32 to vector<256x1xf32>
    %6 = arith.divf %4, %5 : vector<256x1xf32>
    %7 = vector.broadcast %6 : vector<256x1xf32> to vector<256x32xf32>
    %8 = arith.subf %0, %7 : vector<256x32xf32>
    %9 = arith.mulf %8, %8 : vector<256x32xf32>
    %cst_6 = arith.constant dense<0.000000e+00> : vector<256xf32>
    %10 = vector.multi_reduction <add>, %9, %cst_6 [1] : vector<256x32xf32> to vector<256xf32>
    %11 = vector.shape_cast %10 : vector<256xf32> to vector<256x1xf32>
    %cst_7 = arith.constant 3.200000e+01 : f32
    %12 = vector.broadcast %cst_7 : f32 to vector<256x1xf32>
    %13 = arith.divf %11, %12 : vector<256x1xf32>
    %cst_8 = arith.constant 9.99999974E-6 : f32
    %14 = vector.broadcast %cst_8 : f32 to vector<256x1xf32>
    %15 = arith.addf %13, %14 : vector<256x1xf32>
    %16 = math.rsqrt %15 : vector<256x1xf32>
    %17 = vector.broadcast %16 : vector<256x1xf32> to vector<256x32xf32>
    %18 = arith.mulf %8, %17 : vector<256x32xf32>
    %19 = vector.broadcast %1 : vector<1x32xf32> to vector<256x32xf32>
    %20 = arith.mulf %18, %19 : vector<256x32xf32>
    %21 = vector.broadcast %2 : vector<1x32xf32> to vector<256x32xf32>
    %22 = arith.addf %20, %21 : vector<256x32xf32>
    %23 = arith.truncf %22 : vector<256x32xf32> to vector<256x32xbf16>
    %c0_9 = arith.constant 0 : index
    %c0_10 = arith.constant 0 : index
    %24 = vector.load %arg4[%c0_9, %c0_10] : memref<32x32xbf16, #tpu.memory_space<vmem>>, vector<32x32xbf16>
    %cst_11 = arith.constant dense<0.000000e+00> : vector<256x32xf32>
    %25 = tpu.matmul %23, %24, %cst_11 {dimension_numbers = #tpu.dot_dimension_numbers<[1], [0], [0], [1], [0, 0, 1, 1], [], []>} : vector<256x32xbf16>, vector<32x32xbf16>, vector<256x32xf32> -> vector<256x32xf32>
    %c0_12 = arith.constant 0 : index
    %c0_13 = arith.constant 0 : index
    %26 = vector.load %arg5[%c0_12, %c0_13] : memref<1x32xf32, #tpu.memory_space<vmem>>, vector<1x32xf32>
    %27 = vector.broadcast %26 : vector<1x32xf32> to vector<256x32xf32>
    %28 = arith.addf %25, %27 : vector<256x32xf32>
    %c0_14 = arith.constant 0 : index
    %c0_15 = arith.constant 0 : index
    %29 = vector.load %arg6[%c0_14, %c0_15] : memref<32x32xbf16, #tpu.memory_space<vmem>>, vector<32x32xbf16>
    %cst_16 = arith.constant dense<0.000000e+00> : vector<256x32xf32>
    %30 = tpu.matmul %23, %29, %cst_16 {dimension_numbers = #tpu.dot_dimension_numbers<[1], [0], [0], [1], [0, 0, 1, 1], [], []>} : vector<256x32xbf16>, vector<32x32xbf16>, vector<256x32xf32> -> vector<256x32xf32>
    %c0_17 = arith.constant 0 : index
    %c0_18 = arith.constant 0 : index
    %31 = vector.load %arg7[%c0_17, %c0_18] : memref<1x32xf32, #tpu.memory_space<vmem>>, vector<1x32xf32>
    %32 = vector.broadcast %31 : vector<1x32xf32> to vector<256x32xf32>
    %33 = arith.addf %30, %32 : vector<256x32xf32>
    %34 = arith.truncf %28 : vector<256x32xf32> to vector<256x32xbf16>
    %c0_19 = arith.constant 0 : index
    %c0_20 = arith.constant 0 : index
    %35 = vector.load %arg8[%c0_19, %c0_20] : memref<256x32xbf16, #tpu.memory_space<vmem>>, vector<256x32xbf16>
    tpu.vector_store %arg8[%c0_19, %c0_20], %34 {strides = array<i32>} : memref<256x32xbf16, #tpu.memory_space<vmem>>, vector<256x32xbf16>,
    %c0_21 = arith.constant 0 : index
    %c0_22 = arith.constant 0 : index
    %36 = vector.load %arg9[%c0_21, %c0_22] : memref<256x32xf32, #tpu.memory_space<vmem>>, vector<256x32xf32>
    tpu.vector_store %arg9[%c0_21, %c0_22], %33 {strides = array<i32>} : memref<256x32xf32, #tpu.memory_space<vmem>>, vector<256x32xf32>,
    return
  }
  func.func @transform_0(%arg0: i32) -> (i32, i32) {
    %c0_i32 = arith.constant 0 : i32
    %c0_i32_0 = arith.constant 0 : i32
    return %arg0, %c0_i32 : i32, i32
  }
  func.func @transform_1(%arg0: i32) -> (i32, i32) {
    %c0_i32 = arith.constant 0 : i32
    %c0_i32_0 = arith.constant 0 : i32
    %c0_i32_1 = arith.constant 0 : i32
    return %c0_i32, %c0_i32_0 : i32, i32
  }
  func.func @transform_2(%arg0: i32) -> (i32, i32) {
    %c0_i32 = arith.constant 0 : i32
    %c0_i32_0 = arith.constant 0 : i32
    %c0_i32_1 = arith.constant 0 : i32
    return %c0_i32, %c0_i32_0 : i32, i32
  }
  func.func @transform_3(%arg0: i32) -> (i32, i32) {
    %c0_i32 = arith.constant 0 : i32
    %c0_i32_0 = arith.constant 0 : i32
    %c0_i32_1 = arith.constant 0 : i32
    return %c0_i32, %c0_i32_0 : i32, i32
  }
  func.func @transform_4(%arg0: i32) -> (i32, i32) {
    %c0_i32 = arith.constant 0 : i32
    %c0_i32_0 = arith.constant 0 : i32
    %c0_i32_1 = arith.constant 0 : i32
    return %c0_i32, %c0_i32_0 : i32, i32
  }
  func.func @transform_5(%arg0: i32) -> (i32, i32) {
    %c0_i32 = arith.constant 0 : i32
    %c0_i32_0 = arith.constant 0 : i32
    %c0_i32_1 = arith.constant 0 : i32
    return %c0_i32, %c0_i32_0 : i32, i32
  }
  func.func @transform_6(%arg0: i32) -> (i32, i32) {
    %c0_i32 = arith.constant 0 : i32
    %c0_i32_0 = arith.constant 0 : i32
    %c0_i32_1 = arith.constant 0 : i32
    return %c0_i32, %c0_i32_0 : i32, i32
  }
  func.func @transform_7(%arg0: i32) -> (i32, i32) {
    %c0_i32 = arith.constant 0 : i32
    %c0_i32_0 = arith.constant 0 : i32
    return %arg0, %c0_i32 : i32, i32
  }
  func.func @transform_8(%arg0: i32) -> (i32, i32) {
    %c0_i32 = arith.constant 0 : i32
    %c0_i32_0 = arith.constant 0 : i32
    return %arg0, %c0_i32 : i32, i32
  }
}

module attributes {stable_mosaic.version = 11 : i64} {
  func.func @_ln_dual_linear_kernel(%arg0: i32, %arg1: memref<256x32xf32, #tpu.memory_space<vmem>>, %arg2: memref<1x32xf32, #tpu.memory_space<vmem>>, %arg3: memref<1x32xf32, #tpu.memory_space<vmem>>, %arg4: memref<32x32xbf16, #tpu.memory_space<vmem>>, %arg5: memref<1x32xf32, #tpu.memory_space<vmem>>, %arg6: memref<32x32xbf16, #tpu.memory_space<vmem>>, %arg7: memref<1x32xf32, #tpu.memory_space<vmem>>, %arg8: memref<256x32xbf16, #tpu.memory_space<vmem>>, %arg9: memref<256x32xbf16, #tpu.memory_space<vmem>>) attributes {dimension_semantics = [#tpu.dimension_semantics<parallel>], iteration_bounds = array<i64: 1>, scalar_prefetch = 0 : i64, scratch_operands = 0 : i64, tpu.core_type = #tpu.core_type<tc>, window_params = [{transform_indices = @transform_0, window_bounds = array<i64: 256, 32>}, {pipeline_mode = #tpu.pipeline_mode<synchronous>, transform_indices = @transform_1, window_bounds = array<i64: 1, 32>}, {pipeline_mode = #tpu.pipeline_mode<synchronous>, transform_indices = @transform_2, window_bounds = array<i64: 1, 32>}, {pipeline_mode = #tpu.pipeline_mode<synchronous>, transform_indices = @transform_3, window_bounds = array<i64: 32, 32>}, {pipeline_mode = #tpu.pipeline_mode<synchronous>, transform_indices = @transform_4, window_bounds = array<i64: 1, 32>}, {pipeline_mode = #tpu.pipeline_mode<synchronous>, transform_indices = @transform_5, window_bounds = array<i64: 32, 32>}, {pipeline_mode = #tpu.pipeline_mode<synchronous>, transform_indices = @transform_6, window_bounds = array<i64: 1, 32>}, {transform_indices = @transform_7, window_bounds = array<i64: 256, 32>}, {transform_indices = @transform_8, window_bounds = array<i64: 256, 32>}]} {
    %c0 = arith.constant 0 : index
    %c0_0 = arith.constant 0 : index
    %0 = vector.load %arg1[%c0, %c0_0] : memref<256x32xf32, #tpu.memory_space<vmem>>, vector<256x32xf32>
    %c0_1 = arith.constant 0 : index
    %c0_2 = arith.constant 0 : index
    %1 = vector.load %arg2[%c0_1, %c0_2] : memref<1x32xf32, #tpu.memory_space<vmem>>, vector<1x32xf32>
    %c0_3 = arith.constant 0 : index
    %c0_4 = arith.constant 0 : index
    %2 = vector.load %arg3[%c0_3, %c0_4] : memref<1x32xf32, #tpu.memory_space<vmem>>, vector<1x32xf32>
    %cst = arith.constant dense<0.000000e+00> : vector<256xf32>
    %3 = vector.multi_reduction <add>, %0, %cst [1] : vector<256x32xf32> to vector<256xf32>
    %4 = vector.shape_cast %3 : vector<256xf32> to vector<256x1xf32>
    %cst_5 = arith.constant 3.200000e+01 : f32
    %5 = vector.broadcast %cst_5 : f32 to vector<256x1xf32>
    %6 = arith.divf %4, %5 : vector<256x1xf32>
    %7 = vector.broadcast %6 : vector<256x1xf32> to vector<256x32xf32>
    %8 = arith.subf %0, %7 : vector<256x32xf32>
    %9 = arith.mulf %8, %8 : vector<256x32xf32>
    %cst_6 = arith.constant dense<0.000000e+00> : vector<256xf32>
    %10 = vector.multi_reduction <add>, %9, %cst_6 [1] : vector<256x32xf32> to vector<256xf32>
    %11 = vector.shape_cast %10 : vector<256xf32> to vector<256x1xf32>
    %cst_7 = arith.constant 3.200000e+01 : f32
    %12 = vector.broadcast %cst_7 : f32 to vector<256x1xf32>
    %13 = arith.divf %11, %12 : vector<256x1xf32>
    %cst_8 = arith.constant 9.99999974E-6 : f32
    %14 = vector.broadcast %cst_8 : f32 to vector<256x1xf32>
    %15 = arith.addf %13, %14 : vector<256x1xf32>
    %16 = math.rsqrt %15 : vector<256x1xf32>
    %17 = vector.broadcast %16 : vector<256x1xf32> to vector<256x32xf32>
    %18 = arith.mulf %8, %17 : vector<256x32xf32>
    %19 = vector.broadcast %1 : vector<1x32xf32> to vector<256x32xf32>
    %20 = arith.mulf %18, %19 : vector<256x32xf32>
    %21 = vector.broadcast %2 : vector<1x32xf32> to vector<256x32xf32>
    %22 = arith.addf %20, %21 : vector<256x32xf32>
    %23 = arith.truncf %22 : vector<256x32xf32> to vector<256x32xbf16>
    %c0_9 = arith.constant 0 : index
    %c0_10 = arith.constant 0 : index
    %24 = vector.load %arg4[%c0_9, %c0_10] : memref<32x32xbf16, #tpu.memory_space<vmem>>, vector<32x32xbf16>
    %cst_11 = arith.constant dense<0.000000e+00> : vector<256x32xf32>
    %25 = tpu.matmul %23, %24, %cst_11 {dimension_numbers = #tpu.dot_dimension_numbers<[1], [0], [0], [1], [0, 0, 1, 1], [], []>} : vector<256x32xbf16>, vector<32x32xbf16>, vector<256x32xf32> -> vector<256x32xf32>
    %c0_12 = arith.constant 0 : index
    %c0_13 = arith.constant 0 : index
    %26 = vector.load %arg5[%c0_12, %c0_13] : memref<1x32xf32, #tpu.memory_space<vmem>>, vector<1x32xf32>
    %27 = vector.broadcast %26 : vector<1x32xf32> to vector<256x32xf32>
    %28 = arith.addf %25, %27 : vector<256x32xf32>
    %c0_14 = arith.constant 0 : index
    %c0_15 = arith.constant 0 : index
    %29 = vector.load %arg6[%c0_14, %c0_15] : memref<32x32xbf16, #tpu.memory_space<vmem>>, vector<32x32xbf16>
    %cst_16 = arith.constant dense<0.000000e+00> : vector<256x32xf32>
    %30 = tpu.matmul %23, %29, %cst_16 {dimension_numbers = #tpu.dot_dimension_numbers<[1], [0], [0], [1], [0, 0, 1, 1], [], []>} : vector<256x32xbf16>, vector<32x32xbf16>, vector<256x32xf32> -> vector<256x32xf32>
    %c0_17 = arith.constant 0 : index
    %c0_18 = arith.constant 0 : index
    %31 = vector.load %arg7[%c0_17, %c0_18] : memref<1x32xf32, #tpu.memory_space<vmem>>, vector<1x32xf32>
    %32 = vector.broadcast %31 : vector<1x32xf32> to vector<256x32xf32>
    %33 = arith.addf %30, %32 : vector<256x32xf32>
    %34 = arith.truncf %28 : vector<256x32xf32> to vector<256x32xbf16>
    %c0_19 = arith.constant 0 : index
    %c0_20 = arith.constant 0 : index
    %35 = vector.load %arg8[%c0_19, %c0_20] : memref<256x32xbf16, #tpu.memory_space<vmem>>, vector<256x32xbf16>
    tpu.vector_store %arg8[%c0_19, %c0_20], %34 {strides = array<i32>} : memref<256x32xbf16, #tpu.memory_space<vmem>>, vector<256x32xbf16>,
    %36 = arith.truncf %33 : vector<256x32xf32> to vector<256x32xbf16>
    %c0_21 = arith.constant 0 : index
    %c0_22 = arith.constant 0 : index
    %37 = vector.load %arg9[%c0_21, %c0_22] : memref<256x32xbf16, #tpu.memory_space<vmem>>, vector<256x32xbf16>
    tpu.vector_store %arg9[%c0_21, %c0_22], %36 {strides = array<i32>} : memref<256x32xbf16, #tpu.memory_space<vmem>>, vector<256x32xbf16>,
    return
  }
  func.func @transform_0(%arg0: i32) -> (i32, i32) {
    %c0_i32 = arith.constant 0 : i32
    %c0_i32_0 = arith.constant 0 : i32
    return %arg0, %c0_i32 : i32, i32
  }
  func.func @transform_1(%arg0: i32) -> (i32, i32) {
    %c0_i32 = arith.constant 0 : i32
    %c0_i32_0 = arith.constant 0 : i32
    %c0_i32_1 = arith.constant 0 : i32
    return %c0_i32, %c0_i32_0 : i32, i32
  }
  func.func @transform_2(%arg0: i32) -> (i32, i32) {
    %c0_i32 = arith.constant 0 : i32
    %c0_i32_0 = arith.constant 0 : i32
    %c0_i32_1 = arith.constant 0 : i32
    return %c0_i32, %c0_i32_0 : i32, i32
  }
  func.func @transform_3(%arg0: i32) -> (i32, i32) {
    %c0_i32 = arith.constant 0 : i32
    %c0_i32_0 = arith.constant 0 : i32
    %c0_i32_1 = arith.constant 0 : i32
    return %c0_i32, %c0_i32_0 : i32, i32
  }
  func.func @transform_4(%arg0: i32) -> (i32, i32) {
    %c0_i32 = arith.constant 0 : i32
    %c0_i32_0 = arith.constant 0 : i32
    %c0_i32_1 = arith.constant 0 : i32
    return %c0_i32, %c0_i32_0 : i32, i32
  }
  func.func @transform_5(%arg0: i32) -> (i32, i32) {
    %c0_i32 = arith.constant 0 : i32
    %c0_i32_0 = arith.constant 0 : i32
    %c0_i32_1 = arith.constant 0 : i32
    return %c0_i32, %c0_i32_0 : i32, i32
  }
  func.func @transform_6(%arg0: i32) -> (i32, i32) {
    %c0_i32 = arith.constant 0 : i32
    %c0_i32_0 = arith.constant 0 : i32
    %c0_i32_1 = arith.constant 0 : i32
    return %c0_i32, %c0_i32_0 : i32, i32
  }
  func.func @transform_7(%arg0: i32) -> (i32, i32) {
    %c0_i32 = arith.constant 0 : i32
    %c0_i32_0 = arith.constant 0 : i32
    return %arg0, %c0_i32 : i32, i32
  }
  func.func @transform_8(%arg0: i32) -> (i32, i32) {
    %c0_i32 = arith.constant 0 : i32
    %c0_i32_0 = arith.constant 0 : i32
    return %arg0, %c0_i32 : i32, i32
  }
}

module attributes {stable_mosaic.version = 11 : i64} {
  func.func @_edge_attn_kernel(%arg0: i32, %arg1: i32, %arg2: memref<256x1xi32, #tpu.memory_space<vmem>>, %arg3: memref<256x1xi32, #tpu.memory_space<vmem>>, %arg4: memref<256x16xbf16, #tpu.memory_space<vmem>>, %arg5: memref<256x32xbf16, #tpu.memory_space<vmem>>, %arg6: memref<256x32xbf16, #tpu.memory_space<vmem>>, %arg7: memref<256x32xbf16, #tpu.memory_space<vmem>>, %arg8: memref<16x32xbf16, #tpu.memory_space<vmem>>, %arg9: memref<1x32xf32, #tpu.memory_space<vmem>>, %arg10: memref<32x32xbf16, #tpu.memory_space<vmem>>, %arg11: memref<256x32xf32, #tpu.memory_space<vmem>>, %arg12: memref<256x32xf32, #tpu.memory_space<vmem>>, %arg13: memref<1x32xf32, #tpu.memory_space<vmem>>) attributes {dimension_semantics = [#tpu.dimension_semantics<parallel>, #tpu.dimension_semantics<arbitrary>], iteration_bounds = array<i64: 1, 2>, scalar_prefetch = 0 : i64, scratch_operands = 2 : i64, tpu.core_type = #tpu.core_type<tc>, window_params = [{transform_indices = @transform_0, window_bounds = array<i64: 256, 1>}, {transform_indices = @transform_1, window_bounds = array<i64: 256, 1>}, {transform_indices = @transform_2, window_bounds = array<i64: 256, 16>}, {transform_indices = @transform_3, window_bounds = array<i64: 256, 32>}, {transform_indices = @transform_4, window_bounds = array<i64: 256, 32>}, {transform_indices = @transform_5, window_bounds = array<i64: 256, 32>}, {transform_indices = @transform_6, window_bounds = array<i64: 16, 32>}, {transform_indices = @transform_7, window_bounds = array<i64: 1, 32>}, {transform_indices = @transform_8, window_bounds = array<i64: 32, 32>}, {transform_indices = @transform_9, window_bounds = array<i64: 256, 32>}]} {
    %c0_i32 = arith.constant 0 : i32
    %0 = arith.cmpi eq, %arg1, %c0_i32 : i32
    %1 = arith.extui %0 : i1 to i32
    %c0_i32_0 = arith.constant 0 : i32
    %2 = arith.cmpi ne, %1, %c0_i32_0 : i32
    scf.if %2 {
      %cst_43 = arith.constant 0.000000e+00 : f32
      %73 = vector.broadcast %cst_43 : f32 to vector<256x32xf32>
      %c0_44 = arith.constant 0 : index
      %c0_45 = arith.constant 0 : index
      %74 = vector.load %arg11[%c0_44, %c0_45] : memref<256x32xf32, #tpu.memory_space<vmem>>, vector<256x32xf32>
      tpu.vector_store %arg11[%c0_44, %c0_45], %73 {strides = array<i32>} : memref<256x32xf32, #tpu.memory_space<vmem>>, vector<256x32xf32>,
      %cst_46 = arith.constant 0.000000e+00 : f32
      %75 = vector.broadcast %cst_46 : f32 to vector<256x32xf32>
      %c0_47 = arith.constant 0 : index
      %c0_48 = arith.constant 0 : index
      %76 = vector.load %arg12[%c0_47, %c0_48] : memref<256x32xf32, #tpu.memory_space<vmem>>, vector<256x32xf32>
      tpu.vector_store %arg12[%c0_47, %c0_48], %75 {strides = array<i32>} : memref<256x32xf32, #tpu.memory_space<vmem>>, vector<256x32xf32>,
      %cst_49 = arith.constant -1.000000e+30 : f32
      %77 = vector.broadcast %cst_49 : f32 to vector<1x32xf32>
      %c0_50 = arith.constant 0 : index
      %c0_51 = arith.constant 0 : index
      %78 = vector.load %arg13[%c0_50, %c0_51] : memref<1x32xf32, #tpu.memory_space<vmem>>, vector<1x32xf32>
      tpu.vector_store %arg13[%c0_50, %c0_51], %77 {strides = array<i32>} : memref<1x32xf32, #tpu.memory_space<vmem>>, vector<1x32xf32>,
    } else {
    }
    %c0 = arith.constant 0 : index
    %c0_1 = arith.constant 0 : index
    %3 = vector.load %arg4[%c0, %c0_1] : memref<256x16xbf16, #tpu.memory_space<vmem>>, vector<256x16xbf16>
    %c0_2 = arith.constant 0 : index
    %c0_3 = arith.constant 0 : index
    %4 = vector.load %arg8[%c0_2, %c0_3] : memref<16x32xbf16, #tpu.memory_space<vmem>>, vector<16x32xbf16>
    %cst = arith.constant dense<0.000000e+00> : vector<256x32xf32>
    %5 = tpu.matmul %3, %4, %cst {dimension_numbers = #tpu.dot_dimension_numbers<[1], [0], [0], [1], [0, 0, 1, 1], [], []>} : vector<256x16xbf16>, vector<16x32xbf16>, vector<256x32xf32> -> vector<256x32xf32>
    %c0_4 = arith.constant 0 : index
    %c0_5 = arith.constant 0 : index
    %6 = vector.load %arg9[%c0_4, %c0_5] : memref<1x32xf32, #tpu.memory_space<vmem>>, vector<1x32xf32>
    %7 = vector.broadcast %6 : vector<1x32xf32> to vector<256x32xf32>
    %8 = arith.addf %5, %7 : vector<256x32xf32>
    %c0_6 = arith.constant 0 : index
    %c0_7 = arith.constant 0 : index
    %9 = vector.load %arg2[%c0_6, %c0_7] : memref<256x1xi32, #tpu.memory_space<vmem>>, vector<256x1xi32>
    %c0_8 = arith.constant 0 : index
    %c0_9 = arith.constant 0 : index
    %10 = vector.load %arg3[%c0_8, %c0_9] : memref<256x1xi32, #tpu.memory_space<vmem>>, vector<256x1xi32>
    %11 = tpu.iota {dimensions = array<i32: 1>} : vector<256x256xi32>
    %12 = vector.broadcast %9 : vector<256x1xi32> to vector<256x256xi32>
    %13 = arith.cmpi eq, %12, %11 : vector<256x256xi32>
    %14 = arith.extui %13 : vector<256x256xi1> to vector<256x256xi32>
    %15 = arith.sitofp %14 : vector<256x256xi32> to vector<256x256xf32>
    %16 = arith.truncf %15 : vector<256x256xf32> to vector<256x256xbf16>
    %17 = tpu.iota {dimensions = array<i32: 1>} : vector<256x256xi32>
    %18 = vector.broadcast %10 : vector<256x1xi32> to vector<256x256xi32>
    %19 = arith.cmpi eq, %18, %17 : vector<256x256xi32>
    %20 = arith.extui %19 : vector<256x256xi1> to vector<256x256xi32>
    %21 = arith.sitofp %20 : vector<256x256xi32> to vector<256x256xf32>
    %22 = arith.truncf %21 : vector<256x256xf32> to vector<256x256xbf16>
    %c0_10 = arith.constant 0 : index
    %c0_11 = arith.constant 0 : index
    %23 = vector.load %arg5[%c0_10, %c0_11] : memref<256x32xbf16, #tpu.memory_space<vmem>>, vector<256x32xbf16>
    %cst_12 = arith.constant dense<0.000000e+00> : vector<256x32xf32>
    %24 = tpu.matmul %22, %23, %cst_12 {dimension_numbers = #tpu.dot_dimension_numbers<[1], [0], [0], [1], [0, 0, 1, 1], [], []>} : vector<256x256xbf16>, vector<256x32xbf16>, vector<256x32xf32> -> vector<256x32xf32>
    %c0_13 = arith.constant 0 : index
    %c0_14 = arith.constant 0 : index
    %25 = vector.load %arg6[%c0_13, %c0_14] : memref<256x32xbf16, #tpu.memory_space<vmem>>, vector<256x32xbf16>
    %cst_15 = arith.constant dense<0.000000e+00> : vector<256x32xf32>
    %26 = tpu.matmul %16, %25, %cst_15 {dimension_numbers = #tpu.dot_dimension_numbers<[1], [0], [0], [1], [0, 0, 1, 1], [], []>} : vector<256x256xbf16>, vector<256x32xbf16>, vector<256x32xf32> -> vector<256x32xf32>
    %27 = arith.addf %26, %8 : vector<256x32xf32>
    %c0_16 = arith.constant 0 : index
    %c0_17 = arith.constant 0 : index
    %28 = vector.load %arg7[%c0_16, %c0_17] : memref<256x32xbf16, #tpu.memory_space<vmem>>, vector<256x32xbf16>
    %cst_18 = arith.constant dense<0.000000e+00> : vector<256x32xf32>
    %29 = tpu.matmul %16, %28, %cst_18 {dimension_numbers = #tpu.dot_dimension_numbers<[1], [0], [0], [1], [0, 0, 1, 1], [], []>} : vector<256x256xbf16>, vector<256x32xbf16>, vector<256x32xf32> -> vector<256x32xf32>
    %30 = arith.addf %29, %8 : vector<256x32xf32>
    %31 = arith.mulf %24, %27 : vector<256x32xf32>
    %32 = arith.truncf %31 : vector<256x32xf32> to vector<256x32xbf16>
    %c0_19 = arith.constant 0 : index
    %c0_20 = arith.constant 0 : index
    %33 = vector.load %arg10[%c0_19, %c0_20] : memref<32x32xbf16, #tpu.memory_space<vmem>>, vector<32x32xbf16>
    %cst_21 = arith.constant dense<0.000000e+00> : vector<256x32xf32>
    %34 = tpu.matmul %32, %33, %cst_21 {dimension_numbers = #tpu.dot_dimension_numbers<[1], [0], [0], [1], [0, 0, 1, 1], [], []>} : vector<256x32xbf16>, vector<32x32xbf16>, vector<256x32xf32> -> vector<256x32xf32>
    %cst_22 = arith.constant 0.353553385 : f32
    %35 = vector.broadcast %cst_22 : f32 to vector<256x32xf32>
    %36 = arith.mulf %34, %35 : vector<256x32xf32>
    %c256_i32 = arith.constant 256 : i32
    %37 = vector.broadcast %c256_i32 : i32 to vector<256x1xi32>
    %38 = arith.cmpi sge, %10, %37 : vector<256x1xi32>
    %cst_23 = arith.constant -1.000000e+30 : f32
    %39 = vector.shape_cast %38 : vector<256x1xi1> to vector<256x1xi1>
    %40 = vector.broadcast %39 : vector<256x1xi1> to vector<256x32xi1>
    %41 = vector.broadcast %cst_23 : f32 to vector<256x32xf32>
    %42 = arith.select %40, %41, %36 : vector<256x32xi1>, vector<256x32xf32>
    %c0_24 = arith.constant 0 : index
    %c0_25 = arith.constant 0 : index
    %43 = vector.load %arg13[%c0_24, %c0_25] : memref<1x32xf32, #tpu.memory_space<vmem>>, vector<1x32xf32>
    %cst_26 = arith.constant dense<0xFF800000> : vector<32xf32>
    %44 = vector.multi_reduction <maximumf>, %42, %cst_26 [0] : vector<256x32xf32> to vector<32xf32>
    %45 = vector.shape_cast %44 : vector<32xf32> to vector<1x32xf32>
    %46 = arith.maximumf %43, %45 : vector<1x32xf32>
    %c0_27 = arith.constant 0 : index
    %c0_28 = arith.constant 0 : index
    %47 = vector.load %arg13[%c0_27, %c0_28] : memref<1x32xf32, #tpu.memory_space<vmem>>, vector<1x32xf32>
    tpu.vector_store %arg13[%c0_27, %c0_28], %46 {strides = array<i32>} : memref<1x32xf32, #tpu.memory_space<vmem>>, vector<1x32xf32>,
    %48 = arith.subf %45, %43 : vector<1x32xf32>
    %49 = vector.shape_cast %48 : vector<1x32xf32> to vector<1x1x32xf32>
    %cst_29 = arith.constant dense<0xFF800000> : vector<1xf32>
    %50 = vector.multi_reduction <maximumf>, %49, %cst_29 [1, 2] : vector<1x1x32xf32> to vector<1xf32>
    %51 = vector.shape_cast %50 : vector<1xf32> to vector<1x1x1xf32>
    %52 = vector.extract %51[0, 0, 0] : f32 from vector<1x1x1xf32>
    %cst_30 = arith.constant 0.000000e+00 : f32
    %53 = arith.cmpf ogt, %52, %cst_30 : f32
    %54 = arith.extui %53 : i1 to i32
    %c0_i32_31 = arith.constant 0 : i32
    %55 = arith.cmpi ne, %54, %c0_i32_31 : i32
    scf.if %55 {
      %73 = arith.subf %43, %46 : vector<1x32xf32>
      %74 = math.exp %73 : vector<1x32xf32>
      %c0_43 = arith.constant 0 : index
      %c0_44 = arith.constant 0 : index
      %75 = vector.load %arg11[%c0_43, %c0_44] : memref<256x32xf32, #tpu.memory_space<vmem>>, vector<256x32xf32>
      %76 = vector.broadcast %74 : vector<1x32xf32> to vector<256x32xf32>
      %77 = arith.mulf %75, %76 : vector<256x32xf32>
      %c0_45 = arith.constant 0 : index
      %c0_46 = arith.constant 0 : index
      %78 = vector.load %arg11[%c0_45, %c0_46] : memref<256x32xf32, #tpu.memory_space<vmem>>, vector<256x32xf32>
      tpu.vector_store %arg11[%c0_45, %c0_46], %77 {strides = array<i32>} : memref<256x32xf32, #tpu.memory_space<vmem>>, vector<256x32xf32>,
      %c0_47 = arith.constant 0 : index
      %c0_48 = arith.constant 0 : index
      %79 = vector.load %arg12[%c0_47, %c0_48] : memref<256x32xf32, #tpu.memory_space<vmem>>, vector<256x32xf32>
      %80 = vector.broadcast %74 : vector<1x32xf32> to vector<256x32xf32>
      %81 = arith.mulf %79, %80 : vector<256x32xf32>
      %c0_49 = arith.constant 0 : index
      %c0_50 = arith.constant 0 : index
      %82 = vector.load %arg12[%c0_49, %c0_50] : memref<256x32xf32, #tpu.memory_space<vmem>>, vector<256x32xf32>
      tpu.vector_store %arg12[%c0_49, %c0_50], %81 {strides = array<i32>} : memref<256x32xf32, #tpu.memory_space<vmem>>, vector<256x32xf32>,
    } else {
    }
    %56 = vector.broadcast %46 : vector<1x32xf32> to vector<256x32xf32>
    %57 = arith.subf %42, %56 : vector<256x32xf32>
    %58 = math.exp %57 : vector<256x32xf32>
    %c0_32 = arith.constant 0 : index
    %c0_33 = arith.constant 0 : index
    %59 = vector.load %arg12[%c0_32, %c0_33] : memref<256x32xf32, #tpu.memory_space<vmem>>, vector<256x32xf32>
    %60 = arith.truncf %58 : vector<256x32xf32> to vector<256x32xbf16>
    %cst_34 = arith.constant dense<0.000000e+00> : vector<256x32xf32>
    %61 = tpu.matmul %22, %60, %cst_34 {dimension_numbers = #tpu.dot_dimension_numbers<[0], [0], [1], [1], [0, 1, 1, 1], [], []>} : vector<256x256xbf16>, vector<256x32xbf16>, vector<256x32xf32> -> vector<256x32xf32>
    %62 = arith.addf %59, %61 : vector<256x32xf32>
    %c0_35 = arith.constant 0 : index
    %c0_36 = arith.constant 0 : index
    %63 = vector.load %arg12[%c0_35, %c0_36] : memref<256x32xf32, #tpu.memory_space<vmem>>, vector<256x32xf32>
    tpu.vector_store %arg12[%c0_35, %c0_36], %62 {strides = array<i32>} : memref<256x32xf32, #tpu.memory_space<vmem>>, vector<256x32xf32>,
    %c0_37 = arith.constant 0 : index
    %c0_38 = arith.constant 0 : index
    %64 = vector.load %arg11[%c0_37, %c0_38] : memref<256x32xf32, #tpu.memory_space<vmem>>, vector<256x32xf32>
    %65 = arith.mulf %58, %30 : vector<256x32xf32>
    %66 = arith.truncf %65 : vector<256x32xf32> to vector<256x32xbf16>
    %cst_39 = arith.constant dense<0.000000e+00> : vector<256x32xf32>
    %67 = tpu.matmul %22, %66, %cst_39 {dimension_numbers = #tpu.dot_dimension_numbers<[0], [0], [1], [1], [0, 1, 1, 1], [], []>} : vector<256x256xbf16>, vector<256x32xbf16>, vector<256x32xf32> -> vector<256x32xf32>
    %68 = arith.addf %64, %67 : vector<256x32xf32>
    %c0_40 = arith.constant 0 : index
    %c0_41 = arith.constant 0 : index
    %69 = vector.load %arg11[%c0_40, %c0_41] : memref<256x32xf32, #tpu.memory_space<vmem>>, vector<256x32xf32>
    tpu.vector_store %arg11[%c0_40, %c0_41], %68 {strides = array<i32>} : memref<256x32xf32, #tpu.memory_space<vmem>>, vector<256x32xf32>,
    %c1_i32 = arith.constant 1 : i32
    %70 = arith.cmpi eq, %arg1, %c1_i32 : i32
    %71 = arith.extui %70 : i1 to i32
    %c0_i32_42 = arith.constant 0 : i32
    %72 = arith.cmpi ne, %71, %c0_i32_42 : i32
    scf.if %72 {
      %c0_43 = arith.constant 0 : index
      %c0_44 = arith.constant 0 : index
      %73 = vector.load %arg12[%c0_43, %c0_44] : memref<256x32xf32, #tpu.memory_space<vmem>>, vector<256x32xf32>
      %cst_45 = arith.constant 1.000000e-30 : f32
      %74 = vector.broadcast %cst_45 : f32 to vector<256x32xf32>
      %75 = arith.maximumf %73, %74 : vector<256x32xf32>
      %76 = tpu.reciprocal %75 {approx = true} : vector<256x32xf32> -> vector<256x32xf32>
      %cst_46 = arith.constant 0.000000e+00 : f32
      %77 = vector.broadcast %cst_46 : f32 to vector<256x32xf32>
      %78 = arith.cmpf ogt, %73, %77 : vector<256x32xf32>
      %c0_47 = arith.constant 0 : index
      %c0_48 = arith.constant 0 : index
      %79 = vector.load %arg11[%c0_47, %c0_48] : memref<256x32xf32, #tpu.memory_space<vmem>>, vector<256x32xf32>
      %80 = arith.mulf %79, %76 : vector<256x32xf32>
      %cst_49 = arith.constant 0.000000e+00 : f32
      %81 = vector.broadcast %cst_49 : f32 to vector<256x32xf32>
      %82 = arith.select %78, %80, %81 : vector<256x32xi1>, vector<256x32xf32>
      %c0_50 = arith.constant 0 : index
      %c0_51 = arith.constant 0 : index
      %83 = vector.load %arg11[%c0_50, %c0_51] : memref<256x32xf32, #tpu.memory_space<vmem>>, vector<256x32xf32>
      tpu.vector_store %arg11[%c0_50, %c0_51], %82 {strides = array<i32>} : memref<256x32xf32, #tpu.memory_space<vmem>>, vector<256x32xf32>,
    } else {
    }
    return
  }
  func.func @transform_0(%arg0: i32, %arg1: i32) -> (i32, i32) {
    %c0_i32 = arith.constant 0 : i32
    %c0_i32_0 = arith.constant 0 : i32
    return %arg1, %c0_i32 : i32, i32
  }
  func.func @transform_1(%arg0: i32, %arg1: i32) -> (i32, i32) {
    %c0_i32 = arith.constant 0 : i32
    %c0_i32_0 = arith.constant 0 : i32
    return %arg1, %c0_i32 : i32, i32
  }
  func.func @transform_2(%arg0: i32, %arg1: i32) -> (i32, i32) {
    %c0_i32 = arith.constant 0 : i32
    %c0_i32_0 = arith.constant 0 : i32
    return %arg1, %c0_i32 : i32, i32
  }
  func.func @transform_3(%arg0: i32, %arg1: i32) -> (i32, i32) {
    %c0_i32 = arith.constant 0 : i32
    %c0_i32_0 = arith.constant 0 : i32
    return %c0_i32, %arg0 : i32, i32
  }
  func.func @transform_4(%arg0: i32, %arg1: i32) -> (i32, i32) {
    %c0_i32 = arith.constant 0 : i32
    %c0_i32_0 = arith.constant 0 : i32
    return %c0_i32, %arg0 : i32, i32
  }
  func.func @transform_5(%arg0: i32, %arg1: i32) -> (i32, i32) {
    %c0_i32 = arith.constant 0 : i32
    %c0_i32_0 = arith.constant 0 : i32
    return %c0_i32, %arg0 : i32, i32
  }
  func.func @transform_6(%arg0: i32, %arg1: i32) -> (i32, i32) {
    %c0_i32 = arith.constant 0 : i32
    %c0_i32_0 = arith.constant 0 : i32
    return %c0_i32, %arg0 : i32, i32
  }
  func.func @transform_7(%arg0: i32, %arg1: i32) -> (i32, i32) {
    %c0_i32 = arith.constant 0 : i32
    %c0_i32_0 = arith.constant 0 : i32
    return %c0_i32, %arg0 : i32, i32
  }
  func.func @transform_8(%arg0: i32, %arg1: i32) -> (i32, i32) {
    %c0_i32 = arith.constant 0 : i32
    return %arg0, %arg0 : i32, i32
  }
  func.func @transform_9(%arg0: i32, %arg1: i32) -> (i32, i32) {
    %c0_i32 = arith.constant 0 : i32
    %c0_i32_0 = arith.constant 0 : i32
    return %c0_i32, %arg0 : i32, i32
  }
}

module attributes {stable_mosaic.version = 11 : i64} {
  func.func @_dst_out_kernel(%arg0: i32, %arg1: memref<256x32xf32, #tpu.memory_space<vmem>>, %arg2: memref<256x32xf32, #tpu.memory_space<vmem>>, %arg3: memref<256x32xf32, #tpu.memory_space<vmem>>, %arg4: memref<32x32xbf16, #tpu.memory_space<vmem>>, %arg5: memref<1x32xf32, #tpu.memory_space<vmem>>, %arg6: memref<1x32xf32, #tpu.memory_space<vmem>>, %arg7: memref<1x32xf32, #tpu.memory_space<vmem>>, %arg8: memref<32x64xbf16, #tpu.memory_space<vmem>>, %arg9: memref<1x64xf32, #tpu.memory_space<vmem>>, %arg10: memref<64x32xbf16, #tpu.memory_space<vmem>>, %arg11: memref<1x32xf32, #tpu.memory_space<vmem>>, %arg12: memref<256x32xf32, #tpu.memory_space<vmem>>) attributes {dimension_semantics = [#tpu.dimension_semantics<parallel>], iteration_bounds = array<i64: 1>, scalar_prefetch = 0 : i64, scratch_operands = 0 : i64, tpu.core_type = #tpu.core_type<tc>, window_params = [{transform_indices = @transform_0, window_bounds = array<i64: 256, 32>}, {transform_indices = @transform_1, window_bounds = array<i64: 256, 32>}, {transform_indices = @transform_2, window_bounds = array<i64: 256, 32>}, {pipeline_mode = #tpu.pipeline_mode<synchronous>, transform_indices = @transform_3, window_bounds = array<i64: 32, 32>}, {pipeline_mode = #tpu.pipeline_mode<synchronous>, transform_indices = @transform_4, window_bounds = array<i64: 1, 32>}, {pipeline_mode = #tpu.pipeline_mode<synchronous>, transform_indices = @transform_5, window_bounds = array<i64: 1, 32>}, {pipeline_mode = #tpu.pipeline_mode<synchronous>, transform_indices = @transform_6, window_bounds = array<i64: 1, 32>}, {pipeline_mode = #tpu.pipeline_mode<synchronous>, transform_indices = @transform_7, window_bounds = array<i64: 32, 64>}, {pipeline_mode = #tpu.pipeline_mode<synchronous>, transform_indices = @transform_8, window_bounds = array<i64: 1, 64>}, {pipeline_mode = #tpu.pipeline_mode<synchronous>, transform_indices = @transform_9, window_bounds = array<i64: 64, 32>}, {pipeline_mode = #tpu.pipeline_mode<synchronous>, transform_indices = @transform_10, window_bounds = array<i64: 1, 32>}, {transform_indices = @transform_11, window_bounds = array<i64: 256, 32>}]} {
    %c0 = arith.constant 0 : index
    %c0_0 = arith.constant 0 : index
    %0 = vector.load %arg1[%c0, %c0_0] : memref<256x32xf32, #tpu.memory_space<vmem>>, vector<256x32xf32>
    %c0_1 = arith.constant 0 : index
    %c0_2 = arith.constant 0 : index
    %1 = vector.load %arg2[%c0_1, %c0_2] : memref<256x32xf32, #tpu.memory_space<vmem>>, vector<256x32xf32>
    %2 = arith.addf %0, %1 : vector<256x32xf32>
    %3 = arith.truncf %2 : vector<256x32xf32> to vector<256x32xbf16>
    %c0_3 = arith.constant 0 : index
    %c0_4 = arith.constant 0 : index
    %4 = vector.load %arg4[%c0_3, %c0_4] : memref<32x32xbf16, #tpu.memory_space<vmem>>, vector<32x32xbf16>
    %cst = arith.constant dense<0.000000e+00> : vector<256x32xf32>
    %5 = tpu.matmul %3, %4, %cst {dimension_numbers = #tpu.dot_dimension_numbers<[1], [0], [0], [1], [0, 0, 1, 1], [], []>} : vector<256x32xbf16>, vector<32x32xbf16>, vector<256x32xf32> -> vector<256x32xf32>
    %c0_5 = arith.constant 0 : index
    %c0_6 = arith.constant 0 : index
    %6 = vector.load %arg5[%c0_5, %c0_6] : memref<1x32xf32, #tpu.memory_space<vmem>>, vector<1x32xf32>
    %7 = vector.broadcast %6 : vector<1x32xf32> to vector<256x32xf32>
    %8 = arith.addf %5, %7 : vector<256x32xf32>
    %c0_7 = arith.constant 0 : index
    %c0_8 = arith.constant 0 : index
    %9 = vector.load %arg3[%c0_7, %c0_8] : memref<256x32xf32, #tpu.memory_space<vmem>>, vector<256x32xf32>
    %10 = arith.addf %8, %9 : vector<256x32xf32>
    %c0_9 = arith.constant 0 : index
    %c0_10 = arith.constant 0 : index
    %11 = vector.load %arg6[%c0_9, %c0_10] : memref<1x32xf32, #tpu.memory_space<vmem>>, vector<1x32xf32>
    %c0_11 = arith.constant 0 : index
    %c0_12 = arith.constant 0 : index
    %12 = vector.load %arg7[%c0_11, %c0_12] : memref<1x32xf32, #tpu.memory_space<vmem>>, vector<1x32xf32>
    %cst_13 = arith.constant dense<0.000000e+00> : vector<256xf32>
    %13 = vector.multi_reduction <add>, %10, %cst_13 [1] : vector<256x32xf32> to vector<256xf32>
    %14 = vector.shape_cast %13 : vector<256xf32> to vector<256x1xf32>
    %cst_14 = arith.constant 3.200000e+01 : f32
    %15 = vector.broadcast %cst_14 : f32 to vector<256x1xf32>
    %16 = arith.divf %14, %15 : vector<256x1xf32>
    %17 = vector.broadcast %16 : vector<256x1xf32> to vector<256x32xf32>
    %18 = arith.subf %10, %17 : vector<256x32xf32>
    %19 = arith.mulf %18, %18 : vector<256x32xf32>
    %cst_15 = arith.constant dense<0.000000e+00> : vector<256xf32>
    %20 = vector.multi_reduction <add>, %19, %cst_15 [1] : vector<256x32xf32> to vector<256xf32>
    %21 = vector.shape_cast %20 : vector<256xf32> to vector<256x1xf32>
    %cst_16 = arith.constant 3.200000e+01 : f32
    %22 = vector.broadcast %cst_16 : f32 to vector<256x1xf32>
    %23 = arith.divf %21, %22 : vector<256x1xf32>
    %cst_17 = arith.constant 9.99999974E-6 : f32
    %24 = vector.broadcast %cst_17 : f32 to vector<256x1xf32>
    %25 = arith.addf %23, %24 : vector<256x1xf32>
    %26 = math.rsqrt %25 : vector<256x1xf32>
    %27 = vector.broadcast %26 : vector<256x1xf32> to vector<256x32xf32>
    %28 = arith.mulf %18, %27 : vector<256x32xf32>
    %29 = vector.broadcast %11 : vector<1x32xf32> to vector<256x32xf32>
    %30 = arith.mulf %28, %29 : vector<256x32xf32>
    %31 = vector.broadcast %12 : vector<1x32xf32> to vector<256x32xf32>
    %32 = arith.addf %30, %31 : vector<256x32xf32>
    %33 = arith.truncf %32 : vector<256x32xf32> to vector<256x32xbf16>
    %c0_18 = arith.constant 0 : index
    %c0_19 = arith.constant 0 : index
    %34 = vector.load %arg8[%c0_18, %c0_19] : memref<32x64xbf16, #tpu.memory_space<vmem>>, vector<32x64xbf16>
    %cst_20 = arith.constant dense<0.000000e+00> : vector<256x64xf32>
    %35 = tpu.matmul %33, %34, %cst_20 {dimension_numbers = #tpu.dot_dimension_numbers<[1], [0], [0], [1], [0, 0, 1, 1], [], []>} : vector<256x32xbf16>, vector<32x64xbf16>, vector<256x64xf32> -> vector<256x64xf32>
    %c0_21 = arith.constant 0 : index
    %c0_22 = arith.constant 0 : index
    %36 = vector.load %arg9[%c0_21, %c0_22] : memref<1x64xf32, #tpu.memory_space<vmem>>, vector<1x64xf32>
    %37 = vector.broadcast %36 : vector<1x64xf32> to vector<256x64xf32>
    %38 = arith.addf %35, %37 : vector<256x64xf32>
    %cst_23 = arith.constant 5.000000e-01 : f32
    %39 = vector.broadcast %cst_23 : f32 to vector<256x64xf32>
    %40 = arith.mulf %39, %38 : vector<256x64xf32>
    %cst_24 = arith.constant 4.471500e-02 : f32
    %41 = vector.broadcast %cst_24 : f32 to vector<256x64xf32>
    %42 = arith.mulf %41, %38 : vector<256x64xf32>
    %43 = arith.mulf %42, %38 : vector<256x64xf32>
    %44 = arith.mulf %43, %38 : vector<256x64xf32>
    %45 = arith.addf %38, %44 : vector<256x64xf32>
    %cst_25 = arith.constant 0.797884583 : f32
    %46 = vector.broadcast %cst_25 : f32 to vector<256x64xf32>
    %47 = arith.mulf %46, %45 : vector<256x64xf32>
    %48 = math.tanh %47 : vector<256x64xf32>
    %cst_26 = arith.constant 1.000000e+00 : f32
    %49 = vector.broadcast %cst_26 : f32 to vector<256x64xf32>
    %50 = arith.addf %49, %48 : vector<256x64xf32>
    %51 = arith.mulf %40, %50 : vector<256x64xf32>
    %52 = arith.truncf %51 : vector<256x64xf32> to vector<256x64xbf16>
    %c0_27 = arith.constant 0 : index
    %c0_28 = arith.constant 0 : index
    %53 = vector.load %arg10[%c0_27, %c0_28] : memref<64x32xbf16, #tpu.memory_space<vmem>>, vector<64x32xbf16>
    %cst_29 = arith.constant dense<0.000000e+00> : vector<256x32xf32>
    %54 = tpu.matmul %52, %53, %cst_29 {dimension_numbers = #tpu.dot_dimension_numbers<[1], [0], [0], [1], [0, 0, 1, 1], [], []>} : vector<256x64xbf16>, vector<64x32xbf16>, vector<256x32xf32> -> vector<256x32xf32>
    %c0_30 = arith.constant 0 : index
    %c0_31 = arith.constant 0 : index
    %55 = vector.load %arg11[%c0_30, %c0_31] : memref<1x32xf32, #tpu.memory_space<vmem>>, vector<1x32xf32>
    %56 = vector.broadcast %55 : vector<1x32xf32> to vector<256x32xf32>
    %57 = arith.addf %54, %56 : vector<256x32xf32>
    %58 = arith.addf %57, %10 : vector<256x32xf32>
    %c0_32 = arith.constant 0 : index
    %c0_33 = arith.constant 0 : index
    %59 = vector.load %arg12[%c0_32, %c0_33] : memref<256x32xf32, #tpu.memory_space<vmem>>, vector<256x32xf32>
    tpu.vector_store %arg12[%c0_32, %c0_33], %58 {strides = array<i32>} : memref<256x32xf32, #tpu.memory_space<vmem>>, vector<256x32xf32>,
    return
  }
  func.func @transform_0(%arg0: i32) -> (i32, i32) {
    %c0_i32 = arith.constant 0 : i32
    %c0_i32_0 = arith.constant 0 : i32
    return %arg0, %c0_i32 : i32, i32
  }
  func.func @transform_1(%arg0: i32) -> (i32, i32) {
    %c0_i32 = arith.constant 0 : i32
    %c0_i32_0 = arith.constant 0 : i32
    return %arg0, %c0_i32 : i32, i32
  }
  func.func @transform_2(%arg0: i32) -> (i32, i32) {
    %c0_i32 = arith.constant 0 : i32
    %c0_i32_0 = arith.constant 0 : i32
    return %arg0, %c0_i32 : i32, i32
  }
  func.func @transform_3(%arg0: i32) -> (i32, i32) {
    %c0_i32 = arith.constant 0 : i32
    %c0_i32_0 = arith.constant 0 : i32
    %c0_i32_1 = arith.constant 0 : i32
    return %c0_i32, %c0_i32_0 : i32, i32
  }
  func.func @transform_4(%arg0: i32) -> (i32, i32) {
    %c0_i32 = arith.constant 0 : i32
    %c0_i32_0 = arith.constant 0 : i32
    %c0_i32_1 = arith.constant 0 : i32
    return %c0_i32, %c0_i32_0 : i32, i32
  }
  func.func @transform_5(%arg0: i32) -> (i32, i32) {
    %c0_i32 = arith.constant 0 : i32
    %c0_i32_0 = arith.constant 0 : i32
    %c0_i32_1 = arith.constant 0 : i32
    return %c0_i32, %c0_i32_0 : i32, i32
  }
  func.func @transform_6(%arg0: i32) -> (i32, i32) {
    %c0_i32 = arith.constant 0 : i32
    %c0_i32_0 = arith.constant 0 : i32
    %c0_i32_1 = arith.constant 0 : i32
    return %c0_i32, %c0_i32_0 : i32, i32
  }
  func.func @transform_7(%arg0: i32) -> (i32, i32) {
    %c0_i32 = arith.constant 0 : i32
    %c0_i32_0 = arith.constant 0 : i32
    %c0_i32_1 = arith.constant 0 : i32
    return %c0_i32, %c0_i32_0 : i32, i32
  }
  func.func @transform_8(%arg0: i32) -> (i32, i32) {
    %c0_i32 = arith.constant 0 : i32
    %c0_i32_0 = arith.constant 0 : i32
    %c0_i32_1 = arith.constant 0 : i32
    return %c0_i32, %c0_i32_0 : i32, i32
  }
  func.func @transform_9(%arg0: i32) -> (i32, i32) {
    %c0_i32 = arith.constant 0 : i32
    %c0_i32_0 = arith.constant 0 : i32
    %c0_i32_1 = arith.constant 0 : i32
    return %c0_i32, %c0_i32_0 : i32, i32
  }
  func.func @transform_10(%arg0: i32) -> (i32, i32) {
    %c0_i32 = arith.constant 0 : i32
    %c0_i32_0 = arith.constant 0 : i32
    %c0_i32_1 = arith.constant 0 : i32
    return %c0_i32, %c0_i32_0 : i32, i32
  }
  func.func @transform_11(%arg0: i32) -> (i32, i32) {
    %c0_i32 = arith.constant 0 : i32
    %c0_i32_0 = arith.constant 0 : i32
    return %arg0, %c0_i32 : i32, i32
  }
}

</mosaic_0001>

<bundles_post_ra>
// kernel: graph_transformer_mapper_block.4
= control target key start
LH: loop header
LB: loop body
LE: loop exit
PB: predicated region body
PF: predicated region fallthrough
CT: control target
= control target key end

     0   :  { %vm63_vm0 = vcmask 261120   ;;  %vm1117_vm1 = vcmask 257024   ;;  %s2411_s0 = inlined_call_operand.vmem [shape: f32[256,32], index: 0, kind: input, shape index: {}]   ;;  %s2412_s3 = inlined_call_operand.vmem [shape: bf16[32,32], index: 3, kind: input, shape index: {}]   ;;  %s2413_s5 = inlined_call_operand.vmem [shape: bf16[32,32], index: 5, kind: input, shape index: {}]   ;;  %s2414_s1 = inlined_call_operand.vmem [shape: f32[1,32], index: 1, kind: input, shape index: {}]   ;;  %s2415_s2 = inlined_call_operand.vmem [shape: f32[1,32], index: 2, kind: input, shape index: {}]   ;;  %s2416_s4 = inlined_call_operand.vmem [shape: f32[1,32], index: 4, kind: input, shape index: {}]   ;;  %s2417_s6 = inlined_call_operand.vmem [shape: f32[1,32], index: 6, kind: input, shape index: {}]   ;;  %s2418_s8 = inlined_call_operand.vmem [shape: f32[256,32], index: 8, kind: output, shape index: {1}]   ;;  %s2419_s7 = inlined_call_operand.vmem [shape: bf16[256,32], index: 7, kind: output, shape index: {0}]  }
   0x1   :  { %v1518_v0 = vld [vmem:[%s2411_s0] sm:$0xff]  ;;  %v1523_v1 = vld [vmem:[%s2411_s0 + $0x10] sm:$0xff]  ;;  %v1528_v2 = vld [vmem:[%s2411_s0 + $0x8] sm:$0xff] }
   0x2   :  { %v64_v3 = vsel %vm63_vm0, %v1518_v0, 0.0  ;;  %v70_v4 = vsel %vm63_vm0, %v1523_v1, 0.0  ;;  %v1537_v5 = vld [vmem:[%s2411_s0 + $0x18] sm:$0xff]  ;;  %v67_v6 = vsel %vm63_vm0, %v1528_v2, 0.0  ;;  %v1546_v8 = vld [vmem:[%s2411_s0 + $0x20] sm:$0xff]  ;;  %v1551_v9 = vld [vmem:[%s2411_s0 + $0x28] sm:$0xff] }
   0x3   :  { %65 = vadd.xlane.f32.xlu0 %v64_v3  ;;  %71 = vadd.xlane.f32.xlu1 %v70_v4  ;;  %v73_v7 = vsel %vm63_vm0, %v1537_v5, 0.0  ;;  %v76_v10 = vsel %vm63_vm0, %v1546_v8, 0.0  ;;  %v79_v11 = vsel %vm63_vm0, %v1551_v9, 0.0  ;;  %v1560_v12 = vld [vmem:[%s2411_s0 + $0x30] sm:$0xff]  ;;  %v1565_v13 = vld [vmem:[%s2411_s0 + $0x38] sm:$0xff]  ;;  %v1574_v16 = vld [vmem:[%s2411_s0 + $0x40] sm:$0xff] }
   0x4   :  { %v82_v14 = vsel %vm63_vm0, %v1560_v12, 0.0  ;;  %v85_v15 = vsel %vm63_vm0, %v1565_v13, 0.0  ;;  %v1579_v17 = vld [vmem:[%s2411_s0 + $0x48] sm:$0xff]  ;;  %v88_v18 = vsel %vm63_vm0, %v1574_v16, 0.0  ;;  %v1588_v20 = vld [vmem:[%s2411_s0 + $0x50] sm:$0xff]  ;;  %v1593_v21 = vld [vmem:[%s2411_s0 + $0x58] sm:$0xff] }
   0x5   :  { %v91_v19 = vsel %vm63_vm0, %v1579_v17, 0.0  ;;  %v94_v22 = vsel %vm63_vm0, %v1588_v20, 0.0  ;;  %v97_v23 = vsel %vm63_vm0, %v1593_v21, 0.0  ;;  %v1602_v24 = vld [vmem:[%s2411_s0 + $0x60] sm:$0xff]  ;;  %v1607_v25 = vld [vmem:[%s2411_s0 + $0x68] sm:$0xff]  ;;  %v1616_v28 = vld [vmem:[%s2411_s0 + $0x70] sm:$0xff] }
   0x6   :  { %v100_v26 = vsel %vm63_vm0, %v1602_v24, 0.0  ;;  %v103_v27 = vsel %vm63_vm0, %v1607_v25, 0.0  ;;  %v1621_v29 = vld [vmem:[%s2411_s0 + $0x78] sm:$0xff]  ;;  %v106_v30 = vsel %vm63_vm0, %v1616_v28, 0.0  ;;  %v1630_v32 = vld [vmem:[%s2411_s0 + $0x80] sm:$0xff]  ;;  %v1635_v33 = vld [vmem:[%s2411_s0 + $0x88] sm:$0xff] }
   0x7   :  { %68 = vadd.xlane.f32.xlu0 %v67_v6  ;;  %74 = vadd.xlane.f32.xlu1 %v73_v7  ;;  %v109_v31 = vsel %vm63_vm0, %v1621_v29, 0.0  ;;  %v112_v34 = vsel %vm63_vm0, %v1630_v32, 0.0  ;;  %v115_v35 = vsel %vm63_vm0, %v1635_v33, 0.0  ;;  %v1644_v36 = vld [vmem:[%s2411_s0 + $0x90] sm:$0xff]  ;;  %v1649_v37 = vld [vmem:[%s2411_s0 + $0x98] sm:$0xff]  ;;  %v1658_v40 = vld [vmem:[%s2411_s0 + $0xa0] sm:$0xff] }
   0x8   :  { %v118_v38 = vsel %vm63_vm0, %v1644_v36, 0.0  ;;  %v121_v39 = vsel %vm63_vm0, %v1649_v37, 0.0  ;;  %v1663_v41 = vld [vmem:[%s2411_s0 + $0xa8] sm:$0xff]  ;;  %v124_v42 = vsel %vm63_vm0, %v1658_v40, 0.0  ;;  %v1672_v44 = vld [vmem:[%s2411_s0 + $0xb0] sm:$0xff]  ;;  %v1677_v45 = vld [vmem:[%s2411_s0 + $0xb8] sm:$0xff] }
   0x9   :  { %v127_v43 = vsel %vm63_vm0, %v1663_v41, 0.0  ;;  %v130_v46 = vsel %vm63_vm0, %v1672_v44, 0.0  ;;  %v133_v47 = vsel %vm63_vm0, %v1677_v45, 0.0  ;;  %v1686_v48 = vld [vmem:[%s2411_s0 + $0xc0] sm:$0xff]  ;;  %v1691_v49 = vld [vmem:[%s2411_s0 + $0xc8] sm:$0xff]  ;;  %v1700_v52 = vld [vmem:[%s2411_s0 + $0xd0] sm:$0xff] }
   0xa   :  { %v136_v50 = vsel %vm63_vm0, %v1686_v48, 0.0  ;;  %v139_v51 = vsel %vm63_vm0, %v1691_v49, 0.0  ;;  %v1705_v53 = vld [vmem:[%s2411_s0 + $0xd8] sm:$0xff]  ;;  %v142_v54 = vsel %vm63_vm0, %v1700_v52, 0.0  ;;  %v1714_v56 = vld [vmem:[%s2411_s0 + $0xe0] sm:$0xff]  ;;  %v1719_v57 = vld [vmem:[%s2411_s0 + $0xe8] sm:$0xff] }
   0xb   :  { %77 = vadd.xlane.f32.xlu0 %v76_v10  ;;  %80 = vadd.xlane.f32.xlu1 %v79_v11  ;;  %v145_v55 = vsel %vm63_vm0, %v1705_v53, 0.0  ;;  %v148_v58 = vsel %vm63_vm0, %v1714_v56, 0.0  ;;  %v151_v59 = vsel %vm63_vm0, %v1719_v57, 0.0  ;;  %v1728_v60 = vld [vmem:[%s2411_s0 + $0xf0] sm:$0xff]  ;;  %v1733_v61 = vld [vmem:[%s2411_s0 + $0xf8] sm:$0xff] }
   0xc   :  { %v154_v62 = vsel %vm63_vm0, %v1728_v60, 0.0  ;;  %v157_v63 = vsel %vm63_vm0, %v1733_v61, 0.0 }
   0xf   :  { %83 = vadd.xlane.f32.xlu0 %v82_v14  ;;  %86 = vadd.xlane.f32.xlu1 %v85_v15 }
  0x13   :  { %89 = vadd.xlane.f32.xlu0 %v88_v18  ;;  %92 = vadd.xlane.f32.xlu1 %v91_v19 }
  0x17   :  { %95 = vadd.xlane.f32.xlu0 %v94_v22  ;;  %98 = vadd.xlane.f32.xlu1 %v97_v23 }
  0x1b   :  { %101 = vadd.xlane.f32.xlu0 %v100_v26  ;;  %104 = vadd.xlane.f32.xlu1 %v103_v27 }
  0x1f   :  { %107 = vadd.xlane.f32.xlu0 %v106_v30  ;;  %110 = vadd.xlane.f32.xlu1 %v109_v31 }
  0x23   :  { %113 = vadd.xlane.f32.xlu0 %v112_v34  ;;  %116 = vadd.xlane.f32.xlu1 %v115_v35 }
  0x27   :  { %119 = vadd.xlane.f32.xlu0 %v118_v38  ;;  %122 = vadd.xlane.f32.xlu1 %v121_v39 }
  0x2b   :  { %125 = vadd.xlane.f32.xlu0 %v124_v42  ;;  %128 = vadd.xlane.f32.xlu1 %v127_v43 }
  0x2f   :  { %131 = vadd.xlane.f32.xlu0 %v130_v46  ;;  %134 = vadd.xlane.f32.xlu1 %v133_v47 }
  0x33   :  { %137 = vadd.xlane.f32.xlu0 %v136_v50  ;;  %140 = vadd.xlane.f32.xlu1 %v139_v51 }
  0x37   :  { %143 = vadd.xlane.f32.xlu0 %v142_v54  ;;  %146 = vadd.xlane.f32.xlu1 %v145_v55 }
  0x3b   :  { %149 = vadd.xlane.f32.xlu0 %v148_v58  ;;  %152 = vadd.xlane.f32.xlu1 %v151_v59 }
  0x3f   :  { %155 = vadd.xlane.f32.xlu0 %v154_v62  ;;  %158 = vadd.xlane.f32.xlu1 %v157_v63 }
  0x90   :  { %v66_v3 = vpop.xlane.xlu0 %65  ;;  %v72_v4 = vpop.xlane.xlu1 %71 }
  0x91   :  { %v161_v6 = vmul.f32 0.03125, %v66_v3  ;;  %v163_v7 = vmul.f32 0.03125, %v72_v4 }
  0x93   :  { %v1740_v10 = vsub.f32 %v1518_v0, %v161_v6  ;;  %v1743_v11 = vsub.f32 %v1523_v1, %v163_v7 }
  0x94   :  { %v69_v14 = vpop.xlane.xlu0 %68  ;;  %v75_v15 = vpop.xlane.xlu1 %74 }
  0x95   :  { %v162_v18 = vmul.f32 0.03125, %v69_v14  ;;  %v164_v19 = vmul.f32 0.03125, %v75_v15  ;;  %v225_v22 = vmul.f32 %v1740_v10, %v1740_v10  ;;  %v227_v23 = vmul.f32 %v1743_v11, %v1743_v11 }
  0x97   :  { %v1750_v26 = vsub.f32 %v1528_v2, %v162_v18  ;;  %v1753_v27 = vsub.f32 %v1537_v5, %v164_v19  ;;  %v257_v0 = vsel %vm63_vm0, %v225_v22, 0.0  ;;  %v263_v31 = vsel %vm63_vm0, %v227_v23, 0.0 }
  0x98   :  { %258 = vadd.xlane.f32.xlu0 %v257_v0  ;;  %v78_v1 = vpop.xlane.xlu0 %77  ;;  %v81_v30 = vpop.xlane.xlu1 %80 }
  0x99   :  { %v165_v34 = vmul.f32 0.03125, %v78_v1  ;;  %v166_v35 = vmul.f32 0.03125, %v81_v30  ;;  %v226_v38 = vmul.f32 %v1750_v26, %v1750_v26  ;;  %v228_v39 = vmul.f32 %v1753_v27, %v1753_v27 }
  0x9b   :  { %v1762_v2 = vsub.f32 %v1546_v8, %v165_v34  ;;  %v1765_v5 = vsub.f32 %v1551_v9, %v166_v35  ;;  %v260_v42 = vsel %vm63_vm0, %v226_v38, 0.0  ;;  %v266_v47 = vsel %vm63_vm0, %v228_v39, 0.0 }
  0x9c   :  { %264 = vadd.xlane.f32.xlu0 %v263_v31  ;;  %261 = vadd.xlane.f32.xlu1 %v260_v42  ;;  %v84_v43 = vpop.xlane.xlu0 %83  ;;  %v87_v46 = vpop.xlane.xlu1 %86 }
  0x9d   :  { %v167_v50 = vmul.f32 0.03125, %v84_v43  ;;  %v168_v51 = vmul.f32 0.03125, %v87_v46  ;;  %v229_v54 = vmul.f32 %v1762_v2, %v1762_v2  ;;  %v230_v8 = vmul.f32 %v1765_v5, %v1765_v5 }
  0x9f   :  { %v1774_v55 = vsub.f32 %v1560_v12, %v167_v50  ;;  %v1777_v9 = vsub.f32 %v1565_v13, %v168_v51  ;;  %v269_v58 = vsel %vm63_vm0, %v229_v54, 0.0  ;;  %v272_v63 = vsel %vm63_vm0, %v230_v8, 0.0 }
  0xa0   :  { %267 = vadd.xlane.f32.xlu1 %v266_v47  ;;  %270 = vadd.xlane.f32.xlu0 %v269_v58  ;;  %v90_v59 = vpop.xlane.xlu0 %89  ;;  %v93_v62 = vpop.xlane.xlu1 %92 }
  0xa1   :  { %v169_v3 = vmul.f32 0.03125, %v90_v59  ;;  %v170_v4 = vmul.f32 0.03125, %v93_v62  ;;  %v231_v6 = vmul.f32 %v1774_v55, %v1774_v55  ;;  %v232_v12 = vmul.f32 %v1777_v9, %v1777_v9 }
  0xa3   :  { %v1786_v7 = vsub.f32 %v1574_v16, %v169_v3  ;;  %v1789_v13 = vsub.f32 %v1579_v17, %v170_v4  ;;  %v275_v14 = vsel %vm63_vm0, %v231_v6, 0.0  ;;  %v278_v19 = vsel %vm63_vm0, %v232_v12, 0.0 }
  0xa4   :  { %273 = vadd.xlane.f32.xlu1 %v272_v63  ;;  %276 = vadd.xlane.f32.xlu0 %v275_v14  ;;  %v96_v15 = vpop.xlane.xlu0 %95  ;;  %v99_v18 = vpop.xlane.xlu1 %98 }
  0xa5   :  { %v171_v22 = vmul.f32 0.03125, %v96_v15  ;;  %v172_v23 = vmul.f32 0.03125, %v99_v18  ;;  %v233_v0 = vmul.f32 %v1786_v7, %v1786_v7  ;;  %v234_v16 = vmul.f32 %v1789_v13, %v1789_v13 }
  0xa7   :  { %v1798_v1 = vsub.f32 %v1588_v20, %v171_v22  ;;  %v1801_v17 = vsub.f32 %v1593_v21, %v172_v23  ;;  %v281_v30 = vsel %vm63_vm0, %v233_v0, 0.0  ;;  %v284_v35 = vsel %vm63_vm0, %v234_v16, 0.0 }
  0xa8   :  { %279 = vadd.xlane.f32.xlu1 %v278_v19  ;;  %282 = vadd.xlane.f32.xlu0 %v281_v30  ;;  %v102_v31 = vpop.xlane.xlu0 %101  ;;  %v105_v34 = vpop.xlane.xlu1 %104 }
  0xa9   :  { %v173_v38 = vmul.f32 0.03125, %v102_v31  ;;  %v174_v39 = vmul.f32 0.03125, %v105_v34  ;;  %v235_v42 = vmul.f32 %v1798_v1, %v1798_v1  ;;  %v236_v20 = vmul.f32 %v1801_v17, %v1801_v17 }
  0xab   :  { %v1810_v43 = vsub.f32 %v1602_v24, %v173_v38  ;;  %v1813_v21 = vsub.f32 %v1607_v25, %v174_v39  ;;  %v287_v46 = vsel %vm63_vm0, %v235_v42, 0.0  ;;  %v290_v51 = vsel %vm63_vm0, %v236_v20, 0.0 }
  0xac   :  { %285 = vadd.xlane.f32.xlu1 %v284_v35  ;;  %288 = vadd.xlane.f32.xlu0 %v287_v46  ;;  %v108_v47 = vpop.xlane.xlu0 %107  ;;  %v111_v50 = vpop.xlane.xlu1 %110 }
  0xad   :  { %v175_v54 = vmul.f32 0.03125, %v108_v47  ;;  %v176_v8 = vmul.f32 0.03125, %v111_v50  ;;  %v237_v58 = vmul.f32 %v1810_v43, %v1810_v43  ;;  %v238_v24 = vmul.f32 %v1813_v21, %v1813_v21 }
  0xaf   :  { %v1822_v59 = vsub.f32 %v1616_v28, %v175_v54  ;;  %v1825_v25 = vsub.f32 %v1621_v29, %v176_v8  ;;  %v293_v62 = vsel %vm63_vm0, %v237_v58, 0.0  ;;  %v296_v4 = vsel %vm63_vm0, %v238_v24, 0.0  ;;  %v1402_v58 = vld [vmem:[%s2412_s3] sm:$0xff]  }
  0xb0   :  { %291 = vadd.xlane.f32.xlu1 %v290_v51  ;;  %294 = vadd.xlane.f32.xlu0 %v293_v62  ;;  %v114_v63 = vpop.xlane.xlu0 %113  ;;  %v117_v3 = vpop.xlane.xlu1 %116 }
  0xb1   :  { %v177_v6 = vmul.f32 0.03125, %v114_v63  ;;  %v178_v12 = vmul.f32 0.03125, %v117_v3  ;;  %v239_v14 = vmul.f32 %v1822_v59, %v1822_v59  ;;  %v240_v28 = vmul.f32 %v1825_v25, %v1825_v25  ;;  %1330 = vmatprep.subr.bf16.mxu0 %v1402_v58  ;;  %v1403_v63 = vld [vmem:[%s2413_s5] sm:$0xff]  }
  0xb2   :  { %1331 = vmatpush3.bf16.msra.mxu0 %v1402_v58  ;;  %1366 = vmatprep.subr.bf16.mxu1 %v1403_v63 }
  0xb3   :  { %v1834_v15 = vsub.f32 %v1630_v32, %v177_v6  ;;  %v1837_v29 = vsub.f32 %v1635_v33, %v178_v12  ;;  %v299_v18 = vsel %vm63_vm0, %v239_v14, 0.0  ;;  %v302_v23 = vsel %vm63_vm0, %v240_v28, 0.0  ;;  %1367 = vmatpush3.bf16.msra.mxu1 %v1403_v63 }
  0xb4   :  { %297 = vadd.xlane.f32.xlu1 %v296_v4  ;;  %300 = vadd.xlane.f32.xlu0 %v299_v18  ;;  %v120_v19 = vpop.xlane.xlu0 %119  ;;  %v123_v22 = vpop.xlane.xlu1 %122  ;;  %v1404_v18 = vld [vmem:[%s2412_s3 + $0x8] sm:$0xff]  }
  0xb5   :  { %v179_v0 = vmul.f32 0.03125, %v120_v19  ;;  %v180_v16 = vmul.f32 0.03125, %v123_v22  ;;  %v241_v30 = vmul.f32 %v1834_v15, %v1834_v15  ;;  %v242_v32 = vmul.f32 %v1837_v29, %v1837_v29  ;;  %1332 = vmatprep.subr.bf16.mxu0 %v1404_v18 }
  0xb6   :  { %1333 = vmatpush3.bf16.msra.mxu0 %v1404_v18 }
  0xb7   :  { %v1846_v31 = vsub.f32 %v1644_v36, %v179_v0  ;;  %v1849_v33 = vsub.f32 %v1649_v37, %v180_v16  ;;  %v305_v34 = vsel %vm63_vm0, %v241_v30, 0.0  ;;  %v308_v39 = vsel %vm63_vm0, %v242_v32, 0.0 }
  0xb8   :  { %303 = vadd.xlane.f32.xlu1 %v302_v23  ;;  %306 = vadd.xlane.f32.xlu0 %v305_v34  ;;  %v126_v35 = vpop.xlane.xlu0 %125  ;;  %v129_v38 = vpop.xlane.xlu1 %128 }
  0xb9   :  { %v181_v42 = vmul.f32 0.03125, %v126_v35  ;;  %v182_v20 = vmul.f32 0.03125, %v129_v38  ;;  %v243_v46 = vmul.f32 %v1846_v31, %v1846_v31  ;;  %v244_v36 = vmul.f32 %v1849_v33, %v1849_v33 }
  0xbb   :  { %v1858_v47 = vsub.f32 %v1658_v40, %v181_v42  ;;  %v1861_v37 = vsub.f32 %v1663_v41, %v182_v20  ;;  %v311_v50 = vsel %vm63_vm0, %v243_v46, 0.0  ;;  %v314_v8 = vsel %vm63_vm0, %v244_v36, 0.0 }
  0xbc   :  { %309 = vadd.xlane.f32.xlu1 %v308_v39  ;;  %312 = vadd.xlane.f32.xlu0 %v311_v50  ;;  %v132_v51 = vpop.xlane.xlu0 %131  ;;  %v135_v54 = vpop.xlane.xlu1 %134 }
  0xbd   :  { %v183_v24 = vmul.f32 0.03125, %v132_v51  ;;  %v184_v62 = vmul.f32 0.03125, %v135_v54  ;;  %v245_v40 = vmul.f32 %v1858_v47, %v1858_v47  ;;  %v246_v41 = vmul.f32 %v1861_v37, %v1861_v37 }
  0xbf   :  { %v1876_v3 = vsub.f32 %v1672_v44, %v183_v24  ;;  %v1879_v4 = vsub.f32 %v1677_v45, %v184_v62  ;;  %v317_v6 = vsel %vm63_vm0, %v245_v40, 0.0  ;;  %v320_v28 = vsel %vm63_vm0, %v246_v41, 0.0  ;;  %v1405_v44 = vld [vmem:[%s2413_s5 + $0x8] sm:$0xff]  }
  0xc0   :  { %315 = vadd.xlane.f32.xlu1 %v314_v8  ;;  %318 = vadd.xlane.f32.xlu0 %v317_v6  ;;  %v138_v12 = vpop.xlane.xlu0 %137  ;;  %v141_v14 = vpop.xlane.xlu1 %140 }
  0xc1   :  { %v185_v19 = vmul.f32 0.03125, %v138_v12  ;;  %v186_v45 = vmul.f32 0.03125, %v141_v14  ;;  %v247_v22 = vmul.f32 %v1876_v3, %v1876_v3  ;;  %v248_v23 = vmul.f32 %v1879_v4, %v1879_v4  ;;  %1368 = vmatprep.subr.bf16.mxu1 %v1405_v44 }
  0xc2   :  { %1369 = vmatpush3.bf16.msra.mxu1 %v1405_v44 }
  0xc3   :  { %v1894_v0 = vsub.f32 %v1686_v48, %v185_v19  ;;  %v1897_v16 = vsub.f32 %v1691_v49, %v186_v45  ;;  %v323_v30 = vsel %vm63_vm0, %v247_v22, 0.0  ;;  %v326_v35 = vsel %vm63_vm0, %v248_v23, 0.0 }
  0xc4   :  { %321 = vadd.xlane.f32.xlu1 %v320_v28  ;;  %324 = vadd.xlane.f32.xlu0 %v323_v30  ;;  %v144_v32 = vpop.xlane.xlu0 %143  ;;  %v147_v34 = vpop.xlane.xlu1 %146 }
  0xc5   :  { %v187_v38 = vmul.f32 0.03125, %v144_v32  ;;  %v188_v39 = vmul.f32 0.03125, %v147_v34  ;;  %v249_v42 = vmul.f32 %v1894_v0, %v1894_v0  ;;  %v250_v48 = vmul.f32 %v1897_v16, %v1897_v16 }
  0xc7   :  { %v1906_v49 = vsub.f32 %v1700_v52, %v187_v38  ;;  %v1909_v20 = vsub.f32 %v1705_v53, %v188_v39  ;;  %v329_v46 = vsel %vm63_vm0, %v249_v42, 0.0  ;;  %v332_v51 = vsel %vm63_vm0, %v250_v48, 0.0 }
  0xc8   :  { %327 = vadd.xlane.f32.xlu1 %v326_v35  ;;  %330 = vadd.xlane.f32.xlu0 %v329_v46  ;;  %v150_v36 = vpop.xlane.xlu0 %149  ;;  %v153_v50 = vpop.xlane.xlu1 %152 }
  0xc9   :  { %v189_v54 = vmul.f32 0.03125, %v150_v36  ;;  %v190_v8 = vmul.f32 0.03125, %v153_v50  ;;  %v251_v58 = vmul.f32 %v1906_v49, %v1906_v49  ;;  %v252_v52 = vmul.f32 %v1909_v20, %v1909_v20 }
  0xcb   :  { %v1918_v24 = vsub.f32 %v1714_v56, %v189_v54  ;;  %v1921_v53 = vsub.f32 %v1719_v57, %v190_v8  ;;  %v335_v62 = vsel %vm63_vm0, %v251_v58, 0.0  ;;  %v338_v63 = vsel %vm63_vm0, %v252_v52, 0.0 }
  0xcc   :  { %333 = vadd.xlane.f32.xlu1 %v332_v51  ;;  %336 = vadd.xlane.f32.xlu0 %v335_v62  ;;  %v156_v40 = vpop.xlane.xlu0 %155  ;;  %v159_v41 = vpop.xlane.xlu1 %158 }
  0xcd   :  { %v191_v6 = vmul.f32 0.03125, %v156_v40  ;;  %v192_v12 = vmul.f32 0.03125, %v159_v41  ;;  %v253_v14 = vmul.f32 %v1918_v24, %v1918_v24  ;;  %v254_v56 = vmul.f32 %v1921_v53, %v1921_v53 }
  0xcf   :  { %v1930_v28 = vsub.f32 %v1728_v60, %v191_v6  ;;  %v1933_v57 = vsub.f32 %v1733_v61, %v192_v12  ;;  %v341_v18 = vsel %vm63_vm0, %v253_v14, 0.0  ;;  %v344_v44 = vsel %vm63_vm0, %v254_v56, 0.0 }
  0xd0   :  { %339 = vadd.xlane.f32.xlu1 %v338_v63  ;;  %342 = vadd.xlane.f32.xlu0 %v341_v18 }
  0xd1   :  { %v255_v19 = vmul.f32 %v1930_v28, %v1930_v28  ;;  %v256_v45 = vmul.f32 %v1933_v57, %v1933_v57 }
  0xd3   :  { %v347_v22 = vsel %vm63_vm0, %v255_v19, 0.0  ;;  %v350_v60 = vsel %vm63_vm0, %v256_v45, 0.0 }
  0xd4   :  { %345 = vadd.xlane.f32.xlu1 %v344_v44  ;;  %348 = vadd.xlane.f32.xlu0 %v347_v22  ;;  %v1947_v44 = vld [vmem:[%s2414_s1] ss:$0 sm:$0xff] }
  0xd8   :  { %351 = vadd.xlane.f32.xlu1 %v350_v60 }
 0x125   :  { %v259_v61 = vpop.xlane.xlu0 %258 }
 0x126   :  { %v353_v23 = vmul.f32 0.03125, %v259_v61 }
 0x128   :  { %v385_v30 = vadd.f32 1e-05, %v353_v23 }
 0x129   :  { %v262_v32 = vpop.xlane.xlu1 %261  ;;  %v265_v34 = vpop.xlane.xlu0 %264 }
 0x12a   :  { %1406 = vrsqrt.f32 %v385_v30  ;;  %v354_v35 = vmul.f32 0.03125, %v262_v32  ;;  %v355_v38 = vmul.f32 0.03125, %v265_v34 }
 0x12c   :  { %v386_v39 = vadd.f32 1e-05, %v354_v35  ;;  %v387_v42 = vadd.f32 1e-05, %v355_v38  ;;  %v1955_v38 = vld [vmem:[%s2415_s2] ss:$0 sm:$0xff] }
 0x12d   :  { %v268_v48 = vpop.xlane.xlu1 %267  ;;  %v271_v46 = vpop.xlane.xlu0 %270 }
 0x12e   :  { %1408 = vrsqrt.f32 %v386_v39  ;;  %v356_v36 = vmul.f32 0.03125, %v268_v48  ;;  %v357_v50 = vmul.f32 0.03125, %v271_v46 }
 0x12f   :  { %1410 = vrsqrt.f32 %v387_v42 }
 0x130   :  { %v388_v51 = vadd.f32 1e-05, %v356_v36  ;;  %v389_v54 = vadd.f32 1e-05, %v357_v50 }
 0x131   :  { %v274_v8 = vpop.xlane.xlu1 %273  ;;  %v277_v58 = vpop.xlane.xlu0 %276 }
 0x132   :  { %1412 = vrsqrt.f32 %v388_v51  ;;  %v358_v52 = vmul.f32 0.03125, %v274_v8  ;;  %v359_v62 = vmul.f32 0.03125, %v277_v58 }
 0x133   :  { %1414 = vrsqrt.f32 %v389_v54 }
 0x134   :  { %v1407_v40 = vpop.eup %1406  ;;  %v390_v41 = vadd.f32 1e-05, %v358_v52  ;;  %v391_v63 = vadd.f32 1e-05, %v359_v62 }
 0x135   :  { %v280_v6 = vpop.xlane.xlu1 %279  ;;  %v283_v12 = vpop.xlane.xlu0 %282  ;;  %v449_v14 = vmul.f32 %v1407_v40, %v1740_v10 }
 0x136   :  { %1416 = vrsqrt.f32 %v390_v41  ;;  %v360_v56 = vmul.f32 0.03125, %v280_v6  ;;  %v361_v18 = vmul.f32 0.03125, %v283_v12 }
 0x137   :  { %1418 = vrsqrt.f32 %v391_v63  ;;  %v487_v32 = vmul.f32 %v1947_v44, %v449_v14 }
 0x138   :  { %v1409_v19 = vpop.eup %1408  ;;  %v392_v45 = vadd.f32 1e-05, %v360_v56  ;;  %v393_v22 = vadd.f32 1e-05, %v361_v18 }
 0x139   :  { %v1411_v60 = vpop.eup %1410  ;;  %v286_v61 = vpop.xlane.xlu1 %285  ;;  %v450_v30 = vmul.f32 %v1409_v19, %v1750_v26 }
 0x13a   :  { %v289_v23 = vpop.xlane.xlu0 %288  ;;  %v451_v10 = vmul.f32 %v1411_v60, %v1743_v11  ;;  %1420 = vrsqrt.f32 %v392_v45  ;;  %v362_v34 = vmul.f32 0.03125, %v286_v61  ;;  %v525_v11 = vadd.f32 %v1955_v38, %v487_v32 }
 0x13b   :  { %v363_v35 = vmul.f32 0.03125, %v289_v23  ;;  %1422 = vrsqrt.f32 %v393_v22  ;;  %v488_v39 = vmul.f32 %v1947_v44, %v450_v30 }
 0x13c   :  { %v1413_v42 = vpop.eup %1412  ;;  %v394_v48 = vadd.f32 1e-05, %v362_v34  ;;  %v489_v8 = vmul.f32 %v1947_v44, %v451_v10 }
 0x13d   :  { %v395_v46 = vadd.f32 1e-05, %v363_v35  ;;  %v1415_v36 = vpop.eup %1414  ;;  %v452_v26 = vmul.f32 %v1413_v42, %v1753_v27  ;;  %v292_v50 = vpop.xlane.xlu1 %291  ;;  %v526_v54 = vadd.f32 %v1955_v38, %v488_v39 }
 0x13e   :  { %v295_v51 = vpop.xlane.xlu0 %294  ;;  %v453_v58 = vmul.f32 %v1415_v36, %v1762_v2  ;;  %1424 = vrsqrt.f32 %v394_v48  ;;  %v364_v52 = vmul.f32 0.03125, %v292_v50  ;;  %v527_v19 = vadd.f32 %v1955_v38, %v489_v8 }
 0x13f   :  { %v365_v62 = vmul.f32 0.03125, %v295_v51  ;;  %1426 = vrsqrt.f32 %v395_v46  ;;  %v557_v40 = vpack.c.bf16 %v526_v54, %v525_v11  ;;  %v490_v41 = vmul.f32 %v1947_v44, %v452_v26 }
 0x140   :  { %v1417_v63 = vpop.eup %1416  ;;  %v396_v6 = vadd.f32 1e-05, %v364_v52  ;;  %v491_v12 = vmul.f32 %v1947_v44, %v453_v58 }
 0x141   :  { %v397_v27 = vadd.f32 1e-05, %v365_v62  ;;  %v1419_v14 = vpop.eup %1418  ;;  %v454_v56 = vmul.f32 %v1417_v63, %v1765_v5  ;;  %v298_v18 = vpop.xlane.xlu1 %297  ;;  %1334 = vmatprep.mubr.msk.bf16.mxu0 %vm63_vm0, %v557_v40  ;;  %1370 = vmatprep.mubr.msk.bf16.mxu1 %vm63_vm0, %v557_v40  ;;  %v528_v45 = vadd.f32 %v1955_v38, %v490_v41 }
 0x142   :  { %v301_v2 = vpop.xlane.xlu0 %300  ;;  %v455_v22 = vmul.f32 %v1419_v14, %v1774_v55  ;;  %1428 = vrsqrt.f32 %v396_v6  ;;  %v366_v60 = vmul.f32 0.03125, %v298_v18  ;;  %v529_v34 = vadd.f32 %v1955_v38, %v491_v12 }
 0x143   :  { %v367_v61 = vmul.f32 0.03125, %v301_v2  ;;  %1430 = vrsqrt.f32 %v397_v27  ;;  %v558_v23 = vpack.c.bf16 %v528_v45, %v527_v19  ;;  %v492_v30 = vmul.f32 %v1947_v44, %v454_v56 }
 0x144   :  { %v1421_v5 = vpop.eup %1420  ;;  %v398_v32 = vadd.f32 1e-05, %v366_v60  ;;  %v493_v46 = vmul.f32 %v1947_v44, %v455_v22 }
 0x145   :  { %v399_v10 = vadd.f32 1e-05, %v367_v61  ;;  %v1423_v35 = vpop.eup %1422  ;;  %v456_v39 = vmul.f32 %v1421_v5, %v1777_v9  ;;  %v304_v42 = vpop.xlane.xlu1 %303  ;;  %1335 = vmatmul.mubr.msk.bf16.vlgmr.msra.gmra.mrb[0].mxu0 %vm63_vm0, %v558_v23  ;;  %1371 = vmatmul.mubr.msk.bf16.vlgmr.msra.gmra.mrb[0].mxu1 %vm63_vm0, %v558_v23  ;;  %v530_v48 = vadd.f32 %v1955_v38, %v492_v30 }
 0x146   :  { %v307_v55 = vpop.xlane.xlu0 %306  ;;  %v457_v36 = vmul.f32 %v1423_v35, %v1786_v7  ;;  %1432 = vrsqrt.f32 %v398_v32  ;;  %v368_v26 = vmul.f32 0.03125, %v304_v42  ;;  %v531_v41 = vadd.f32 %v1955_v38, %v493_v46 }
 0x147   :  { %v369_v50 = vmul.f32 0.03125, %v307_v55  ;;  %1434 = vrsqrt.f32 %v399_v10  ;;  %v559_v51 = vpack.c.bf16 %v530_v48, %v529_v34  ;;  %v494_v11 = vmul.f32 %v1947_v44, %v456_v39 }
 0x148   :  { %v1425_v9 = vpop.eup %1424  ;;  %v400_v54 = vadd.f32 1e-05, %v368_v26  ;;  %v495_v58 = vmul.f32 %v1947_v44, %v457_v36 }
 0x149   :  { %v401_v8 = vadd.f32 1e-05, %v369_v50  ;;  %v1427_v52 = vpop.eup %1426  ;;  %v458_v62 = vmul.f32 %v1425_v9, %v1789_v13  ;;  %v310_v40 = vpop.xlane.xlu1 %309  ;;  %1338 = vmatprep.mubr.msk.bf16.mxu0 %vm63_vm0, %v559_v51  ;;  %1374 = vmatprep.mubr.msk.bf16.mxu1 %vm63_vm0, %v559_v51  ;;  %v532_v63 = vadd.f32 %v1955_v38, %v494_v11 }
 0x14a   :  { %v313_v7 = vpop.xlane.xlu0 %312  ;;  %v459_v6 = vmul.f32 %v1427_v52, %v1798_v1  ;;  %1436 = vrsqrt.f32 %v400_v54  ;;  %v370_v27 = vmul.f32 0.03125, %v310_v40  ;;  %v533_v19 = vadd.f32 %v1955_v38, %v495_v58 }
 0x14b   :  { %v371_v12 = vmul.f32 0.03125, %v313_v7  ;;  %1438 = vrsqrt.f32 %v401_v8  ;;  %v560_v14 = vpack.c.bf16 %v532_v63, %v531_v41  ;;  %v496_v56 = vmul.f32 %v1947_v44, %v458_v62 }
 0x14c   :  { %v1429_v13 = vpop.eup %1428  ;;  %v402_v18 = vadd.f32 1e-05, %v370_v27  ;;  %v497_v23 = vmul.f32 %v1947_v44, %v459_v6 }
 0x14d   :  { %v403_v2 = vadd.f32 1e-05, %v371_v12  ;;  %v1431_v45 = vpop.eup %1430  ;;  %v460_v22 = vmul.f32 %v1429_v13, %v1801_v17  ;;  %v316_v60 = vpop.xlane.xlu1 %315  ;;  %1339 = vmatmul.mubr.msk.bf16.gmra.mrb[4].mxu0 %vm63_vm0, %v560_v14  ;;  %1375 = vmatmul.mubr.msk.bf16.gmra.mrb[4].mxu1 %vm63_vm0, %v560_v14  ;;  %v534_v61 = vadd.f32 %v1955_v38, %v496_v56 }
 0x14e   :  { %v319_v1 = vpop.xlane.xlu0 %318  ;;  %v461_v30 = vmul.f32 %v1431_v45, %v1810_v43  ;;  %1440 = vrsqrt.f32 %v402_v18  ;;  %v372_v5 = vmul.f32 0.03125, %v316_v60  ;;  %v535_v36 = vadd.f32 %v1955_v38, %v497_v23 }
 0x14f   :  { %v373_v32 = vmul.f32 0.03125, %v319_v1  ;;  %1442 = vrsqrt.f32 %v403_v2  ;;  %v561_v10 = vpack.c.bf16 %v534_v61, %v533_v19  ;;  %v498_v34 = vmul.f32 %v1947_v44, %v460_v22 }
 0x150   :  { %v1433_v17 = vpop.eup %1432  ;;  %v404_v35 = vadd.f32 1e-05, %v372_v5  ;;  %v499_v42 = vmul.f32 %v1947_v44, %v461_v30 }
 0x151   :  { %v405_v39 = vadd.f32 1e-05, %v373_v32  ;;  %v1435_v55 = vpop.eup %1434  ;;  %v462_v48 = vmul.f32 %v1433_v17, %v1813_v21  ;;  %v322_v46 = vpop.xlane.xlu1 %321  ;;  %1342 = vmatprep.mubr.msk.bf16.mxu0 %vm63_vm0, %v561_v10  ;;  %1378 = vmatprep.mubr.msk.bf16.mxu1 %vm63_vm0, %v561_v10  ;;  %v536_v26 = vadd.f32 %v1955_v38, %v498_v34 }
 0x152   :  { %v325_v43 = vpop.xlane.xlu0 %324  ;;  %v463_v50 = vmul.f32 %v1435_v55, %v1822_v59  ;;  %1444 = vrsqrt.f32 %v404_v35  ;;  %v374_v51 = vmul.f32 0.03125, %v322_v46  ;;  %v537_v52 = vadd.f32 %v1955_v38, %v499_v42 }
 0x153   :  { %v375_v11 = vmul.f32 0.03125, %v325_v43  ;;  %1446 = vrsqrt.f32 %v405_v39  ;;  %v562_v9 = vpack.c.bf16 %v536_v26, %v535_v36  ;;  %v500_v54 = vmul.f32 %v1947_v44, %v462_v48 }
 0x154   :  { %v1437_v21 = vpop.eup %1436  ;;  %v406_v8 = vadd.f32 1e-05, %v374_v51  ;;  %v501_v63 = vmul.f32 %v1947_v44, %v463_v50 }
 0x155   :  { %v407_v58 = vadd.f32 1e-05, %v375_v11  ;;  %v1439_v62 = vpop.eup %1438  ;;  %v464_v40 = vmul.f32 %v1437_v21, %v1825_v25  ;;  %v328_v7 = vpop.xlane.xlu1 %327  ;;  %1343 = vmatmul.mubr.msk.bf16.gmra.mrb[8].mxu0 %vm63_vm0, %v562_v9  ;;  %1379 = vmatmul.mubr.msk.bf16.gmra.mrb[8].mxu1 %vm63_vm0, %v562_v9  ;;  %v538_v41 = vadd.f32 %v1955_v38, %v500_v54 }
 0x156   :  { %v331_v59 = vpop.xlane.xlu0 %330  ;;  %v465_v6 = vmul.f32 %v1439_v62, %v1834_v15  ;;  %1448 = vrsqrt.f32 %v406_v8  ;;  %v376_v27 = vmul.f32 0.03125, %v328_v7  ;;  %v539_v60 = vadd.f32 %v1955_v38, %v501_v63 }
 0x157   :  { %v377_v12 = vmul.f32 0.03125, %v331_v59  ;;  %1450 = vrsqrt.f32 %v407_v58  ;;  %v563_v14 = vpack.c.bf16 %v538_v41, %v537_v52  ;;  %v502_v56 = vmul.f32 %v1947_v44, %v464_v40 }
 0x158   :  { %v1441_v25 = vpop.eup %1440  ;;  %v408_v13 = vadd.f32 1e-05, %v376_v27  ;;  %v503_v2 = vmul.f32 %v1947_v44, %v465_v6 }
 0x159   :  { %v409_v18 = vadd.f32 1e-05, %v377_v12  ;;  %v1443_v19 = vpop.eup %1442  ;;  %v466_v45 = vmul.f32 %v1441_v25, %v1837_v29  ;;  %v334_v22 = vpop.xlane.xlu1 %333  ;;  %1346 = vmatprep.mubr.msk.bf16.mxu0 %vm63_vm0, %v563_v14  ;;  %1382 = vmatprep.mubr.msk.bf16.mxu1 %vm63_vm0, %v563_v14  ;;  %v540_v1 = vadd.f32 %v1955_v38, %v502_v56 }
 0x15a   :  { %v337_v15 = vpop.xlane.xlu0 %336  ;;  %v467_v61 = vmul.f32 %v1443_v19, %v1846_v31  ;;  %1452 = vrsqrt.f32 %v408_v13  ;;  %v378_v23 = vmul.f32 0.03125, %v334_v22  ;;  %v541_v17 = vadd.f32 %v1955_v38, %v503_v2 }
 0x15b   :  { %v379_v30 = vmul.f32 0.03125, %v337_v15  ;;  %1454 = vrsqrt.f32 %v409_v18  ;;  %v564_v5 = vpack.c.bf16 %v540_v1, %v539_v60  ;;  %v504_v32 = vmul.f32 %v1947_v44, %v466_v45 }
 0x15c   :  { %v1445_v29 = vpop.eup %1444  ;;  %v410_v10 = vadd.f32 1e-05, %v378_v23  ;;  %v505_v48 = vmul.f32 %v1947_v44, %v467_v61 }
 0x15d   :  { %v411_v34 = vadd.f32 1e-05, %v379_v30  ;;  %v1447_v35 = vpop.eup %1446  ;;  %v468_v39 = vmul.f32 %v1445_v29, %v1849_v33  ;;  %v340_v42 = vpop.xlane.xlu1 %339  ;;  %1347 = vmatmul.mubr.msk.bf16.gmra.mrb[12].mxu0 %vm63_vm0, %v564_v5  ;;  %1383 = vmatmul.mubr.msk.bf16.gmra.mrb[12].mxu1 %vm63_vm0, %v564_v5  ;;  %v542_v55 = vadd.f32 %v1955_v38, %v504_v32 }
 0x15e   :  { %v343_v31 = vpop.xlane.xlu0 %342  ;;  %v469_v46 = vmul.f32 %v1447_v35, %v1858_v47  ;;  %1456 = vrsqrt.f32 %v410_v10  ;;  %v380_v43 = vmul.f32 0.03125, %v340_v42  ;;  %v543_v58 = vadd.f32 %v1955_v38, %v505_v48 }
 0x15f   :  { %v381_v36 = vmul.f32 0.03125, %v343_v31  ;;  %1458 = vrsqrt.f32 %v411_v34  ;;  %v565_v26 = vpack.c.bf16 %v542_v55, %v541_v17  ;;  %v506_v50 = vmul.f32 %v1947_v44, %v468_v39 }
 0x160   :  { %v1449_v33 = vpop.eup %1448  ;;  %v412_v51 = vadd.f32 1e-05, %v380_v43  ;;  %v507_v9 = vmul.f32 %v1947_v44, %v469_v46 }
 0x161   :  { %v413_v11 = vadd.f32 1e-05, %v381_v36  ;;  %v1451_v54 = vpop.eup %1450  ;;  %v470_v21 = vmul.f32 %v1449_v33, %v1861_v37  ;;  %v346_v8 = vpop.xlane.xlu1 %345  ;;  %1350 = vmatprep.mubr.msk.bf16.mxu0 %vm63_vm0, %v565_v26  ;;  %1386 = vmatprep.mubr.msk.bf16.mxu1 %vm63_vm0, %v565_v26  ;;  %v544_v52 = vadd.f32 %v1955_v38, %v506_v50 }
 0x162   :  { %v349_v47 = vpop.xlane.xlu0 %348  ;;  %v471_v62 = vmul.f32 %v1451_v54, %v1876_v3  ;;  %1460 = vrsqrt.f32 %v412_v51  ;;  %v382_v40 = vmul.f32 0.03125, %v346_v8  ;;  %v545_v27 = vadd.f32 %v1955_v38, %v507_v9  ;;  %v2084_v54 = vld [vmem:[%s2416_s4] ss:$0 sm:$0xff] }
 0x163   :  { %v383_v7 = vmul.f32 0.03125, %v349_v47  ;;  %1462 = vrsqrt.f32 %v413_v11  ;;  %v566_v59 = vpack.c.bf16 %v544_v52, %v543_v58  ;;  %v508_v41 = vmul.f32 %v1947_v44, %v470_v21 }
 0x164   :  { %v1453_v37 = vpop.eup %1452  ;;  %v414_v63 = vadd.f32 1e-05, %v382_v40  ;;  %v509_v25 = vmul.f32 %v1947_v44, %v471_v62 }
 0x165   :  { %v415_v6 = vadd.f32 1e-05, %v383_v7  ;;  %v1455_v12 = vpop.eup %1454  ;;  %v472_v14 = vmul.f32 %v1453_v37, %v1879_v4  ;;  %v352_v56 = vpop.xlane.xlu1 %351  ;;  %1351 = vmatmul.mubr.msk.bf16.gmra.mrb[16].mxu0 %vm63_vm0, %v566_v59  ;;  %1387 = vmatmul.mubr.msk.bf16.gmra.mrb[16].mxu1 %vm63_vm0, %v566_v59  ;;  %v546_v3 = vadd.f32 %v1955_v38, %v508_v41 }
 0x166   :  { %v473_v13 = vmul.f32 %v1455_v12, %v1894_v0  ;;  %1464 = vrsqrt.f32 %v414_v63  ;;  %v384_v18 = vmul.f32 0.03125, %v352_v56  ;;  %v547_v1 = vadd.f32 %v1955_v38, %v509_v25 }
 0x167   :  { %1466 = vrsqrt.f32 %v415_v6  ;;  %v567_v2 = vpack.c.bf16 %v546_v3, %v545_v27  ;;  %v510_v19 = vmul.f32 %v1947_v44, %v472_v14 }
 0x168   :  { %v1457_v45 = vpop.eup %1456  ;;  %v416_v22 = vadd.f32 1e-05, %v384_v18  ;;  %v511_v4 = vmul.f32 %v1947_v44, %v473_v13 }
 0x169   :  { %v1459_v15 = vpop.eup %1458  ;;  %v474_v60 = vmul.f32 %v1457_v45, %v1897_v16  ;;  %1354 = vmatprep.mubr.msk.bf16.mxu0 %vm63_vm0, %v567_v2  ;;  %1390 = vmatprep.mubr.msk.bf16.mxu1 %vm63_vm0, %v567_v2  ;;  %v548_v0 = vadd.f32 %v1955_v38, %v510_v19 }
 0x16a   :  { %v475_v61 = vmul.f32 %v1459_v15, %v1906_v49  ;;  %1468 = vrsqrt.f32 %v416_v22  ;;  %v549_v32 = vadd.f32 %v1955_v38, %v511_v4 }
 0x16b   :  { %v568_v23 = vpack.c.bf16 %v548_v0, %v547_v1  ;;  %v512_v30 = vmul.f32 %v1947_v44, %v474_v60 }
 0x16c   :  { %v1461_v5 = vpop.eup %1460  ;;  %v513_v34 = vmul.f32 %v1947_v44, %v475_v61 }
 0x16d   :  { %v1463_v29 = vpop.eup %1462  ;;  %v476_v16 = vmul.f32 %v1461_v5, %v1909_v20  ;;  %1355 = vmatmul.mubr.msk.bf16.gmra.mrb[20].mxu0 %vm63_vm0, %v568_v23  ;;  %1391 = vmatmul.mubr.msk.bf16.gmra.mrb[20].mxu1 %vm63_vm0, %v568_v23  ;;  %v550_v10 = vadd.f32 %v1955_v38, %v512_v30 }
 0x16e   :  { %v477_v49 = vmul.f32 %v1463_v29, %v1918_v24  ;;  %v551_v20 = vadd.f32 %v1955_v38, %v513_v34 }
 0x16f   :  { %v569_v17 = vpack.c.bf16 %v550_v10, %v549_v32  ;;  %v514_v35 = vmul.f32 %v1947_v44, %v476_v16 }
 0x170   :  { %v1465_v39 = vpop.eup %1464  ;;  %v515_v42 = vmul.f32 %v1947_v44, %v477_v49 }
 0x171   :  { %v1467_v31 = vpop.eup %1466  ;;  %v478_v55 = vmul.f32 %v1465_v39, %v1921_v53  ;;  %1358 = vmatprep.mubr.msk.bf16.mxu0 %vm63_vm0, %v569_v17  ;;  %1394 = vmatprep.mubr.msk.bf16.mxu1 %vm63_vm0, %v569_v17  ;;  %v552_v48 = vadd.f32 %v1955_v38, %v514_v35 }
 0x172   :  { %v479_v46 = vmul.f32 %v1467_v31, %v1930_v28  ;;  %v553_v26 = vadd.f32 %v1955_v38, %v515_v42 }
 0x173   :  { %v570_v24 = vpack.c.bf16 %v552_v48, %v551_v20  ;;  %v516_v43 = vmul.f32 %v1947_v44, %v478_v55 }
 0x174   :  { %v1469_v36 = vpop.eup %1468  ;;  %v517_v33 = vmul.f32 %v1947_v44, %v479_v46 }
 0x175   :  { %v480_v50 = vmul.f32 %v1469_v36, %v1933_v57  ;;  %1359 = vmatmul.mubr.msk.bf16.gmra.mrb[24].mxu0 %vm63_vm0, %v570_v24  ;;  %1395 = vmatmul.mubr.msk.bf16.gmra.mrb[24].mxu1 %vm63_vm0, %v570_v24  ;;  %v554_v53 = vadd.f32 %v1955_v38, %v516_v43 }
 0x176   :  { %v555_v28 = vadd.f32 %v1955_v38, %v517_v33 }
 0x177   :  { %v571_v51 = vpack.c.bf16 %v554_v53, %v553_v26  ;;  %v518_v11 = vmul.f32 %v1947_v44, %v480_v50  ;;  %v2089_v44 = vld [vmem:[%s2417_s6] ss:$0 sm:$0xff] }
 0x179   :  { %1362 = vmatprep.mubr.msk.bf16.mxu0 %vm63_vm0, %v571_v51  ;;  %1398 = vmatprep.mubr.msk.bf16.mxu1 %vm63_vm0, %v571_v51  ;;  %v556_v9 = vadd.f32 %v1955_v38, %v518_v11 }
 0x17b   :  { %v572_v57 = vpack.c.bf16 %v556_v9, %v555_v28 }
 0x17d   :  { %1363 = vmatmul.mubr.msk.bf16.gmra.mrb[28].mxu0 %vm63_vm0, %v572_v57  ;;  %1399 = vmatmul.mubr.msk.bf16.gmra.mrb[28].mxu1 %vm63_vm0, %v572_v57 }
 0x218   :  { %v1336_v21 = vpop.f32.mrb[0].mxu0  ;;  %v1372_v8 = vpop.f32.mrb[0].mxu1 }
 0x219   :  { %v687_v47 = vadd.f32 %v1336_v21, %v2084_v54  ;;  %v871_v38 = vadd.f32 %v1372_v8, %v2089_v44  ;;  %v678_v58 = vpop.f32.mrb[1].mxu0  ;;  %v862_v52 = vpop.f32.mrb[1].mxu1 }
 0x21a   :  { %v679_v62 = vadd.f32 %v2084_v54, %v678_v58  ;;  %v863_v40 = vadd.f32 %v2089_v44, %v862_v52  ;;  %v1337_v7 = vpop.f32.mrb[2].mxu0  ;;  %v1373_v59 = vpop.f32.mrb[2].mxu1 }
 0x21b   :  { %v1264_v41 = vpack.c.bf16 %v687_v47, %v687_v47  ;;  %1152 = vst.msk [vmem:[%s2418_s8 + $0x10] sm:$0xff] %vm63_vm0, %v871_v38  ;;  %v690_v37 = vadd.f32 %v1337_v7, %v2084_v54  ;;  %v874_v63 = vadd.f32 %v1373_v59, %v2089_v44  ;;  %v681_v6 = vpop.f32.mrb[3].mxu0  ;;  %v865_v27 = vpop.f32.mrb[3].mxu1 }
 0x21c   :  { %v1262_v12 = vpack.c.bf16 %v679_v62, %v679_v62  ;;  %1150 = vst.msk [vmem:[%s2418_s8] sm:$0xff] %vm63_vm0, %v863_v40  ;;  %v682_v14 = vadd.f32 %v2084_v54, %v681_v6  ;;  %v866_v56 = vadd.f32 %v2089_v44, %v865_v27 }
 0x21d   :  { %1120 = vst.msk [vmem:[%s2419_s7 + $0x8] sm:$0xf] %vm1117_vm1, %v1264_v41  ;;  %v1265_v3 = vpack.c.bf16 %v690_v37, %v690_v37 }
 0x21e   :  { %1153 = vst.msk [vmem:[%s2418_s8 + $0x18] sm:$0xff] %vm63_vm0, %v874_v63  ;;  %v1263_v25 = vpack.c.bf16 %v682_v14, %v682_v14  ;;  %1151 = vst.msk [vmem:[%s2418_s8 + $0x8] sm:$0xff] %vm63_vm0, %v866_v56 }
 0x21f   :  { %1118 = vst.msk [vmem:[%s2419_s7] sm:$0xf] %vm1117_vm1, %v1262_v12  ;;  %1121 = vst.msk [vmem:[%s2419_s7 + $0xc] sm:$0xf] %vm1117_vm1, %v1265_v3 }
 0x220   :  { %1119 = vst.msk [vmem:[%s2419_s7 + $0x4] sm:$0xf] %vm1117_vm1, %v1263_v25  ;;  %v1340_v13 = vpop.f32.mrb[4].mxu0  ;;  %v1376_v18 = vpop.f32.mrb[4].mxu1 }
 0x221   :  { %v703_v2 = vadd.f32 %v1340_v13, %v2084_v54  ;;  %v887_v19 = vadd.f32 %v1376_v18, %v2089_v44  ;;  %v694_v45 = vpop.f32.mrb[5].mxu0  ;;  %v878_v22 = vpop.f32.mrb[5].mxu1 }
 0x222   :  { %v695_v4 = vadd.f32 %v2084_v54, %v694_v45  ;;  %v879_v15 = vadd.f32 %v2089_v44, %v878_v22  ;;  %v1341_v60 = vpop.f32.mrb[6].mxu0  ;;  %v1377_v1 = vpop.f32.mrb[6].mxu1 }
 0x223   :  { %v1268_v0 = vpack.c.bf16 %v703_v2, %v703_v2  ;;  %1156 = vst.msk [vmem:[%s2418_s8 + $0x30] sm:$0xff] %vm63_vm0, %v887_v19  ;;  %v706_v61 = vadd.f32 %v1341_v60, %v2084_v54  ;;  %v890_v23 = vadd.f32 %v1377_v1, %v2089_v44  ;;  %v697_v30 = vpop.f32.mrb[7].mxu0  ;;  %v881_v5 = vpop.f32.mrb[7].mxu1 }
 0x224   :  { %v1266_v32 = vpack.c.bf16 %v695_v4, %v695_v4  ;;  %1154 = vst.msk [vmem:[%s2418_s8 + $0x20] sm:$0xff] %vm63_vm0, %v879_v15  ;;  %v698_v29 = vadd.f32 %v2084_v54, %v697_v30  ;;  %v882_v16 = vadd.f32 %v2089_v44, %v881_v5 }
 0x225   :  { %1124 = vst.msk [vmem:[%s2419_s7 + $0x18] sm:$0xf] %vm1117_vm1, %v1268_v0  ;;  %v1269_v10 = vpack.c.bf16 %v706_v61, %v706_v61 }
 0x226   :  { %1157 = vst.msk [vmem:[%s2418_s8 + $0x38] sm:$0xff] %vm63_vm0, %v890_v23  ;;  %v1267_v34 = vpack.c.bf16 %v698_v29, %v698_v29  ;;  %1155 = vst.msk [vmem:[%s2418_s8 + $0x28] sm:$0xff] %vm63_vm0, %v882_v16 }
 0x227   :  { %1122 = vst.msk [vmem:[%s2419_s7 + $0x10] sm:$0xf] %vm1117_vm1, %v1266_v32  ;;  %1125 = vst.msk [vmem:[%s2419_s7 + $0x1c] sm:$0xf] %vm1117_vm1, %v1269_v10 }
 0x228   :  { %1123 = vst.msk [vmem:[%s2419_s7 + $0x14] sm:$0xf] %vm1117_vm1, %v1267_v34  ;;  %v1344_v49 = vpop.f32.mrb[8].mxu0  ;;  %v1380_v17 = vpop.f32.mrb[8].mxu1 }
 0x229   :  { %v719_v35 = vadd.f32 %v1344_v49, %v2084_v54  ;;  %v903_v39 = vadd.f32 %v1380_v17, %v2089_v44  ;;  %v710_v42 = vpop.f32.mrb[9].mxu0  ;;  %v894_v31 = vpop.f32.mrb[9].mxu1 }
 0x22a   :  { %v711_v55 = vadd.f32 %v2084_v54, %v710_v42  ;;  %v895_v20 = vadd.f32 %v2089_v44, %v894_v31  ;;  %v1345_v48 = vpop.f32.mrb[10].mxu0  ;;  %v1381_v46 = vpop.f32.mrb[10].mxu1 }
 0x22b   :  { %v1272_v24 = vpack.c.bf16 %v719_v35, %v719_v35  ;;  %1160 = vst.msk [vmem:[%s2418_s8 + $0x50] sm:$0xff] %vm63_vm0, %v903_v39  ;;  %v722_v43 = vadd.f32 %v1345_v48, %v2084_v54  ;;  %v906_v36 = vadd.f32 %v1381_v46, %v2089_v44  ;;  %v713_v26 = vpop.f32.mrb[11].mxu0  ;;  %v897_v50 = vpop.f32.mrb[11].mxu1 }
 0x22c   :  { %v1270_v53 = vpack.c.bf16 %v711_v55, %v711_v55  ;;  %1158 = vst.msk [vmem:[%s2418_s8 + $0x40] sm:$0xff] %vm63_vm0, %v895_v20  ;;  %v714_v33 = vadd.f32 %v2084_v54, %v713_v26  ;;  %v898_v51 = vadd.f32 %v2089_v44, %v897_v50 }
 0x22d   :  { %1128 = vst.msk [vmem:[%s2419_s7 + $0x28] sm:$0xf] %vm1117_vm1, %v1272_v24  ;;  %v1273_v11 = vpack.c.bf16 %v722_v43, %v722_v43 }
 0x22e   :  { %1161 = vst.msk [vmem:[%s2418_s8 + $0x58] sm:$0xff] %vm63_vm0, %v906_v36  ;;  %v1271_v28 = vpack.c.bf16 %v714_v33, %v714_v33  ;;  %1159 = vst.msk [vmem:[%s2418_s8 + $0x48] sm:$0xff] %vm63_vm0, %v898_v51 }
 0x22f   :  { %1126 = vst.msk [vmem:[%s2419_s7 + $0x20] sm:$0xf] %vm1117_vm1, %v1270_v53  ;;  %1129 = vst.msk [vmem:[%s2419_s7 + $0x2c] sm:$0xf] %vm1117_vm1, %v1273_v11 }
 0x230   :  { %1127 = vst.msk [vmem:[%s2419_s7 + $0x24] sm:$0xf] %vm1117_vm1, %v1271_v28  ;;  %v1348_v9 = vpop.f32.mrb[12].mxu0  ;;  %v1384_v57 = vpop.f32.mrb[12].mxu1 }
 0x231   :  { %v735_v21 = vadd.f32 %v1348_v9, %v2084_v54  ;;  %v919_v8 = vadd.f32 %v1384_v57, %v2089_v44  ;;  %v726_v47 = vpop.f32.mrb[13].mxu0  ;;  %v910_v38 = vpop.f32.mrb[13].mxu1 }
 0x232   :  { %v727_v58 = vadd.f32 %v2084_v54, %v726_v47  ;;  %v911_v52 = vadd.f32 %v2089_v44, %v910_v38  ;;  %v1349_v62 = vpop.f32.mrb[14].mxu0  ;;  %v1385_v40 = vpop.f32.mrb[14].mxu1 }
 0x233   :  { %v1276_v7 = vpack.c.bf16 %v735_v21, %v735_v21  ;;  %1164 = vst.msk [vmem:[%s2418_s8 + $0x70] sm:$0xff] %vm63_vm0, %v919_v8  ;;  %v738_v59 = vadd.f32 %v1349_v62, %v2084_v54  ;;  %v922_v41 = vadd.f32 %v1385_v40, %v2089_v44  ;;  %v729_v37 = vpop.f32.mrb[15].mxu0  ;;  %v913_v63 = vpop.f32.mrb[15].mxu1 }
 0x234   :  { %v1274_v6 = vpack.c.bf16 %v727_v58, %v727_v58  ;;  %1162 = vst.msk [vmem:[%s2418_s8 + $0x60] sm:$0xff] %vm63_vm0, %v911_v52  ;;  %v730_v27 = vadd.f32 %v2084_v54, %v729_v37  ;;  %v914_v12 = vadd.f32 %v2089_v44, %v913_v63 }
 0x235   :  { %1132 = vst.msk [vmem:[%s2419_s7 + $0x38] sm:$0xf] %vm1117_vm1, %v1276_v7  ;;  %v1277_v14 = vpack.c.bf16 %v738_v59, %v738_v59 }
 0x236   :  { %1165 = vst.msk [vmem:[%s2418_s8 + $0x78] sm:$0xff] %vm63_vm0, %v922_v41  ;;  %v1275_v56 = vpack.c.bf16 %v730_v27, %v730_v27  ;;  %1163 = vst.msk [vmem:[%s2418_s8 + $0x68] sm:$0xff] %vm63_vm0, %v914_v12 }
 0x237   :  { %1130 = vst.msk [vmem:[%s2419_s7 + $0x30] sm:$0xf] %vm1117_vm1, %v1274_v6  ;;  %1133 = vst.msk [vmem:[%s2419_s7 + $0x3c] sm:$0xf] %vm1117_vm1, %v1277_v14 }
 0x238   :  { %1131 = vst.msk [vmem:[%s2419_s7 + $0x34] sm:$0xf] %vm1117_vm1, %v1275_v56  ;;  %v1352_v3 = vpop.f32.mrb[16].mxu0  ;;  %v1388_v25 = vpop.f32.mrb[16].mxu1 }
 0x239   :  { %v751_v13 = vadd.f32 %v1352_v3, %v2084_v54  ;;  %v935_v18 = vadd.f32 %v1388_v25, %v2089_v44  ;;  %v742_v2 = vpop.f32.mrb[17].mxu0  ;;  %v926_v19 = vpop.f32.mrb[17].mxu1 }
 0x23a   :  { %v743_v45 = vadd.f32 %v2084_v54, %v742_v2  ;;  %v927_v22 = vadd.f32 %v2089_v44, %v926_v19  ;;  %v1353_v4 = vpop.f32.mrb[18].mxu0  ;;  %v1389_v15 = vpop.f32.mrb[18].mxu1 }
 0x23b   :  { %v1280_v60 = vpack.c.bf16 %v751_v13, %v751_v13  ;;  %1168 = vst.msk [vmem:[%s2418_s8 + $0x90] sm:$0xff] %vm63_vm0, %v935_v18  ;;  %v754_v1 = vadd.f32 %v1353_v4, %v2084_v54  ;;  %v938_v0 = vadd.f32 %v1389_v15, %v2089_v44  ;;  %v745_v61 = vpop.f32.mrb[19].mxu0  ;;  %v929_v23 = vpop.f32.mrb[19].mxu1 }
 0x23c   :  { %v1278_v30 = vpack.c.bf16 %v743_v45, %v743_v45  ;;  %1166 = vst.msk [vmem:[%s2418_s8 + $0x80] sm:$0xff] %vm63_vm0, %v927_v22  ;;  %v746_v5 = vadd.f32 %v2084_v54, %v745_v61  ;;  %v930_v32 = vadd.f32 %v2089_v44, %v929_v23 }
 0x23d   :  { %1136 = vst.msk [vmem:[%s2419_s7 + $0x48] sm:$0xf] %vm1117_vm1, %v1280_v60  ;;  %v1281_v29 = vpack.c.bf16 %v754_v1, %v754_v1 }
 0x23e   :  { %1169 = vst.msk [vmem:[%s2418_s8 + $0x98] sm:$0xff] %vm63_vm0, %v938_v0  ;;  %v1279_v16 = vpack.c.bf16 %v746_v5, %v746_v5  ;;  %1167 = vst.msk [vmem:[%s2418_s8 + $0x88] sm:$0xff] %vm63_vm0, %v930_v32 }
 0x23f   :  { %1134 = vst.msk [vmem:[%s2419_s7 + $0x40] sm:$0xf] %vm1117_vm1, %v1278_v30  ;;  %1137 = vst.msk [vmem:[%s2419_s7 + $0x4c] sm:$0xf] %vm1117_vm1, %v1281_v29 }
 0x240   :  { %1135 = vst.msk [vmem:[%s2419_s7 + $0x44] sm:$0xf] %vm1117_vm1, %v1279_v16  ;;  %v1356_v10 = vpop.f32.mrb[20].mxu0  ;;  %v1392_v34 = vpop.f32.mrb[20].mxu1 }
 0x241   :  { %v767_v49 = vadd.f32 %v1356_v10, %v2084_v54  ;;  %v951_v17 = vadd.f32 %v1392_v34, %v2089_v44  ;;  %v758_v35 = vpop.f32.mrb[21].mxu0  ;;  %v942_v39 = vpop.f32.mrb[21].mxu1 }
 0x242   :  { %v759_v42 = vadd.f32 %v2084_v54, %v758_v35  ;;  %v943_v31 = vadd.f32 %v2089_v44, %v942_v39  ;;  %v1357_v55 = vpop.f32.mrb[22].mxu0  ;;  %v1393_v20 = vpop.f32.mrb[22].mxu1 }
 0x243   :  { %v1284_v48 = vpack.c.bf16 %v767_v49, %v767_v49  ;;  %1172 = vst.msk [vmem:[%s2418_s8 + $0xb0] sm:$0xff] %vm63_vm0, %v951_v17  ;;  %v770_v46 = vadd.f32 %v1357_v55, %v2084_v54  ;;  %v954_v24 = vadd.f32 %v1393_v20, %v2089_v44  ;;  %v761_v43 = vpop.f32.mrb[23].mxu0  ;;  %v945_v36 = vpop.f32.mrb[23].mxu1 }
 0x244   :  { %v1282_v26 = vpack.c.bf16 %v759_v42, %v759_v42  ;;  %1170 = vst.msk [vmem:[%s2418_s8 + $0xa0] sm:$0xff] %vm63_vm0, %v943_v31  ;;  %v762_v50 = vadd.f32 %v2084_v54, %v761_v43  ;;  %v946_v53 = vadd.f32 %v2089_v44, %v945_v36 }
 0x245   :  { %1140 = vst.msk [vmem:[%s2419_s7 + $0x58] sm:$0xf] %vm1117_vm1, %v1284_v48  ;;  %v1285_v33 = vpack.c.bf16 %v770_v46, %v770_v46 }
 0x246   :  { %1173 = vst.msk [vmem:[%s2418_s8 + $0xb8] sm:$0xff] %vm63_vm0, %v954_v24  ;;  %v1283_v51 = vpack.c.bf16 %v762_v50, %v762_v50  ;;  %1171 = vst.msk [vmem:[%s2418_s8 + $0xa8] sm:$0xff] %vm63_vm0, %v946_v53 }
 0x247   :  { %1138 = vst.msk [vmem:[%s2419_s7 + $0x50] sm:$0xf] %vm1117_vm1, %v1282_v26  ;;  %1141 = vst.msk [vmem:[%s2419_s7 + $0x5c] sm:$0xf] %vm1117_vm1, %v1285_v33 }
 0x248   :  { %1139 = vst.msk [vmem:[%s2419_s7 + $0x54] sm:$0xf] %vm1117_vm1, %v1283_v51  ;;  %v1360_v11 = vpop.f32.mrb[24].mxu0  ;;  %v1396_v28 = vpop.f32.mrb[24].mxu1 }
 0x249   :  { %v783_v9 = vadd.f32 %v1360_v11, %v2084_v54  ;;  %v967_v57 = vadd.f32 %v1396_v28, %v2089_v44  ;;  %v774_v21 = vpop.f32.mrb[25].mxu0  ;;  %v958_v8 = vpop.f32.mrb[25].mxu1 }
 0x24a   :  { %v775_v47 = vadd.f32 %v2084_v54, %v774_v21  ;;  %v959_v38 = vadd.f32 %v2089_v44, %v958_v8  ;;  %v1361_v58 = vpop.f32.mrb[26].mxu0  ;;  %v1397_v52 = vpop.f32.mrb[26].mxu1 }
 0x24b   :  { %v1288_v62 = vpack.c.bf16 %v783_v9, %v783_v9  ;;  %1176 = vst.msk [vmem:[%s2418_s8 + $0xd0] sm:$0xff] %vm63_vm0, %v967_v57  ;;  %v786_v40 = vadd.f32 %v1361_v58, %v2084_v54  ;;  %v970_v7 = vadd.f32 %v1397_v52, %v2089_v44  ;;  %v777_v59 = vpop.f32.mrb[27].mxu0  ;;  %v961_v41 = vpop.f32.mrb[27].mxu1 }
 0x24c   :  { %v1286_v37 = vpack.c.bf16 %v775_v47, %v775_v47  ;;  %1174 = vst.msk [vmem:[%s2418_s8 + $0xc0] sm:$0xff] %vm63_vm0, %v959_v38  ;;  %v778_v63 = vadd.f32 %v2084_v54, %v777_v59  ;;  %v962_v6 = vadd.f32 %v2089_v44, %v961_v41 }
 0x24d   :  { %1144 = vst.msk [vmem:[%s2419_s7 + $0x68] sm:$0xf] %vm1117_vm1, %v1288_v62  ;;  %v1289_v27 = vpack.c.bf16 %v786_v40, %v786_v40 }
 0x24e   :  { %1177 = vst.msk [vmem:[%s2418_s8 + $0xd8] sm:$0xff] %vm63_vm0, %v970_v7  ;;  %v1287_v12 = vpack.c.bf16 %v778_v63, %v778_v63  ;;  %1175 = vst.msk [vmem:[%s2418_s8 + $0xc8] sm:$0xff] %vm63_vm0, %v962_v6 }
 0x24f   :  { %1142 = vst.msk [vmem:[%s2419_s7 + $0x60] sm:$0xf] %vm1117_vm1, %v1286_v37  ;;  %1145 = vst.msk [vmem:[%s2419_s7 + $0x6c] sm:$0xf] %vm1117_vm1, %v1289_v27 }
 0x250   :  { %1143 = vst.msk [vmem:[%s2419_s7 + $0x64] sm:$0xf] %vm1117_vm1, %v1287_v12  ;;  %v1364_v14 = vpop.f32.mrb[28].mxu0  ;;  %v1400_v56 = vpop.f32.mrb[28].mxu1 }
 0x251   :  { %v799_v3 = vadd.f32 %v1364_v14, %v2084_v54  ;;  %v983_v25 = vadd.f32 %v1400_v56, %v2089_v44  ;;  %v790_v13 = vpop.f32.mrb[29].mxu0  ;;  %v974_v18 = vpop.f32.mrb[29].mxu1 }
 0x252   :  { %v791_v2 = vadd.f32 %v2084_v54, %v790_v13  ;;  %v975_v19 = vadd.f32 %v2089_v44, %v974_v18  ;;  %v1365_v45 = vpop.f32.mrb[30].mxu0  ;;  %v1401_v22 = vpop.f32.mrb[30].mxu1 }
 0x253   :  { %v1292_v4 = vpack.c.bf16 %v799_v3, %v799_v3  ;;  %1180 = vst.msk [vmem:[%s2418_s8 + $0xf0] sm:$0xff] %vm63_vm0, %v983_v25  ;;  %v802_v15 = vadd.f32 %v1365_v45, %v2084_v54  ;;  %v986_v60 = vadd.f32 %v1401_v22, %v2089_v44  ;;  %v793_v1 = vpop.f32.mrb[31].mxu0  ;;  %v977_v0 = vpop.f32.mrb[31].mxu1 }
 0x254   :  { %v1290_v61 = vpack.c.bf16 %v791_v2, %v791_v2  ;;  %1178 = vst.msk [vmem:[%s2418_s8 + $0xe0] sm:$0xff] %vm63_vm0, %v975_v19  ;;  %v794_v23 = vadd.f32 %v2084_v54, %v793_v1  ;;  %v978_v30 = vadd.f32 %v2089_v44, %v977_v0 }
 0x255   :  { %1148 = vst.msk [vmem:[%s2419_s7 + $0x78] sm:$0xf] %vm1117_vm1, %v1292_v4  ;;  %v1293_v5 = vpack.c.bf16 %v802_v15, %v802_v15 }
 0x256   :  { %1181 = vst.msk [vmem:[%s2418_s8 + $0xf8] sm:$0xff] %vm63_vm0, %v986_v60  ;;  %v1291_v32 = vpack.c.bf16 %v794_v23, %v794_v23  ;;  %1179 = vst.msk [vmem:[%s2418_s8 + $0xe8] sm:$0xff] %vm63_vm0, %v978_v30 }
 0x257   :  { %1146 = vst.msk [vmem:[%s2419_s7 + $0x70] sm:$0xf] %vm1117_vm1, %v1290_v61  ;;  %1149 = vst.msk [vmem:[%s2419_s7 + $0x7c] sm:$0xf] %vm1117_vm1, %v1293_v5 }
 0x258   :  { %1147 = vst.msk [vmem:[%s2419_s7 + $0x74] sm:$0xf] %vm1117_vm1, %v1291_v32 }

// kernel: graph_transformer_mapper_block.5
= control target key start
LH: loop header
LB: loop body
LE: loop exit
PB: predicated region body
PF: predicated region fallthrough
CT: control target
= control target key end

     0   :  { %vm63_vm0 = vcmask 261120   ;;  %vm1117_vm1 = vcmask 257024   ;;  %s2603_s0 = inlined_call_operand.vmem [shape: f32[256,32], index: 0, kind: input, shape index: {}]   ;;  %s2604_s3 = inlined_call_operand.vmem [shape: bf16[32,32], index: 3, kind: input, shape index: {}]   ;;  %s2605_s5 = inlined_call_operand.vmem [shape: bf16[32,32], index: 5, kind: input, shape index: {}]   ;;  %s2606_s1 = inlined_call_operand.vmem [shape: f32[1,32], index: 1, kind: input, shape index: {}]   ;;  %s2607_s2 = inlined_call_operand.vmem [shape: f32[1,32], index: 2, kind: input, shape index: {}]   ;;  %s2608_s4 = inlined_call_operand.vmem [shape: f32[1,32], index: 4, kind: input, shape index: {}]   ;;  %s2609_s6 = inlined_call_operand.vmem [shape: f32[1,32], index: 6, kind: input, shape index: {}]   ;;  %s2610_s7 = inlined_call_operand.vmem [shape: bf16[256,32], index: 7, kind: output, shape index: {0}]   ;;  %s2611_s8 = inlined_call_operand.vmem [shape: bf16[256,32], index: 8, kind: output, shape index: {1}]  }
   0x1   :  { %v1710_v0 = vld [vmem:[%s2603_s0] sm:$0xff]  ;;  %v1715_v1 = vld [vmem:[%s2603_s0 + $0x10] sm:$0xff]  ;;  %v1720_v2 = vld [vmem:[%s2603_s0 + $0x8] sm:$0xff] }
   0x2   :  { %v64_v3 = vsel %vm63_vm0, %v1710_v0, 0.0  ;;  %v70_v4 = vsel %vm63_vm0, %v1715_v1, 0.0  ;;  %v1729_v5 = vld [vmem:[%s2603_s0 + $0x18] sm:$0xff]  ;;  %v67_v6 = vsel %vm63_vm0, %v1720_v2, 0.0  ;;  %v1738_v8 = vld [vmem:[%s2603_s0 + $0x20] sm:$0xff]  ;;  %v1743_v9 = vld [vmem:[%s2603_s0 + $0x28] sm:$0xff] }
   0x3   :  { %65 = vadd.xlane.f32.xlu0 %v64_v3  ;;  %71 = vadd.xlane.f32.xlu1 %v70_v4  ;;  %v73_v7 = vsel %vm63_vm0, %v1729_v5, 0.0  ;;  %v76_v10 = vsel %vm63_vm0, %v1738_v8, 0.0  ;;  %v79_v11 = vsel %vm63_vm0, %v1743_v9, 0.0  ;;  %v1752_v12 = vld [vmem:[%s2603_s0 + $0x30] sm:$0xff]  ;;  %v1757_v13 = vld [vmem:[%s2603_s0 + $0x38] sm:$0xff]  ;;  %v1766_v16 = vld [vmem:[%s2603_s0 + $0x40] sm:$0xff] }
   0x4   :  { %v82_v14 = vsel %vm63_vm0, %v1752_v12, 0.0  ;;  %v85_v15 = vsel %vm63_vm0, %v1757_v13, 0.0  ;;  %v1771_v17 = vld [vmem:[%s2603_s0 + $0x48] sm:$0xff]  ;;  %v88_v18 = vsel %vm63_vm0, %v1766_v16, 0.0  ;;  %v1780_v20 = vld [vmem:[%s2603_s0 + $0x50] sm:$0xff]  ;;  %v1785_v21 = vld [vmem:[%s2603_s0 + $0x58] sm:$0xff] }
   0x5   :  { %v91_v19 = vsel %vm63_vm0, %v1771_v17, 0.0  ;;  %v94_v22 = vsel %vm63_vm0, %v1780_v20, 0.0  ;;  %v97_v23 = vsel %vm63_vm0, %v1785_v21, 0.0  ;;  %v1794_v24 = vld [vmem:[%s2603_s0 + $0x60] sm:$0xff]  ;;  %v1799_v25 = vld [vmem:[%s2603_s0 + $0x68] sm:$0xff]  ;;  %v1808_v28 = vld [vmem:[%s2603_s0 + $0x70] sm:$0xff] }
   0x6   :  { %v100_v26 = vsel %vm63_vm0, %v1794_v24, 0.0  ;;  %v103_v27 = vsel %vm63_vm0, %v1799_v25, 0.0  ;;  %v1813_v29 = vld [vmem:[%s2603_s0 + $0x78] sm:$0xff]  ;;  %v106_v30 = vsel %vm63_vm0, %v1808_v28, 0.0  ;;  %v1822_v32 = vld [vmem:[%s2603_s0 + $0x80] sm:$0xff]  ;;  %v1827_v33 = vld [vmem:[%s2603_s0 + $0x88] sm:$0xff] }
   0x7   :  { %68 = vadd.xlane.f32.xlu0 %v67_v6  ;;  %74 = vadd.xlane.f32.xlu1 %v73_v7  ;;  %v109_v31 = vsel %vm63_vm0, %v1813_v29, 0.0  ;;  %v112_v34 = vsel %vm63_vm0, %v1822_v32, 0.0  ;;  %v115_v35 = vsel %vm63_vm0, %v1827_v33, 0.0  ;;  %v1836_v36 = vld [vmem:[%s2603_s0 + $0x90] sm:$0xff]  ;;  %v1841_v37 = vld [vmem:[%s2603_s0 + $0x98] sm:$0xff]  ;;  %v1850_v40 = vld [vmem:[%s2603_s0 + $0xa0] sm:$0xff] }
   0x8   :  { %v118_v38 = vsel %vm63_vm0, %v1836_v36, 0.0  ;;  %v121_v39 = vsel %vm63_vm0, %v1841_v37, 0.0  ;;  %v1855_v41 = vld [vmem:[%s2603_s0 + $0xa8] sm:$0xff]  ;;  %v124_v42 = vsel %vm63_vm0, %v1850_v40, 0.0  ;;  %v1864_v44 = vld [vmem:[%s2603_s0 + $0xb0] sm:$0xff]  ;;  %v1869_v45 = vld [vmem:[%s2603_s0 + $0xb8] sm:$0xff] }
   0x9   :  { %v127_v43 = vsel %vm63_vm0, %v1855_v41, 0.0  ;;  %v130_v46 = vsel %vm63_vm0, %v1864_v44, 0.0  ;;  %v133_v47 = vsel %vm63_vm0, %v1869_v45, 0.0  ;;  %v1878_v48 = vld [vmem:[%s2603_s0 + $0xc0] sm:$0xff]  ;;  %v1883_v49 = vld [vmem:[%s2603_s0 + $0xc8] sm:$0xff]  ;;  %v1892_v52 = vld [vmem:[%s2603_s0 + $0xd0] sm:$0xff] }
   0xa   :  { %v136_v50 = vsel %vm63_vm0, %v1878_v48, 0.0  ;;  %v139_v51 = vsel %vm63_vm0, %v1883_v49, 0.0  ;;  %v1897_v53 = vld [vmem:[%s2603_s0 + $0xd8] sm:$0xff]  ;;  %v142_v54 = vsel %vm63_vm0, %v1892_v52, 0.0  ;;  %v1906_v56 = vld [vmem:[%s2603_s0 + $0xe0] sm:$0xff]  ;;  %v1911_v57 = vld [vmem:[%s2603_s0 + $0xe8] sm:$0xff] }
   0xb   :  { %77 = vadd.xlane.f32.xlu0 %v76_v10  ;;  %80 = vadd.xlane.f32.xlu1 %v79_v11  ;;  %v145_v55 = vsel %vm63_vm0, %v1897_v53, 0.0  ;;  %v148_v58 = vsel %vm63_vm0, %v1906_v56, 0.0  ;;  %v151_v59 = vsel %vm63_vm0, %v1911_v57, 0.0  ;;  %v1920_v60 = vld [vmem:[%s2603_s0 + $0xf0] sm:$0xff]  ;;  %v1925_v61 = vld [vmem:[%s2603_s0 + $0xf8] sm:$0xff] }
   0xc   :  { %v154_v62 = vsel %vm63_vm0, %v1920_v60, 0.0  ;;  %v157_v63 = vsel %vm63_vm0, %v1925_v61, 0.0 }
   0xf   :  { %83 = vadd.xlane.f32.xlu0 %v82_v14  ;;  %86 = vadd.xlane.f32.xlu1 %v85_v15 }
  0x13   :  { %89 = vadd.xlane.f32.xlu0 %v88_v18  ;;  %92 = vadd.xlane.f32.xlu1 %v91_v19 }
  0x17   :  { %95 = vadd.xlane.f32.xlu0 %v94_v22  ;;  %98 = vadd.xlane.f32.xlu1 %v97_v23 }
  0x1b   :  { %101 = vadd.xlane.f32.xlu0 %v100_v26  ;;  %104 = vadd.xlane.f32.xlu1 %v103_v27 }
  0x1f   :  { %107 = vadd.xlane.f32.xlu0 %v106_v30  ;;  %110 = vadd.xlane.f32.xlu1 %v109_v31 }
  0x23   :  { %113 = vadd.xlane.f32.xlu0 %v112_v34  ;;  %116 = vadd.xlane.f32.xlu1 %v115_v35 }
  0x27   :  { %119 = vadd.xlane.f32.xlu0 %v118_v38  ;;  %122 = vadd.xlane.f32.xlu1 %v121_v39 }
  0x2b   :  { %125 = vadd.xlane.f32.xlu0 %v124_v42  ;;  %128 = vadd.xlane.f32.xlu1 %v127_v43 }
  0x2f   :  { %131 = vadd.xlane.f32.xlu0 %v130_v46  ;;  %134 = vadd.xlane.f32.xlu1 %v133_v47 }
  0x33   :  { %137 = vadd.xlane.f32.xlu0 %v136_v50  ;;  %140 = vadd.xlane.f32.xlu1 %v139_v51 }
  0x37   :  { %143 = vadd.xlane.f32.xlu0 %v142_v54  ;;  %146 = vadd.xlane.f32.xlu1 %v145_v55 }
  0x3b   :  { %149 = vadd.xlane.f32.xlu0 %v148_v58  ;;  %152 = vadd.xlane.f32.xlu1 %v151_v59 }
  0x3f   :  { %155 = vadd.xlane.f32.xlu0 %v154_v62  ;;  %158 = vadd.xlane.f32.xlu1 %v157_v63 }
  0x90   :  { %v66_v3 = vpop.xlane.xlu0 %65  ;;  %v72_v4 = vpop.xlane.xlu1 %71 }
  0x91   :  { %v161_v6 = vmul.f32 0.03125, %v66_v3  ;;  %v163_v7 = vmul.f32 0.03125, %v72_v4 }
  0x93   :  { %v1932_v10 = vsub.f32 %v1710_v0, %v161_v6  ;;  %v1935_v11 = vsub.f32 %v1715_v1, %v163_v7 }
  0x94   :  { %v69_v14 = vpop.xlane.xlu0 %68  ;;  %v75_v15 = vpop.xlane.xlu1 %74 }
  0x95   :  { %v162_v18 = vmul.f32 0.03125, %v69_v14  ;;  %v164_v19 = vmul.f32 0.03125, %v75_v15  ;;  %v225_v22 = vmul.f32 %v1932_v10, %v1932_v10  ;;  %v227_v23 = vmul.f32 %v1935_v11, %v1935_v11 }
  0x97   :  { %v1942_v26 = vsub.f32 %v1720_v2, %v162_v18  ;;  %v1945_v27 = vsub.f32 %v1729_v5, %v164_v19  ;;  %v257_v0 = vsel %vm63_vm0, %v225_v22, 0.0  ;;  %v263_v31 = vsel %vm63_vm0, %v227_v23, 0.0 }
  0x98   :  { %258 = vadd.xlane.f32.xlu0 %v257_v0  ;;  %v78_v1 = vpop.xlane.xlu0 %77  ;;  %v81_v30 = vpop.xlane.xlu1 %80 }
  0x99   :  { %v165_v34 = vmul.f32 0.03125, %v78_v1  ;;  %v166_v35 = vmul.f32 0.03125, %v81_v30  ;;  %v226_v38 = vmul.f32 %v1942_v26, %v1942_v26  ;;  %v228_v39 = vmul.f32 %v1945_v27, %v1945_v27 }
  0x9b   :  { %v1954_v2 = vsub.f32 %v1738_v8, %v165_v34  ;;  %v1957_v5 = vsub.f32 %v1743_v9, %v166_v35  ;;  %v260_v42 = vsel %vm63_vm0, %v226_v38, 0.0  ;;  %v266_v47 = vsel %vm63_vm0, %v228_v39, 0.0 }
  0x9c   :  { %264 = vadd.xlane.f32.xlu0 %v263_v31  ;;  %261 = vadd.xlane.f32.xlu1 %v260_v42  ;;  %v84_v43 = vpop.xlane.xlu0 %83  ;;  %v87_v46 = vpop.xlane.xlu1 %86 }
  0x9d   :  { %v167_v50 = vmul.f32 0.03125, %v84_v43  ;;  %v168_v51 = vmul.f32 0.03125, %v87_v46  ;;  %v229_v54 = vmul.f32 %v1954_v2, %v1954_v2  ;;  %v230_v8 = vmul.f32 %v1957_v5, %v1957_v5 }
  0x9f   :  { %v1966_v55 = vsub.f32 %v1752_v12, %v167_v50  ;;  %v1969_v9 = vsub.f32 %v1757_v13, %v168_v51  ;;  %v269_v58 = vsel %vm63_vm0, %v229_v54, 0.0  ;;  %v272_v63 = vsel %vm63_vm0, %v230_v8, 0.0 }
  0xa0   :  { %267 = vadd.xlane.f32.xlu1 %v266_v47  ;;  %270 = vadd.xlane.f32.xlu0 %v269_v58  ;;  %v90_v59 = vpop.xlane.xlu0 %89  ;;  %v93_v62 = vpop.xlane.xlu1 %92 }
  0xa1   :  { %v169_v3 = vmul.f32 0.03125, %v90_v59  ;;  %v170_v4 = vmul.f32 0.03125, %v93_v62  ;;  %v231_v6 = vmul.f32 %v1966_v55, %v1966_v55  ;;  %v232_v12 = vmul.f32 %v1969_v9, %v1969_v9 }
  0xa3   :  { %v1978_v7 = vsub.f32 %v1766_v16, %v169_v3  ;;  %v1981_v13 = vsub.f32 %v1771_v17, %v170_v4  ;;  %v275_v14 = vsel %vm63_vm0, %v231_v6, 0.0  ;;  %v278_v19 = vsel %vm63_vm0, %v232_v12, 0.0 }
  0xa4   :  { %273 = vadd.xlane.f32.xlu1 %v272_v63  ;;  %276 = vadd.xlane.f32.xlu0 %v275_v14  ;;  %v96_v15 = vpop.xlane.xlu0 %95  ;;  %v99_v18 = vpop.xlane.xlu1 %98 }
  0xa5   :  { %v171_v22 = vmul.f32 0.03125, %v96_v15  ;;  %v172_v23 = vmul.f32 0.03125, %v99_v18  ;;  %v233_v0 = vmul.f32 %v1978_v7, %v1978_v7  ;;  %v234_v16 = vmul.f32 %v1981_v13, %v1981_v13 }
  0xa7   :  { %v1990_v1 = vsub.f32 %v1780_v20, %v171_v22  ;;  %v1993_v17 = vsub.f32 %v1785_v21, %v172_v23  ;;  %v281_v30 = vsel %vm63_vm0, %v233_v0, 0.0  ;;  %v284_v35 = vsel %vm63_vm0, %v234_v16, 0.0 }
  0xa8   :  { %279 = vadd.xlane.f32.xlu1 %v278_v19  ;;  %282 = vadd.xlane.f32.xlu0 %v281_v30  ;;  %v102_v31 = vpop.xlane.xlu0 %101  ;;  %v105_v34 = vpop.xlane.xlu1 %104 }
  0xa9   :  { %v173_v38 = vmul.f32 0.03125, %v102_v31  ;;  %v174_v39 = vmul.f32 0.03125, %v105_v34  ;;  %v235_v42 = vmul.f32 %v1990_v1, %v1990_v1  ;;  %v236_v20 = vmul.f32 %v1993_v17, %v1993_v17 }
  0xab   :  { %v2002_v43 = vsub.f32 %v1794_v24, %v173_v38  ;;  %v2005_v21 = vsub.f32 %v1799_v25, %v174_v39  ;;  %v287_v46 = vsel %vm63_vm0, %v235_v42, 0.0  ;;  %v290_v51 = vsel %vm63_vm0, %v236_v20, 0.0 }
  0xac   :  { %285 = vadd.xlane.f32.xlu1 %v284_v35  ;;  %288 = vadd.xlane.f32.xlu0 %v287_v46  ;;  %v108_v47 = vpop.xlane.xlu0 %107  ;;  %v111_v50 = vpop.xlane.xlu1 %110 }
  0xad   :  { %v175_v54 = vmul.f32 0.03125, %v108_v47  ;;  %v176_v8 = vmul.f32 0.03125, %v111_v50  ;;  %v237_v58 = vmul.f32 %v2002_v43, %v2002_v43  ;;  %v238_v24 = vmul.f32 %v2005_v21, %v2005_v21 }
  0xaf   :  { %v2014_v59 = vsub.f32 %v1808_v28, %v175_v54  ;;  %v2017_v25 = vsub.f32 %v1813_v29, %v176_v8  ;;  %v293_v62 = vsel %vm63_vm0, %v237_v58, 0.0  ;;  %v296_v4 = vsel %vm63_vm0, %v238_v24, 0.0  ;;  %v1594_v58 = vld [vmem:[%s2604_s3] sm:$0xff]  }
  0xb0   :  { %291 = vadd.xlane.f32.xlu1 %v290_v51  ;;  %294 = vadd.xlane.f32.xlu0 %v293_v62  ;;  %v114_v63 = vpop.xlane.xlu0 %113  ;;  %v117_v3 = vpop.xlane.xlu1 %116 }
  0xb1   :  { %v177_v6 = vmul.f32 0.03125, %v114_v63  ;;  %v178_v12 = vmul.f32 0.03125, %v117_v3  ;;  %v239_v14 = vmul.f32 %v2014_v59, %v2014_v59  ;;  %v240_v28 = vmul.f32 %v2017_v25, %v2017_v25  ;;  %1522 = vmatprep.subr.bf16.mxu0 %v1594_v58  ;;  %v1595_v63 = vld [vmem:[%s2605_s5] sm:$0xff]  }
  0xb2   :  { %1523 = vmatpush3.bf16.msra.mxu0 %v1594_v58  ;;  %1558 = vmatprep.subr.bf16.mxu1 %v1595_v63 }
  0xb3   :  { %v2026_v15 = vsub.f32 %v1822_v32, %v177_v6  ;;  %v2029_v29 = vsub.f32 %v1827_v33, %v178_v12  ;;  %v299_v18 = vsel %vm63_vm0, %v239_v14, 0.0  ;;  %v302_v23 = vsel %vm63_vm0, %v240_v28, 0.0  ;;  %1559 = vmatpush3.bf16.msra.mxu1 %v1595_v63 }
  0xb4   :  { %297 = vadd.xlane.f32.xlu1 %v296_v4  ;;  %300 = vadd.xlane.f32.xlu0 %v299_v18  ;;  %v120_v19 = vpop.xlane.xlu0 %119  ;;  %v123_v22 = vpop.xlane.xlu1 %122  ;;  %v1596_v18 = vld [vmem:[%s2604_s3 + $0x8] sm:$0xff]  }
  0xb5   :  { %v179_v0 = vmul.f32 0.03125, %v120_v19  ;;  %v180_v16 = vmul.f32 0.03125, %v123_v22  ;;  %v241_v30 = vmul.f32 %v2026_v15, %v2026_v15  ;;  %v242_v32 = vmul.f32 %v2029_v29, %v2029_v29  ;;  %1524 = vmatprep.subr.bf16.mxu0 %v1596_v18 }
  0xb6   :  { %1525 = vmatpush3.bf16.msra.mxu0 %v1596_v18 }
  0xb7   :  { %v2038_v31 = vsub.f32 %v1836_v36, %v179_v0  ;;  %v2041_v33 = vsub.f32 %v1841_v37, %v180_v16  ;;  %v305_v34 = vsel %vm63_vm0, %v241_v30, 0.0  ;;  %v308_v39 = vsel %vm63_vm0, %v242_v32, 0.0 }
  0xb8   :  { %303 = vadd.xlane.f32.xlu1 %v302_v23  ;;  %306 = vadd.xlane.f32.xlu0 %v305_v34  ;;  %v126_v35 = vpop.xlane.xlu0 %125  ;;  %v129_v38 = vpop.xlane.xlu1 %128 }
  0xb9   :  { %v181_v42 = vmul.f32 0.03125, %v126_v35  ;;  %v182_v20 = vmul.f32 0.03125, %v129_v38  ;;  %v243_v46 = vmul.f32 %v2038_v31, %v2038_v31  ;;  %v244_v36 = vmul.f32 %v2041_v33, %v2041_v33 }
  0xbb   :  { %v2050_v47 = vsub.f32 %v1850_v40, %v181_v42  ;;  %v2053_v37 = vsub.f32 %v1855_v41, %v182_v20  ;;  %v311_v50 = vsel %vm63_vm0, %v243_v46, 0.0  ;;  %v314_v8 = vsel %vm63_vm0, %v244_v36, 0.0 }
  0xbc   :  { %309 = vadd.xlane.f32.xlu1 %v308_v39  ;;  %312 = vadd.xlane.f32.xlu0 %v311_v50  ;;  %v132_v51 = vpop.xlane.xlu0 %131  ;;  %v135_v54 = vpop.xlane.xlu1 %134 }
  0xbd   :  { %v183_v24 = vmul.f32 0.03125, %v132_v51  ;;  %v184_v62 = vmul.f32 0.03125, %v135_v54  ;;  %v245_v40 = vmul.f32 %v2050_v47, %v2050_v47  ;;  %v246_v41 = vmul.f32 %v2053_v37, %v2053_v37 }
  0xbf   :  { %v2068_v3 = vsub.f32 %v1864_v44, %v183_v24  ;;  %v2071_v4 = vsub.f32 %v1869_v45, %v184_v62  ;;  %v317_v6 = vsel %vm63_vm0, %v245_v40, 0.0  ;;  %v320_v28 = vsel %vm63_vm0, %v246_v41, 0.0  ;;  %v1597_v44 = vld [vmem:[%s2605_s5 + $0x8] sm:$0xff]  }
  0xc0   :  { %315 = vadd.xlane.f32.xlu1 %v314_v8  ;;  %318 = vadd.xlane.f32.xlu0 %v317_v6  ;;  %v138_v12 = vpop.xlane.xlu0 %137  ;;  %v141_v14 = vpop.xlane.xlu1 %140 }
  0xc1   :  { %v185_v19 = vmul.f32 0.03125, %v138_v12  ;;  %v186_v45 = vmul.f32 0.03125, %v141_v14  ;;  %v247_v22 = vmul.f32 %v2068_v3, %v2068_v3  ;;  %v248_v23 = vmul.f32 %v2071_v4, %v2071_v4  ;;  %1560 = vmatprep.subr.bf16.mxu1 %v1597_v44 }
  0xc2   :  { %1561 = vmatpush3.bf16.msra.mxu1 %v1597_v44 }
  0xc3   :  { %v2086_v0 = vsub.f32 %v1878_v48, %v185_v19  ;;  %v2089_v16 = vsub.f32 %v1883_v49, %v186_v45  ;;  %v323_v30 = vsel %vm63_vm0, %v247_v22, 0.0  ;;  %v326_v35 = vsel %vm63_vm0, %v248_v23, 0.0 }
  0xc4   :  { %321 = vadd.xlane.f32.xlu1 %v320_v28  ;;  %324 = vadd.xlane.f32.xlu0 %v323_v30  ;;  %v144_v32 = vpop.xlane.xlu0 %143  ;;  %v147_v34 = vpop.xlane.xlu1 %146 }
  0xc5   :  { %v187_v38 = vmul.f32 0.03125, %v144_v32  ;;  %v188_v39 = vmul.f32 0.03125, %v147_v34  ;;  %v249_v42 = vmul.f32 %v2086_v0, %v2086_v0  ;;  %v250_v48 = vmul.f32 %v2089_v16, %v2089_v16 }
  0xc7   :  { %v2098_v49 = vsub.f32 %v1892_v52, %v187_v38  ;;  %v2101_v20 = vsub.f32 %v1897_v53, %v188_v39  ;;  %v329_v46 = vsel %vm63_vm0, %v249_v42, 0.0  ;;  %v332_v51 = vsel %vm63_vm0, %v250_v48, 0.0 }
  0xc8   :  { %327 = vadd.xlane.f32.xlu1 %v326_v35  ;;  %330 = vadd.xlane.f32.xlu0 %v329_v46  ;;  %v150_v36 = vpop.xlane.xlu0 %149  ;;  %v153_v50 = vpop.xlane.xlu1 %152 }
  0xc9   :  { %v189_v54 = vmul.f32 0.03125, %v150_v36  ;;  %v190_v8 = vmul.f32 0.03125, %v153_v50  ;;  %v251_v58 = vmul.f32 %v2098_v49, %v2098_v49  ;;  %v252_v52 = vmul.f32 %v2101_v20, %v2101_v20 }
  0xcb   :  { %v2110_v24 = vsub.f32 %v1906_v56, %v189_v54  ;;  %v2113_v53 = vsub.f32 %v1911_v57, %v190_v8  ;;  %v335_v62 = vsel %vm63_vm0, %v251_v58, 0.0  ;;  %v338_v63 = vsel %vm63_vm0, %v252_v52, 0.0 }
  0xcc   :  { %333 = vadd.xlane.f32.xlu1 %v332_v51  ;;  %336 = vadd.xlane.f32.xlu0 %v335_v62  ;;  %v156_v40 = vpop.xlane.xlu0 %155  ;;  %v159_v41 = vpop.xlane.xlu1 %158 }
  0xcd   :  { %v191_v6 = vmul.f32 0.03125, %v156_v40  ;;  %v192_v12 = vmul.f32 0.03125, %v159_v41  ;;  %v253_v14 = vmul.f32 %v2110_v24, %v2110_v24  ;;  %v254_v56 = vmul.f32 %v2113_v53, %v2113_v53 }
  0xcf   :  { %v2122_v28 = vsub.f32 %v1920_v60, %v191_v6  ;;  %v2125_v57 = vsub.f32 %v1925_v61, %v192_v12  ;;  %v341_v18 = vsel %vm63_vm0, %v253_v14, 0.0  ;;  %v344_v44 = vsel %vm63_vm0, %v254_v56, 0.0 }
  0xd0   :  { %339 = vadd.xlane.f32.xlu1 %v338_v63  ;;  %342 = vadd.xlane.f32.xlu0 %v341_v18 }
  0xd1   :  { %v255_v19 = vmul.f32 %v2122_v28, %v2122_v28  ;;  %v256_v45 = vmul.f32 %v2125_v57, %v2125_v57 }
  0xd3   :  { %v347_v22 = vsel %vm63_vm0, %v255_v19, 0.0  ;;  %v350_v60 = vsel %vm63_vm0, %v256_v45, 0.0 }
  0xd4   :  { %345 = vadd.xlane.f32.xlu1 %v344_v44  ;;  %348 = vadd.xlane.f32.xlu0 %v347_v22  ;;  %v2139_v44 = vld [vmem:[%s2606_s1] ss:$0 sm:$0xff] }
  0xd8   :  { %351 = vadd.xlane.f32.xlu1 %v350_v60 }
 0x125   :  { %v259_v61 = vpop.xlane.xlu0 %258 }
 0x126   :  { %v353_v23 = vmul.f32 0.03125, %v259_v61 }
 0x128   :  { %v385_v30 = vadd.f32 1e-05, %v353_v23 }
 0x129   :  { %v262_v32 = vpop.xlane.xlu1 %261  ;;  %v265_v34 = vpop.xlane.xlu0 %264 }
 0x12a   :  { %1598 = vrsqrt.f32 %v385_v30  ;;  %v354_v35 = vmul.f32 0.03125, %v262_v32  ;;  %v355_v38 = vmul.f32 0.03125, %v265_v34 }
 0x12c   :  { %v386_v39 = vadd.f32 1e-05, %v354_v35  ;;  %v387_v42 = vadd.f32 1e-05, %v355_v38  ;;  %v2147_v38 = vld [vmem:[%s2607_s2] ss:$0 sm:$0xff] }
 0x12d   :  { %v268_v48 = vpop.xlane.xlu1 %267  ;;  %v271_v46 = vpop.xlane.xlu0 %270 }
 0x12e   :  { %1600 = vrsqrt.f32 %v386_v39  ;;  %v356_v36 = vmul.f32 0.03125, %v268_v48  ;;  %v357_v50 = vmul.f32 0.03125, %v271_v46 }
 0x12f   :  { %1602 = vrsqrt.f32 %v387_v42 }
 0x130   :  { %v388_v51 = vadd.f32 1e-05, %v356_v36  ;;  %v389_v54 = vadd.f32 1e-05, %v357_v50 }
 0x131   :  { %v274_v8 = vpop.xlane.xlu1 %273  ;;  %v277_v58 = vpop.xlane.xlu0 %276 }
 0x132   :  { %1604 = vrsqrt.f32 %v388_v51  ;;  %v358_v52 = vmul.f32 0.03125, %v274_v8  ;;  %v359_v62 = vmul.f32 0.03125, %v277_v58 }
 0x133   :  { %1606 = vrsqrt.f32 %v389_v54 }
 0x134   :  { %v1599_v40 = vpop.eup %1598  ;;  %v390_v41 = vadd.f32 1e-05, %v358_v52  ;;  %v391_v63 = vadd.f32 1e-05, %v359_v62 }
 0x135   :  { %v280_v6 = vpop.xlane.xlu1 %279  ;;  %v283_v12 = vpop.xlane.xlu0 %282  ;;  %v449_v14 = vmul.f32 %v1599_v40, %v1932_v10 }
 0x136   :  { %1608 = vrsqrt.f32 %v390_v41  ;;  %v360_v56 = vmul.f32 0.03125, %v280_v6  ;;  %v361_v18 = vmul.f32 0.03125, %v283_v12 }
 0x137   :  { %1610 = vrsqrt.f32 %v391_v63  ;;  %v487_v32 = vmul.f32 %v2139_v44, %v449_v14 }
 0x138   :  { %v1601_v19 = vpop.eup %1600  ;;  %v392_v45 = vadd.f32 1e-05, %v360_v56  ;;  %v393_v22 = vadd.f32 1e-05, %v361_v18 }
 0x139   :  { %v1603_v60 = vpop.eup %1602  ;;  %v286_v61 = vpop.xlane.xlu1 %285  ;;  %v450_v30 = vmul.f32 %v1601_v19, %v1942_v26 }
 0x13a   :  { %v289_v23 = vpop.xlane.xlu0 %288  ;;  %v451_v10 = vmul.f32 %v1603_v60, %v1935_v11  ;;  %1612 = vrsqrt.f32 %v392_v45  ;;  %v362_v34 = vmul.f32 0.03125, %v286_v61  ;;  %v525_v11 = vadd.f32 %v2147_v38, %v487_v32 }
 0x13b   :  { %v363_v35 = vmul.f32 0.03125, %v289_v23  ;;  %1614 = vrsqrt.f32 %v393_v22  ;;  %v488_v39 = vmul.f32 %v2139_v44, %v450_v30 }
 0x13c   :  { %v1605_v42 = vpop.eup %1604  ;;  %v394_v48 = vadd.f32 1e-05, %v362_v34  ;;  %v489_v8 = vmul.f32 %v2139_v44, %v451_v10 }
 0x13d   :  { %v395_v46 = vadd.f32 1e-05, %v363_v35  ;;  %v1607_v36 = vpop.eup %1606  ;;  %v452_v26 = vmul.f32 %v1605_v42, %v1945_v27  ;;  %v292_v50 = vpop.xlane.xlu1 %291  ;;  %v526_v54 = vadd.f32 %v2147_v38, %v488_v39 }
 0x13e   :  { %v295_v51 = vpop.xlane.xlu0 %294  ;;  %v453_v58 = vmul.f32 %v1607_v36, %v1954_v2  ;;  %1616 = vrsqrt.f32 %v394_v48  ;;  %v364_v52 = vmul.f32 0.03125, %v292_v50  ;;  %v527_v19 = vadd.f32 %v2147_v38, %v489_v8 }
 0x13f   :  { %v365_v62 = vmul.f32 0.03125, %v295_v51  ;;  %1618 = vrsqrt.f32 %v395_v46  ;;  %v557_v40 = vpack.c.bf16 %v526_v54, %v525_v11  ;;  %v490_v41 = vmul.f32 %v2139_v44, %v452_v26 }
 0x140   :  { %v1609_v63 = vpop.eup %1608  ;;  %v396_v6 = vadd.f32 1e-05, %v364_v52  ;;  %v491_v12 = vmul.f32 %v2139_v44, %v453_v58 }
 0x141   :  { %v397_v27 = vadd.f32 1e-05, %v365_v62  ;;  %v1611_v14 = vpop.eup %1610  ;;  %v454_v56 = vmul.f32 %v1609_v63, %v1957_v5  ;;  %v298_v18 = vpop.xlane.xlu1 %297  ;;  %1526 = vmatprep.mubr.msk.bf16.mxu0 %vm63_vm0, %v557_v40  ;;  %1562 = vmatprep.mubr.msk.bf16.mxu1 %vm63_vm0, %v557_v40  ;;  %v528_v45 = vadd.f32 %v2147_v38, %v490_v41 }
 0x142   :  { %v301_v2 = vpop.xlane.xlu0 %300  ;;  %v455_v22 = vmul.f32 %v1611_v14, %v1966_v55  ;;  %1620 = vrsqrt.f32 %v396_v6  ;;  %v366_v60 = vmul.f32 0.03125, %v298_v18  ;;  %v529_v34 = vadd.f32 %v2147_v38, %v491_v12 }
 0x143   :  { %v367_v61 = vmul.f32 0.03125, %v301_v2  ;;  %1622 = vrsqrt.f32 %v397_v27  ;;  %v558_v23 = vpack.c.bf16 %v528_v45, %v527_v19  ;;  %v492_v30 = vmul.f32 %v2139_v44, %v454_v56 }
 0x144   :  { %v1613_v5 = vpop.eup %1612  ;;  %v398_v32 = vadd.f32 1e-05, %v366_v60  ;;  %v493_v46 = vmul.f32 %v2139_v44, %v455_v22 }
 0x145   :  { %v399_v10 = vadd.f32 1e-05, %v367_v61  ;;  %v1615_v35 = vpop.eup %1614  ;;  %v456_v39 = vmul.f32 %v1613_v5, %v1969_v9  ;;  %v304_v42 = vpop.xlane.xlu1 %303  ;;  %1527 = vmatmul.mubr.msk.bf16.vlgmr.msra.gmra.mrb[0].mxu0 %vm63_vm0, %v558_v23  ;;  %1563 = vmatmul.mubr.msk.bf16.vlgmr.msra.gmra.mrb[0].mxu1 %vm63_vm0, %v558_v23  ;;  %v530_v48 = vadd.f32 %v2147_v38, %v492_v30 }
 0x146   :  { %v307_v55 = vpop.xlane.xlu0 %306  ;;  %v457_v36 = vmul.f32 %v1615_v35, %v1978_v7  ;;  %1624 = vrsqrt.f32 %v398_v32  ;;  %v368_v26 = vmul.f32 0.03125, %v304_v42  ;;  %v531_v41 = vadd.f32 %v2147_v38, %v493_v46 }
 0x147   :  { %v369_v50 = vmul.f32 0.03125, %v307_v55  ;;  %1626 = vrsqrt.f32 %v399_v10  ;;  %v559_v51 = vpack.c.bf16 %v530_v48, %v529_v34  ;;  %v494_v11 = vmul.f32 %v2139_v44, %v456_v39 }
 0x148   :  { %v1617_v9 = vpop.eup %1616  ;;  %v400_v54 = vadd.f32 1e-05, %v368_v26  ;;  %v495_v58 = vmul.f32 %v2139_v44, %v457_v36 }
 0x149   :  { %v401_v8 = vadd.f32 1e-05, %v369_v50  ;;  %v1619_v52 = vpop.eup %1618  ;;  %v458_v62 = vmul.f32 %v1617_v9, %v1981_v13  ;;  %v310_v40 = vpop.xlane.xlu1 %309  ;;  %1530 = vmatprep.mubr.msk.bf16.mxu0 %vm63_vm0, %v559_v51  ;;  %1566 = vmatprep.mubr.msk.bf16.mxu1 %vm63_vm0, %v559_v51  ;;  %v532_v63 = vadd.f32 %v2147_v38, %v494_v11 }
 0x14a   :  { %v313_v7 = vpop.xlane.xlu0 %312  ;;  %v459_v6 = vmul.f32 %v1619_v52, %v1990_v1  ;;  %1628 = vrsqrt.f32 %v400_v54  ;;  %v370_v27 = vmul.f32 0.03125, %v310_v40  ;;  %v533_v19 = vadd.f32 %v2147_v38, %v495_v58 }
 0x14b   :  { %v371_v12 = vmul.f32 0.03125, %v313_v7  ;;  %1630 = vrsqrt.f32 %v401_v8  ;;  %v560_v14 = vpack.c.bf16 %v532_v63, %v531_v41  ;;  %v496_v56 = vmul.f32 %v2139_v44, %v458_v62 }
 0x14c   :  { %v1621_v13 = vpop.eup %1620  ;;  %v402_v18 = vadd.f32 1e-05, %v370_v27  ;;  %v497_v23 = vmul.f32 %v2139_v44, %v459_v6 }
 0x14d   :  { %v403_v2 = vadd.f32 1e-05, %v371_v12  ;;  %v1623_v45 = vpop.eup %1622  ;;  %v460_v22 = vmul.f32 %v1621_v13, %v1993_v17  ;;  %v316_v60 = vpop.xlane.xlu1 %315  ;;  %1531 = vmatmul.mubr.msk.bf16.gmra.mrb[4].mxu0 %vm63_vm0, %v560_v14  ;;  %1567 = vmatmul.mubr.msk.bf16.gmra.mrb[4].mxu1 %vm63_vm0, %v560_v14  ;;  %v534_v61 = vadd.f32 %v2147_v38, %v496_v56 }
 0x14e   :  { %v319_v1 = vpop.xlane.xlu0 %318  ;;  %v461_v30 = vmul.f32 %v1623_v45, %v2002_v43  ;;  %1632 = vrsqrt.f32 %v402_v18  ;;  %v372_v5 = vmul.f32 0.03125, %v316_v60  ;;  %v535_v36 = vadd.f32 %v2147_v38, %v497_v23 }
 0x14f   :  { %v373_v32 = vmul.f32 0.03125, %v319_v1  ;;  %1634 = vrsqrt.f32 %v403_v2  ;;  %v561_v10 = vpack.c.bf16 %v534_v61, %v533_v19  ;;  %v498_v34 = vmul.f32 %v2139_v44, %v460_v22 }
 0x150   :  { %v1625_v17 = vpop.eup %1624  ;;  %v404_v35 = vadd.f32 1e-05, %v372_v5  ;;  %v499_v42 = vmul.f32 %v2139_v44, %v461_v30 }
 0x151   :  { %v405_v39 = vadd.f32 1e-05, %v373_v32  ;;  %v1627_v55 = vpop.eup %1626  ;;  %v462_v48 = vmul.f32 %v1625_v17, %v2005_v21  ;;  %v322_v46 = vpop.xlane.xlu1 %321  ;;  %1534 = vmatprep.mubr.msk.bf16.mxu0 %vm63_vm0, %v561_v10  ;;  %1570 = vmatprep.mubr.msk.bf16.mxu1 %vm63_vm0, %v561_v10  ;;  %v536_v26 = vadd.f32 %v2147_v38, %v498_v34 }
 0x152   :  { %v325_v43 = vpop.xlane.xlu0 %324  ;;  %v463_v50 = vmul.f32 %v1627_v55, %v2014_v59  ;;  %1636 = vrsqrt.f32 %v404_v35  ;;  %v374_v51 = vmul.f32 0.03125, %v322_v46  ;;  %v537_v52 = vadd.f32 %v2147_v38, %v499_v42 }
 0x153   :  { %v375_v11 = vmul.f32 0.03125, %v325_v43  ;;  %1638 = vrsqrt.f32 %v405_v39  ;;  %v562_v9 = vpack.c.bf16 %v536_v26, %v535_v36  ;;  %v500_v54 = vmul.f32 %v2139_v44, %v462_v48 }
 0x154   :  { %v1629_v21 = vpop.eup %1628  ;;  %v406_v8 = vadd.f32 1e-05, %v374_v51  ;;  %v501_v63 = vmul.f32 %v2139_v44, %v463_v50 }
 0x155   :  { %v407_v58 = vadd.f32 1e-05, %v375_v11  ;;  %v1631_v62 = vpop.eup %1630  ;;  %v464_v40 = vmul.f32 %v1629_v21, %v2017_v25  ;;  %v328_v7 = vpop.xlane.xlu1 %327  ;;  %1535 = vmatmul.mubr.msk.bf16.gmra.mrb[8].mxu0 %vm63_vm0, %v562_v9  ;;  %1571 = vmatmul.mubr.msk.bf16.gmra.mrb[8].mxu1 %vm63_vm0, %v562_v9  ;;  %v538_v41 = vadd.f32 %v2147_v38, %v500_v54 }
 0x156   :  { %v331_v59 = vpop.xlane.xlu0 %330  ;;  %v465_v6 = vmul.f32 %v1631_v62, %v2026_v15  ;;  %1640 = vrsqrt.f32 %v406_v8  ;;  %v376_v27 = vmul.f32 0.03125, %v328_v7  ;;  %v539_v60 = vadd.f32 %v2147_v38, %v501_v63 }
 0x157   :  { %v377_v12 = vmul.f32 0.03125, %v331_v59  ;;  %1642 = vrsqrt.f32 %v407_v58  ;;  %v563_v14 = vpack.c.bf16 %v538_v41, %v537_v52  ;;  %v502_v56 = vmul.f32 %v2139_v44, %v464_v40 }
 0x158   :  { %v1633_v25 = vpop.eup %1632  ;;  %v408_v13 = vadd.f32 1e-05, %v376_v27  ;;  %v503_v2 = vmul.f32 %v2139_v44, %v465_v6 }
 0x159   :  { %v409_v18 = vadd.f32 1e-05, %v377_v12  ;;  %v1635_v19 = vpop.eup %1634  ;;  %v466_v45 = vmul.f32 %v1633_v25, %v2029_v29  ;;  %v334_v22 = vpop.xlane.xlu1 %333  ;;  %1538 = vmatprep.mubr.msk.bf16.mxu0 %vm63_vm0, %v563_v14  ;;  %1574 = vmatprep.mubr.msk.bf16.mxu1 %vm63_vm0, %v563_v14  ;;  %v540_v1 = vadd.f32 %v2147_v38, %v502_v56 }
 0x15a   :  { %v337_v15 = vpop.xlane.xlu0 %336  ;;  %v467_v61 = vmul.f32 %v1635_v19, %v2038_v31  ;;  %1644 = vrsqrt.f32 %v408_v13  ;;  %v378_v23 = vmul.f32 0.03125, %v334_v22  ;;  %v541_v17 = vadd.f32 %v2147_v38, %v503_v2 }
 0x15b   :  { %v379_v30 = vmul.f32 0.03125, %v337_v15  ;;  %1646 = vrsqrt.f32 %v409_v18  ;;  %v564_v5 = vpack.c.bf16 %v540_v1, %v539_v60  ;;  %v504_v32 = vmul.f32 %v2139_v44, %v466_v45 }
 0x15c   :  { %v1637_v29 = vpop.eup %1636  ;;  %v410_v10 = vadd.f32 1e-05, %v378_v23  ;;  %v505_v48 = vmul.f32 %v2139_v44, %v467_v61 }
 0x15d   :  { %v411_v34 = vadd.f32 1e-05, %v379_v30  ;;  %v1639_v35 = vpop.eup %1638  ;;  %v468_v39 = vmul.f32 %v1637_v29, %v2041_v33  ;;  %v340_v42 = vpop.xlane.xlu1 %339  ;;  %1539 = vmatmul.mubr.msk.bf16.gmra.mrb[12].mxu0 %vm63_vm0, %v564_v5  ;;  %1575 = vmatmul.mubr.msk.bf16.gmra.mrb[12].mxu1 %vm63_vm0, %v564_v5  ;;  %v542_v55 = vadd.f32 %v2147_v38, %v504_v32 }
 0x15e   :  { %v343_v31 = vpop.xlane.xlu0 %342  ;;  %v469_v46 = vmul.f32 %v1639_v35, %v2050_v47  ;;  %1648 = vrsqrt.f32 %v410_v10  ;;  %v380_v43 = vmul.f32 0.03125, %v340_v42  ;;  %v543_v58 = vadd.f32 %v2147_v38, %v505_v48 }
 0x15f   :  { %v381_v36 = vmul.f32 0.03125, %v343_v31  ;;  %1650 = vrsqrt.f32 %v411_v34  ;;  %v565_v26 = vpack.c.bf16 %v542_v55, %v541_v17  ;;  %v506_v50 = vmul.f32 %v2139_v44, %v468_v39 }
 0x160   :  { %v1641_v33 = vpop.eup %1640  ;;  %v412_v51 = vadd.f32 1e-05, %v380_v43  ;;  %v507_v9 = vmul.f32 %v2139_v44, %v469_v46 }
 0x161   :  { %v413_v11 = vadd.f32 1e-05, %v381_v36  ;;  %v1643_v54 = vpop.eup %1642  ;;  %v470_v21 = vmul.f32 %v1641_v33, %v2053_v37  ;;  %v346_v8 = vpop.xlane.xlu1 %345  ;;  %1542 = vmatprep.mubr.msk.bf16.mxu0 %vm63_vm0, %v565_v26  ;;  %1578 = vmatprep.mubr.msk.bf16.mxu1 %vm63_vm0, %v565_v26  ;;  %v544_v52 = vadd.f32 %v2147_v38, %v506_v50 }
 0x162   :  { %v349_v47 = vpop.xlane.xlu0 %348  ;;  %v471_v62 = vmul.f32 %v1643_v54, %v2068_v3  ;;  %1652 = vrsqrt.f32 %v412_v51  ;;  %v382_v40 = vmul.f32 0.03125, %v346_v8  ;;  %v545_v27 = vadd.f32 %v2147_v38, %v507_v9  ;;  %v2276_v54 = vld [vmem:[%s2608_s4] ss:$0 sm:$0xff] }
 0x163   :  { %v383_v7 = vmul.f32 0.03125, %v349_v47  ;;  %1654 = vrsqrt.f32 %v413_v11  ;;  %v566_v59 = vpack.c.bf16 %v544_v52, %v543_v58  ;;  %v508_v41 = vmul.f32 %v2139_v44, %v470_v21 }
 0x164   :  { %v1645_v37 = vpop.eup %1644  ;;  %v414_v63 = vadd.f32 1e-05, %v382_v40  ;;  %v509_v25 = vmul.f32 %v2139_v44, %v471_v62 }
 0x165   :  { %v415_v6 = vadd.f32 1e-05, %v383_v7  ;;  %v1647_v12 = vpop.eup %1646  ;;  %v472_v14 = vmul.f32 %v1645_v37, %v2071_v4  ;;  %v352_v56 = vpop.xlane.xlu1 %351  ;;  %1543 = vmatmul.mubr.msk.bf16.gmra.mrb[16].mxu0 %vm63_vm0, %v566_v59  ;;  %1579 = vmatmul.mubr.msk.bf16.gmra.mrb[16].mxu1 %vm63_vm0, %v566_v59  ;;  %v546_v3 = vadd.f32 %v2147_v38, %v508_v41 }
 0x166   :  { %v473_v13 = vmul.f32 %v1647_v12, %v2086_v0  ;;  %1656 = vrsqrt.f32 %v414_v63  ;;  %v384_v18 = vmul.f32 0.03125, %v352_v56  ;;  %v547_v1 = vadd.f32 %v2147_v38, %v509_v25 }
 0x167   :  { %1658 = vrsqrt.f32 %v415_v6  ;;  %v567_v2 = vpack.c.bf16 %v546_v3, %v545_v27  ;;  %v510_v19 = vmul.f32 %v2139_v44, %v472_v14 }
 0x168   :  { %v1649_v45 = vpop.eup %1648  ;;  %v416_v22 = vadd.f32 1e-05, %v384_v18  ;;  %v511_v4 = vmul.f32 %v2139_v44, %v473_v13 }
 0x169   :  { %v1651_v15 = vpop.eup %1650  ;;  %v474_v60 = vmul.f32 %v1649_v45, %v2089_v16  ;;  %1546 = vmatprep.mubr.msk.bf16.mxu0 %vm63_vm0, %v567_v2  ;;  %1582 = vmatprep.mubr.msk.bf16.mxu1 %vm63_vm0, %v567_v2  ;;  %v548_v0 = vadd.f32 %v2147_v38, %v510_v19 }
 0x16a   :  { %v475_v61 = vmul.f32 %v1651_v15, %v2098_v49  ;;  %1660 = vrsqrt.f32 %v416_v22  ;;  %v549_v32 = vadd.f32 %v2147_v38, %v511_v4 }
 0x16b   :  { %v568_v23 = vpack.c.bf16 %v548_v0, %v547_v1  ;;  %v512_v30 = vmul.f32 %v2139_v44, %v474_v60 }
 0x16c   :  { %v1653_v5 = vpop.eup %1652  ;;  %v513_v34 = vmul.f32 %v2139_v44, %v475_v61 }
 0x16d   :  { %v1655_v29 = vpop.eup %1654  ;;  %v476_v16 = vmul.f32 %v1653_v5, %v2101_v20  ;;  %1547 = vmatmul.mubr.msk.bf16.gmra.mrb[20].mxu0 %vm63_vm0, %v568_v23  ;;  %1583 = vmatmul.mubr.msk.bf16.gmra.mrb[20].mxu1 %vm63_vm0, %v568_v23  ;;  %v550_v10 = vadd.f32 %v2147_v38, %v512_v30 }
 0x16e   :  { %v477_v49 = vmul.f32 %v1655_v29, %v2110_v24  ;;  %v551_v20 = vadd.f32 %v2147_v38, %v513_v34 }
 0x16f   :  { %v569_v17 = vpack.c.bf16 %v550_v10, %v549_v32  ;;  %v514_v35 = vmul.f32 %v2139_v44, %v476_v16 }
 0x170   :  { %v1657_v39 = vpop.eup %1656  ;;  %v515_v42 = vmul.f32 %v2139_v44, %v477_v49 }
 0x171   :  { %v1659_v31 = vpop.eup %1658  ;;  %v478_v55 = vmul.f32 %v1657_v39, %v2113_v53  ;;  %1550 = vmatprep.mubr.msk.bf16.mxu0 %vm63_vm0, %v569_v17  ;;  %1586 = vmatprep.mubr.msk.bf16.mxu1 %vm63_vm0, %v569_v17  ;;  %v552_v48 = vadd.f32 %v2147_v38, %v514_v35 }
 0x172   :  { %v479_v46 = vmul.f32 %v1659_v31, %v2122_v28  ;;  %v553_v26 = vadd.f32 %v2147_v38, %v515_v42 }
 0x173   :  { %v570_v24 = vpack.c.bf16 %v552_v48, %v551_v20  ;;  %v516_v43 = vmul.f32 %v2139_v44, %v478_v55 }
 0x174   :  { %v1661_v36 = vpop.eup %1660  ;;  %v517_v33 = vmul.f32 %v2139_v44, %v479_v46 }
 0x175   :  { %v480_v50 = vmul.f32 %v1661_v36, %v2125_v57  ;;  %1551 = vmatmul.mubr.msk.bf16.gmra.mrb[24].mxu0 %vm63_vm0, %v570_v24  ;;  %1587 = vmatmul.mubr.msk.bf16.gmra.mrb[24].mxu1 %vm63_vm0, %v570_v24  ;;  %v554_v53 = vadd.f32 %v2147_v38, %v516_v43 }
 0x176   :  { %v555_v28 = vadd.f32 %v2147_v38, %v517_v33 }
 0x177   :  { %v571_v51 = vpack.c.bf16 %v554_v53, %v553_v26  ;;  %v518_v11 = vmul.f32 %v2139_v44, %v480_v50  ;;  %v2281_v44 = vld [vmem:[%s2609_s6] ss:$0 sm:$0xff] }
 0x179   :  { %1554 = vmatprep.mubr.msk.bf16.mxu0 %vm63_vm0, %v571_v51  ;;  %1590 = vmatprep.mubr.msk.bf16.mxu1 %vm63_vm0, %v571_v51  ;;  %v556_v9 = vadd.f32 %v2147_v38, %v518_v11 }
 0x17b   :  { %v572_v57 = vpack.c.bf16 %v556_v9, %v555_v28 }
 0x17d   :  { %1555 = vmatmul.mubr.msk.bf16.gmra.mrb[28].mxu0 %vm63_vm0, %v572_v57  ;;  %1591 = vmatmul.mubr.msk.bf16.gmra.mrb[28].mxu1 %vm63_vm0, %v572_v57 }
 0x218   :  { %v1528_v21 = vpop.f32.mrb[0].mxu0  ;;  %v1564_v8 = vpop.f32.mrb[0].mxu1 }
 0x219   :  { %v687_v47 = vadd.f32 %v1528_v21, %v2276_v54  ;;  %v871_v38 = vadd.f32 %v1564_v8, %v2281_v44  ;;  %v678_v58 = vpop.f32.mrb[1].mxu0  ;;  %v862_v52 = vpop.f32.mrb[1].mxu1 }
 0x21a   :  { %v679_v62 = vadd.f32 %v2276_v54, %v678_v58  ;;  %v863_v40 = vadd.f32 %v2281_v44, %v862_v52  ;;  %v1529_v7 = vpop.f32.mrb[2].mxu0  ;;  %v1565_v59 = vpop.f32.mrb[2].mxu1 }
 0x21b   :  { %v1424_v41 = vpack.c.bf16 %v687_v47, %v687_v47  ;;  %v1456_v37 = vpack.c.bf16 %v871_v38, %v871_v38  ;;  %v690_v63 = vadd.f32 %v1529_v7, %v2276_v54  ;;  %v874_v6 = vadd.f32 %v1565_v59, %v2281_v44  ;;  %v681_v27 = vpop.f32.mrb[3].mxu0  ;;  %v865_v12 = vpop.f32.mrb[3].mxu1 }
 0x21c   :  { %v1422_v14 = vpack.c.bf16 %v679_v62, %v679_v62  ;;  %v1454_v56 = vpack.c.bf16 %v863_v40, %v863_v40  ;;  %v682_v3 = vadd.f32 %v2276_v54, %v681_v27  ;;  %v866_v25 = vadd.f32 %v2281_v44, %v865_v12 }
 0x21d   :  { %1120 = vst.msk [vmem:[%s2610_s7 + $0x8] sm:$0xf] %vm1117_vm1, %v1424_v41  ;;  %1280 = vst.msk [vmem:[%s2611_s8 + $0x8] sm:$0xf] %vm1117_vm1, %v1456_v37  ;;  %v1425_v13 = vpack.c.bf16 %v690_v63, %v690_v63  ;;  %v1457_v18 = vpack.c.bf16 %v874_v6, %v874_v6 }
 0x21e   :  { %1118 = vst.msk [vmem:[%s2610_s7] sm:$0xf] %vm1117_vm1, %v1422_v14  ;;  %1278 = vst.msk [vmem:[%s2611_s8] sm:$0xf] %vm1117_vm1, %v1454_v56  ;;  %v1423_v2 = vpack.c.bf16 %v682_v3, %v682_v3  ;;  %v1455_v19 = vpack.c.bf16 %v866_v25, %v866_v25 }
 0x21f   :  { %1121 = vst.msk [vmem:[%s2610_s7 + $0xc] sm:$0xf] %vm1117_vm1, %v1425_v13  ;;  %1281 = vst.msk [vmem:[%s2611_s8 + $0xc] sm:$0xf] %vm1117_vm1, %v1457_v18 }
 0x220   :  { %1119 = vst.msk [vmem:[%s2610_s7 + $0x4] sm:$0xf] %vm1117_vm1, %v1423_v2  ;;  %1279 = vst.msk [vmem:[%s2611_s8 + $0x4] sm:$0xf] %vm1117_vm1, %v1455_v19  ;;  %v1532_v45 = vpop.f32.mrb[4].mxu0  ;;  %v1568_v22 = vpop.f32.mrb[4].mxu1 }
 0x221   :  { %v703_v4 = vadd.f32 %v1532_v45, %v2276_v54  ;;  %v887_v15 = vadd.f32 %v1568_v22, %v2281_v44  ;;  %v694_v60 = vpop.f32.mrb[5].mxu0  ;;  %v878_v1 = vpop.f32.mrb[5].mxu1 }
 0x222   :  { %v695_v0 = vadd.f32 %v2276_v54, %v694_v60  ;;  %v879_v61 = vadd.f32 %v2281_v44, %v878_v1  ;;  %v1533_v23 = vpop.f32.mrb[6].mxu0  ;;  %v1569_v30 = vpop.f32.mrb[6].mxu1 }
 0x223   :  { %v1428_v5 = vpack.c.bf16 %v703_v4, %v703_v4  ;;  %v1460_v32 = vpack.c.bf16 %v887_v15, %v887_v15  ;;  %v706_v29 = vadd.f32 %v1533_v23, %v2276_v54  ;;  %v890_v16 = vadd.f32 %v1569_v30, %v2281_v44  ;;  %v697_v10 = vpop.f32.mrb[7].mxu0  ;;  %v881_v34 = vpop.f32.mrb[7].mxu1 }
 0x224   :  { %v1426_v49 = vpack.c.bf16 %v695_v0, %v695_v0  ;;  %v1458_v17 = vpack.c.bf16 %v879_v61, %v879_v61  ;;  %v698_v35 = vadd.f32 %v2276_v54, %v697_v10  ;;  %v882_v39 = vadd.f32 %v2281_v44, %v881_v34 }
 0x225   :  { %1124 = vst.msk [vmem:[%s2610_s7 + $0x18] sm:$0xf] %vm1117_vm1, %v1428_v5  ;;  %1284 = vst.msk [vmem:[%s2611_s8 + $0x18] sm:$0xf] %vm1117_vm1, %v1460_v32  ;;  %v1429_v42 = vpack.c.bf16 %v706_v29, %v706_v29  ;;  %v1461_v31 = vpack.c.bf16 %v890_v16, %v890_v16 }
 0x226   :  { %1122 = vst.msk [vmem:[%s2610_s7 + $0x10] sm:$0xf] %vm1117_vm1, %v1426_v49  ;;  %1282 = vst.msk [vmem:[%s2611_s8 + $0x10] sm:$0xf] %vm1117_vm1, %v1458_v17  ;;  %v1427_v55 = vpack.c.bf16 %v698_v35, %v698_v35  ;;  %v1459_v20 = vpack.c.bf16 %v882_v39, %v882_v39 }
 0x227   :  { %1125 = vst.msk [vmem:[%s2610_s7 + $0x1c] sm:$0xf] %vm1117_vm1, %v1429_v42  ;;  %1285 = vst.msk [vmem:[%s2611_s8 + $0x1c] sm:$0xf] %vm1117_vm1, %v1461_v31 }
 0x228   :  { %1123 = vst.msk [vmem:[%s2610_s7 + $0x14] sm:$0xf] %vm1117_vm1, %v1427_v55  ;;  %1283 = vst.msk [vmem:[%s2611_s8 + $0x14] sm:$0xf] %vm1117_vm1, %v1459_v20  ;;  %v1536_v48 = vpop.f32.mrb[8].mxu0  ;;  %v1572_v46 = vpop.f32.mrb[8].mxu1 }
 0x229   :  { %v719_v24 = vadd.f32 %v1536_v48, %v2276_v54  ;;  %v903_v43 = vadd.f32 %v1572_v46, %v2281_v44  ;;  %v710_v36 = vpop.f32.mrb[9].mxu0  ;;  %v894_v26 = vpop.f32.mrb[9].mxu1 }
 0x22a   :  { %v711_v50 = vadd.f32 %v2276_v54, %v710_v36  ;;  %v895_v53 = vadd.f32 %v2281_v44, %v894_v26  ;;  %v1537_v33 = vpop.f32.mrb[10].mxu0  ;;  %v1573_v51 = vpop.f32.mrb[10].mxu1 }
 0x22b   :  { %v1432_v11 = vpack.c.bf16 %v719_v24, %v719_v24  ;;  %v1464_v28 = vpack.c.bf16 %v903_v43, %v903_v43  ;;  %v722_v9 = vadd.f32 %v1537_v33, %v2276_v54  ;;  %v906_v57 = vadd.f32 %v1573_v51, %v2281_v44  ;;  %v713_v21 = vpop.f32.mrb[11].mxu0  ;;  %v897_v8 = vpop.f32.mrb[11].mxu1 }
 0x22c   :  { %v1430_v47 = vpack.c.bf16 %v711_v50, %v711_v50  ;;  %v1462_v38 = vpack.c.bf16 %v895_v53, %v895_v53  ;;  %v714_v58 = vadd.f32 %v2276_v54, %v713_v21  ;;  %v898_v52 = vadd.f32 %v2281_v44, %v897_v8 }
 0x22d   :  { %1128 = vst.msk [vmem:[%s2610_s7 + $0x28] sm:$0xf] %vm1117_vm1, %v1432_v11  ;;  %1288 = vst.msk [vmem:[%s2611_s8 + $0x28] sm:$0xf] %vm1117_vm1, %v1464_v28  ;;  %v1433_v62 = vpack.c.bf16 %v722_v9, %v722_v9  ;;  %v1465_v40 = vpack.c.bf16 %v906_v57, %v906_v57 }
 0x22e   :  { %1126 = vst.msk [vmem:[%s2610_s7 + $0x20] sm:$0xf] %vm1117_vm1, %v1430_v47  ;;  %1286 = vst.msk [vmem:[%s2611_s8 + $0x20] sm:$0xf] %vm1117_vm1, %v1462_v38  ;;  %v1431_v7 = vpack.c.bf16 %v714_v58, %v714_v58  ;;  %v1463_v59 = vpack.c.bf16 %v898_v52, %v898_v52 }
 0x22f   :  { %1129 = vst.msk [vmem:[%s2610_s7 + $0x2c] sm:$0xf] %vm1117_vm1, %v1433_v62  ;;  %1289 = vst.msk [vmem:[%s2611_s8 + $0x2c] sm:$0xf] %vm1117_vm1, %v1465_v40 }
 0x230   :  { %1127 = vst.msk [vmem:[%s2610_s7 + $0x24] sm:$0xf] %vm1117_vm1, %v1431_v7  ;;  %1287 = vst.msk [vmem:[%s2611_s8 + $0x24] sm:$0xf] %vm1117_vm1, %v1463_v59  ;;  %v1540_v41 = vpop.f32.mrb[12].mxu0  ;;  %v1576_v37 = vpop.f32.mrb[12].mxu1 }
 0x231   :  { %v735_v63 = vadd.f32 %v1540_v41, %v2276_v54  ;;  %v919_v6 = vadd.f32 %v1576_v37, %v2281_v44  ;;  %v726_v27 = vpop.f32.mrb[13].mxu0  ;;  %v910_v12 = vpop.f32.mrb[13].mxu1 }
 0x232   :  { %v727_v14 = vadd.f32 %v2276_v54, %v726_v27  ;;  %v911_v56 = vadd.f32 %v2281_v44, %v910_v12  ;;  %v1541_v3 = vpop.f32.mrb[14].mxu0  ;;  %v1577_v25 = vpop.f32.mrb[14].mxu1 }
 0x233   :  { %v1436_v13 = vpack.c.bf16 %v735_v63, %v735_v63  ;;  %v1468_v18 = vpack.c.bf16 %v919_v6, %v919_v6  ;;  %v738_v2 = vadd.f32 %v1541_v3, %v2276_v54  ;;  %v922_v19 = vadd.f32 %v1577_v25, %v2281_v44  ;;  %v729_v45 = vpop.f32.mrb[15].mxu0  ;;  %v913_v22 = vpop.f32.mrb[15].mxu1 }
 0x234   :  { %v1434_v4 = vpack.c.bf16 %v727_v14, %v727_v14  ;;  %v1466_v15 = vpack.c.bf16 %v911_v56, %v911_v56  ;;  %v730_v60 = vadd.f32 %v2276_v54, %v729_v45  ;;  %v914_v1 = vadd.f32 %v2281_v44, %v913_v22 }
 0x235   :  { %1132 = vst.msk [vmem:[%s2610_s7 + $0x38] sm:$0xf] %vm1117_vm1, %v1436_v13  ;;  %1292 = vst.msk [vmem:[%s2611_s8 + $0x38] sm:$0xf] %vm1117_vm1, %v1468_v18  ;;  %v1437_v0 = vpack.c.bf16 %v738_v2, %v738_v2  ;;  %v1469_v61 = vpack.c.bf16 %v922_v19, %v922_v19 }
 0x236   :  { %1130 = vst.msk [vmem:[%s2610_s7 + $0x30] sm:$0xf] %vm1117_vm1, %v1434_v4  ;;  %1290 = vst.msk [vmem:[%s2611_s8 + $0x30] sm:$0xf] %vm1117_vm1, %v1466_v15  ;;  %v1435_v23 = vpack.c.bf16 %v730_v60, %v730_v60  ;;  %v1467_v30 = vpack.c.bf16 %v914_v1, %v914_v1 }
 0x237   :  { %1133 = vst.msk [vmem:[%s2610_s7 + $0x3c] sm:$0xf] %vm1117_vm1, %v1437_v0  ;;  %1293 = vst.msk [vmem:[%s2611_s8 + $0x3c] sm:$0xf] %vm1117_vm1, %v1469_v61 }
 0x238   :  { %1131 = vst.msk [vmem:[%s2610_s7 + $0x34] sm:$0xf] %vm1117_vm1, %v1435_v23  ;;  %1291 = vst.msk [vmem:[%s2611_s8 + $0x34] sm:$0xf] %vm1117_vm1, %v1467_v30  ;;  %v1544_v5 = vpop.f32.mrb[16].mxu0  ;;  %v1580_v32 = vpop.f32.mrb[16].mxu1 }
 0x239   :  { %v751_v29 = vadd.f32 %v1544_v5, %v2276_v54  ;;  %v935_v16 = vadd.f32 %v1580_v32, %v2281_v44  ;;  %v742_v10 = vpop.f32.mrb[17].mxu0  ;;  %v926_v34 = vpop.f32.mrb[17].mxu1 }
 0x23a   :  { %v743_v49 = vadd.f32 %v2276_v54, %v742_v10  ;;  %v927_v17 = vadd.f32 %v2281_v44, %v926_v34  ;;  %v1545_v35 = vpop.f32.mrb[18].mxu0  ;;  %v1581_v39 = vpop.f32.mrb[18].mxu1 }
 0x23b   :  { %v1440_v42 = vpack.c.bf16 %v751_v29, %v751_v29  ;;  %v1472_v31 = vpack.c.bf16 %v935_v16, %v935_v16  ;;  %v754_v55 = vadd.f32 %v1545_v35, %v2276_v54  ;;  %v938_v20 = vadd.f32 %v1581_v39, %v2281_v44  ;;  %v745_v48 = vpop.f32.mrb[19].mxu0  ;;  %v929_v46 = vpop.f32.mrb[19].mxu1 }
 0x23c   :  { %v1438_v24 = vpack.c.bf16 %v743_v49, %v743_v49  ;;  %v1470_v43 = vpack.c.bf16 %v927_v17, %v927_v17  ;;  %v746_v36 = vadd.f32 %v2276_v54, %v745_v48  ;;  %v930_v26 = vadd.f32 %v2281_v44, %v929_v46 }
 0x23d   :  { %1136 = vst.msk [vmem:[%s2610_s7 + $0x48] sm:$0xf] %vm1117_vm1, %v1440_v42  ;;  %1296 = vst.msk [vmem:[%s2611_s8 + $0x48] sm:$0xf] %vm1117_vm1, %v1472_v31  ;;  %v1441_v50 = vpack.c.bf16 %v754_v55, %v754_v55  ;;  %v1473_v53 = vpack.c.bf16 %v938_v20, %v938_v20 }
 0x23e   :  { %1134 = vst.msk [vmem:[%s2610_s7 + $0x40] sm:$0xf] %vm1117_vm1, %v1438_v24  ;;  %1294 = vst.msk [vmem:[%s2611_s8 + $0x40] sm:$0xf] %vm1117_vm1, %v1470_v43  ;;  %v1439_v33 = vpack.c.bf16 %v746_v36, %v746_v36  ;;  %v1471_v51 = vpack.c.bf16 %v930_v26, %v930_v26 }
 0x23f   :  { %1137 = vst.msk [vmem:[%s2610_s7 + $0x4c] sm:$0xf] %vm1117_vm1, %v1441_v50  ;;  %1297 = vst.msk [vmem:[%s2611_s8 + $0x4c] sm:$0xf] %vm1117_vm1, %v1473_v53 }
 0x240   :  { %1135 = vst.msk [vmem:[%s2610_s7 + $0x44] sm:$0xf] %vm1117_vm1, %v1439_v33  ;;  %1295 = vst.msk [vmem:[%s2611_s8 + $0x44] sm:$0xf] %vm1117_vm1, %v1471_v51  ;;  %v1548_v11 = vpop.f32.mrb[20].mxu0  ;;  %v1584_v28 = vpop.f32.mrb[20].mxu1 }
 0x241   :  { %v767_v9 = vadd.f32 %v1548_v11, %v2276_v54  ;;  %v951_v57 = vadd.f32 %v1584_v28, %v2281_v44  ;;  %v758_v21 = vpop.f32.mrb[21].mxu0  ;;  %v942_v8 = vpop.f32.mrb[21].mxu1 }
 0x242   :  { %v759_v47 = vadd.f32 %v2276_v54, %v758_v21  ;;  %v943_v38 = vadd.f32 %v2281_v44, %v942_v8  ;;  %v1549_v58 = vpop.f32.mrb[22].mxu0  ;;  %v1585_v52 = vpop.f32.mrb[22].mxu1 }
 0x243   :  { %v1444_v62 = vpack.c.bf16 %v767_v9, %v767_v9  ;;  %v1476_v40 = vpack.c.bf16 %v951_v57, %v951_v57  ;;  %v770_v7 = vadd.f32 %v1549_v58, %v2276_v54  ;;  %v954_v59 = vadd.f32 %v1585_v52, %v2281_v44  ;;  %v761_v41 = vpop.f32.mrb[23].mxu0  ;;  %v945_v37 = vpop.f32.mrb[23].mxu1 }
 0x244   :  { %v1442_v63 = vpack.c.bf16 %v759_v47, %v759_v47  ;;  %v1474_v6 = vpack.c.bf16 %v943_v38, %v943_v38  ;;  %v762_v27 = vadd.f32 %v2276_v54, %v761_v41  ;;  %v946_v12 = vadd.f32 %v2281_v44, %v945_v37 }
 0x245   :  { %1140 = vst.msk [vmem:[%s2610_s7 + $0x58] sm:$0xf] %vm1117_vm1, %v1444_v62  ;;  %1300 = vst.msk [vmem:[%s2611_s8 + $0x58] sm:$0xf] %vm1117_vm1, %v1476_v40  ;;  %v1445_v14 = vpack.c.bf16 %v770_v7, %v770_v7  ;;  %v1477_v56 = vpack.c.bf16 %v954_v59, %v954_v59 }
 0x246   :  { %1138 = vst.msk [vmem:[%s2610_s7 + $0x50] sm:$0xf] %vm1117_vm1, %v1442_v63  ;;  %1298 = vst.msk [vmem:[%s2611_s8 + $0x50] sm:$0xf] %vm1117_vm1, %v1474_v6  ;;  %v1443_v3 = vpack.c.bf16 %v762_v27, %v762_v27  ;;  %v1475_v25 = vpack.c.bf16 %v946_v12, %v946_v12 }
 0x247   :  { %1141 = vst.msk [vmem:[%s2610_s7 + $0x5c] sm:$0xf] %vm1117_vm1, %v1445_v14  ;;  %1301 = vst.msk [vmem:[%s2611_s8 + $0x5c] sm:$0xf] %vm1117_vm1, %v1477_v56 }
 0x248   :  { %1139 = vst.msk [vmem:[%s2610_s7 + $0x54] sm:$0xf] %vm1117_vm1, %v1443_v3  ;;  %1299 = vst.msk [vmem:[%s2611_s8 + $0x54] sm:$0xf] %vm1117_vm1, %v1475_v25  ;;  %v1552_v13 = vpop.f32.mrb[24].mxu0  ;;  %v1588_v18 = vpop.f32.mrb[24].mxu1 }
 0x249   :  { %v783_v2 = vadd.f32 %v1552_v13, %v2276_v54  ;;  %v967_v19 = vadd.f32 %v1588_v18, %v2281_v44  ;;  %v774_v45 = vpop.f32.mrb[25].mxu0  ;;  %v958_v22 = vpop.f32.mrb[25].mxu1 }
 0x24a   :  { %v775_v4 = vadd.f32 %v2276_v54, %v774_v45  ;;  %v959_v15 = vadd.f32 %v2281_v44, %v958_v22  ;;  %v1553_v60 = vpop.f32.mrb[26].mxu0  ;;  %v1589_v1 = vpop.f32.mrb[26].mxu1 }
 0x24b   :  { %v1448_v0 = vpack.c.bf16 %v783_v2, %v783_v2  ;;  %v1480_v61 = vpack.c.bf16 %v967_v19, %v967_v19  ;;  %v786_v23 = vadd.f32 %v1553_v60, %v2276_v54  ;;  %v970_v30 = vadd.f32 %v1589_v1, %v2281_v44  ;;  %v777_v5 = vpop.f32.mrb[27].mxu0  ;;  %v961_v32 = vpop.f32.mrb[27].mxu1 }
 0x24c   :  { %v1446_v29 = vpack.c.bf16 %v775_v4, %v775_v4  ;;  %v1478_v16 = vpack.c.bf16 %v959_v15, %v959_v15  ;;  %v778_v10 = vadd.f32 %v2276_v54, %v777_v5  ;;  %v962_v34 = vadd.f32 %v2281_v44, %v961_v32 }
 0x24d   :  { %1144 = vst.msk [vmem:[%s2610_s7 + $0x68] sm:$0xf] %vm1117_vm1, %v1448_v0  ;;  %1304 = vst.msk [vmem:[%s2611_s8 + $0x68] sm:$0xf] %vm1117_vm1, %v1480_v61  ;;  %v1449_v49 = vpack.c.bf16 %v786_v23, %v786_v23  ;;  %v1481_v17 = vpack.c.bf16 %v970_v30, %v970_v30 }
 0x24e   :  { %1142 = vst.msk [vmem:[%s2610_s7 + $0x60] sm:$0xf] %vm1117_vm1, %v1446_v29  ;;  %1302 = vst.msk [vmem:[%s2611_s8 + $0x60] sm:$0xf] %vm1117_vm1, %v1478_v16  ;;  %v1447_v35 = vpack.c.bf16 %v778_v10, %v778_v10  ;;  %v1479_v39 = vpack.c.bf16 %v962_v34, %v962_v34 }
 0x24f   :  { %1145 = vst.msk [vmem:[%s2610_s7 + $0x6c] sm:$0xf] %vm1117_vm1, %v1449_v49  ;;  %1305 = vst.msk [vmem:[%s2611_s8 + $0x6c] sm:$0xf] %vm1117_vm1, %v1481_v17 }
 0x250   :  { %1143 = vst.msk [vmem:[%s2610_s7 + $0x64] sm:$0xf] %vm1117_vm1, %v1447_v35  ;;  %1303 = vst.msk [vmem:[%s2611_s8 + $0x64] sm:$0xf] %vm1117_vm1, %v1479_v39  ;;  %v1556_v42 = vpop.f32.mrb[28].mxu0  ;;  %v1592_v31 = vpop.f32.mrb[28].mxu1 }
 0x251   :  { %v799_v55 = vadd.f32 %v1556_v42, %v2276_v54  ;;  %v983_v20 = vadd.f32 %v1592_v31, %v2281_v44  ;;  %v790_v48 = vpop.f32.mrb[29].mxu0  ;;  %v974_v46 = vpop.f32.mrb[29].mxu1 }
 0x252   :  { %v791_v24 = vadd.f32 %v2276_v54, %v790_v48  ;;  %v975_v43 = vadd.f32 %v2281_v44, %v974_v46  ;;  %v1557_v36 = vpop.f32.mrb[30].mxu0  ;;  %v1593_v26 = vpop.f32.mrb[30].mxu1 }
 0x253   :  { %v1452_v50 = vpack.c.bf16 %v799_v55, %v799_v55  ;;  %v1484_v53 = vpack.c.bf16 %v983_v20, %v983_v20  ;;  %v802_v33 = vadd.f32 %v1557_v36, %v2276_v54  ;;  %v986_v51 = vadd.f32 %v1593_v26, %v2281_v44  ;;  %v793_v11 = vpop.f32.mrb[31].mxu0  ;;  %v977_v28 = vpop.f32.mrb[31].mxu1 }
 0x254   :  { %v1450_v9 = vpack.c.bf16 %v791_v24, %v791_v24  ;;  %v1482_v57 = vpack.c.bf16 %v975_v43, %v975_v43  ;;  %v794_v21 = vadd.f32 %v2276_v54, %v793_v11  ;;  %v978_v8 = vadd.f32 %v2281_v44, %v977_v28 }
 0x255   :  { %1148 = vst.msk [vmem:[%s2610_s7 + $0x78] sm:$0xf] %vm1117_vm1, %v1452_v50  ;;  %1308 = vst.msk [vmem:[%s2611_s8 + $0x78] sm:$0xf] %vm1117_vm1, %v1484_v53  ;;  %v1453_v47 = vpack.c.bf16 %v802_v33, %v802_v33  ;;  %v1485_v38 = vpack.c.bf16 %v986_v51, %v986_v51 }
 0x256   :  { %1146 = vst.msk [vmem:[%s2610_s7 + $0x70] sm:$0xf] %vm1117_vm1, %v1450_v9  ;;  %1306 = vst.msk [vmem:[%s2611_s8 + $0x70] sm:$0xf] %vm1117_vm1, %v1482_v57  ;;  %v1451_v54 = vpack.c.bf16 %v794_v21, %v794_v21  ;;  %v1483_v44 = vpack.c.bf16 %v978_v8, %v978_v8 }
 0x257   :  { %1149 = vst.msk [vmem:[%s2610_s7 + $0x7c] sm:$0xf] %vm1117_vm1, %v1453_v47  ;;  %1309 = vst.msk [vmem:[%s2611_s8 + $0x7c] sm:$0xf] %vm1117_vm1, %v1485_v38 }
 0x258   :  { %1147 = vst.msk [vmem:[%s2610_s7 + $0x74] sm:$0xf] %vm1117_vm1, %v1451_v54  ;;  %1307 = vst.msk [vmem:[%s2611_s8 + $0x74] sm:$0xf] %vm1117_vm1, %v1483_v44 }

// kernel: graph_transformer_mapper_block.7
= control target key start
LH: loop header
LB: loop body
LE: loop exit
PB: predicated region body
PF: predicated region fallthrough
CT: control target
= control target key end

     0   :  { %vm174_vm0 = vcmask 261120   ;;  %vm1534_vm1 = vcmask 523264   ;;  %s3552_s3 = inlined_call_operand.vmem [shape: bf16[32,32], index: 3, kind: input, shape index: {}]   ;;  %s3553_s0 = inlined_call_operand.vmem [shape: f32[256,32], index: 0, kind: input, shape index: {}]   ;;  %s3554_s1 = inlined_call_operand.vmem [shape: f32[256,32], index: 1, kind: input, shape index: {}]   ;;  %s3555_s4 = inlined_call_operand.vmem [shape: f32[1,32], index: 4, kind: input, shape index: {}]   ;;  %s3556_s2 = inlined_call_operand.vmem [shape: f32[256,32], index: 2, kind: input, shape index: {}]   ;;  %s3557_s7 = inlined_call_operand.vmem [shape: bf16[32,64], index: 7, kind: input, shape index: {}]   ;;  %s3558_s5 = inlined_call_operand.vmem [shape: f32[1,32], index: 5, kind: input, shape index: {}]   ;;  %s3559_s6 = inlined_call_operand.vmem [shape: f32[1,32], index: 6, kind: input, shape index: {}]   ;;  %s3560_s9 = inlined_call_operand.vmem [shape: bf16[64,32], index: 9, kind: input, shape index: {}]   ;;  %s3561_s8 = inlined_call_operand.vmem [shape: f32[1,64], index: 8, kind: input, shape index: {}]   ;;  %s3562_s10 = inlined_call_operand.vmem [shape: f32[1,32], index: 10, kind: input, shape index: {}]   ;;  %s3563_s11 = inlined_call_operand.vmem [shape: f32[256,32], index: 11, kind: output, shape index: {}]  }
   0x1   :  { %v2045_v0 = vld [vmem:[%s3552_s3] sm:$0xff]   ;;  %v2046_v1 = vld [vmem:[%s3552_s3 + $0x8] sm:$0xff]   ;;  %v41_v7 = vld [vmem:[%s3553_s0 + $0x10] sm:$0xff] }
   0x2   :  { %1929 = vmatprep.subr.bf16.mxu0 %v2045_v0  ;;  %v39_v2 = vld [vmem:[%s3553_s0] sm:$0xff]  ;;  %v40_v3 = vld [vmem:[%s3553_s0 + $0x8] sm:$0xff]  ;;  %2041 = vmatprep.subr.bf16.mxu1 %v2045_v0  ;;  %v42_v8 = vld [vmem:[%s3553_s0 + $0x18] sm:$0xff] }
   0x3   :  { %v71_v4 = vld [vmem:[%s3554_s1] sm:$0xff]  ;;  %1930 = vmatpush3.bf16.msra.mxu0 %v2045_v0  ;;  %v72_v5 = vld [vmem:[%s3554_s1 + $0x8] sm:$0xff]  ;;  %2043 = vmatpush3.bf16.msra.mxu1 %v2045_v0  ;;  %v73_v10 = vld [vmem:[%s3554_s1 + $0x10] sm:$0xff] }
   0x4   :  { %v103_v6 = vadd.f32 %v71_v4, %v39_v2  ;;  %1931 = vmatprep.subr.bf16.mxu0 %v2046_v1  ;;  %v104_v9 = vadd.f32 %v72_v5, %v40_v3  ;;  %v74_v11 = vld [vmem:[%s3554_s1 + $0x18] sm:$0xff]  ;;  %v43_v12 = vld [vmem:[%s3553_s0 + $0x20] sm:$0xff]  ;;  %2042 = vmatprep.subr.bf16.mxu1 %v2046_v1  ;;  %v105_v13 = vadd.f32 %v73_v10, %v41_v7  ;;  %v44_v15 = vld [vmem:[%s3553_s0 + $0x28] sm:$0xff] }
   0x5   :  { %v106_v14 = vadd.f32 %v74_v11, %v42_v8  ;;  %v75_v16 = vld [vmem:[%s3554_s1 + $0x20] sm:$0xff]  ;;  %v76_v17 = vld [vmem:[%s3554_s1 + $0x28] sm:$0xff]  ;;  %v45_v21 = vld [vmem:[%s3553_s0 + $0x30] sm:$0xff] }
   0x6   :  { %v135_v18 = vpack.c.bf16 %v104_v9, %v103_v6  ;;  %v107_v19 = vadd.f32 %v75_v16, %v43_v12  ;;  %v108_v20 = vadd.f32 %v76_v17, %v44_v15  ;;  %v46_v22 = vld [vmem:[%s3553_s0 + $0x38] sm:$0xff]  ;;  %v77_v24 = vld [vmem:[%s3554_s1 + $0x30] sm:$0xff]  ;;  %v47_v26 = vld [vmem:[%s3553_s0 + $0x40] sm:$0xff] }
   0x7   :  { %1932 = vmatpush3.bf16.msra.mxu0 %v2046_v1  ;;  %v136_v23 = vpack.c.bf16 %v106_v14, %v105_v13  ;;  %v78_v25 = vld [vmem:[%s3554_s1 + $0x38] sm:$0xff]  ;;  %2044 = vmatpush3.bf16.msra.mxu1 %v2046_v1  ;;  %v48_v28 = vld [vmem:[%s3553_s0 + $0x48] sm:$0xff]  ;;  %v79_v29 = vld [vmem:[%s3554_s1 + $0x40] sm:$0xff]  ;;  %v109_v31 = vadd.f32 %v77_v24, %v45_v21 }
   0x8   :  { %1933 = vmatprep.mubr.msk.bf16.mxu0 %vm174_vm0, %v135_v18  ;;  %v137_v27 = vpack.c.bf16 %v108_v20, %v107_v19  ;;  %v80_v30 = vld [vmem:[%s3554_s1 + $0x48] sm:$0xff]  ;;  %v110_v32 = vadd.f32 %v78_v25, %v46_v22  ;;  %v111_v33 = vadd.f32 %v79_v29, %v47_v26  ;;  %v55_v35 = vld [vmem:[%s3553_s0 + $0x80] sm:$0xff]  ;;  %v49_v36 = vld [vmem:[%s3553_s0 + $0x50] sm:$0xff] }
   0x9   :  { %v112_v34 = vadd.f32 %v80_v30, %v48_v28  ;;  %v50_v37 = vld [vmem:[%s3553_s0 + $0x58] sm:$0xff]  ;;  %v81_v38 = vld [vmem:[%s3554_s1 + $0x50] sm:$0xff]  ;;  %v56_v40 = vld [vmem:[%s3553_s0 + $0x88] sm:$0xff] }
   0xa   :  { %1934 = vmatmul.mubr.msk.bf16.vlgmr.msra.gmra.mrb[0].mxu0 %vm174_vm0, %v136_v23  ;;  %v82_v39 = vld [vmem:[%s3554_s1 + $0x58] sm:$0xff]  ;;  %v87_v41 = vld [vmem:[%s3554_s1 + $0x80] sm:$0xff]  ;;  %v88_v42 = vld [vmem:[%s3554_s1 + $0x88] sm:$0xff]  ;;  %v138_v43 = vpack.c.bf16 %v110_v32, %v109_v31  ;;  %v113_v4 = vadd.f32 %v81_v38, %v49_v36 }
   0xb   :  { %1937 = vmatprep.mubr.msk.bf16.mxu0 %vm174_vm0, %v137_v27  ;;  %v51_v44 = vld [vmem:[%s3553_s0 + $0x60] sm:$0xff]  ;;  %v52_v45 = vld [vmem:[%s3553_s0 + $0x68] sm:$0xff]  ;;  %v119_v48 = vadd.f32 %v87_v41, %v55_v35  ;;  %v120_v49 = vadd.f32 %v88_v42, %v56_v40  ;;  %v57_v50 = vld [vmem:[%s3553_s0 + $0x90] sm:$0xff]  ;;  %v139_v53 = vpack.c.bf16 %v112_v34, %v111_v33  ;;  %v114_v5 = vadd.f32 %v82_v39, %v50_v37 }
   0xc   :  { %v83_v46 = vld [vmem:[%s3554_s1 + $0x60] sm:$0xff]  ;;  %v84_v47 = vld [vmem:[%s3554_s1 + $0x68] sm:$0xff]  ;;  %v58_v51 = vld [vmem:[%s3553_s0 + $0x98] sm:$0xff] }
   0xd   :  { %v89_v52 = vld [vmem:[%s3554_s1 + $0x90] sm:$0xff]  ;;  %v90_v54 = vld [vmem:[%s3554_s1 + $0x98] sm:$0xff]  ;;  %v59_v56 = vld [vmem:[%s3553_s0 + $0xa0] sm:$0xff]  ;;  %v143_v58 = vpack.c.bf16 %v120_v49, %v119_v48  ;;  %v115_v10 = vadd.f32 %v83_v46, %v51_v44  ;;  %v116_v11 = vadd.f32 %v84_v47, %v52_v45  ;;  %v140_v18 = vpack.c.bf16 %v114_v5, %v113_v4 }
   0xe   :  { %v121_v55 = vadd.f32 %v89_v52, %v57_v50  ;;  %v60_v57 = vld [vmem:[%s3553_s0 + $0xa8] sm:$0xff]  ;;  %v122_v59 = vadd.f32 %v90_v54, %v58_v51  ;;  %v91_v60 = vld [vmem:[%s3554_s1 + $0xa0] sm:$0xff]  ;;  %v61_v62 = vld [vmem:[%s3553_s0 + $0xb0] sm:$0xff] }
   0xf   :  { %v92_v61 = vld [vmem:[%s3554_s1 + $0xa8] sm:$0xff]  ;;  %v123_v63 = vadd.f32 %v91_v60, %v59_v56  ;;  %v62_v1 = vld [vmem:[%s3553_s0 + $0xb8] sm:$0xff]  ;;  %v93_v2 = vld [vmem:[%s3554_s1 + $0xb0] sm:$0xff]  ;;  %1949 = vmatprep.mubr.msk.bf16.mxu1 %vm174_vm0, %v143_v58  ;;  %v141_v20 = vpack.c.bf16 %v116_v11, %v115_v10 }
  0x10   :  { %v124_v0 = vadd.f32 %v92_v61, %v60_v57  ;;  %v94_v3 = vld [vmem:[%s3554_s1 + $0xb8] sm:$0xff]  ;;  %v144_v6 = vpack.c.bf16 %v122_v59, %v121_v55  ;;  %v63_v7 = vld [vmem:[%s3553_s0 + $0xc0] sm:$0xff]  ;;  %v64_v8 = vld [vmem:[%s3553_s0 + $0xc8] sm:$0xff]  ;;  %v125_v14 = vadd.f32 %v93_v2, %v61_v62 }
  0x11   :  { %v95_v9 = vld [vmem:[%s3554_s1 + $0xc0] sm:$0xff]  ;;  %v96_v13 = vld [vmem:[%s3554_s1 + $0xc8] sm:$0xff]  ;;  %v126_v15 = vadd.f32 %v94_v3, %v62_v1  ;;  %v53_v19 = vld [vmem:[%s3553_s0 + $0x70] sm:$0xff] }
  0x12   :  { %1938 = vmatmul.mubr.msk.bf16.gmra.mrb[4].mxu0 %vm174_vm0, %v138_v43  ;;  %v145_v12 = vpack.c.bf16 %v124_v0, %v123_v63  ;;  %1950 = vmatmul.mubr.msk.bf16.vlgmr.msra.gmra.mrb[0].mxu1 %vm174_vm0, %v144_v6  ;;  %v127_v16 = vadd.f32 %v95_v9, %v63_v7  ;;  %v128_v17 = vadd.f32 %v96_v13, %v64_v8  ;;  %v54_v21 = vld [vmem:[%s3553_s0 + $0x78] sm:$0xff]  ;;  %v85_v22 = vld [vmem:[%s3554_s1 + $0x70] sm:$0xff]  ;;  %v67_v30 = vld [vmem:[%s3553_s0 + $0xe0] sm:$0xff] }
  0x13   :  { %1941 = vmatprep.mubr.msk.bf16.mxu0 %vm174_vm0, %v139_v53  ;;  %v86_v23 = vld [vmem:[%s3554_s1 + $0x78] sm:$0xff]  ;;  %v146_v24 = vpack.c.bf16 %v126_v15, %v125_v14  ;;  %v65_v25 = vld [vmem:[%s3553_s0 + $0xd0] sm:$0xff]  ;;  %v117_v31 = vadd.f32 %v85_v22, %v53_v19  ;;  %v68_v33 = vld [vmem:[%s3553_s0 + $0xe8] sm:$0xff] }
  0x14   :  { %1953 = vmatprep.mubr.msk.bf16.mxu1 %vm174_vm0, %v145_v12  ;;  %v66_v26 = vld [vmem:[%s3553_s0 + $0xd8] sm:$0xff]  ;;  %v147_v27 = vpack.c.bf16 %v128_v17, %v127_v16  ;;  %v97_v28 = vld [vmem:[%s3554_s1 + $0xd0] sm:$0xff]  ;;  %v118_v32 = vadd.f32 %v86_v23, %v54_v21  ;;  %v99_v34 = vld [vmem:[%s3554_s1 + $0xe0] sm:$0xff] }
  0x15   :  { %v98_v29 = vld [vmem:[%s3554_s1 + $0xd8] sm:$0xff]  ;;  %v100_v35 = vld [vmem:[%s3554_s1 + $0xe8] sm:$0xff]  ;;  %v129_v36 = vadd.f32 %v97_v28, %v65_v25  ;;  %v131_v38 = vadd.f32 %v99_v34, %v67_v30  ;;  %v69_v42 = vld [vmem:[%s3553_s0 + $0xf0] sm:$0xff] }
  0x16   :  { %v130_v37 = vadd.f32 %v98_v29, %v66_v26  ;;  %v132_v39 = vadd.f32 %v100_v35, %v68_v33  ;;  %v142_v40 = vpack.c.bf16 %v118_v32, %v117_v31  ;;  %v70_v44 = vld [vmem:[%s3553_s0 + $0xf8] sm:$0xff]  ;;  %v101_v45 = vld [vmem:[%s3554_s1 + $0xf0] sm:$0xff]  ;;  %v2458_v50 = vld [vmem:[%s3555_s4] ss:$0 sm:$0xff] }
  0x17   :  { %v102_v46 = vld [vmem:[%s3554_s1 + $0xf8] sm:$0xff]  ;;  %v133_v47 = vadd.f32 %v101_v45, %v69_v42  ;;  %v386_v52 = vld [vmem:[%s3556_s2 + $0x10] sm:$0xff]  ;;  %v384_v55 = vld [vmem:[%s3556_s2] sm:$0xff] }
  0x18   :  { %v148_v41 = vpack.c.bf16 %v130_v37, %v129_v36  ;;  %v149_v43 = vpack.c.bf16 %v132_v39, %v131_v38  ;;  %v134_v48 = vadd.f32 %v102_v46, %v70_v44  ;;  %v387_v58 = vld [vmem:[%s3556_s2 + $0x18] sm:$0xff]  ;;  %v385_v62 = vld [vmem:[%s3556_s2 + $0x8] sm:$0xff]  ;;  %v388_v7 = vld [vmem:[%s3556_s2 + $0x20] sm:$0xff] }
  0x19   :  { %v390_v14 = vld [vmem:[%s3556_s2 + $0x30] sm:$0xff]  ;;  %v389_v16 = vld [vmem:[%s3556_s2 + $0x28] sm:$0xff]  ;;  %v391_v22 = vld [vmem:[%s3556_s2 + $0x38] sm:$0xff] }
  0x1a   :  { %1942 = vmatmul.mubr.msk.bf16.gmra.mrb[8].mxu0 %vm174_vm0, %v140_v18  ;;  %1954 = vmatmul.mubr.msk.bf16.gmra.mrb[4].mxu1 %vm174_vm0, %v146_v24  ;;  %v150_v49 = vpack.c.bf16 %v134_v48, %v133_v47  ;;  %v392_v31 = vld [vmem:[%s3556_s2 + $0x40] sm:$0xff]  ;;  %v394_v37 = vld [vmem:[%s3556_s2 + $0x50] sm:$0xff]  ;;  %v393_v39 = vld [vmem:[%s3556_s2 + $0x48] sm:$0xff] }
  0x1b   :  { %1945 = vmatprep.mubr.msk.bf16.mxu0 %vm174_vm0, %v141_v20  ;;  %1957 = vmatprep.mubr.msk.bf16.mxu1 %vm174_vm0, %v147_v27  ;;  %v395_v46 = vld [vmem:[%s3556_s2 + $0x58] sm:$0xff] }
  0x22   :  { %1946 = vmatmul.mubr.msk.bf16.gmra.mrb[12].mxu0 %vm174_vm0, %v142_v40  ;;  %1958 = vmatmul.mubr.msk.bf16.gmra.mrb[8].mxu1 %vm174_vm0, %v148_v41 }
  0x23   :  { %1961 = vmatprep.mubr.msk.bf16.mxu1 %vm174_vm0, %v149_v43 }
  0x2a   :  { %1962 = vmatmul.mubr.msk.bf16.gmra.mrb[12].mxu1 %vm174_vm0, %v150_v49 }
  0xdd   :  { %v1935_v51 = vpop.f32.mrb[0].mxu0 }
  0xde   :  { %v266_v53 = vadd.f32 %v1935_v51, %v2458_v50  ;;  %v257_v54 = vpop.f32.mrb[1].mxu0 }
  0xdf   :  { %v258_v56 = vadd.f32 %v2458_v50, %v257_v54  ;;  %v1936_v57 = vpop.f32.mrb[2].mxu0 }
  0xe0   :  { %v2471_v59 = vadd.f32 %v386_v52, %v266_v53  ;;  %v269_v60 = vadd.f32 %v1936_v57, %v2458_v50  ;;  %v260_v61 = vpop.f32.mrb[3].mxu0 }
  0xe1   :  { %v2477_v63 = vadd.f32 %v384_v55, %v258_v56  ;;  %v261_v0 = vadd.f32 %v2458_v50, %v260_v61  ;;  %v396_v56 = vld [vmem:[%s3556_s2 + $0x60] sm:$0xff] }
  0xe2   :  { %v2480_v1 = vadd.f32 %v387_v58, %v269_v60  ;;  %v456_v2 = vsel %vm174_vm0, %v2471_v59, 0.0 }
  0xe3   :  { %v2484_v3 = vadd.f32 %v385_v62, %v261_v0  ;;  %457 = vadd.xlane.f32.xlu1 %v456_v2  ;;  %v450_v4 = vsel %vm174_vm0, %v2477_v63, 0.0  ;;  %v398_v0 = vld [vmem:[%s3556_s2 + $0x70] sm:$0xff] }
  0xe4   :  { %451 = vadd.xlane.f32.xlu0 %v450_v4  ;;  %v459_v8 = vsel %vm174_vm0, %v2480_v1, 0.0  ;;  %v397_v4 = vld [vmem:[%s3556_s2 + $0x68] sm:$0xff] }
  0xe5   :  { %v1939_v5 = vpop.f32.mrb[4].mxu0  ;;  %v453_v12 = vsel %vm174_vm0, %v2484_v3, 0.0  ;;  %v2497_v13 = vpop.f32.mrb[0].mxu1 }
  0xe6   :  { %v273_v6 = vpop.f32.mrb[5].mxu0  ;;  %v282_v9 = vadd.f32 %v1939_v5, %v2458_v50  ;;  %v321_v17 = vpop.f32.mrb[1].mxu1 }
  0xe7   :  { %v274_v10 = vadd.f32 %v2458_v50, %v273_v6  ;;  %460 = vadd.xlane.f32.xlu1 %v459_v8  ;;  %v1940_v11 = vpop.f32.mrb[6].mxu0  ;;  %v2509_v21 = vpop.f32.mrb[2].mxu1  ;;  %v322_v5 = vadd.f32 %v2458_v50, %v321_v17 }
  0xe8   :  { %v276_v15 = vpop.f32.mrb[7].mxu0  ;;  %454 = vadd.xlane.f32.xlu0 %v453_v12  ;;  %v285_v19 = vadd.f32 %v1940_v11, %v2458_v50  ;;  %v324_v23 = vpop.f32.mrb[3].mxu1  ;;  %v2514_v24 = vadd.f32 %v390_v14, %v282_v9  ;;  %v399_v12 = vld [vmem:[%s3556_s2 + $0x78] sm:$0xff]  ;;  %v400_v14 = vld [vmem:[%s3556_s2 + $0x80] sm:$0xff] }
  0xe9   :  { %v2505_v18 = vadd.f32 %v388_v7, %v274_v10  ;;  %v277_v20 = vadd.f32 %v2458_v50, %v276_v15 }
  0xea   :  { %v2520_v27 = vadd.f32 %v391_v22, %v285_v19  ;;  %v468_v35 = vsel %vm174_vm0, %v2514_v24, 0.0  ;;  %v401_v22 = vld [vmem:[%s3556_s2 + $0x88] sm:$0xff] }
  0xeb   :  { %v2516_v25 = vadd.f32 %v389_v16, %v277_v20  ;;  %v462_v26 = vsel %vm174_vm0, %v2505_v18, 0.0  ;;  %v325_v20 = vadd.f32 %v2458_v50, %v324_v23 }
  0xec   :  { %463 = vadd.xlane.f32.xlu0 %v462_v26  ;;  %v471_v44 = vsel %vm174_vm0, %v2520_v27, 0.0 }
  0xed   :  { %v1943_v28 = vpop.f32.mrb[8].mxu0  ;;  %v465_v29 = vsel %vm174_vm0, %v2516_v25, 0.0  ;;  %v2531_v36 = vpop.f32.mrb[4].mxu1 }
  0xee   :  { %v289_v30 = vpop.f32.mrb[9].mxu0  ;;  %466 = vadd.xlane.f32.xlu1 %v465_v29  ;;  %v298_v32 = vadd.f32 %v1943_v28, %v2458_v50  ;;  %v337_v40 = vpop.f32.mrb[5].mxu1  ;;  %v2602_v28 = vadd.f32 %v400_v14, %v322_v5 }
  0xef   :  { %v290_v33 = vadd.f32 %v2458_v50, %v289_v30  ;;  %v1944_v34 = vpop.f32.mrb[10].mxu0  ;;  %v2545_v45 = vpop.f32.mrb[6].mxu1  ;;  %v330_v30 = vadd.f32 %v2497_v13, %v2458_v50 }
  0xf0   :  { %v292_v38 = vpop.f32.mrb[11].mxu0  ;;  %469 = vadd.xlane.f32.xlu0 %v468_v35  ;;  %v301_v42 = vadd.f32 %v1944_v34, %v2458_v50  ;;  %v340_v47 = vpop.f32.mrb[7].mxu1  ;;  %v2550_v48 = vadd.f32 %v394_v37, %v298_v32  ;;  %3588 = vst [vmem:[#allocation6_spill] sm:$0xff] %v2602_v28  ;;  %v333_v35 = vadd.f32 %v2509_v21, %v2458_v50  ;;  %v498_v13 = vsel %vm174_vm0, %v2602_v28, 0.0 }
  0xf1   :  { %v2539_v41 = vadd.f32 %v392_v31, %v290_v33  ;;  %v293_v43 = vadd.f32 %v2458_v50, %v292_v38  ;;  %v2608_v31 = vadd.f32 %v401_v22, %v325_v20  ;;  %v402_v33 = vld [vmem:[%s3556_s2 + $0x90] sm:$0xff]  ;;  %v338_v38 = vadd.f32 %v2458_v50, %v337_v40  ;;  %v405_v40 = vld [vmem:[%s3556_s2 + $0xa8] sm:$0xff] }
  0xf2   :  { %472 = vadd.xlane.f32.xlu1 %v471_v44  ;;  %v2556_v52 = vadd.f32 %v395_v46, %v301_v42  ;;  %v480_v61 = vsel %vm174_vm0, %v2550_v48, 0.0  ;;  %v403_v42 = vld [vmem:[%s3556_s2 + $0x98] sm:$0xff]  ;;  %v2628_v21 = vadd.f32 %v402_v33, %v330_v30  ;;  %v412_v30 = vld [vmem:[%s3556_s2 + $0xe0] sm:$0xff] }
  0xf3   :  { %v2552_v49 = vadd.f32 %v393_v39, %v293_v43  ;;  %v474_v51 = vsel %vm174_vm0, %v2539_v41, 0.0  ;;  %3589 = vst [vmem:[#allocation7_spill] sm:$0xff] %v2608_v31  ;;  %v404_v43 = vld [vmem:[%s3556_s2 + $0xa0] sm:$0xff]  ;;  %v501_v46 = vsel %vm174_vm0, %v2608_v31, 0.0 }
  0xf4   :  { %475 = vadd.xlane.f32.xlu0 %v474_v51  ;;  %v483_v10 = vsel %vm174_vm0, %v2556_v52, 0.0  ;;  %3590 = vst [vmem:[#allocation8_spill] sm:$0xff] %v2628_v21  ;;  %v341_v51 = vadd.f32 %v2458_v50, %v340_v47  ;;  %v406_v47 = vld [vmem:[%s3556_s2 + $0xb0] sm:$0xff] }
  0xf5   :  { %v1947_v53 = vpop.f32.mrb[12].mxu0  ;;  %v477_v54 = vsel %vm174_vm0, %v2552_v49, 0.0  ;;  %v2567_v62 = vpop.f32.mrb[8].mxu1 }
  0xf6   :  { %v305_v55 = vpop.f32.mrb[13].mxu0  ;;  %478 = vadd.xlane.f32.xlu1 %v477_v54  ;;  %v314_v57 = vadd.f32 %v1947_v53, %v2458_v50  ;;  %v353_v6 = vpop.f32.mrb[9].mxu1  ;;  %v2636_v53 = vadd.f32 %v403_v42, %v333_v35  ;;  %v2638_v54 = vadd.f32 %v404_v43, %v338_v38  ;;  %v414_v43 = vld [vmem:[%s3556_s2 + $0xf0] sm:$0xff] }
  0xf7   :  { %v306_v58 = vadd.f32 %v2458_v50, %v305_v55  ;;  %v1948_v60 = vpop.f32.mrb[14].mxu0  ;;  %v2582_v11 = vpop.f32.mrb[10].mxu1  ;;  %v346_v55 = vadd.f32 %v2531_v36, %v2458_v50  ;;  %v354_v36 = vadd.f32 %v2458_v50, %v353_v6  ;;  %v409_v6 = vld [vmem:[%s3556_s2 + $0xc8] sm:$0xff] }
  0xf8   :  { %v308_v2 = vpop.f32.mrb[15].mxu0  ;;  %481 = vadd.xlane.f32.xlu0 %v480_v61  ;;  %v317_v8 = vadd.f32 %v1948_v60, %v2458_v50  ;;  %v356_v15 = vpop.f32.mrb[11].mxu1  ;;  %v2590_v16 = vadd.f32 %v398_v0, %v314_v57  ;;  %3591 = vst [vmem:[#allocation9_spill] sm:$0xff] %v2636_v53  ;;  %3592 = vst [vmem:[#allocation10_spill] sm:$0xff] %v2638_v54  ;;  %v504_v57 = vsel %vm174_vm0, %v2628_v21, 0.0  ;;  %v507_v60 = vsel %vm174_vm0, %v2636_v53, 0.0 }
  0xf9   :  { %v2576_v7 = vadd.f32 %v396_v56, %v306_v58  ;;  %v309_v9 = vadd.f32 %v2458_v50, %v308_v2  ;;  %v2642_v56 = vadd.f32 %v405_v40, %v341_v51  ;;  %v349_v58 = vadd.f32 %v2545_v45, %v2458_v50  ;;  %v407_v0 = vld [vmem:[%s3556_s2 + $0xb8] sm:$0xff]  ;;  %v408_v2 = vld [vmem:[%s3556_s2 + $0xc0] sm:$0xff] }
  0xfa   :  { %484 = vadd.xlane.f32.xlu1 %v483_v10  ;;  %3585 = vst [vmem:[#allocation3_spill] sm:$0xff] %v2590_v16  ;;  %v2600_v26 = vadd.f32 %v399_v12, %v317_v8  ;;  %v492_v23 = vsel %vm174_vm0, %v2590_v16, 0.0  ;;  %v510_v61 = vsel %vm174_vm0, %v2638_v54, 0.0  ;;  %v357_v5 = vadd.f32 %v2458_v50, %v356_v15  ;;  %v410_v15 = vld [vmem:[%s3556_s2 + $0xd0] sm:$0xff] }
  0xfb   :  { %3584 = vst [vmem:[#allocation2_spill] sm:$0xff] %v2576_v7  ;;  %v2592_v17 = vadd.f32 %v397_v4, %v309_v9  ;;  %v486_v19 = vsel %vm174_vm0, %v2576_v7, 0.0  ;;  %3593 = vst [vmem:[#allocation11_spill] sm:$0xff] %v2642_v56  ;;  %v2662_v4 = vadd.f32 %v406_v47, %v346_v55  ;;  %v513_v45 = vsel %vm174_vm0, %v2642_v56, 0.0  ;;  %v2047_v47 = vld [vmem:[%s3557_s7] sm:$0xff]  }
  0xfc   :  { %487 = vadd.xlane.f32.xlu0 %v486_v19  ;;  %3587 = vst [vmem:[#allocation5_spill] sm:$0xff] %v2600_v26  ;;  %v495_v37 = vsel %vm174_vm0, %v2600_v26, 0.0  ;;  %v2670_v8 = vadd.f32 %v407_v0, %v349_v58  ;;  %v2672_v9 = vadd.f32 %v408_v2, %v354_v36  ;;  %v362_v10 = vadd.f32 %v2567_v62, %v2458_v50 }
  0xfd   :  { %3586 = vst [vmem:[#allocation4_spill] sm:$0xff] %v2592_v17  ;;  %v489_v29 = vsel %vm174_vm0, %v2592_v17, 0.0  ;;  %v1963_v32 = vpop.f32.mrb[12].mxu1  ;;  %3594 = vst [vmem:[#allocation12_spill] sm:$0xff] %v2662_v4  ;;  %v2676_v12 = vadd.f32 %v409_v6, %v357_v5  ;;  %v516_v14 = vsel %vm174_vm0, %v2662_v4, 0.0  ;;  %v365_v19 = vadd.f32 %v2582_v11, %v2458_v50  ;;  %1965 = vmatprep.subr.bf16.mxu1 %v2047_v47 }
  0xfe   :  { %490 = vadd.xlane.f32.xlu1 %v489_v29  ;;  %v369_v34 = vpop.f32.mrb[13].mxu1  ;;  %3595 = vst [vmem:[#allocation13_spill] sm:$0xff] %v2670_v8  ;;  %3596 = vst [vmem:[#allocation14_spill] sm:$0xff] %v2672_v9  ;;  %v519_v20 = vsel %vm174_vm0, %v2670_v8, 0.0  ;;  %v522_v22 = vsel %vm174_vm0, %v2672_v9, 0.0  ;;  %v411_v29 = vld [vmem:[%s3556_s2 + $0xd8] sm:$0xff]  ;;  %1966 = vmatpush3.bf16.msra.mxu1 %v2047_v47 }
  0xff   :  { %v1964_v39 = vpop.f32.mrb[14].mxu1  ;;  %3597 = vst [vmem:[#allocation15_spill] sm:$0xff] %v2676_v12  ;;  %v370_v62 = vadd.f32 %v2458_v50, %v369_v34  ;;  %v525_v11 = vsel %vm174_vm0, %v2676_v12, 0.0  ;;  %v413_v34 = vld [vmem:[%s3556_s2 + $0xe8] sm:$0xff]  ;;  %v2704_v35 = vadd.f32 %v411_v29, %v365_v19 }
 0x100   :  { %493 = vadd.xlane.f32.xlu0 %v492_v23  ;;  %v372_v44 = vpop.f32.mrb[15].mxu1  ;;  %v2696_v23 = vadd.f32 %v410_v15, %v362_v10 }
 0x101   :  { %v373_v33 = vadd.f32 %v2458_v50, %v372_v44  ;;  %3599 = vst [vmem:[#allocation17_spill] sm:$0xff] %v2704_v35  ;;  %v381_v44 = vadd.f32 %v1964_v39, %v2458_v50 }
 0x102   :  { %496 = vadd.xlane.f32.xlu1 %v495_v37  ;;  %3598 = vst [vmem:[#allocation16_spill] sm:$0xff] %v2696_v23  ;;  %v2706_v37 = vadd.f32 %v412_v30, %v370_v62  ;;  %v528_v42 = vsel %vm174_vm0, %v2696_v23, 0.0 }
 0x103   :  { %v2709_v38 = vadd.f32 %v413_v34, %v373_v33 }
 0x104   :  { %499 = vadd.xlane.f32.xlu0 %v498_v13  ;;  %3600 = vst [vmem:[#allocation18_spill] sm:$0xff] %v2706_v37  ;;  %v378_v13 = vadd.f32 %v1963_v32, %v2458_v50  ;;  %v534_v51 = vsel %vm174_vm0, %v2706_v37, 0.0  ;;  %v415_v32 = vld [vmem:[%s3556_s2 + $0xf8] sm:$0xff] }
 0x105   :  { %3601 = vst [vmem:[#allocation19_spill] sm:$0xff] %v2709_v38  ;;  %v537_v55 = vsel %vm174_vm0, %v2709_v38, 0.0 }
 0x106   :  { %502 = vadd.xlane.f32.xlu1 %v501_v46  ;;  %v531_v46 = vsel %vm174_vm0, %v2704_v35, 0.0  ;;  %v2724_v40 = vadd.f32 %v414_v43, %v378_v13 }
 0x108   :  { %505 = vadd.xlane.f32.xlu0 %v504_v57  ;;  %3602 = vst [vmem:[#allocation20_spill] sm:$0xff] %v2724_v40  ;;  %v2728_v57 = vadd.f32 %v415_v32, %v381_v44  ;;  %v540_v50 = vsel %vm174_vm0, %v2724_v40, 0.0 }
 0x10a   :  { %508 = vadd.xlane.f32.xlu1 %v507_v60  ;;  %3603 = vst [vmem:[#allocation21_spill] sm:$0xff] %v2728_v57  ;;  %v543_v39 = vsel %vm174_vm0, %v2728_v57, 0.0 }
 0x10c   :  { %511 = vadd.xlane.f32.xlu0 %v510_v61 }
 0x10e   :  { %514 = vadd.xlane.f32.xlu1 %v513_v45 }
 0x110   :  { %517 = vadd.xlane.f32.xlu0 %v516_v14 }
 0x112   :  { %520 = vadd.xlane.f32.xlu1 %v519_v20 }
 0x114   :  { %523 = vadd.xlane.f32.xlu0 %v522_v22 }
 0x116   :  { %526 = vadd.xlane.f32.xlu1 %v525_v11 }
 0x118   :  { %529 = vadd.xlane.f32.xlu0 %v528_v42 }
 0x11a   :  { %532 = vadd.xlane.f32.xlu1 %v531_v46 }
 0x11c   :  { %535 = vadd.xlane.f32.xlu0 %v534_v51 }
 0x11e   :  { %538 = vadd.xlane.f32.xlu1 %v537_v55 }
 0x120   :  { %541 = vadd.xlane.f32.xlu0 %v540_v50 }
 0x122   :  { %544 = vadd.xlane.f32.xlu1 %v543_v39 }
 0x170   :  { %v458_v58 = vpop.xlane.xlu1 %457 }
 0x171   :  { %v549_v60 = vmul.f32 0.03125, %v458_v58  ;;  %v452_v61 = vpop.xlane.xlu0 %451 }
 0x172   :  { %v547_v36 = vmul.f32 0.03125, %v452_v61 }
 0x173   :  { %v2738_v0 = vsub.f32 %v2471_v59, %v549_v60 }
 0x174   :  { %v2741_v2 = vsub.f32 %v2477_v63, %v547_v36  ;;  %v461_v45 = vpop.xlane.xlu1 %460 }
 0x175   :  { %v550_v5 = vmul.f32 0.03125, %v461_v45  ;;  %v455_v6 = vpop.xlane.xlu0 %454  ;;  %v613_v22 = vmul.f32 %v2738_v0, %v2738_v0 }
 0x176   :  { %v548_v10 = vmul.f32 0.03125, %v455_v6  ;;  %v611_v14 = vmul.f32 %v2741_v2, %v2741_v2 }
 0x177   :  { %v2746_v15 = vsub.f32 %v2480_v1, %v550_v5  ;;  %v649_v42 = vsel %vm174_vm0, %v613_v22, 0.0 }
 0x178   :  { %v2749_v19 = vsub.f32 %v2484_v3, %v548_v10  ;;  %v643_v20 = vsel %vm174_vm0, %v611_v14, 0.0 }
 0x179   :  { %644 = vadd.xlane.f32.xlu0 %v643_v20  ;;  %v464_v62 = vpop.xlane.xlu0 %463  ;;  %v614_v33 = vmul.f32 %v2746_v15, %v2746_v15 }
 0x17a   :  { %v551_v29 = vmul.f32 0.03125, %v464_v62  ;;  %v612_v30 = vmul.f32 %v2749_v19, %v2749_v19 }
 0x17b   :  { %v467_v11 = vpop.xlane.xlu1 %466  ;;  %v652_v50 = vsel %vm174_vm0, %v614_v33, 0.0 }
 0x17c   :  { %v2759_v34 = vsub.f32 %v2505_v18, %v551_v29  ;;  %v552_v13 = vmul.f32 0.03125, %v467_v11  ;;  %v646_v43 = vsel %vm174_vm0, %v612_v30, 0.0 }
 0x17d   :  { %650 = vadd.xlane.f32.xlu0 %v649_v42  ;;  %647 = vadd.xlane.f32.xlu1 %v646_v43  ;;  %v470_v44 = vpop.xlane.xlu0 %469 }
 0x17e   :  { %v2764_v46 = vsub.f32 %v2516_v25, %v552_v13  ;;  %v553_v51 = vmul.f32 0.03125, %v470_v44  ;;  %v615_v32 = vmul.f32 %v2759_v34, %v2759_v34 }
 0x17f   :  { %v473_v55 = vpop.xlane.xlu1 %472 }
 0x180   :  { %v2770_v39 = vsub.f32 %v2514_v24, %v553_v51  ;;  %v554_v47 = vmul.f32 0.03125, %v473_v55  ;;  %v655_v58 = vsel %vm174_vm0, %v615_v32, 0.0  ;;  %v616_v60 = vmul.f32 %v2764_v46, %v2764_v46 }
 0x181   :  { %653 = vadd.xlane.f32.xlu1 %v652_v50  ;;  %656 = vadd.xlane.f32.xlu0 %v655_v58  ;;  %v476_v61 = vpop.xlane.xlu0 %475 }
 0x182   :  { %v2776_v36 = vsub.f32 %v2520_v27, %v554_v47  ;;  %v555_v45 = vmul.f32 0.03125, %v476_v61  ;;  %v617_v5 = vmul.f32 %v2770_v39, %v2770_v39  ;;  %v658_v10 = vsel %vm174_vm0, %v616_v60, 0.0 }
 0x183   :  { %v479_v6 = vpop.xlane.xlu1 %478 }
 0x184   :  { %v2782_v14 = vsub.f32 %v2539_v41, %v555_v45  ;;  %v556_v20 = vmul.f32 0.03125, %v479_v6  ;;  %v661_v22 = vsel %vm174_vm0, %v617_v5, 0.0  ;;  %v618_v62 = vmul.f32 %v2776_v36, %v2776_v36 }
 0x185   :  { %659 = vadd.xlane.f32.xlu1 %v658_v10  ;;  %662 = vadd.xlane.f32.xlu0 %v661_v22  ;;  %v482_v29 = vpop.xlane.xlu0 %481 }
 0x186   :  { %v2788_v30 = vsub.f32 %v2552_v49, %v556_v20  ;;  %v557_v11 = vmul.f32 0.03125, %v482_v29  ;;  %v619_v33 = vmul.f32 %v2782_v14, %v2782_v14  ;;  %v664_v42 = vsel %vm174_vm0, %v618_v62, 0.0 }
 0x187   :  { %v485_v13 = vpop.xlane.xlu1 %484 }
 0x188   :  { %v2794_v43 = vsub.f32 %v2550_v48, %v557_v11  ;;  %v558_v44 = vmul.f32 0.03125, %v485_v13  ;;  %v667_v51 = vsel %vm174_vm0, %v619_v33, 0.0  ;;  %v620_v32 = vmul.f32 %v2788_v30, %v2788_v30 }
 0x189   :  { %665 = vadd.xlane.f32.xlu1 %v664_v42  ;;  %668 = vadd.xlane.f32.xlu0 %v667_v51  ;;  %v488_v55 = vpop.xlane.xlu0 %487 }
 0x18a   :  { %v2800_v50 = vsub.f32 %v2556_v52, %v558_v44  ;;  %v559_v47 = vmul.f32 0.03125, %v488_v55  ;;  %v621_v58 = vmul.f32 %v2794_v43, %v2794_v43  ;;  %v670_v61 = vsel %vm174_vm0, %v620_v32, 0.0 }
 0x18b   :  { %v491_v60 = vpop.xlane.xlu1 %490 }
 0x18c   :  { %v2806_v45 = vsub.f32 %v2576_v7, %v559_v47  ;;  %v560_v5 = vmul.f32 0.03125, %v491_v60  ;;  %v673_v6 = vsel %vm174_vm0, %v621_v58, 0.0  ;;  %v622_v10 = vmul.f32 %v2800_v50, %v2800_v50 }
 0x18d   :  { %671 = vadd.xlane.f32.xlu1 %v670_v61  ;;  %674 = vadd.xlane.f32.xlu0 %v673_v6  ;;  %v494_v20 = vpop.xlane.xlu0 %493 }
 0x18e   :  { %v2812_v22 = vsub.f32 %v2592_v17, %v560_v5  ;;  %v561_v62 = vmul.f32 0.03125, %v494_v20  ;;  %v623_v29 = vmul.f32 %v2806_v45, %v2806_v45  ;;  %v676_v33 = vsel %vm174_vm0, %v622_v10, 0.0 }
 0x18f   :  { %v497_v11 = vpop.xlane.xlu1 %496 }
 0x190   :  { %v2818_v13 = vsub.f32 %v2590_v16, %v561_v62  ;;  %v562_v42 = vmul.f32 0.03125, %v497_v11  ;;  %v679_v44 = vsel %vm174_vm0, %v623_v29, 0.0  ;;  %v624_v51 = vmul.f32 %v2812_v22, %v2812_v22 }
 0x191   :  { %677 = vadd.xlane.f32.xlu1 %v676_v33  ;;  %680 = vadd.xlane.f32.xlu0 %v679_v44  ;;  %v500_v32 = vpop.xlane.xlu0 %499 }
 0x192   :  { %v2824_v55 = vsub.f32 %v2600_v26, %v562_v42  ;;  %v563_v47 = vmul.f32 0.03125, %v500_v32  ;;  %v625_v58 = vmul.f32 %v2818_v13, %v2818_v13  ;;  %v682_v61 = vsel %vm174_vm0, %v624_v51, 0.0 }
 0x193   :  { %v503_v60 = vpop.xlane.xlu1 %502 }
 0x194   :  { %v2830_v5 = vsub.f32 %v2602_v28, %v563_v47  ;;  %v564_v6 = vmul.f32 0.03125, %v503_v60  ;;  %v685_v10 = vsel %vm174_vm0, %v625_v58, 0.0  ;;  %v626_v20 = vmul.f32 %v2824_v55, %v2824_v55 }
 0x195   :  { %683 = vadd.xlane.f32.xlu1 %v682_v61  ;;  %686 = vadd.xlane.f32.xlu0 %v685_v10  ;;  %v506_v62 = vpop.xlane.xlu0 %505 }
 0x196   :  { %v2836_v29 = vsub.f32 %v2608_v31, %v564_v6  ;;  %v565_v11 = vmul.f32 0.03125, %v506_v62  ;;  %v627_v33 = vmul.f32 %v2830_v5, %v2830_v5  ;;  %v688_v44 = vsel %vm174_vm0, %v626_v20, 0.0 }
 0x197   :  { %v509_v42 = vpop.xlane.xlu1 %508 }
 0x198   :  { %v2842_v51 = vsub.f32 %v2628_v21, %v565_v11  ;;  %v566_v32 = vmul.f32 0.03125, %v509_v42  ;;  %v691_v47 = vsel %vm174_vm0, %v627_v33, 0.0  ;;  %v628_v58 = vmul.f32 %v2836_v29, %v2836_v29 }
 0x199   :  { %689 = vadd.xlane.f32.xlu1 %v688_v44  ;;  %692 = vadd.xlane.f32.xlu0 %v691_v47  ;;  %v512_v60 = vpop.xlane.xlu0 %511 }
 0x19a   :  { %v2848_v61 = vsub.f32 %v2636_v53, %v566_v32  ;;  %v567_v6 = vmul.f32 0.03125, %v512_v60  ;;  %v629_v10 = vmul.f32 %v2842_v51, %v2842_v51  ;;  %v694_v62 = vsel %vm174_vm0, %v628_v58, 0.0 }
 0x19b   :  { %v515_v20 = vpop.xlane.xlu1 %514 }
 0x19c   :  { %v2854_v11 = vsub.f32 %v2638_v54, %v567_v6  ;;  %v568_v33 = vmul.f32 0.03125, %v515_v20  ;;  %v697_v42 = vsel %vm174_vm0, %v629_v10, 0.0  ;;  %v630_v44 = vmul.f32 %v2848_v61, %v2848_v61 }
 0x19d   :  { %695 = vadd.xlane.f32.xlu1 %v694_v62  ;;  %698 = vadd.xlane.f32.xlu0 %v697_v42  ;;  %v518_v32 = vpop.xlane.xlu0 %517  ;;  %v2048_v42 = vld [vmem:[%s3557_s7 + $0x8] sm:$0xff]  }
 0x19e   :  { %v2860_v47 = vsub.f32 %v2642_v56, %v568_v33  ;;  %v569_v60 = vmul.f32 0.03125, %v518_v32  ;;  %v631_v31 = vmul.f32 %v2854_v11, %v2854_v11  ;;  %v700_v6 = vsel %vm174_vm0, %v630_v44, 0.0  ;;  %1967 = vmatprep.subr.bf16.mxu1 %v2048_v42 }
 0x19f   :  { %v521_v58 = vpop.xlane.xlu1 %520  ;;  %1968 = vmatpush3.bf16.msra.mxu1 %v2048_v42 }
 0x1a0   :  { %v2866_v20 = vsub.f32 %v2662_v4, %v569_v60  ;;  %v570_v10 = vmul.f32 0.03125, %v521_v58  ;;  %v703_v54 = vsel %vm174_vm0, %v631_v31, 0.0  ;;  %v632_v62 = vmul.f32 %v2860_v47, %v2860_v47 }
 0x1a1   :  { %701 = vadd.xlane.f32.xlu1 %v700_v6  ;;  %704 = vadd.xlane.f32.xlu0 %v703_v54  ;;  %v524_v33 = vpop.xlane.xlu0 %523 }
 0x1a2   :  { %v2875_v32 = vsub.f32 %v2670_v8, %v570_v10  ;;  %v571_v44 = vmul.f32 0.03125, %v524_v33  ;;  %v633_v60 = vmul.f32 %v2866_v20, %v2866_v20  ;;  %v706_v31 = vsel %vm174_vm0, %v632_v62, 0.0 }
 0x1a3   :  { %v527_v58 = vpop.xlane.xlu1 %526 }
 0x1a4   :  { %v2881_v56 = vsub.f32 %v2672_v9, %v571_v44  ;;  %v572_v54 = vmul.f32 0.03125, %v527_v58  ;;  %v709_v6 = vsel %vm174_vm0, %v633_v60, 0.0  ;;  %v634_v4 = vmul.f32 %v2875_v32, %v2875_v32 }
 0x1a5   :  { %707 = vadd.xlane.f32.xlu1 %v706_v31  ;;  %710 = vadd.xlane.f32.xlu0 %v709_v6  ;;  %v530_v10 = vpop.xlane.xlu0 %529 }
 0x1a6   :  { %v2887_v33 = vsub.f32 %v2676_v12, %v572_v54  ;;  %v573_v8 = vmul.f32 0.03125, %v530_v10  ;;  %v635_v62 = vmul.f32 %v2881_v56, %v2881_v56  ;;  %v712_v44 = vsel %vm174_vm0, %v634_v4, 0.0 }
 0x1a7   :  { %v533_v53 = vpop.xlane.xlu1 %532 }
 0x1a8   :  { %v2893_v58 = vsub.f32 %v2696_v23, %v573_v8  ;;  %v574_v60 = vmul.f32 0.03125, %v533_v53  ;;  %v715_v9 = vsel %vm174_vm0, %v635_v62, 0.0  ;;  %v636_v42 = vmul.f32 %v2887_v33, %v2887_v33 }
 0x1a9   :  { %713 = vadd.xlane.f32.xlu1 %v712_v44  ;;  %716 = vadd.xlane.f32.xlu0 %v715_v9  ;;  %v536_v31 = vpop.xlane.xlu0 %535 }
 0x1aa   :  { %v2899_v54 = vsub.f32 %v2704_v35, %v574_v60  ;;  %v575_v6 = vmul.f32 0.03125, %v536_v31  ;;  %v637_v10 = vmul.f32 %v2893_v58, %v2893_v58  ;;  %v718_v8 = vsel %vm174_vm0, %v636_v42, 0.0 }
 0x1ab   :  { %v539_v4 = vpop.xlane.xlu1 %538 }
 0x1ac   :  { %v2905_v53 = vsub.f32 %v2706_v37, %v575_v6  ;;  %v576_v62 = vmul.f32 0.03125, %v539_v4  ;;  %v721_v12 = vsel %vm174_vm0, %v637_v10, 0.0  ;;  %v638_v9 = vmul.f32 %v2899_v54, %v2899_v54 }
 0x1ad   :  { %719 = vadd.xlane.f32.xlu1 %v718_v8  ;;  %722 = vadd.xlane.f32.xlu0 %v721_v12  ;;  %v542_v44 = vpop.xlane.xlu0 %541 }
 0x1ae   :  { %v2911_v60 = vsub.f32 %v2709_v38, %v576_v62  ;;  %v577_v31 = vmul.f32 0.03125, %v542_v44  ;;  %v639_v35 = vmul.f32 %v2905_v53, %v2905_v53  ;;  %v724_v6 = vsel %vm174_vm0, %v638_v9, 0.0 }
 0x1af   :  { %v545_v42 = vpop.xlane.xlu1 %544 }
 0x1b0   :  { %v2917_v4 = vsub.f32 %v2724_v40, %v577_v31  ;;  %v578_v10 = vmul.f32 0.03125, %v545_v42  ;;  %v727_v37 = vsel %vm174_vm0, %v639_v35, 0.0  ;;  %v640_v12 = vmul.f32 %v2911_v60, %v2911_v60 }
 0x1b1   :  { %725 = vadd.xlane.f32.xlu1 %v724_v6  ;;  %728 = vadd.xlane.f32.xlu0 %v727_v37 }
 0x1b2   :  { %v2923_v8 = vsub.f32 %v2728_v57, %v578_v10  ;;  %v641_v62 = vmul.f32 %v2917_v4, %v2917_v4  ;;  %v730_v44 = vsel %vm174_vm0, %v640_v12, 0.0 }
 0x1b4   :  { %v733_v9 = vsel %vm174_vm0, %v641_v62, 0.0  ;;  %v642_v31 = vmul.f32 %v2923_v8, %v2923_v8 }
 0x1b5   :  { %731 = vadd.xlane.f32.xlu1 %v730_v44  ;;  %734 = vadd.xlane.f32.xlu0 %v733_v9 }
 0x1b6   :  { %v736_v35 = vsel %vm174_vm0, %v642_v31, 0.0 }
 0x1b9   :  { %737 = vadd.xlane.f32.xlu1 %v736_v35 }
 0x206   :  { %v645_v42 = vpop.xlane.xlu0 %644 }
 0x207   :  { %v739_v37 = vmul.f32 0.03125, %v645_v42 }
 0x209   :  { %v771_v6 = vadd.f32 1e-05, %v739_v37 }
 0x20a   :  { %v648_v10 = vpop.xlane.xlu1 %647  ;;  %v651_v38 = vpop.xlane.xlu0 %650 }
 0x20b   :  { %2053 = vrsqrt.f32 %v771_v6  ;;  %v740_v57 = vmul.f32 0.03125, %v648_v10  ;;  %v741_v40 = vmul.f32 0.03125, %v651_v38 }
 0x20d   :  { %v772_v23 = vadd.f32 1e-05, %v740_v57  ;;  %v773_v12 = vadd.f32 1e-05, %v741_v40 }
 0x20e   :  { %v654_v28 = vpop.xlane.xlu1 %653  ;;  %v657_v62 = vpop.xlane.xlu0 %656 }
 0x20f   :  { %2055 = vrsqrt.f32 %v772_v23  ;;  %v742_v21 = vmul.f32 0.03125, %v654_v28  ;;  %v743_v17 = vmul.f32 0.03125, %v657_v62  ;;  %v2936_v28 = vld [vmem:[%s3558_s5] ss:$0 sm:$0xff] }
 0x210   :  { %2057 = vrsqrt.f32 %v773_v12 }
 0x211   :  { %v774_v44 = vadd.f32 1e-05, %v742_v21  ;;  %v775_v9 = vadd.f32 1e-05, %v743_v17 }
 0x212   :  { %v660_v31 = vpop.xlane.xlu1 %659  ;;  %v663_v35 = vpop.xlane.xlu0 %662 }
 0x213   :  { %2059 = vrsqrt.f32 %v774_v44  ;;  %v744_v42 = vmul.f32 0.03125, %v660_v31  ;;  %v745_v37 = vmul.f32 0.03125, %v663_v35 }
 0x214   :  { %2061 = vrsqrt.f32 %v775_v9 }
 0x215   :  { %v2054_v26 = vpop.eup %2053  ;;  %v776_v6 = vadd.f32 1e-05, %v744_v42  ;;  %v777_v10 = vadd.f32 1e-05, %v745_v37 }
 0x216   :  { %v835_v38 = vmul.f32 %v2054_v26, %v2741_v2  ;;  %v666_v40 = vpop.xlane.xlu1 %665  ;;  %v669_v57 = vpop.xlane.xlu0 %668  ;;  %v2943_v2 = vld [vmem:[%s3559_s6] ss:$0 sm:$0xff] }
 0x217   :  { %2063 = vrsqrt.f32 %v776_v6  ;;  %v746_v17 = vmul.f32 0.03125, %v666_v40  ;;  %v747_v21 = vmul.f32 0.03125, %v669_v57 }
 0x218   :  { %2065 = vrsqrt.f32 %v777_v10  ;;  %v873_v26 = vmul.f32 %v2936_v28, %v835_v38 }
 0x219   :  { %v2056_v23 = vpop.eup %2055  ;;  %v778_v12 = vadd.f32 1e-05, %v746_v17  ;;  %v779_v62 = vadd.f32 1e-05, %v747_v21 }
 0x21a   :  { %v2058_v44 = vpop.eup %2057  ;;  %v836_v9 = vmul.f32 %v2056_v23, %v2749_v19  ;;  %v672_v31 = vpop.xlane.xlu1 %671  ;;  %v911_v16 = vadd.f32 %v2943_v2, %v873_v26 }
 0x21b   :  { %v675_v35 = vpop.xlane.xlu0 %674  ;;  %v837_v42 = vmul.f32 %v2058_v44, %v2738_v0  ;;  %2067 = vrsqrt.f32 %v778_v12  ;;  %v748_v37 = vmul.f32 0.03125, %v672_v31 }
 0x21c   :  { %v749_v6 = vmul.f32 0.03125, %v675_v35  ;;  %2069 = vrsqrt.f32 %v779_v62  ;;  %v874_v10 = vmul.f32 %v2936_v28, %v836_v9 }
 0x21d   :  { %v2060_v40 = vpop.eup %2059  ;;  %v875_v19 = vmul.f32 %v2936_v28, %v837_v42  ;;  %v780_v57 = vadd.f32 1e-05, %v748_v37 }
 0x21e   :  { %v781_v17 = vadd.f32 1e-05, %v749_v6  ;;  %v2062_v21 = vpop.eup %2061  ;;  %v838_v38 = vmul.f32 %v2060_v40, %v2746_v15  ;;  %v678_v23 = vpop.xlane.xlu1 %677  ;;  %v912_v0 = vadd.f32 %v2943_v2, %v874_v10 }
 0x21f   :  { %v681_v7 = vpop.xlane.xlu0 %680  ;;  %v839_v12 = vmul.f32 %v2062_v21, %v2759_v34  ;;  %2071 = vrsqrt.f32 %v780_v57  ;;  %v750_v62 = vmul.f32 0.03125, %v678_v23  ;;  %v913_v42 = vadd.f32 %v2943_v2, %v875_v19 }
 0x220   :  { %v876_v44 = vmul.f32 %v2936_v28, %v838_v38  ;;  %2073 = vrsqrt.f32 %v781_v17  ;;  %v751_v9 = vmul.f32 0.03125, %v681_v7  ;;  %v943_v31 = vpack.c.bf16 %v912_v0, %v911_v16 }
 0x221   :  { %v2064_v35 = vpop.eup %2063  ;;  %v782_v37 = vadd.f32 1e-05, %v750_v62  ;;  %v877_v57 = vmul.f32 %v2936_v28, %v839_v12 }
 0x222   :  { %v2066_v15 = vpop.eup %2065  ;;  %v914_v6 = vadd.f32 %v2943_v2, %v876_v44  ;;  %v840_v26 = vmul.f32 %v2064_v35, %v2764_v46  ;;  %v783_v40 = vadd.f32 1e-05, %v751_v9  ;;  %v684_v10 = vpop.xlane.xlu1 %683  ;;  %1969 = vmatprep.mubr.msk.bf16.mxu1 %vm174_vm0, %v943_v31 }
 0x223   :  { %v687_v34 = vpop.xlane.xlu0 %686  ;;  %v841_v17 = vmul.f32 %v2066_v15, %v2770_v39  ;;  %2075 = vrsqrt.f32 %v782_v37  ;;  %v752_v7 = vmul.f32 0.03125, %v684_v10  ;;  %v915_v12 = vadd.f32 %v2943_v2, %v877_v57 }
 0x224   :  { %v753_v16 = vmul.f32 0.03125, %v687_v34  ;;  %2077 = vrsqrt.f32 %v783_v40  ;;  %v944_v19 = vpack.c.bf16 %v914_v6, %v913_v42  ;;  %v878_v21 = vmul.f32 %v2936_v28, %v840_v26 }
 0x225   :  { %v2068_v38 = vpop.eup %2067  ;;  %v784_v23 = vadd.f32 1e-05, %v752_v7  ;;  %v879_v31 = vmul.f32 %v2936_v28, %v841_v17 }
 0x226   :  { %v785_v0 = vadd.f32 1e-05, %v753_v16  ;;  %v2070_v46 = vpop.eup %2069  ;;  %v842_v62 = vmul.f32 %v2068_v38, %v2776_v36  ;;  %v690_v44 = vpop.xlane.xlu1 %689  ;;  %1970 = vmatmul.mubr.msk.bf16.vlgmr.msra.gmra.mrb[16].mxu1 %vm174_vm0, %v944_v19  ;;  %v916_v39 = vadd.f32 %v2943_v2, %v878_v21 }
 0x227   :  { %v693_v9 = vpop.xlane.xlu0 %692  ;;  %v843_v35 = vmul.f32 %v2070_v46, %v2782_v14  ;;  %2079 = vrsqrt.f32 %v784_v23  ;;  %v754_v42 = vmul.f32 0.03125, %v690_v44  ;;  %v917_v17 = vadd.f32 %v2943_v2, %v879_v31 }
 0x228   :  { %v755_v37 = vmul.f32 0.03125, %v693_v9  ;;  %2081 = vrsqrt.f32 %v785_v0  ;;  %v945_v15 = vpack.c.bf16 %v916_v39, %v915_v12  ;;  %v880_v6 = vmul.f32 %v2936_v28, %v842_v62 }
 0x229   :  { %v2072_v36 = vpop.eup %2071  ;;  %v786_v26 = vadd.f32 1e-05, %v754_v42  ;;  %v881_v16 = vmul.f32 %v2936_v28, %v843_v35 }
 0x22a   :  { %v787_v40 = vadd.f32 1e-05, %v755_v37  ;;  %v2074_v10 = vpop.eup %2073  ;;  %v844_v34 = vmul.f32 %v2072_v36, %v2788_v30  ;;  %v696_v57 = vpop.xlane.xlu1 %695  ;;  %1973 = vmatprep.mubr.msk.bf16.mxu1 %vm174_vm0, %v945_v15  ;;  %v918_v14 = vadd.f32 %v2943_v2, %v880_v6 }
 0x22b   :  { %v699_v7 = vpop.xlane.xlu0 %698  ;;  %v845_v19 = vmul.f32 %v2074_v10, %v2794_v43  ;;  %2083 = vrsqrt.f32 %v786_v26  ;;  %v756_v21 = vmul.f32 0.03125, %v696_v57  ;;  %v919_v31 = vadd.f32 %v2943_v2, %v881_v16 }
 0x22c   :  { %v757_v38 = vmul.f32 0.03125, %v699_v7  ;;  %2085 = vrsqrt.f32 %v787_v40  ;;  %v946_v23 = vpack.c.bf16 %v918_v14, %v917_v17  ;;  %v882_v0 = vmul.f32 %v2936_v28, %v844_v34 }
 0x22d   :  { %v2076_v30 = vpop.eup %2075  ;;  %v788_v46 = vadd.f32 1e-05, %v756_v21  ;;  %v883_v35 = vmul.f32 %v2936_v28, %v845_v19 }
 0x22e   :  { %v789_v62 = vadd.f32 1e-05, %v757_v38  ;;  %v2078_v44 = vpop.eup %2077  ;;  %v846_v9 = vmul.f32 %v2076_v30, %v2800_v50  ;;  %v702_v12 = vpop.xlane.xlu1 %701  ;;  %1974 = vmatmul.mubr.msk.bf16.gmra.mrb[20].mxu1 %vm174_vm0, %v946_v23  ;;  %v920_v43 = vadd.f32 %v2943_v2, %v882_v0 }
 0x22f   :  { %v705_v39 = vpop.xlane.xlu0 %704  ;;  %v847_v42 = vmul.f32 %v2078_v44, %v2806_v45  ;;  %2087 = vrsqrt.f32 %v788_v46  ;;  %v758_v37 = vmul.f32 0.03125, %v702_v12  ;;  %v921_v17 = vadd.f32 %v2943_v2, %v883_v35 }
 0x230   :  { %v759_v15 = vmul.f32 0.03125, %v705_v39  ;;  %2089 = vrsqrt.f32 %v789_v62  ;;  %v947_v6 = vpack.c.bf16 %v920_v43, %v919_v31  ;;  %v884_v36 = vmul.f32 %v2936_v28, %v846_v9 }
 0x231   :  { %v2080_v50 = vpop.eup %2079  ;;  %v790_v26 = vadd.f32 1e-05, %v758_v37  ;;  %v885_v14 = vmul.f32 %v2936_v28, %v847_v42 }
 0x232   :  { %v791_v40 = vadd.f32 1e-05, %v759_v15  ;;  %v2082_v10 = vpop.eup %2081  ;;  %v848_v34 = vmul.f32 %v2080_v50, %v2812_v22  ;;  %v708_v57 = vpop.xlane.xlu1 %707  ;;  %1977 = vmatprep.mubr.msk.bf16.mxu1 %vm174_vm0, %v947_v6  ;;  %v922_v45 = vadd.f32 %v2943_v2, %v884_v36 }
 0x233   :  { %v711_v7 = vpop.xlane.xlu0 %710  ;;  %v849_v16 = vmul.f32 %v2082_v10, %v2818_v13  ;;  %2091 = vrsqrt.f32 %v790_v26  ;;  %v760_v19 = vmul.f32 0.03125, %v708_v57  ;;  %v923_v12 = vadd.f32 %v2943_v2, %v885_v14 }
 0x234   :  { %v761_v21 = vmul.f32 0.03125, %v711_v7  ;;  %2093 = vrsqrt.f32 %v791_v40  ;;  %v948_v38 = vpack.c.bf16 %v922_v45, %v921_v17  ;;  %v886_v23 = vmul.f32 %v2936_v28, %v848_v34 }
 0x235   :  { %v2084_v22 = vpop.eup %2083  ;;  %v792_v0 = vadd.f32 1e-05, %v760_v19  ;;  %v887_v39 = vmul.f32 %v2936_v28, %v849_v16 }
 0x236   :  { %v793_v30 = vadd.f32 1e-05, %v761_v21  ;;  %v2086_v46 = vpop.eup %2085  ;;  %v850_v62 = vmul.f32 %v2084_v22, %v2824_v55  ;;  %v714_v44 = vpop.xlane.xlu1 %713  ;;  %1978 = vmatmul.mubr.msk.bf16.gmra.mrb[24].mxu1 %vm174_vm0, %v948_v38  ;;  %v924_v13 = vadd.f32 %v2943_v2, %v886_v23 }
 0x237   :  { %v717_v9 = vpop.xlane.xlu0 %716  ;;  %v851_v31 = vmul.f32 %v2086_v46, %v2830_v5  ;;  %2095 = vrsqrt.f32 %v792_v0  ;;  %v762_v43 = vmul.f32 0.03125, %v714_v44  ;;  %v925_v10 = vadd.f32 %v2943_v2, %v887_v39 }
 0x238   :  { %v763_v35 = vmul.f32 0.03125, %v717_v9  ;;  %2097 = vrsqrt.f32 %v793_v30  ;;  %v949_v42 = vpack.c.bf16 %v924_v13, %v923_v12  ;;  %v888_v37 = vmul.f32 %v2936_v28, %v850_v62 }
 0x239   :  { %v2088_v55 = vpop.eup %2087  ;;  %v794_v15 = vadd.f32 1e-05, %v762_v43  ;;  %v889_v34 = vmul.f32 %v2936_v28, %v851_v31 }
 0x23a   :  { %v795_v6 = vadd.f32 1e-05, %v763_v35  ;;  %v2090_v36 = vpop.eup %2089  ;;  %v852_v50 = vmul.f32 %v2088_v55, %v2836_v29  ;;  %v720_v26 = vpop.xlane.xlu1 %719  ;;  %1981 = vmatprep.mubr.msk.bf16.mxu1 %vm174_vm0, %v949_v42  ;;  %v926_v5 = vadd.f32 %v2943_v2, %v888_v37 }
 0x23b   :  { %v723_v40 = vpop.xlane.xlu0 %722  ;;  %v853_v57 = vmul.f32 %v2090_v36, %v2842_v51  ;;  %2099 = vrsqrt.f32 %v794_v15  ;;  %v764_v7 = vmul.f32 0.03125, %v720_v26  ;;  %v927_v0 = vadd.f32 %v2943_v2, %v889_v34 }
 0x23c   :  { %v765_v17 = vmul.f32 0.03125, %v723_v40  ;;  %2101 = vrsqrt.f32 %v795_v6  ;;  %v950_v45 = vpack.c.bf16 %v926_v5, %v925_v10  ;;  %v890_v14 = vmul.f32 %v2936_v28, %v852_v50 }
 0x23d   :  { %v2092_v29 = vpop.eup %2091  ;;  %v796_v16 = vadd.f32 1e-05, %v764_v7  ;;  %v891_v30 = vmul.f32 %v2936_v28, %v853_v57 }
 0x23e   :  { %v797_v19 = vadd.f32 1e-05, %v765_v17  ;;  %v2094_v21 = vpop.eup %2093  ;;  %v854_v38 = vmul.f32 %v2092_v29, %v2848_v61  ;;  %v726_v23 = vpop.xlane.xlu1 %725  ;;  %1982 = vmatmul.mubr.msk.bf16.gmra.mrb[28].mxu1 %vm174_vm0, %v950_v45  ;;  %v928_v51 = vadd.f32 %v2943_v2, %v890_v14 }
 0x23f   :  { %v729_v22 = vpop.xlane.xlu0 %728  ;;  %v855_v46 = vmul.f32 %v2094_v21, %v2854_v11  ;;  %2103 = vrsqrt.f32 %v796_v16  ;;  %v766_v62 = vmul.f32 0.03125, %v726_v23  ;;  %v929_v37 = vadd.f32 %v2943_v2, %v891_v30 }
 0x240   :  { %v767_v44 = vmul.f32 0.03125, %v729_v22  ;;  %2105 = vrsqrt.f32 %v797_v19  ;;  %v951_v9 = vpack.c.bf16 %v928_v51, %v927_v0  ;;  %v892_v12 = vmul.f32 %v2936_v28, %v854_v38 }
 0x241   :  { %v2096_v61 = vpop.eup %2095  ;;  %v798_v13 = vadd.f32 1e-05, %v766_v62  ;;  %v893_v55 = vmul.f32 %v2936_v28, %v855_v46 }
 0x242   :  { %v799_v39 = vadd.f32 1e-05, %v767_v44  ;;  %v2098_v31 = vpop.eup %2097  ;;  %v856_v43 = vmul.f32 %v2096_v61, %v2860_v47  ;;  %v732_v35 = vpop.xlane.xlu1 %731  ;;  %1985 = vmatprep.mubr.msk.bf16.mxu1 %vm174_vm0, %v951_v9  ;;  %v930_v11 = vadd.f32 %v2943_v2, %v892_v12 }
 0x243   :  { %v735_v42 = vpop.xlane.xlu0 %734  ;;  %v857_v15 = vmul.f32 %v2098_v31, %v2866_v20  ;;  %2107 = vrsqrt.f32 %v798_v13  ;;  %v768_v6 = vmul.f32 0.03125, %v732_v35  ;;  %v931_v7 = vadd.f32 %v2943_v2, %v893_v55 }
 0x244   :  { %v769_v36 = vmul.f32 0.03125, %v735_v42  ;;  %2109 = vrsqrt.f32 %v799_v39  ;;  %v952_v50 = vpack.c.bf16 %v930_v11, %v929_v37  ;;  %v894_v26 = vmul.f32 %v2936_v28, %v856_v43 }
 0x245   :  { %v2100_v47 = vpop.eup %2099  ;;  %v800_v40 = vadd.f32 1e-05, %v768_v6  ;;  %v895_v17 = vmul.f32 %v2936_v28, %v857_v15 }
 0x246   :  { %v801_v10 = vadd.f32 1e-05, %v769_v36  ;;  %v2102_v5 = vpop.eup %2101  ;;  %v858_v34 = vmul.f32 %v2100_v47, %v2875_v32  ;;  %v738_v57 = vpop.xlane.xlu1 %737  ;;  %1986 = vmatmul.mubr.msk.bf16.gmra.mrb[32].mxu1 %vm174_vm0, %v952_v50  ;;  %v932_v20 = vadd.f32 %v2943_v2, %v894_v26 }
 0x247   :  { %v859_v45 = vmul.f32 %v2102_v5, %v2881_v56  ;;  %2111 = vrsqrt.f32 %v800_v40  ;;  %v770_v14 = vmul.f32 0.03125, %v738_v57  ;;  %v933_v23 = vadd.f32 %v2943_v2, %v895_v17  ;;  %v3069_v5 = vld [vmem:[%s3561_s8] ss:$0 sm:$0xff] }
 0x248   :  { %2113 = vrsqrt.f32 %v801_v10  ;;  %v953_v29 = vpack.c.bf16 %v932_v20, %v931_v7  ;;  %v896_v16 = vmul.f32 %v2936_v28, %v858_v34  ;;  %v2050_v10 = vld [vmem:[%s3560_s9 + $0x8] sm:$0xff]  }
 0x249   :  { %v2104_v19 = vpop.eup %2103  ;;  %v802_v21 = vadd.f32 1e-05, %v770_v14  ;;  %v897_v0 = vmul.f32 %v2936_v28, %v859_v45 }
 0x24a   :  { %v2106_v32 = vpop.eup %2105  ;;  %v860_v38 = vmul.f32 %v2104_v19, %v2887_v33  ;;  %1989 = vmatprep.mubr.msk.bf16.mxu1 %vm174_vm0, %v953_v29  ;;  %v934_v22 = vadd.f32 %v2943_v2, %v896_v16 }
 0x24b   :  { %v861_v56 = vmul.f32 %v2106_v32, %v2893_v58  ;;  %2115 = vrsqrt.f32 %v802_v21  ;;  %v935_v33 = vadd.f32 %v2943_v2, %v897_v0 }
 0x24c   :  { %v954_v51 = vpack.c.bf16 %v934_v22, %v933_v23  ;;  %v898_v30 = vmul.f32 %v2936_v28, %v860_v38 }
 0x24d   :  { %v2108_v46 = vpop.eup %2107  ;;  %v899_v12 = vmul.f32 %v2936_v28, %v861_v56 }
 0x24e   :  { %v2110_v62 = vpop.eup %2109  ;;  %v862_v44 = vmul.f32 %v2108_v46, %v2899_v54  ;;  %1990 = vmatmul.mubr.msk.bf16.gmra.mrb[36].mxu1 %vm174_vm0, %v954_v51  ;;  %v936_v9 = vadd.f32 %v2943_v2, %v898_v30 }
 0x24f   :  { %v863_v61 = vmul.f32 %v2110_v62, %v2905_v53  ;;  %v937_v54 = vadd.f32 %v2943_v2, %v899_v12 }
 0x250   :  { %v955_v13 = vpack.c.bf16 %v936_v9, %v935_v33  ;;  %v900_v58 = vmul.f32 %v2936_v28, %v862_v44 }
 0x251   :  { %v2112_v39 = vpop.eup %2111  ;;  %v901_v42 = vmul.f32 %v2936_v28, %v863_v61 }
 0x252   :  { %v2114_v31 = vpop.eup %2113  ;;  %v864_v43 = vmul.f32 %v2112_v39, %v2911_v60  ;;  %1993 = vmatprep.mubr.msk.bf16.mxu1 %vm174_vm0, %v955_v13  ;;  %v938_v35 = vadd.f32 %v2943_v2, %v900_v58 }
 0x253   :  { %v865_v37 = vmul.f32 %v2114_v31, %v2917_v4  ;;  %v939_v60 = vadd.f32 %v2943_v2, %v901_v42 }
 0x254   :  { %v956_v11 = vpack.c.bf16 %v938_v35, %v937_v54  ;;  %v902_v53 = vmul.f32 %v2936_v28, %v864_v43 }
 0x255   :  { %v2116_v55 = vpop.eup %2115  ;;  %v903_v36 = vmul.f32 %v2936_v28, %v865_v37 }
 0x256   :  { %v866_v15 = vmul.f32 %v2116_v55, %v2923_v8  ;;  %1994 = vmatmul.mubr.msk.bf16.gmra.mrb[40].mxu1 %vm174_vm0, %v956_v11  ;;  %v940_v6 = vadd.f32 %v2943_v2, %v902_v53  ;;  %v2049_v8 = vld [vmem:[%s3560_s9] sm:$0xff]  }
 0x257   :  { %v941_v4 = vadd.f32 %v2943_v2, %v903_v36  ;;  %2001 = vmatprep.subr.bf16.mxu0 %v2049_v8 }
 0x258   :  { %v957_v50 = vpack.c.bf16 %v940_v6, %v939_v60  ;;  %v904_v26 = vmul.f32 %v2936_v28, %v866_v15  ;;  %2002 = vmatpush3.bf16.msra.mxu0 %v2049_v8  ;;  %v2051_v28 = vld [vmem:[%s3560_s9 + $0x10] sm:$0xff]  }
 0x259   :  { %2003 = vmatprep.subr.bf16.mxu0 %v2050_v10 }
 0x25a   :  { %1997 = vmatprep.mubr.msk.bf16.mxu1 %vm174_vm0, %v957_v50  ;;  %v942_v47 = vadd.f32 %v2943_v2, %v904_v26  ;;  %v2052_v2 = vld [vmem:[%s3560_s9 + $0x18] sm:$0xff]  }
 0x25c   :  { %v958_v40 = vpack.c.bf16 %v942_v47, %v941_v4  ;;  %2004 = vmatpush3.bf16.msra.mxu0 %v2050_v10 }
 0x25d   :  { %2005 = vmatprep.subr.bf16.mxu0 %v2051_v28 }
 0x25e   :  { %1998 = vmatmul.mubr.msk.bf16.gmra.mrb[44].mxu1 %vm174_vm0, %v958_v40 }
 0x260   :  { %2006 = vmatpush3.bf16.msra.mxu0 %v2051_v28 }
 0x261   :  { %2007 = vmatprep.subr.bf16.mxu0 %v2052_v2 }
 0x264   :  { %2008 = vmatpush3.bf16.msra.mxu0 %v2052_v2 }
 0x2f9   :  { %v1971_v34 = vpop.f32.mrb[16].mxu1 }
 0x2fa   :  { %v1073_v57 = vadd.f32 %v1971_v34, %v3069_v5  ;;  %v1064_v7 = vpop.f32.mrb[17].mxu1 }
 0x2fb   :  { %v1065_v20 = vadd.f32 %v3069_v5, %v1064_v7  ;;  %v1972_v17 = vpop.f32.mrb[18].mxu1 }
 0x2fc   :  { %v1225_v45 = vmul.f32 0.044715, %v1073_v57  ;;  %v1076_v14 = vadd.f32 %v1972_v17, %v3069_v5  ;;  %v1067_v29 = vpop.f32.mrb[19].mxu1  ;;  %v3075_v56 = vmul.f32 0.5, %v1073_v57 }
 0x2fd   :  { %v1223_v16 = vmul.f32 0.044715, %v1065_v20  ;;  %v1068_v19 = vadd.f32 %v3069_v5, %v1067_v29  ;;  %v3077_v62 = vmul.f32 0.5, %v1065_v20 }
 0x2fe   :  { %v1257_v21 = vmul.f32 %v1225_v45, %v1073_v57  ;;  %v1226_v32 = vmul.f32 0.044715, %v1076_v14  ;;  %v3079_v33 = vmul.f32 0.5, %v1076_v14 }
 0x2ff   :  { %v1255_v38 = vmul.f32 %v1223_v16, %v1065_v20  ;;  %v1224_v23 = vmul.f32 0.044715, %v1068_v19  ;;  %v3083_v43 = vmul.f32 0.5, %v1068_v19 }
 0x300   :  { %v1289_v22 = vmul.f32 %v1257_v21, %v1073_v57  ;;  %v1258_v0 = vmul.f32 %v1226_v32, %v1076_v14 }
 0x301   :  { %v1287_v51 = vmul.f32 %v1255_v38, %v1065_v20  ;;  %v1256_v30 = vmul.f32 %v1224_v23, %v1068_v19  ;;  %v1975_v46 = vpop.f32.mrb[20].mxu1 }
 0x302   :  { %v1321_v44 = vadd.f32 %v1289_v22, %v1073_v57  ;;  %v1290_v9 = vmul.f32 %v1258_v0, %v1076_v14  ;;  %v1089_v12 = vadd.f32 %v1975_v46, %v3069_v5  ;;  %v1080_v61 = vpop.f32.mrb[21].mxu1 }
 0x303   :  { %v1319_v13 = vadd.f32 %v1287_v51, %v1065_v20  ;;  %v1288_v58 = vmul.f32 %v1256_v30, %v1068_v19  ;;  %v1081_v39 = vadd.f32 %v3069_v5, %v1080_v61  ;;  %v1976_v31 = vpop.f32.mrb[22].mxu1 }
 0x304   :  { %v1353_v54 = vmul.f32 0.7978846, %v1321_v44  ;;  %v1322_v35 = vadd.f32 %v1290_v9, %v1076_v14  ;;  %v1229_v42 = vmul.f32 0.044715, %v1089_v12  ;;  %v1092_v37 = vadd.f32 %v1976_v31, %v3069_v5  ;;  %v1083_v11 = vpop.f32.mrb[23].mxu1 }
 0x305   :  { %v1351_v53 = vmul.f32 0.7978846, %v1319_v13  ;;  %v1320_v55 = vadd.f32 %v1288_v58, %v1068_v19  ;;  %v1227_v15 = vmul.f32 0.044715, %v1081_v39  ;;  %v1084_v60 = vadd.f32 %v3069_v5, %v1083_v11 }
 0x306   :  { %2117 = vtanh.f32 %v1353_v54  ;;  %v1354_v6 = vmul.f32 0.7978846, %v1322_v35  ;;  %v1261_v36 = vmul.f32 %v1229_v42, %v1089_v12  ;;  %v1230_v50 = vmul.f32 0.044715, %v1092_v37 }
 0x307   :  { %2119 = vtanh.f32 %v1351_v53  ;;  %v1352_v26 = vmul.f32 0.7978846, %v1320_v55  ;;  %v1259_v4 = vmul.f32 %v1227_v15, %v1081_v39  ;;  %v1228_v47 = vmul.f32 0.044715, %v1084_v60 }
 0x308   :  { %2121 = vtanh.f32 %v1354_v6  ;;  %v1293_v40 = vmul.f32 %v1261_v36, %v1089_v12  ;;  %v1262_v8 = vmul.f32 %v1230_v50, %v1092_v37  ;;  %v3087_v10 = vmul.f32 0.5, %v1081_v39 }
 0x309   :  { %2123 = vtanh.f32 %v1352_v26  ;;  %v1291_v28 = vmul.f32 %v1259_v4, %v1081_v39  ;;  %v1260_v2 = vmul.f32 %v1228_v47, %v1084_v60  ;;  %v1979_v34 = vpop.f32.mrb[24].mxu1  ;;  %v3089_v57 = vmul.f32 0.5, %v1084_v60 }
 0x30a   :  { %v1325_v7 = vadd.f32 %v1293_v40, %v1089_v12  ;;  %v1294_v20 = vmul.f32 %v1262_v8, %v1092_v37  ;;  %v3092_v17 = vadd.f32 %v1979_v34, %v3069_v5  ;;  %v1096_v45 = vpop.f32.mrb[25].mxu1  ;;  %v3094_v14 = vmul.f32 0.5, %v1089_v12 }
 0x30b   :  { %v1323_v29 = vadd.f32 %v1291_v28, %v1081_v39  ;;  %v1292_v16 = vmul.f32 %v1260_v2, %v1084_v60  ;;  %v1097_v19 = vadd.f32 %v3069_v5, %v1096_v45  ;;  %v1980_v21 = vpop.f32.mrb[26].mxu1  ;;  %v3097_v32 = vmul.f32 0.5, %v1092_v37 }
 0x30c   :  { %v1357_v38 = vmul.f32 0.7978846, %v1325_v7  ;;  %v1326_v23 = vadd.f32 %v1294_v20, %v1092_v37  ;;  %v1233_v22 = vmul.f32 0.044715, %v3092_v17  ;;  %v3101_v0 = vadd.f32 %v1980_v21, %v3069_v5  ;;  %v1099_v51 = vpop.f32.mrb[27].mxu1 }
 0x30d   :  { %v1355_v30 = vmul.f32 0.7978846, %v1323_v29  ;;  %v1324_v46 = vadd.f32 %v1292_v16, %v1084_v60  ;;  %v1231_v44 = vmul.f32 0.044715, %v1097_v19  ;;  %v3104_v9 = vadd.f32 %v3069_v5, %v1099_v51 }
 0x30e   :  { %2125 = vtanh.f32 %v1357_v38  ;;  %v1358_v12 = vmul.f32 0.7978846, %v1326_v23  ;;  %v1265_v61 = vmul.f32 %v1233_v22, %v3092_v17  ;;  %v1234_v13 = vmul.f32 0.044715, %v3101_v0 }
 0x30f   :  { %2127 = vtanh.f32 %v1355_v30  ;;  %v1356_v58 = vmul.f32 0.7978846, %v1324_v46  ;;  %v1263_v39 = vmul.f32 %v1231_v44, %v1097_v19  ;;  %v1232_v31 = vmul.f32 0.044715, %v3104_v9 }
 0x310   :  { %v2118_v54 = vpop.eup %2117  ;;  %2129 = vtanh.f32 %v1358_v12  ;;  %v1297_v35 = vmul.f32 %v1265_v61, %v3092_v17  ;;  %v1266_v42 = vmul.f32 %v1234_v13, %v3101_v0  ;;  %v3111_v37 = vmul.f32 0.5, %v1097_v19 }
 0x311   :  { %v2120_v11 = vpop.eup %2119  ;;  %v1417_v53 = vadd.f32 1.0, %v2118_v54  ;;  %2131 = vtanh.f32 %v1356_v58  ;;  %v1295_v55 = vmul.f32 %v1263_v39, %v1097_v19  ;;  %v1264_v15 = vmul.f32 %v1232_v31, %v3104_v9  ;;  %v1983_v60 = vpop.f32.mrb[28].mxu1 }
 0x312   :  { %v2122_v6 = vpop.eup %2121  ;;  %v1329_v36 = vadd.f32 %v1297_v35, %v3092_v17  ;;  %v1298_v50 = vmul.f32 %v1266_v42, %v3101_v0  ;;  %v3117_v26 = vadd.f32 %v1983_v60, %v3069_v5  ;;  %v1112_v4 = vpop.f32.mrb[29].mxu1  ;;  %v1415_v47 = vadd.f32 1.0, %v2120_v11 }
 0x313   :  { %v2124_v40 = vpop.eup %2123  ;;  %v3120_v8 = vmul.f32 %v1417_v53, %v3075_v56  ;;  %v1418_v28 = vadd.f32 1.0, %v2122_v6  ;;  %v1327_v2 = vadd.f32 %v1295_v55, %v1097_v19  ;;  %v1296_v34 = vmul.f32 %v1264_v15, %v3104_v9  ;;  %v1984_v7 = vpop.f32.mrb[30].mxu1 }
 0x314   :  { %v1361_v20 = vmul.f32 0.7978846, %v1329_v36  ;;  %v1330_v45 = vadd.f32 %v1298_v50, %v3101_v0  ;;  %v1237_v29 = vmul.f32 0.044715, %v3117_v26  ;;  %v3126_v16 = vadd.f32 %v3069_v5, %v1112_v4  ;;  %v1115_v21 = vpop.f32.mrb[31].mxu1 }
 0x315   :  { %v1450_v38 = vmul.f32 %v1418_v28, %v3079_v33  ;;  %v1359_v23 = vmul.f32 0.7978846, %v1327_v2  ;;  %v1328_v56 = vadd.f32 %v1296_v34, %v3104_v9  ;;  %v3131_v19 = vadd.f32 %v1984_v7, %v3069_v5 }
 0x316   :  { %2133 = vtanh.f32 %v1361_v20  ;;  %v1362_v22 = vmul.f32 0.7978846, %v1330_v45  ;;  %v1269_v51 = vmul.f32 %v1237_v29, %v3117_v26  ;;  %v1235_v30 = vmul.f32 0.044715, %v3126_v16 }
 0x317   :  { %v1480_v46 = vpack.c.bf16 %v1450_v38, %v3120_v8  ;;  %2135 = vtanh.f32 %v1359_v23  ;;  %v1360_v44 = vmul.f32 0.7978846, %v1328_v56  ;;  %v1238_v12 = vmul.f32 0.044715, %v3131_v19 }
 0x318   :  { %v3137_v61 = vpop.eup %2125  ;;  %2137 = vtanh.f32 %v1362_v22  ;;  %v1301_v33 = vmul.f32 %v1269_v51, %v3117_v26  ;;  %v1267_v13 = vmul.f32 %v1235_v30, %v3126_v16  ;;  %v3142_v58 = vadd.f32 %v3069_v5, %v1115_v21 }
 0x319   :  { %v2128_v39 = vpop.eup %2127  ;;  %2139 = vtanh.f32 %v1360_v44  ;;  %v1270_v31 = vmul.f32 %v1238_v12, %v3131_v19  ;;  %v1987_v54 = vpop.f32.mrb[32].mxu1  ;;  %v1416_v35 = vadd.f32 1.0, %v2124_v40  ;;  %v1447_v42 = vmul.f32 %v1415_v47, %v3077_v62 }
 0x31a   :  { %v3146_v11 = vpop.eup %2129  ;;  %v1333_v53 = vadd.f32 %v1301_v33, %v3117_v26  ;;  %v1299_v55 = vmul.f32 %v1267_v13, %v3126_v16  ;;  %v1236_v15 = vmul.f32 0.044715, %v3142_v58  ;;  %v3152_v60 = vadd.f32 %v1987_v54, %v3069_v5  ;;  %v1128_v6 = vpop.f32.mrb[33].mxu1 }
 0x31b   :  { %v2132_v36 = vpop.eup %2131  ;;  %v1302_v50 = vmul.f32 %v1270_v31, %v3131_v19  ;;  %v3156_v4 = vadd.f32 %v3069_v5, %v1128_v6  ;;  %v1448_v62 = vmul.f32 %v1416_v35, %v3083_v43  ;;  %v1988_v47 = vpop.f32.mrb[34].mxu1  ;;  %v1419_v40 = vadd.f32 1.0, %v2128_v39 }
 0x31c   :  { %v1365_v8 = vmul.f32 0.7978846, %v1333_v53  ;;  %v1331_v28 = vadd.f32 %v1299_v55, %v3126_v16  ;;  %v1268_v2 = vmul.f32 %v1236_v15, %v3142_v58  ;;  %v1241_v34 = vmul.f32 0.044715, %v3152_v60  ;;  %v1131_v7 = vpop.f32.mrb[35].mxu1 }
 0x31d   :  { %v1334_v20 = vadd.f32 %v1302_v50, %v3131_v19  ;;  %v1239_v45 = vmul.f32 0.044715, %v3156_v4  ;;  %v1479_v29 = vpack.c.bf16 %v1448_v62, %v1447_v42  ;;  %v3165_v21 = vadd.f32 %v1988_v47, %v3069_v5 }
 0x31e   :  { %2141 = vtanh.f32 %v1365_v8  ;;  %v1363_v43 = vmul.f32 0.7978846, %v1331_v28  ;;  %v1300_v38 = vmul.f32 %v1268_v2, %v3142_v58  ;;  %v1273_v23 = vmul.f32 %v1241_v34, %v3152_v60 }
 0x31f   :  { %v1366_v56 = vmul.f32 0.7978846, %v1334_v20  ;;  %v1271_v22 = vmul.f32 %v1239_v45, %v3156_v4  ;;  %2009 = vmatprep.mubr.msk.bf16.mxu0 %vm1534_vm1, %v1479_v29  ;;  %v1242_v51 = vmul.f32 0.044715, %v3165_v21  ;;  %v3173_v30 = vadd.f32 %v3069_v5, %v1131_v7 }
 0x320   :  { %v3175_v44 = vpop.eup %2133  ;;  %2143 = vtanh.f32 %v1363_v43  ;;  %v1332_v12 = vadd.f32 %v1300_v38, %v3142_v58  ;;  %v1305_v33 = vmul.f32 %v1273_v23, %v3152_v60  ;;  %2010 = vmatmul.mubr.msk.bf16.vlgmr.msra.gmra.mrb[16].mxu0 %vm1534_vm1, %v1480_v46  ;;  %v1420_v13 = vadd.f32 1.0, %v2132_v36 }
 0x321   :  { %v3180_v39 = vpop.eup %2135  ;;  %2145 = vtanh.f32 %v1366_v56  ;;  %v1303_v31 = vmul.f32 %v1271_v22, %v3156_v4  ;;  %v1274_v54 = vmul.f32 %v1242_v51, %v3165_v21  ;;  %v1240_v35 = vmul.f32 0.044715, %v3173_v30  ;;  %v1991_v42 = vpop.f32.mrb[36].mxu1 }
 0x322   :  { %v3185_v53 = vpop.eup %2137  ;;  %v1364_v55 = vmul.f32 0.7978846, %v1332_v12  ;;  %v1337_v15 = vadd.f32 %v1305_v33, %v3152_v60  ;;  %v3189_v6 = vadd.f32 %v1991_v42, %v3069_v5  ;;  %v1144_v46 = vpop.f32.mrb[37].mxu1  ;;  %v1451_v36 = vmul.f32 %v1419_v40, %v3087_v10 }
 0x323   :  { %v3192_v50 = vpop.eup %2139  ;;  %v1335_v62 = vadd.f32 %v1303_v31, %v3156_v4  ;;  %v1306_v47 = vmul.f32 %v1274_v54, %v3165_v21  ;;  %v1272_v8 = vmul.f32 %v1240_v35, %v3173_v30  ;;  %v3198_v28 = vadd.f32 %v3069_v5, %v1144_v46  ;;  %v1992_v2 = vpop.f32.mrb[38].mxu1 }
 0x324   :  { %2147 = vtanh.f32 %v1364_v55  ;;  %v1369_v34 = vmul.f32 0.7978846, %v1337_v15  ;;  %v1245_v7 = vmul.f32 0.044715, %v3189_v6  ;;  %v1452_v20 = vmul.f32 %v1420_v13, %v3089_v57  ;;  %v1147_v45 = vpop.f32.mrb[39].mxu1 }
 0x325   :  { %v1367_v10 = vmul.f32 0.7978846, %v1335_v62  ;;  %v1338_v40 = vadd.f32 %v1306_v47, %v3165_v21  ;;  %v1304_v29 = vmul.f32 %v1272_v8, %v3173_v30  ;;  %v1243_v43 = vmul.f32 0.044715, %v3198_v28 }
 0x326   :  { %2149 = vtanh.f32 %v1369_v34  ;;  %v1277_v38 = vmul.f32 %v1245_v7, %v3189_v6  ;;  %v1481_v23 = vpack.c.bf16 %v1452_v20, %v1451_v36  ;;  %v3207_v56 = vadd.f32 %v1992_v2, %v3069_v5 }
 0x327   :  { %2151 = vtanh.f32 %v1367_v10  ;;  %v1370_v22 = vmul.f32 0.7978846, %v1338_v40  ;;  %v1336_v51 = vadd.f32 %v1304_v29, %v3173_v30  ;;  %v1275_v57 = vmul.f32 %v1243_v43, %v3198_v28 }
 0x328   :  { %v3211_v12 = vpop.eup %2141  ;;  %v1309_v33 = vmul.f32 %v1277_v38, %v3189_v6  ;;  %2013 = vmatprep.mubr.msk.bf16.mxu0 %vm1534_vm1, %v1481_v23  ;;  %v1246_v13 = vmul.f32 0.044715, %v3207_v56  ;;  %v1421_v31 = vadd.f32 1.0, %v3137_v61  ;;  %v1422_v54 = vadd.f32 1.0, %v3146_v11 }
 0x329   :  { %2153 = vtanh.f32 %v1370_v22  ;;  %v1368_v35 = vmul.f32 0.7978846, %v1336_v51  ;;  %v1307_v42 = vmul.f32 %v1275_v57, %v3198_v28  ;;  %v3220_v55 = vadd.f32 %v3069_v5, %v1147_v45  ;;  %v1995_v15 = vpop.f32.mrb[40].mxu1 }
 0x32a   :  { %v3222_v46 = vpop.eup %2143  ;;  %v1341_v36 = vadd.f32 %v1309_v33, %v3189_v6  ;;  %v1278_v62 = vmul.f32 %v1246_v13, %v3207_v56  ;;  %v1453_v47 = vmul.f32 %v1421_v31, %v3094_v14  ;;  %v1454_v61 = vmul.f32 %v1422_v54, %v3097_v32  ;;  %v1160_v8 = vpop.f32.mrb[41].mxu1 }
 0x32b   :  { %v3228_v11 = vpop.eup %2145  ;;  %2155 = vtanh.f32 %v1368_v35  ;;  %v1339_v2 = vadd.f32 %v1307_v42, %v3198_v28  ;;  %v1244_v34 = vmul.f32 0.044715, %v3220_v55  ;;  %v3233_v7 = vadd.f32 %v1995_v15, %v3069_v5  ;;  %v1996_v20 = vpop.f32.mrb[42].mxu1 }
 0x32c   :  { %v1373_v45 = vmul.f32 0.7978846, %v1341_v36  ;;  %v1310_v10 = vmul.f32 %v1278_v62, %v3207_v56  ;;  %v1482_v40 = vpack.c.bf16 %v1454_v61, %v1453_v47  ;;  %v3237_v14 = vadd.f32 %v3069_v5, %v1160_v8  ;;  %v1163_v32 = vpop.f32.mrb[43].mxu1 }
 0x32d   :  { %v1371_v29 = vmul.f32 0.7978846, %v1339_v2  ;;  %v1276_v43 = vmul.f32 %v1244_v34, %v3220_v55  ;;  %v1249_v38 = vmul.f32 0.044715, %v3233_v7  ;;  %v1200_v23 = vmul.f32 0.5, %v3104_v9 }
 0x32e   :  { %v3242_v22 = vpop.eup %2147  ;;  %2157 = vtanh.f32 %v1373_v45  ;;  %v1342_v51 = vadd.f32 %v1310_v10, %v3207_v56  ;;  %2014 = vmatmul.mubr.msk.bf16.gmra.mrb[20].mxu0 %vm1534_vm1, %v1482_v40  ;;  %v1247_v57 = vmul.f32 0.044715, %v3237_v14  ;;  %v1423_v33 = vadd.f32 1.0, %v3180_v39 }
 0x32f   :  { %2159 = vtanh.f32 %v1371_v29  ;;  %v1308_v13 = vmul.f32 %v1276_v43, %v3220_v55  ;;  %v1281_v31 = vmul.f32 %v1249_v38, %v3233_v7  ;;  %v1424_v54 = vadd.f32 1.0, %v3192_v50 }
 0x330   :  { %v3251_v35 = vpop.eup %2149  ;;  %v1374_v9 = vmul.f32 0.7978846, %v1342_v51  ;;  %v1279_v42 = vmul.f32 %v1247_v57, %v3237_v14  ;;  %v1455_v15 = vmul.f32 %v1423_v33, %v3111_v37  ;;  %v3256_v36 = vadd.f32 %v1996_v20, %v3069_v5 }
 0x331   :  { %v3258_v62 = vpop.eup %2151  ;;  %v1340_v39 = vadd.f32 %v1308_v13, %v3220_v55  ;;  %v1313_v47 = vmul.f32 %v1281_v31, %v3233_v7  ;;  %v1456_v61 = vmul.f32 %v1424_v54, %v1200_v23  ;;  %v1201_v8 = vmul.f32 0.5, %v3092_v17  ;;  %v1999_v50 = vpop.f32.mrb[44].mxu1 }
 0x332   :  { %2161 = vtanh.f32 %v1374_v9  ;;  %v1311_v2 = vmul.f32 %v1279_v42, %v3237_v14  ;;  %v1250_v34 = vmul.f32 0.044715, %v3256_v36  ;;  %v1202_v37 = vmul.f32 0.5, %v3101_v0  ;;  %v1176_v45 = vpop.f32.mrb[45].mxu1 }
 0x333   :  { %v3266_v20 = vpop.eup %2153  ;;  %v1372_v10 = vmul.f32 0.7978846, %v1340_v39  ;;  %v1345_v40 = vadd.f32 %v1313_v47, %v3233_v7  ;;  %v1483_v29 = vpack.c.bf16 %v1456_v61, %v1455_v15  ;;  %v1425_v43 = vadd.f32 1.0, %v3175_v44  ;;  %v2000_v38 = vpop.f32.mrb[46].mxu1 }
 0x334   :  { %v1343_v17 = vadd.f32 %v1311_v2, %v3237_v14  ;;  %v1282_v23 = vmul.f32 %v1250_v34, %v3256_v36  ;;  %v1426_v51 = vadd.f32 1.0, %v3185_v53  ;;  %v3274_v57 = vadd.f32 %v3069_v5, %v1163_v32  ;;  %v1179_v0 = vpop.f32.mrb[47].mxu1 }
 0x335   :  { %v3276_v33 = vpop.eup %2155  ;;  %2163 = vtanh.f32 %v1372_v10  ;;  %v1377_v13 = vmul.f32 0.7978846, %v1345_v40  ;;  %2017 = vmatprep.mubr.msk.bf16.mxu0 %vm1534_vm1, %v1483_v29  ;;  %v1457_v31 = vmul.f32 %v1425_v43, %v1201_v8  ;;  %v3280_v44 = vadd.f32 %v1999_v50, %v3069_v5 }
 0x336   :  { %v1375_v54 = vmul.f32 0.7978846, %v1343_v17  ;;  %v1314_v9 = vmul.f32 %v1282_v23, %v3256_v36  ;;  %v1458_v42 = vmul.f32 %v1426_v51, %v1202_v37  ;;  %v1248_v53 = vmul.f32 0.044715, %v3274_v57 }
 0x337   :  { %2165 = vtanh.f32 %v1377_v13  ;;  %v1253_v32 = vmul.f32 0.044715, %v3280_v44  ;;  %v3286_v15 = vadd.f32 %v3069_v5, %v1176_v45  ;;  %v1203_v39 = vmul.f32 0.5, %v3126_v16 }
 0x338   :  { %v3289_v47 = vpop.eup %2157  ;;  %2167 = vtanh.f32 %v1375_v54  ;;  %v1346_v61 = vadd.f32 %v1314_v9, %v3256_v36  ;;  %v1484_v8 = vpack.c.bf16 %v1458_v42, %v1457_v31  ;;  %v1280_v50 = vmul.f32 %v1248_v53, %v3274_v57 }
 0x339   :  { %v2160_v2 = vpop.eup %2159  ;;  %v1285_v34 = vmul.f32 %v1253_v32, %v3280_v44  ;;  %v1251_v37 = vmul.f32 0.044715, %v3286_v15  ;;  %v1204_v10 = vmul.f32 0.5, %v3142_v58  ;;  %v1427_v45 = vadd.f32 1.0, %v3222_v46 }
 0x33a   :  { %v1378_v40 = vmul.f32 0.7978846, %v1346_v61  ;;  %2018 = vmatmul.mubr.msk.bf16.gmra.mrb[24].mxu0 %vm1534_vm1, %v1484_v8  ;;  %v1312_v16 = vmul.f32 %v1280_v50, %v3274_v57  ;;  %v1428_v29 = vadd.f32 1.0, %v3242_v22  ;;  %v3301_v43 = vadd.f32 %v2000_v38, %v3069_v5 }
 0x33b   :  { %v1317_v17 = vmul.f32 %v1285_v34, %v3280_v44  ;;  %v1283_v23 = vmul.f32 %v1251_v37, %v3286_v15  ;;  %v1459_v51 = vmul.f32 %v1427_v45, %v1203_v39  ;;  %v1205_v13 = vmul.f32 0.5, %v3117_v26 }
 0x33c   :  { %v2162_v58 = vpop.eup %2161  ;;  %2169 = vtanh.f32 %v1378_v40  ;;  %v1344_v46 = vadd.f32 %v1312_v16, %v3274_v57  ;;  %v1460_v31 = vmul.f32 %v1428_v29, %v1204_v10  ;;  %v1254_v54 = vmul.f32 0.044715, %v3301_v43 }
 0x33d   :  { %v1349_v9 = vadd.f32 %v1317_v17, %v3280_v44  ;;  %v1315_v22 = vmul.f32 %v1283_v23, %v3286_v15  ;;  %v1206_v38 = vmul.f32 0.5, %v3131_v19  ;;  %v1429_v42 = vadd.f32 1.0, %v3211_v12 }
 0x33e   :  { %v1376_v53 = vmul.f32 0.7978846, %v1344_v46  ;;  %v1485_v32 = vpack.c.bf16 %v1460_v31, %v1459_v51  ;;  %v1286_v39 = vmul.f32 %v1254_v54, %v3301_v43  ;;  %v1430_v26 = vadd.f32 1.0, %v3228_v11 }
 0x33f   :  { %v2164_v61 = vpop.eup %2163  ;;  %v1381_v8 = vmul.f32 0.7978846, %v1349_v9  ;;  %v1347_v50 = vadd.f32 %v1315_v22, %v3286_v15  ;;  %v1461_v34 = vmul.f32 %v1429_v42, %v1205_v13  ;;  %v3316_v37 = vadd.f32 %v3069_v5, %v1179_v0 }
 0x340   :  { %2171 = vtanh.f32 %v1376_v53  ;;  %2021 = vmatprep.mubr.msk.bf16.mxu0 %vm1534_vm1, %v1485_v32  ;;  %v1318_v19 = vmul.f32 %v1286_v39, %v3301_v43  ;;  %v1462_v12 = vmul.f32 %v1430_v26, %v1206_v38  ;;  %v1207_v10 = vmul.f32 0.5, %v3156_v4 }
 0x341   :  { %v2166_v45 = vpop.eup %2165  ;;  %2173 = vtanh.f32 %v1381_v8  ;;  %v1379_v40 = vmul.f32 0.7978846, %v1347_v50  ;;  %v1252_v11 = vmul.f32 0.044715, %v3316_v37  ;;  %v1208_v16 = vmul.f32 0.5, %v3173_v30 }
 0x342   :  { %v2168_v29 = vpop.eup %2167  ;;  %v1350_v17 = vadd.f32 %v1318_v19, %v3301_v43  ;;  %v1486_v5 = vpack.c.bf16 %v1462_v12, %v1461_v34  ;;  %v1431_v0 = vadd.f32 1.0, %v3258_v62  ;;  %v1432_v23 = vadd.f32 1.0, %v3276_v33 }
 0x343   :  { %2175 = vtanh.f32 %v1379_v40  ;;  %v1284_v51 = vmul.f32 %v1252_v11, %v3316_v37  ;;  %v1209_v4 = vmul.f32 0.5, %v3152_v60  ;;  %v1433_v30 = vadd.f32 1.0, %v3251_v35 }
 0x344   :  { %v1382_v13 = vmul.f32 0.7978846, %v1350_v17  ;;  %2022 = vmatmul.mubr.msk.bf16.gmra.mrb[28].mxu0 %vm1534_vm1, %v1486_v5  ;;  %v1463_v46 = vmul.f32 %v1431_v0, %v1207_v10  ;;  %v1464_v31 = vmul.f32 %v1432_v23, %v1208_v16  ;;  %v1210_v9 = vmul.f32 0.5, %v3165_v21 }
 0x345   :  { %v1316_v54 = vmul.f32 %v1284_v51, %v3316_v37  ;;  %v1434_v62 = vadd.f32 1.0, %v3266_v20  ;;  %v1211_v33 = vmul.f32 0.5, %v3198_v28  ;;  %v1212_v60 = vmul.f32 0.5, %v3220_v55 }
 0x346   :  { %v2170_v22 = vpop.eup %2169  ;;  %2177 = vtanh.f32 %v1382_v13  ;;  %v1487_v38 = vpack.c.bf16 %v1464_v31, %v1463_v46  ;;  %v1435_v42 = vadd.f32 1.0, %v2160_v2  ;;  %v1465_v32 = vmul.f32 %v1433_v30, %v1209_v4 }
 0x347   :  { %v1348_v53 = vadd.f32 %v1316_v54, %v3316_v37  ;;  %v1466_v39 = vmul.f32 %v1434_v62, %v1210_v9  ;;  %v1436_v26 = vadd.f32 1.0, %v2164_v61  ;;  %v1213_v35 = vmul.f32 0.5, %v3189_v6 }
 0x348   :  { %2025 = vmatprep.mubr.msk.bf16.mxu0 %vm1534_vm1, %v1487_v38  ;;  %v1214_v21 = vmul.f32 0.5, %v3207_v56  ;;  %v1437_v20 = vadd.f32 1.0, %v3289_v47  ;;  %v1438_v28 = vadd.f32 1.0, %v2162_v58  ;;  %v1467_v34 = vmul.f32 %v1435_v42, %v1211_v33 }
 0x349   :  { %v1380_v8 = vmul.f32 0.7978846, %v1348_v53  ;;  %v1488_v50 = vpack.c.bf16 %v1466_v39, %v1465_v32  ;;  %v1468_v19 = vmul.f32 %v1436_v26, %v1212_v60  ;;  %v1215_v10 = vmul.f32 0.5, %v3237_v14 }
 0x34a   :  { %v2172_v55 = vpop.eup %2171  ;;  %v1469_v2 = vmul.f32 %v1437_v20, %v1213_v35  ;;  %v1470_v12 = vmul.f32 %v1438_v28, %v1214_v21  ;;  %v1439_v40 = vadd.f32 1.0, %v2168_v29  ;;  %v1216_v6 = vmul.f32 0.5, %v3274_v57 }
 0x34b   :  { %v2174_v61 = vpop.eup %2173  ;;  %2179 = vtanh.f32 %v1380_v8  ;;  %v1489_v11 = vpack.c.bf16 %v1468_v19, %v1467_v34  ;;  %v1440_v16 = vadd.f32 1.0, %v2172_v55  ;;  %v1217_v47 = vmul.f32 0.5, %v3233_v7 }
 0x34c   :  { %2026 = vmatmul.mubr.msk.bf16.gmra.mrb[32].mxu0 %vm1534_vm1, %v1488_v50  ;;  %v1490_v56 = vpack.c.bf16 %v1470_v12, %v1469_v2  ;;  %v1441_v58 = vadd.f32 1.0, %v2166_v45  ;;  %v1471_v5 = vmul.f32 %v1439_v40, %v1215_v10  ;;  %v1218_v14 = vmul.f32 0.5, %v3256_v36 }
 0x34d   :  { %v2176_v17 = vpop.eup %2175  ;;  %2029 = vmatprep.mubr.msk.bf16.mxu0 %vm1534_vm1, %v1489_v11  ;;  %v1472_v0 = vmul.f32 %v1440_v16, %v1216_v6  ;;  %v1442_v29 = vadd.f32 1.0, %v2170_v22  ;;  %v1445_v13 = vadd.f32 1.0, %v2174_v61  ;;  %v1221_v31 = vmul.f32 0.5, %v3280_v44 }
 0x34e   :  { %v1473_v51 = vmul.f32 %v1441_v58, %v1217_v47  ;;  %v1222_v30 = vmul.f32 0.5, %v3301_v43  ;;  %v1443_v9 = vadd.f32 1.0, %v2176_v17  ;;  %v1219_v33 = vmul.f32 0.5, %v3286_v15  ;;  %v3358_v43 = vld [vmem:[%s3562_s10] ss:$0 sm:$0xff] }
 0x34f   :  { %v1491_v23 = vpack.c.bf16 %v1472_v0, %v1471_v5  ;;  %v1474_v4 = vmul.f32 %v1442_v29, %v1218_v14  ;;  %v1477_v45 = vmul.f32 %v1445_v13, %v1221_v31  ;;  %v1220_v22 = vmul.f32 0.5, %v3316_v37  ;;  %v3604_v29 = vld [vmem:[#allocation3_spill] sm:$0xff] }
 0x350   :  { %v2178_v57 = vpop.eup %2177  ;;  %v1475_v60 = vmul.f32 %v1443_v9, %v1219_v33  ;;  %v3608_v33 = vld [vmem:[#allocation8_spill] sm:$0xff] }
 0x351   :  { %v1492_v46 = vpack.c.bf16 %v1474_v4, %v1473_v51  ;;  %v1446_v7 = vadd.f32 1.0, %v2178_v57  ;;  %v3605_v4 = vld [vmem:[#allocation2_spill] sm:$0xff] }
 0x353   :  { %v1478_v54 = vmul.f32 %v1446_v7, %v1222_v30  ;;  %v3607_v30 = vld [vmem:[#allocation4_spill] sm:$0xff] }
 0x354   :  { %2030 = vmatmul.mubr.msk.bf16.gmra.mrb[36].mxu0 %vm1534_vm1, %v1490_v56 }
 0x355   :  { %v2180_v62 = vpop.eup %2179  ;;  %2033 = vmatprep.mubr.msk.bf16.mxu0 %vm1534_vm1, %v1491_v23  ;;  %v1494_v36 = vpack.c.bf16 %v1478_v54, %v1477_v45 }
 0x356   :  { %v1444_v38 = vadd.f32 1.0, %v2180_v62 }
 0x358   :  { %v1476_v42 = vmul.f32 %v1444_v38, %v1220_v22 }
 0x35a   :  { %v1493_v44 = vpack.c.bf16 %v1476_v42, %v1475_v60  ;;  %v3609_v42 = vld [vmem:[#allocation6_spill] sm:$0xff] }
 0x35c   :  { %2034 = vmatmul.mubr.msk.bf16.gmra.mrb[40].mxu0 %vm1534_vm1, %v1492_v46  ;;  %v3606_v46 = vld [vmem:[#allocation5_spill] sm:$0xff] }
 0x35d   :  { %2037 = vmatprep.mubr.msk.bf16.mxu0 %vm1534_vm1, %v1493_v44 }
 0x364   :  { %2038 = vmatmul.mubr.msk.bf16.gmra.mrb[44].mxu0 %vm1534_vm1, %v1494_v36 }
 0x3f3   :  { %v2011_v53 = vpop.f32.mrb[16].mxu0 }
 0x3f4   :  { %v1626_v15 = vadd.f32 %v2011_v53, %v3358_v43  ;;  %v1617_v32 = vpop.f32.mrb[17].mxu0 }
 0x3f5   :  { %v1618_v37 = vadd.f32 %v3358_v43, %v1617_v32  ;;  %v2012_v39 = vpop.f32.mrb[18].mxu0 }
 0x3f6   :  { %v1746_v26 = vadd.f32 %v1626_v15, %v2471_v59  ;;  %v1629_v35 = vadd.f32 %v2012_v39, %v3358_v43  ;;  %v1620_v21 = vpop.f32.mrb[19].mxu0  ;;  %v3610_v15 = vld [vmem:[#allocation9_spill] sm:$0xff] }
 0x3f7   :  { %v1744_v20 = vadd.f32 %v1618_v37, %v2477_v63  ;;  %v1621_v28 = vadd.f32 %v3358_v43, %v1620_v21  ;;  %v3611_v37 = vld [vmem:[#allocation7_spill] sm:$0xff] }
 0x3f8   :  { %1778 = vst.msk [vmem:[%s3563_s11 + $0x10] sm:$0xff] %vm174_vm0, %v1746_v26  ;;  %v1747_v8 = vadd.f32 %v1629_v35, %v2480_v1 }
 0x3f9   :  { %1776 = vst.msk [vmem:[%s3563_s11] sm:$0xff] %vm174_vm0, %v1744_v20  ;;  %v1745_v59 = vadd.f32 %v1621_v28, %v2484_v3 }
 0x3fa   :  { %1779 = vst.msk [vmem:[%s3563_s11 + $0x18] sm:$0xff] %vm174_vm0, %v1747_v8  ;;  %v3612_v8 = vld [vmem:[#allocation12_spill] sm:$0xff] }
 0x3fb   :  { %1777 = vst.msk [vmem:[%s3563_s11 + $0x8] sm:$0xff] %vm174_vm0, %v1745_v59 }
 0x401   :  { %v2015_v63 = vpop.f32.mrb[20].mxu0 }
 0x402   :  { %v1642_v1 = vadd.f32 %v2015_v63, %v3358_v43  ;;  %v1633_v50 = vpop.f32.mrb[21].mxu0 }
 0x403   :  { %v1634_v34 = vadd.f32 %v3358_v43, %v1633_v50  ;;  %v2016_v19 = vpop.f32.mrb[22].mxu0  ;;  %v3613_v50 = vld [vmem:[#allocation10_spill] sm:$0xff] }
 0x404   :  { %v1750_v55 = vadd.f32 %v1642_v1, %v2514_v24  ;;  %v1645_v3 = vadd.f32 %v2016_v19, %v3358_v43  ;;  %v1636_v2 = vpop.f32.mrb[23].mxu0 }
 0x405   :  { %v1748_v12 = vadd.f32 %v1634_v34, %v2505_v18  ;;  %v1637_v10 = vadd.f32 %v3358_v43, %v1636_v2  ;;  %v3615_v2 = vld [vmem:[#allocation11_spill] sm:$0xff] }
 0x406   :  { %1782 = vst.msk [vmem:[%s3563_s11 + $0x30] sm:$0xff] %vm174_vm0, %v1750_v55  ;;  %v1751_v40 = vadd.f32 %v1645_v3, %v2520_v27  ;;  %v3614_v55 = vld [vmem:[#allocation13_spill] sm:$0xff] }
 0x407   :  { %1780 = vst.msk [vmem:[%s3563_s11 + $0x20] sm:$0xff] %vm174_vm0, %v1748_v12  ;;  %v1749_v24 = vadd.f32 %v1637_v10, %v2516_v25 }
 0x408   :  { %1783 = vst.msk [vmem:[%s3563_s11 + $0x38] sm:$0xff] %vm174_vm0, %v1751_v40 }
 0x409   :  { %1781 = vst.msk [vmem:[%s3563_s11 + $0x28] sm:$0xff] %vm174_vm0, %v1749_v24 }
 0x40d   :  { %v2019_v18 = vpop.f32.mrb[24].mxu0 }
 0x40e   :  { %v1658_v27 = vadd.f32 %v2019_v18, %v3358_v43  ;;  %v1649_v61 = vpop.f32.mrb[25].mxu0 }
 0x40f   :  { %v1650_v11 = vadd.f32 %v3358_v43, %v1649_v61  ;;  %v2020_v6 = vpop.f32.mrb[26].mxu0  ;;  %v3616_v61 = vld [vmem:[#allocation16_spill] sm:$0xff] }
 0x410   :  { %v1754_v16 = vadd.f32 %v1658_v27, %v2550_v48  ;;  %v1661_v25 = vadd.f32 %v2020_v6, %v3358_v43  ;;  %v1652_v56 = vpop.f32.mrb[27].mxu0 }
 0x411   :  { %v1752_v47 = vadd.f32 %v1650_v11, %v2539_v41  ;;  %v1653_v58 = vadd.f32 %v3358_v43, %v1652_v56 }
 0x412   :  { %1786 = vst.msk [vmem:[%s3563_s11 + $0x50] sm:$0xff] %vm174_vm0, %v1754_v16  ;;  %v1755_v17 = vadd.f32 %v1661_v25, %v2556_v52  ;;  %v3617_v25 = vld [vmem:[#allocation14_spill] sm:$0xff] }
 0x413   :  { %1784 = vst.msk [vmem:[%s3563_s11 + $0x40] sm:$0xff] %vm174_vm0, %v1752_v47  ;;  %v1753_v48 = vadd.f32 %v1653_v58, %v2552_v49  ;;  %v3618_v58 = vld [vmem:[#allocation17_spill] sm:$0xff] }
 0x414   :  { %1787 = vst.msk [vmem:[%s3563_s11 + $0x58] sm:$0xff] %vm174_vm0, %v1755_v17 }
 0x415   :  { %1785 = vst.msk [vmem:[%s3563_s11 + $0x48] sm:$0xff] %vm174_vm0, %v1753_v48  ;;  %v3619_v48 = vld [vmem:[#allocation15_spill] sm:$0xff] }
 0x417   :  { %v2023_v41 = vpop.f32.mrb[28].mxu0 }
 0x418   :  { %v1674_v52 = vadd.f32 %v2023_v41, %v3358_v43  ;;  %v1665_v5 = vpop.f32.mrb[29].mxu0 }
 0x419   :  { %v1666_v0 = vadd.f32 %v3358_v43, %v1665_v5  ;;  %v2024_v14 = vpop.f32.mrb[30].mxu0 }
 0x41a   :  { %v1758_v23 = vadd.f32 %v1674_v52, %v3604_v29  ;;  %v1677_v49 = vadd.f32 %v2024_v14, %v3358_v43  ;;  %v1668_v51 = vpop.f32.mrb[31].mxu0 }
 0x41b   :  { %v1756_v13 = vadd.f32 %v1666_v0, %v3605_v4  ;;  %v1669_v57 = vadd.f32 %v3358_v43, %v1668_v51 }
 0x41c   :  { %1790 = vst.msk [vmem:[%s3563_s11 + $0x70] sm:$0xff] %vm174_vm0, %v1758_v23  ;;  %v1759_v31 = vadd.f32 %v1677_v49, %v3606_v46  ;;  %v3620_v23 = vld [vmem:[#allocation20_spill] sm:$0xff] }
 0x41d   :  { %1788 = vst.msk [vmem:[%s3563_s11 + $0x60] sm:$0xff] %vm174_vm0, %v1756_v13  ;;  %v1757_v7 = vadd.f32 %v1669_v57, %v3607_v30  ;;  %v3621_v13 = vld [vmem:[#allocation18_spill] sm:$0xff] }
 0x41e   :  { %1791 = vst.msk [vmem:[%s3563_s11 + $0x78] sm:$0xff] %vm174_vm0, %v1759_v31  ;;  %v3622_v31 = vld [vmem:[#allocation21_spill] sm:$0xff] }
 0x41f   :  { %1789 = vst.msk [vmem:[%s3563_s11 + $0x68] sm:$0xff] %vm174_vm0, %v1757_v7  ;;  %v2027_v45 = vpop.f32.mrb[32].mxu0  ;;  %v3623_v7 = vld [vmem:[#allocation19_spill] sm:$0xff] }
 0x420   :  { %v1690_v54 = vadd.f32 %v2027_v45, %v3358_v43  ;;  %v1681_v9 = vpop.f32.mrb[33].mxu0 }
 0x421   :  { %v1682_v62 = vadd.f32 %v3358_v43, %v1681_v9  ;;  %v2028_v36 = vpop.f32.mrb[34].mxu0 }
 0x422   :  { %v1762_v22 = vadd.f32 %v1690_v54, %v3608_v33  ;;  %v1693_v38 = vadd.f32 %v2028_v36, %v3358_v43  ;;  %v1684_v60 = vpop.f32.mrb[35].mxu0 }
 0x423   :  { %v1760_v44 = vadd.f32 %v1682_v62, %v3609_v42  ;;  %v1685_v53 = vadd.f32 %v3358_v43, %v1684_v60 }
 0x424   :  { %1794 = vst.msk [vmem:[%s3563_s11 + $0x90] sm:$0xff] %vm174_vm0, %v1762_v22  ;;  %v1763_v32 = vadd.f32 %v1693_v38, %v3610_v15 }
 0x425   :  { %1792 = vst.msk [vmem:[%s3563_s11 + $0x80] sm:$0xff] %vm174_vm0, %v1760_v44  ;;  %v1761_v39 = vadd.f32 %v1685_v53, %v3611_v37 }
 0x426   :  { %1795 = vst.msk [vmem:[%s3563_s11 + $0x98] sm:$0xff] %vm174_vm0, %v1763_v32 }
 0x427   :  { %1793 = vst.msk [vmem:[%s3563_s11 + $0x88] sm:$0xff] %vm174_vm0, %v1761_v39  ;;  %v2031_v26 = vpop.f32.mrb[36].mxu0 }
 0x428   :  { %v1706_v35 = vadd.f32 %v2031_v26, %v3358_v43  ;;  %v1697_v21 = vpop.f32.mrb[37].mxu0 }
 0x429   :  { %v1698_v20 = vadd.f32 %v3358_v43, %v1697_v21  ;;  %v2032_v28 = vpop.f32.mrb[38].mxu0 }
 0x42a   :  { %v1766_v59 = vadd.f32 %v1706_v35, %v3612_v8  ;;  %v1709_v63 = vadd.f32 %v2032_v28, %v3358_v43  ;;  %v1700_v1 = vpop.f32.mrb[39].mxu0 }
 0x42b   :  { %v1764_v34 = vadd.f32 %v1698_v20, %v3613_v50  ;;  %v1701_v19 = vadd.f32 %v3358_v43, %v1700_v1 }
 0x42c   :  { %1798 = vst.msk [vmem:[%s3563_s11 + $0xb0] sm:$0xff] %vm174_vm0, %v1766_v59  ;;  %v1767_v3 = vadd.f32 %v1709_v63, %v3614_v55 }
 0x42d   :  { %1796 = vst.msk [vmem:[%s3563_s11 + $0xa0] sm:$0xff] %vm174_vm0, %v1764_v34  ;;  %v1765_v12 = vadd.f32 %v1701_v19, %v3615_v2 }
 0x42e   :  { %1799 = vst.msk [vmem:[%s3563_s11 + $0xb8] sm:$0xff] %vm174_vm0, %v1767_v3 }
 0x42f   :  { %1797 = vst.msk [vmem:[%s3563_s11 + $0xa8] sm:$0xff] %vm174_vm0, %v1765_v12  ;;  %v2035_v10 = vpop.f32.mrb[40].mxu0 }
 0x430   :  { %v1722_v40 = vadd.f32 %v2035_v10, %v3358_v43  ;;  %v1713_v24 = vpop.f32.mrb[41].mxu0 }
 0x431   :  { %v1714_v18 = vadd.f32 %v3358_v43, %v1713_v24  ;;  %v2036_v27 = vpop.f32.mrb[42].mxu0 }
 0x432   :  { %v1770_v11 = vadd.f32 %v1722_v40, %v3616_v61  ;;  %v1725_v6 = vadd.f32 %v2036_v27, %v3358_v43  ;;  %v1716_v16 = vpop.f32.mrb[43].mxu0 }
 0x433   :  { %v1768_v56 = vadd.f32 %v1714_v18, %v3617_v25  ;;  %v1717_v47 = vadd.f32 %v3358_v43, %v1716_v16 }
 0x434   :  { %1802 = vst.msk [vmem:[%s3563_s11 + $0xd0] sm:$0xff] %vm174_vm0, %v1770_v11  ;;  %v1771_v17 = vadd.f32 %v1725_v6, %v3618_v58 }
 0x435   :  { %1800 = vst.msk [vmem:[%s3563_s11 + $0xc0] sm:$0xff] %vm174_vm0, %v1768_v56  ;;  %v1769_v41 = vadd.f32 %v1717_v47, %v3619_v48 }
 0x436   :  { %1803 = vst.msk [vmem:[%s3563_s11 + $0xd8] sm:$0xff] %vm174_vm0, %v1771_v17 }
 0x437   :  { %1801 = vst.msk [vmem:[%s3563_s11 + $0xc8] sm:$0xff] %vm174_vm0, %v1769_v41  ;;  %v2039_v52 = vpop.f32.mrb[44].mxu0 }
 0x438   :  { %v1738_v5 = vadd.f32 %v2039_v52, %v3358_v43  ;;  %v1729_v0 = vpop.f32.mrb[45].mxu0 }
 0x439   :  { %v1730_v14 = vadd.f32 %v3358_v43, %v1729_v0  ;;  %v2040_v29 = vpop.f32.mrb[46].mxu0 }
 0x43a   :  { %v1774_v49 = vadd.f32 %v1738_v5, %v3620_v23  ;;  %v1741_v51 = vadd.f32 %v2040_v29, %v3358_v43  ;;  %v1732_v4 = vpop.f32.mrb[47].mxu0 }
 0x43b   :  { %v1772_v57 = vadd.f32 %v1730_v14, %v3621_v13  ;;  %v1733_v46 = vadd.f32 %v3358_v43, %v1732_v4 }
 0x43c   :  { %1806 = vst.msk [vmem:[%s3563_s11 + $0xf0] sm:$0xff] %vm174_vm0, %v1774_v49  ;;  %v1775_v30 = vadd.f32 %v1741_v51, %v3622_v31 }
 0x43d   :  { %1804 = vst.msk [vmem:[%s3563_s11 + $0xe0] sm:$0xff] %vm174_vm0, %v1772_v57  ;;  %v1773_v45 = vadd.f32 %v1733_v46, %v3623_v7 }
 0x43e   :  { %1807 = vst.msk [vmem:[%s3563_s11 + $0xf8] sm:$0xff] %vm174_vm0, %v1775_v30 }
 0x43f   :  { %1805 = vst.msk [vmem:[%s3563_s11 + $0xe8] sm:$0xff] %vm174_vm0, %v1773_v45 }

// kernel: graph_transformer_mapper_block.6
= control target key start
LH: loop header
LB: loop body
LE: loop exit
PB: predicated region body
PF: predicated region fallthrough
CT: control target
= control target key end

     0   :  { %s5914_s30 = smov 0   ;;  %s5916_s10 = smov 0   ;;  %s9091_s0 = inlined_call_operand.vmem [shape: s32[512,1], index: 0, kind: input, shape index: {}]   ;;  %s9092_s1 = inlined_call_operand.vmem [shape: s32[512,1], index: 1, kind: input, shape index: {}]   ;;  %s9093_s2 = inlined_call_operand.vmem [shape: bf16[512,16], index: 2, kind: input, shape index: {}]   ;;  %s9094_s3 = inlined_call_operand.vmem [shape: bf16[256,32], index: 3, kind: input, shape index: {}]   ;;  %s9095_s4 = inlined_call_operand.vmem [shape: bf16[256,32], index: 4, kind: input, shape index: {}]   ;;  %s9096_s5 = inlined_call_operand.vmem [shape: bf16[256,32], index: 5, kind: input, shape index: {}]   ;;  %s9097_s6 = inlined_call_operand.vmem [shape: bf16[16,32], index: 6, kind: input, shape index: {}]   ;;  %s9098_s7 = inlined_call_operand.vmem [shape: f32[1,32], index: 7, kind: input, shape index: {}]   ;;  %s9099_s8 = inlined_call_operand.vmem [shape: bf16[32,32], index: 8, kind: input, shape index: {}]   ;;  %s9100_s9 = inlined_call_operand.vmem [shape: f32[256,32], index: 9, kind: output, shape index: {}]  }
   0x1   :  { %s5918_s11 = smov 0  }
   0x2 LB: > { %s28_s12 = sadd.s32 1, %s5853_s10  ;;  %p4492_p0 = scmp.ge.s32.totalorder %s5857_s11, 1  ;;  %s5857_s11 = sphi %s5918_s11, %s19_s11   ;;  %s5853_s10 = sphi %s5916_s10, %s9538_s10   ;;  %s5849_s30 = sphi %s5914_s30, %s9537_s30  }
   0x3   : > { %p29_p1 = scmp.ge.s32.totalorder %s28_s12, 2  ;;  %p382_p2 = scmp.lt.s32.totalorder %s5857_s11, 3 }
   0x5   : > { %s9540_s12 = smov (%p29_p1, %s28_s12), 0  ;;  %p383_p3 = pnand %p4492_p0, %p382_p2 }
   0x7   : > { %386 = sbr.rel (%p383_p3) target bundleno = 1507 (0x5e3), region = 56 }
   0xe   : > { %s4493_s13 = sshll.u32 %s5849_s30, 5  ;;  %p4499_p5 = scmp.ne.s32.totalorder %s5849_s30, 0 }
   0xf   : > { %p455_p4 = scmp.lt.s32.totalorder %s4493_s13, 63  ;;  %vm509_vm0 = vcmask (!%p4499_p5), 261120   ;;  %vm574_vm1 = vcmask (!%p4499_p5), 253952   ;;  %v5859_v0 = vmov (!%p4499_p5), 0.0   ;;  %v5860_v1 = vmov (!%p4499_p5), -1e+30  }
  0x10   : > { %508 = sbr.rel (%p4499_p5) target bundleno = 49 (0x31), region = 60  ;;  %510 = vst.msk [vmem:[%s9100_s9] sm:$0xff] (!%p4499_p5), %vm509_vm0, %v5859_v0  ;;  %511 = vst.msk [vmem:[%s9100_s9 + $0x8] sm:$0xff] (!%p4499_p5), %vm509_vm0, %v5859_v0 }
  0x11   : > { %s9542_s13 = smov (!%p455_p4, %s4493_s13), 63  ;;  %512 = vst.msk [vmem:[%s9100_s9 + $0x10] sm:$0xff] (!%p4499_p5), %vm509_vm0, %v5859_v0  ;;  %513 = vst.msk [vmem:[%s9100_s9 + $0x18] sm:$0xff] (!%p4499_p5), %vm509_vm0, %v5859_v0 }
  0x12   : > { %s4494_s14 = sshll.u32 %s9542_s13, 3  ;;  %s4498_s15 = sshll.u32 %s9542_s13, 2  ;;  %514 = vst.msk [vmem:[%s9100_s9 + $0x20] sm:$0xff] (!%p4499_p5), %vm509_vm0, %v5859_v0  ;;  %515 = vst.msk [vmem:[%s9100_s9 + $0x28] sm:$0xff] (!%p4499_p5), %vm509_vm0, %v5859_v0 }
  0x13   : > { %s5938_s18 = scalar_lea.vmem %s9091_s0, %s4494_s14  ;;  %s5943_s21 = scalar_lea.vmem %s9092_s1, %s4494_s14  ;;  %516 = vst.msk [vmem:[%s9100_s9 + $0x30] sm:$0xff] (!%p4499_p5), %vm509_vm0, %v5859_v0  ;;  %517 = vst.msk [vmem:[%s9100_s9 + $0x38] sm:$0xff] (!%p4499_p5), %vm509_vm0, %v5859_v0 }
  0x14   : > { %s5948_s24 = scalar_lea.vmem %s9093_s2, %s4498_s15  ;;  %518 = vst.msk [vmem:[%s9100_s9 + $0x40] sm:$0xff] (!%p4499_p5), %vm509_vm0, %v5859_v0  ;;  %519 = vst.msk [vmem:[%s9100_s9 + $0x48] sm:$0xff] (!%p4499_p5), %vm509_vm0, %v5859_v0 }
  0x15   : > { %520 = vst.msk [vmem:[%s9100_s9 + $0x50] sm:$0xff] (!%p4499_p5), %vm509_vm0, %v5859_v0  ;;  %521 = vst.msk [vmem:[%s9100_s9 + $0x58] sm:$0xff] (!%p4499_p5), %vm509_vm0, %v5859_v0 }
  0x16   : > { %522 = vst.msk [vmem:[%s9100_s9 + $0x60] sm:$0xff] (!%p4499_p5), %vm509_vm0, %v5859_v0  ;;  %523 = vst.msk [vmem:[%s9100_s9 + $0x68] sm:$0xff] (!%p4499_p5), %vm509_vm0, %v5859_v0 }
  0x17   : > { %524 = vst.msk [vmem:[%s9100_s9 + $0x70] sm:$0xff] %vm509_vm0, %v5859_v0  ;;  %525 = vst.msk [vmem:[%s9100_s9 + $0x78] sm:$0xff] %vm509_vm0, %v5859_v0 }
  0x18   : > { %526 = vst.msk [vmem:[%s9100_s9 + $0x80] sm:$0xff] %vm509_vm0, %v5859_v0  ;;  %527 = vst.msk [vmem:[%s9100_s9 + $0x88] sm:$0xff] %vm509_vm0, %v5859_v0 }
  0x19   : > { %528 = vst.msk [vmem:[%s9100_s9 + $0x90] sm:$0xff] %vm509_vm0, %v5859_v0  ;;  %529 = vst.msk [vmem:[%s9100_s9 + $0x98] sm:$0xff] %vm509_vm0, %v5859_v0 }
  0x1a   : > { %530 = vst.msk [vmem:[%s9100_s9 + $0xa0] sm:$0xff] %vm509_vm0, %v5859_v0  ;;  %531 = vst.msk [vmem:[%s9100_s9 + $0xa8] sm:$0xff] %vm509_vm0, %v5859_v0 }
  0x1b   : > { %532 = vst.msk [vmem:[%s9100_s9 + $0xb0] sm:$0xff] %vm509_vm0, %v5859_v0  ;;  %533 = vst.msk [vmem:[%s9100_s9 + $0xb8] sm:$0xff] %vm509_vm0, %v5859_v0 }
  0x1c   : > { %534 = vst.msk [vmem:[%s9100_s9 + $0xc0] sm:$0xff] %vm509_vm0, %v5859_v0  ;;  %535 = vst.msk [vmem:[%s9100_s9 + $0xc8] sm:$0xff] %vm509_vm0, %v5859_v0 }
  0x1d   : > { %536 = vst.msk [vmem:[%s9100_s9 + $0xd0] sm:$0xff] %vm509_vm0, %v5859_v0  ;;  %537 = vst.msk [vmem:[%s9100_s9 + $0xd8] sm:$0xff] %vm509_vm0, %v5859_v0 }
  0x1e   : > { %538 = vst.msk [vmem:[%s9100_s9 + $0xe0] sm:$0xff] %vm509_vm0, %v5859_v0  ;;  %539 = vst.msk [vmem:[%s9100_s9 + $0xe8] sm:$0xff] %vm509_vm0, %v5859_v0 }
  0x1f   : > { %540 = vst.msk [vmem:[%s9100_s9 + $0xf0] sm:$0xff] %vm509_vm0, %v5859_v0  ;;  %541 = vst.msk [vmem:[%s9100_s9 + $0xf8] sm:$0xff] %vm509_vm0, %v5859_v0 }
  0x20   : > { %542 = vst.msk [vmem:[#allocation2] sm:$0xff] %vm509_vm0, %v5859_v0  ;;  %543 = vst.msk [vmem:[#allocation2 + $0x8] sm:$0xff] %vm509_vm0, %v5859_v0 }
  0x21   : > { %544 = vst.msk [vmem:[#allocation2 + $0x10] sm:$0xff] %vm509_vm0, %v5859_v0  ;;  %545 = vst.msk [vmem:[#allocation2 + $0x18] sm:$0xff] %vm509_vm0, %v5859_v0 }
  0x22   : > { %546 = vst.msk [vmem:[#allocation2 + $0x20] sm:$0xff] %vm509_vm0, %v5859_v0  ;;  %547 = vst.msk [vmem:[#allocation2 + $0x28] sm:$0xff] %vm509_vm0, %v5859_v0 }
  0x23   : > { %548 = vst.msk [vmem:[#allocation2 + $0x30] sm:$0xff] %vm509_vm0, %v5859_v0  ;;  %549 = vst.msk [vmem:[#allocation2 + $0x38] sm:$0xff] %vm509_vm0, %v5859_v0 }
  0x24   : > { %550 = vst.msk [vmem:[#allocation2 + $0x40] sm:$0xff] %vm509_vm0, %v5859_v0  ;;  %551 = vst.msk [vmem:[#allocation2 + $0x48] sm:$0xff] %vm509_vm0, %v5859_v0 }
  0x25   : > { %552 = vst.msk [vmem:[#allocation2 + $0x50] sm:$0xff] %vm509_vm0, %v5859_v0  ;;  %553 = vst.msk [vmem:[#allocation2 + $0x58] sm:$0xff] %vm509_vm0, %v5859_v0 }
  0x26   : > { %554 = vst.msk [vmem:[#allocation2 + $0x60] sm:$0xff] %vm509_vm0, %v5859_v0  ;;  %555 = vst.msk [vmem:[#allocation2 + $0x68] sm:$0xff] %vm509_vm0, %v5859_v0 }
  0x27   : > { %556 = vst.msk [vmem:[#allocation2 + $0x70] sm:$0xff] %vm509_vm0, %v5859_v0  ;;  %557 = vst.msk [vmem:[#allocation2 + $0x78] sm:$0xff] %vm509_vm0, %v5859_v0 }
  0x28   : > { %558 = vst.msk [vmem:[#allocation2 + $0x80] sm:$0xff] %vm509_vm0, %v5859_v0  ;;  %559 = vst.msk [vmem:[#allocation2 + $0x88] sm:$0xff] %vm509_vm0, %v5859_v0 }
  0x29   : > { %560 = vst.msk [vmem:[#allocation2 + $0x90] sm:$0xff] %vm509_vm0, %v5859_v0  ;;  %561 = vst.msk [vmem:[#allocation2 + $0x98] sm:$0xff] %vm509_vm0, %v5859_v0 }
  0x2a   : > { %562 = vst.msk [vmem:[#allocation2 + $0xa0] sm:$0xff] %vm509_vm0, %v5859_v0  ;;  %563 = vst.msk [vmem:[#allocation2 + $0xa8] sm:$0xff] %vm509_vm0, %v5859_v0 }
  0x2b   : > { %564 = vst.msk [vmem:[#allocation2 + $0xb0] sm:$0xff] %vm509_vm0, %v5859_v0  ;;  %565 = vst.msk [vmem:[#allocation2 + $0xb8] sm:$0xff] %vm509_vm0, %v5859_v0 }
  0x2c   : > { %566 = vst.msk [vmem:[#allocation2 + $0xc0] sm:$0xff] %vm509_vm0, %v5859_v0  ;;  %567 = vst.msk [vmem:[#allocation2 + $0xc8] sm:$0xff] %vm509_vm0, %v5859_v0 }
  0x2d   : > { %568 = vst.msk [vmem:[#allocation2 + $0xd0] sm:$0xff] %vm509_vm0, %v5859_v0  ;;  %569 = vst.msk [vmem:[#allocation2 + $0xd8] sm:$0xff] %vm509_vm0, %v5859_v0 }
  0x2e   : > { %570 = vst.msk [vmem:[#allocation2 + $0xe0] sm:$0xff] %vm509_vm0, %v5859_v0  ;;  %571 = vst.msk [vmem:[#allocation2 + $0xe8] sm:$0xff] %vm509_vm0, %v5859_v0 }
  0x2f   : > { %572 = vst.msk [vmem:[#allocation2 + $0xf0] sm:$0xff] %vm509_vm0, %v5859_v0  ;;  %573 = vst.msk [vmem:[#allocation2 + $0xf8] sm:$0xff] %vm509_vm0, %v5859_v0 }
  0x30   : > { %575 = vst.msk [vmem:[#allocation3] sm:$0x1] %vm574_vm1, %v5860_v1 }
  0x31 PF: > { %v6177_v2 = vld [vmem:[%s5943_s21] sm:$0xff]  ;;  %v5861_v4 = vmov 0   ;;  %v6184_v5 = vld [vmem:[%s5943_s21 + $0x8] sm:$0xff]  ;;  %v916_v7 = vld [vmem:[%s5938_s18 + $0x18] sm:$0xff]  ;;  %vm703_vm2 = vcmask 130048  }
  0x32   : > { %v913_v3 = vld [vmem:[%s5938_s18] sm:$0xff]  ;;  %5637 = vset.pattern.permute.xlu1 %v5861_v4  ;;  %5636 = vset.pattern.permute.xlu0 %v5861_v4  ;;  %v914_v6 = vld [vmem:[%s5938_s18 + $0x8] sm:$0xff]  ;;  %v915_v8 = vld [vmem:[%s5938_s18 + $0x10] sm:$0xff]  ;;  %vm2793_vm3 = vcmp.ge.s32.totalorder %v6177_v2, 256  ;;  %vm2794_vm4 = vcmp.ge.s32.totalorder %v6184_v5, 256 }
  0x33   : > { %1301 = vperm.xlu1 %5637, %v6177_v2   ;;  %981 = vperm.xlu0 %5636, %v913_v3   ;;  %v6191_v9 = vld [vmem:[%s5943_s21 + $0x18] sm:$0xff]  ;;  %v6194_v10 = vld [vmem:[%s5943_s21 + $0x10] sm:$0xff]  ;;  %v5638_v11 = vld [vmem:[%s9097_s6] sm:$0xff]  }
  0x34   : > { %v918_v12 = vld [vmem:[%s5938_s18 + $0x28] sm:$0xff]  ;;  %v917_v13 = vld [vmem:[%s5938_s18 + $0x20] sm:$0xff]  ;;  %5519 = vmatprep.subr.bf16.mxu0 %v5638_v11  ;;  %v5643_v19 = vld [vmem:[%s5948_s24 + $0x10] sm:$0xff]   ;;  %vm2796_vm5 = vcmp.ge.s32.totalorder %v6191_v9, 256  ;;  %vm2795_vm6 = vcmp.ge.s32.totalorder %v6194_v10, 256 }
  0x35   : > { %v5639_v14 = vld [vmem:[%s5948_s24] sm:$0xff]   ;;  %v5640_v15 = vld [vmem:[%s5948_s24 + $0x8] sm:$0xff]   ;;  %5520 = vmatpush3.bf16.msra.mxu0 %v5638_v11  ;;  %v920_v22 = vld [vmem:[%s5938_s18 + $0x38] sm:$0xff] }
  0x36   : > { %5521 = vmatprep.mubr.msk.bf16.mxu0 %vm703_vm2, %v5639_v14  ;;  %v5641_v16 = vld [vmem:[%s9095_s4 + $0x40] sm:$0xff]   ;;  %v6213_v18 = vld [vmem:[%s5943_s21 + $0x28] sm:$0xff]  ;;  %v919_v23 = vld [vmem:[%s5938_s18 + $0x30] sm:$0xff] }
  0x37   : > { %1304 = vperm.xlu1 %5637, %v6184_v5   ;;  %984 = vperm.xlu0 %5636, %v914_v6   ;;  %v5642_v17 = vld [vmem:[%s9095_s4] sm:$0xff]   ;;  %v5645_v21 = vld [vmem:[%s9095_s4 + $0x48] sm:$0xff]   ;;  %v5644_v25 = vld [vmem:[%s5948_s24 + $0x18] sm:$0xff]   ;;  %vm2798_vm7 = vcmp.ge.s32.totalorder %v6213_v18, 256  ;;  %v2828_v5 = vsel %vm2796_vm5, 1, %v5861_v4 }
  0x38   : > { %5053 = vmatprep.subr.bf16.mxu0 %v5641_v16  ;;  %v6217_v20 = vld [vmem:[%s5943_s21 + $0x20] sm:$0xff]  ;;  %5522 = vmatmul.mubr.msk.bf16.vlgmr.msra.gmra.mrb[0].mxu0 %vm703_vm2, %v5640_v15  ;;  %v5646_v24 = vld [vmem:[%s9095_s4 + $0x8] sm:$0xff]   ;;  %v6234_v27 = vld [vmem:[%s5943_s21 + $0x38] sm:$0xff] }
  0x39   : > { %5054 = vmatpush3.bf16.msra.mxu0 %v5642_v17  ;;  %5525 = vmatprep.mubr.msk.bf16.mxu0 %vm703_vm2, %v5643_v19  ;;  %v5647_v26 = vld [vmem:[%s5948_s24 + $0x20] sm:$0xff]   ;;  %v5649_v28 = vld [vmem:[%s9095_s4 + $0x50] sm:$0xff]   ;;  %v922_v31 = vld [vmem:[%s5938_s18 + $0x48] sm:$0xff]  ;;  %vm2797_vm13 = vcmp.ge.s32.totalorder %v6217_v20, 256 }
  0x3a   : > { %5055 = vmatprep.subr.bf16.mxu0 %v5645_v21  ;;  %v6240_v29 = vld [vmem:[%s5943_s21 + $0x30] sm:$0xff]  ;;  %v921_v32 = vld [vmem:[%s5938_s18 + $0x40] sm:$0xff]  ;;  %v5648_v33 = vld [vmem:[%s5948_s24 + $0x28] sm:$0xff]  }
  0x3b   : > { %990 = vperm.xlu1 %5637, %v916_v7   ;;  %987 = vperm.xlu0 %5636, %v915_v8   ;;  %v5650_v30 = vld [vmem:[%s9095_s4 + $0x10] sm:$0xff]   ;;  %v5653_v35 = vld [vmem:[%s9095_s4 + $0x58] sm:$0xff]   ;;  %v6260_v37 = vld [vmem:[%s5943_s21 + $0x48] sm:$0xff]  ;;  %vm2799_vm5 = vcmp.ge.s32.totalorder %v6240_v29, 256 }
  0x3c   : > { %v5651_v34 = vld [vmem:[%s5948_s24 + $0x30] sm:$0xff]   ;;  %v5654_v36 = vld [vmem:[%s9095_s4 + $0x18] sm:$0xff]   ;;  %v6263_v38 = vld [vmem:[%s5943_s21 + $0x40] sm:$0xff] }
  0x3d   : > { %5056 = vmatpush3.bf16.msra.mxu0 %v5646_v24  ;;  %v924_v39 = vld [vmem:[%s5938_s18 + $0x58] sm:$0xff]  ;;  %v923_v40 = vld [vmem:[%s5938_s18 + $0x50] sm:$0xff]  ;;  %v5657_v42 = vld [vmem:[%s9095_s4 + $0x60] sm:$0xff]  }
  0x3e   : > { %5057 = vmatprep.subr.bf16.mxu0 %v5649_v28  ;;  %v5652_v41 = vld [vmem:[%s5948_s24 + $0x38] sm:$0xff]   ;;  %v5658_v43 = vld [vmem:[%s9094_s3 + $0x40] sm:$0xff]   ;;  %v6289_v48 = vld [vmem:[%s5943_s21 + $0x50] sm:$0xff] }
  0x3f   : > { %1310 = vperm.xlu1 %5637, %v6191_v9   ;;  %1307 = vperm.xlu0 %5636, %v6194_v10   ;;  %v5659_v44 = vld [vmem:[%s9095_s4 + $0x20] sm:$0xff]   ;;  %v6286_v47 = vld [vmem:[%s5943_s21 + $0x58] sm:$0xff]  ;;  %v5662_v49 = vld [vmem:[%s9094_s3 + $0x48] sm:$0xff]   ;;  %v2830_v9 = vsel %vm2798_vm7, 1, %v5861_v4  ;;  %v9124_v10 = vmov 0.0  }
  0x40   : > { %5526 = vmatmul.mubr.msk.bf16.gmra.mrb[4].mxu0 %vm703_vm2, %v5644_v25  ;;  %v5655_v45 = vld [vmem:[%s5948_s24 + $0x40] sm:$0xff]   ;;  %4941 = vmatprep.subr.bf16.mxu1 %v5658_v43  ;;  %v5663_v50 = vld [vmem:[%s9094_s3 + $0x8] sm:$0xff]   ;;  %v5661_v54 = vld [vmem:[%s5948_s24 + $0x50] sm:$0xff]  }
  0x41   : > { %5529 = vmatprep.mubr.msk.bf16.mxu0 %vm703_vm2, %v5647_v26  ;;  %5058 = vmatpush3.bf16.msra.mxu0 %v5650_v30  ;;  %v5660_v46 = vld [vmem:[%s9094_s3] sm:$0xff]   ;;  %v926_v51 = vld [vmem:[%s5938_s18 + $0x68] sm:$0xff]  ;;  %v5666_v56 = vld [vmem:[%s9094_s3 + $0x50] sm:$0xff]  }
  0x42   : > { %5059 = vmatprep.subr.bf16.mxu0 %v5653_v35  ;;  %4942 = vmatpush3.bf16.msra.mxu1 %v5660_v46  ;;  %v925_v52 = vld [vmem:[%s5938_s18 + $0x60] sm:$0xff]  ;;  %v5656_v53 = vld [vmem:[%s5948_s24 + $0x48] sm:$0xff]   ;;  %v5668_v58 = vld [vmem:[%s9094_s3 + $0x10] sm:$0xff]  }
  0x43   : > { %996 = vperm.xlu1 %5637, %v918_v12   ;;  %993 = vperm.xlu0 %5636, %v917_v13   ;;  %v5665_v55 = vld [vmem:[%s9095_s4 + $0x68] sm:$0xff]   ;;  %v6321_v60 = vld [vmem:[%s5943_s21 + $0x60] sm:$0xff]  ;;  %v5670_v61 = vld [vmem:[%s9094_s3 + $0x58] sm:$0xff]  }
  0x44   : > { %4943 = vmatprep.subr.bf16.mxu1 %v5662_v49  ;;  %v5667_v57 = vld [vmem:[%s9095_s4 + $0x28] sm:$0xff]   ;;  %v928_v62 = vld [vmem:[%s5938_s18 + $0x78] sm:$0xff]  ;;  %v927_v63 = vld [vmem:[%s5938_s18 + $0x70] sm:$0xff] }
  0x45   : > { %5060 = vmatpush3.bf16.msra.mxu0 %v5654_v36  ;;  %v6318_v59 = vld [vmem:[%s5943_s21 + $0x68] sm:$0xff]  ;;  %v5664_v0 = vld [vmem:[%s5948_s24 + $0x58] sm:$0xff]   ;;  %v5669_v3 = vld [vmem:[%s5948_s24 + $0x60] sm:$0xff]  }
  0x46   : > { %5061 = vmatprep.subr.bf16.mxu0 %v5657_v42  ;;  %4944 = vmatpush3.bf16.msra.mxu1 %v5663_v50  ;;  %v5671_v1 = vld [vmem:[%s9094_s3 + $0x18] sm:$0xff]   ;;  %v5673_v6 = vld [vmem:[%s9095_s4 + $0x70] sm:$0xff]   ;;  %v5674_v7 = vld [vmem:[%s9094_s3 + $0x60] sm:$0xff]  }
  0x47   : > { %1316 = vperm.xlu1 %5637, %v6213_v18   ;;  %1313 = vperm.xlu0 %5636, %v6217_v20   ;;  %v5675_v8 = vld [vmem:[%s9095_s4 + $0x30] sm:$0xff]   ;;  %v5676_v11 = vld [vmem:[%s9094_s3 + $0x20] sm:$0xff]   ;;  %v6350_v12 = vld [vmem:[%s5943_s21 + $0x78] sm:$0xff] }
  0x48   : > { %5530 = vmatmul.mubr.msk.bf16.gmra.mrb[8].mxu0 %vm703_vm2, %v5648_v33  ;;  %4945 = vmatprep.subr.bf16.mxu1 %v5666_v56  ;;  %v6353_v13 = vld [vmem:[%s5943_s21 + $0x70] sm:$0xff]  ;;  %v930_v14 = vld [vmem:[%s5938_s18 + $0x88] sm:$0xff]  ;;  %v929_v16 = vld [vmem:[%s5938_s18 + $0x80] sm:$0xff] }
  0x49   : > { %5533 = vmatprep.mubr.msk.bf16.mxu0 %vm703_vm2, %v5651_v34  ;;  %5062 = vmatpush3.bf16.msra.mxu0 %v5659_v44  ;;  %v5678_v15 = vld [vmem:[%s9094_s3 + $0x68] sm:$0xff]   ;;  %v5677_v21 = vld [vmem:[%s5948_s24 + $0x70] sm:$0xff]   ;;  %v5681_v24 = vld [vmem:[%s9095_s4 + $0x78] sm:$0xff]  }
  0x4a   : > { %5063 = vmatprep.subr.bf16.mxu0 %v5665_v55  ;;  %4946 = vmatpush3.bf16.msra.mxu1 %v5668_v58  ;;  %v5679_v17 = vld [vmem:[%s9094_s3 + $0x28] sm:$0xff]   ;;  %v5682_v25 = vld [vmem:[%s9094_s3 + $0x70] sm:$0xff]   ;;  %v5683_v26 = vld [vmem:[%s9095_s4 + $0x38] sm:$0xff]  }
  0x4b   : > { %1002 = vperm.xlu1 %5637, %v920_v22   ;;  %999 = vperm.xlu0 %5636, %v919_v23   ;;  %v5672_v19 = vld [vmem:[%s5948_s24 + $0x68] sm:$0xff]   ;;  %v6373_v23 = vld [vmem:[%s5943_s21 + $0x80] sm:$0xff]  ;;  %v5684_v28 = vld [vmem:[%s9094_s3 + $0x30] sm:$0xff]  }
  0x4c   : > { %4947 = vmatprep.subr.bf16.mxu1 %v5670_v61  ;;  %v6370_v22 = vld [vmem:[%s5943_s21 + $0x88] sm:$0xff]  ;;  %v932_v30 = vld [vmem:[%s5938_s18 + $0x98] sm:$0xff]  ;;  %v6404_v36 = vld [vmem:[%s5943_s21 + $0x90] sm:$0xff] }
  0x4d   : > { %5064 = vmatpush3.bf16.msra.mxu0 %v5667_v57  ;;  %v5685_v33 = vld [vmem:[%s9094_s3 + $0x78] sm:$0xff]   ;;  %v6415_v42 = vld [vmem:[%s5943_s21 + $0xa0] sm:$0xff]  ;;  %v935_v44 = vld [vmem:[%s5938_s18 + $0xb0] sm:$0xff] }
  0x4e   : > { %4948 = vmatpush3.bf16.msra.mxu1 %v5671_v1  ;;  %5065 = vmatprep.subr.bf16.mxu0 %v5673_v6  ;;  %v5686_v34 = vld [vmem:[%s9094_s3 + $0x38] sm:$0xff]   ;;  %v6425_v46 = vld [vmem:[%s5943_s21 + $0xb0] sm:$0xff]  ;;  %v938_v49 = vld [vmem:[%s5938_s18 + $0xc8] sm:$0xff] }
  0x4f   : > { %1322 = vperm.xlu1 %5637, %v6234_v27   ;;  %1319 = vperm.xlu0 %5636, %v6240_v29   ;;  %v6401_v35 = vld [vmem:[%s5943_s21 + $0x98] sm:$0xff]  ;;  %v937_v50 = vld [vmem:[%s5938_s18 + $0xc0] sm:$0xff]  ;;  %v6448_v57 = vld [vmem:[%s5943_s21 + $0xd0] sm:$0xff] }
  0x50   : > { %5534 = vmatmul.mubr.msk.bf16.gmra.mrb[12].mxu0 %vm703_vm2, %v5652_v41  ;;  %4949 = vmatprep.subr.bf16.mxu1 %v5674_v7  ;;  %v6412_v41 = vld [vmem:[%s5943_s21 + $0xa8] sm:$0xff]  ;;  %v936_v43 = vld [vmem:[%s5938_s18 + $0xb8] sm:$0xff]  ;;  %v5687_v55 = vld [vmem:[%s9096_s5 + $0x40] sm:$0xff]   ;;  %v9115_v7 = vlaneseq }
  0x51   : > { %5537 = vmatprep.mubr.msk.bf16.mxu0 %vm703_vm2, %v5655_v45  ;;  %5066 = vmatpush3.bf16.msra.mxu0 %v5675_v8  ;;  %v6422_v45 = vld [vmem:[%s5943_s21 + $0xb8] sm:$0xff]  ;;  %v942_v58 = vld [vmem:[%s5938_s18 + $0xe8] sm:$0xff]  ;;  %v941_v61 = vld [vmem:[%s5938_s18 + $0xe0] sm:$0xff] }
  0x52   : > { %4950 = vmatpush3.bf16.msra.mxu1 %v5676_v11  ;;  %5067 = vmatprep.subr.bf16.mxu0 %v5681_v24  ;;  %v6445_v56 = vld [vmem:[%s5943_s21 + $0xd8] sm:$0xff]  ;;  %v943_v1 = vld [vmem:[%s5938_s18 + $0xf0] sm:$0xff]  ;;  %v6475_v8 = vand.u32 127, %v9115_v7  ;;  %v2826_v11 = vsel %vm2794_vm4, 1, %v5861_v4  ;;  %vm2800_vm4 = vcmp.ge.s32.totalorder %v6234_v27, 256  ;;  %v5689_v27 = vld [vmem:[%s9096_s5 + $0x48] sm:$0xff]  }
  0x53   : > { %1008 = vperm.xlu1 %5637, %v922_v31   ;;  %1005 = vperm.xlu0 %5636, %v921_v32   ;;  %v931_v31 = vld [vmem:[%s5938_s18 + $0x90] sm:$0xff]  ;;  %v5680_v32 = vld [vmem:[%s5948_s24 + $0x78] sm:$0xff]   ;;  %v2832_v29 = vsel %vm2800_vm4, 1, %v5861_v4 }
  0x54   : > { %4951 = vmatprep.subr.bf16.mxu1 %v5678_v15  ;;  %v6468_v6 = vld [vmem:[%s5943_s21 + $0xf0] sm:$0xff]  ;;  %v6483_v2 = vadd.s32 128, %v6475_v8 }
  0x55   : > { %5068 = vmatpush3.bf16.msra.mxu0 %v5683_v26  ;;  %v9284_v26 = vmov 0 }
  0x56   : > { %4952 = vmatpush3.bf16.msra.mxu1 %v5679_v17  ;;  %5165 = vmatprep.subr.bf16.mxu0 %v5687_v55  ;;  %v2827_v17 = vsel %vm2795_vm6, 1, %v5861_v4 }
  0x57   : > { %1328 = vperm.xlu1 %5637, %v6260_v37   ;;  %1325 = vperm.xlu0 %5636, %v6263_v38  }
  0x58   : > { %5538 = vmatmul.mubr.msk.bf16.gmra.mrb[16].mxu0 %vm703_vm2, %v5656_v53  ;;  %4953 = vmatprep.subr.bf16.mxu1 %v5682_v25  ;;  %v940_v53 = vld [vmem:[%s5938_s18 + $0xd8] sm:$0xff] }
  0x59   : > { %5541 = vmatprep.mubr.msk.bf16.mxu0 %vm703_vm2, %v5661_v54  ;;  %v939_v54 = vld [vmem:[%s5938_s18 + $0xd0] sm:$0xff] }
  0x5a   : > { %4954 = vmatpush3.bf16.msra.mxu1 %v5684_v28 }
  0x5b   : > { %1014 = vperm.xlu1 %5637, %v924_v39   ;;  %1011 = vperm.xlu0 %5636, %v923_v40   ;;  %v934_v39 = vld [vmem:[%s5938_s18 + $0xa8] sm:$0xff]  ;;  %v933_v40 = vld [vmem:[%s5938_s18 + $0xa0] sm:$0xff] }
  0x5c   : > { %4955 = vmatprep.subr.bf16.mxu1 %v5685_v33  ;;  %v9254_v33 = vmov 0 }
  0x5e   : > { %4956 = vmatpush3.bf16.msra.mxu1 %v5686_v34  ;;  %v9117_v34 = vmov 1.0|1.0  }
  0x5f   : > { %1334 = vperm.xlu1 %5637, %v6286_v47   ;;  %1331 = vperm.xlu0 %5636, %v6289_v48  }
  0x60   : > { %5542 = vmatmul.mubr.msk.bf16.gmra.mrb[20].mxu0 %vm703_vm2, %v5664_v0  ;;  %5589 = vmatprep.subr.bf16.mxu1 %v5687_v55  ;;  %v944_v0 = vld [vmem:[%s5938_s18 + $0xf8] sm:$0xff] }
  0x61   : > { %5545 = vmatprep.mubr.msk.bf16.mxu0 %vm703_vm2, %v5669_v3  ;;  %v6465_v3 = vld [vmem:[%s5943_s21 + $0xf8] sm:$0xff] }
  0x63   : > { %1020 = vperm.xlu1 %5637, %v926_v51   ;;  %1017 = vperm.xlu0 %5636, %v925_v52   ;;  %v6432_v51 = vld [vmem:[%s5943_s21 + $0xc8] sm:$0xff]  ;;  %v6435_v52 = vld [vmem:[%s5943_s21 + $0xc0] sm:$0xff] }
  0x67   : > { %1340 = vperm.xlu1 %5637, %v6318_v59   ;;  %1337 = vperm.xlu0 %5636, %v6321_v60  }
  0x68   : > { %5546 = vmatmul.mubr.msk.bf16.gmra.mrb[24].mxu0 %vm703_vm2, %v5672_v19 }
  0x69   : > { %5549 = vmatprep.mubr.msk.bf16.mxu0 %vm703_vm2, %v5677_v21 }
  0x6b   : > { %1026 = vperm.xlu1 %5637, %v928_v62   ;;  %1023 = vperm.xlu0 %5636, %v927_v63   ;;  %v6455_v62 = vld [vmem:[%s5943_s21 + $0xe8] sm:$0xff]  ;;  %v6458_v63 = vld [vmem:[%s5943_s21 + $0xe0] sm:$0xff] }
  0x6f   : > { %1346 = vperm.xlu1 %5637, %v6350_v12   ;;  %1343 = vperm.xlu0 %5636, %v6353_v13  }
  0x70   : > { %5550 = vmatmul.mubr.msk.bf16.gmra.mrb[28].mxu0 %vm703_vm2, %v5680_v32 }
  0x73   : > { %1032 = vperm.xlu1 %5637, %v930_v14   ;;  %1029 = vperm.xlu0 %5636, %v929_v16   ;;  %v2825_v14 = vsel %vm2793_vm3, 1, %v5861_v4 }
  0x77   : > { %1352 = vperm.xlu1 %5637, %v6370_v22   ;;  %1349 = vperm.xlu0 %5636, %v6373_v23  }
  0x7b   : > { %1038 = vperm.xlu1 %5637, %v932_v30   ;;  %1035 = vperm.xlu0 %5636, %v931_v31  }
  0x7f   : > { %1358 = vperm.xlu1 %5637, %v6401_v35   ;;  %1355 = vperm.xlu0 %5636, %v6404_v36  }
  0x83   : > { %1044 = vperm.xlu1 %5637, %v934_v39   ;;  %1041 = vperm.xlu0 %5636, %v933_v40  }
  0x87   : > { %1364 = vperm.xlu1 %5637, %v6412_v41   ;;  %1361 = vperm.xlu0 %5636, %v6415_v42  }
  0x8b   : > { %1050 = vperm.xlu1 %5637, %v936_v43   ;;  %1047 = vperm.xlu0 %5636, %v935_v44   ;;  %v2829_v43 = vsel %vm2797_vm13, 1, %v5861_v4  ;;  %v5688_v44 = vld [vmem:[%s9096_s5] sm:$0xff]   ;;  %vm2801_vm13 = vcmp.ge.s32.totalorder %v6263_v38, 256 }
  0x8f   : > { %1370 = vperm.xlu1 %5637, %v6422_v45   ;;  %1367 = vperm.xlu0 %5636, %v6425_v46  }
  0x93   : > { %1056 = vperm.xlu1 %5637, %v938_v49   ;;  %1053 = vperm.xlu0 %5636, %v937_v50   ;;  %v2831_v49 = vsel %vm2799_vm5, 1, %v5861_v4 }
  0x97   : > { %1376 = vperm.xlu1 %5637, %v6432_v51   ;;  %1373 = vperm.xlu0 %5636, %v6435_v52  }
  0x9b   : > { %1062 = vperm.xlu1 %5637, %v940_v53   ;;  %1059 = vperm.xlu0 %5636, %v939_v54  }
  0x9f   : > { %1382 = vperm.xlu1 %5637, %v6445_v56   ;;  %1379 = vperm.xlu0 %5636, %v6448_v57  }
  0xa3   : > { %1068 = vperm.xlu1 %5637, %v942_v58   ;;  %1065 = vperm.xlu0 %5636, %v941_v61  }
  0xa7   : > { %1388 = vperm.xlu1 %5637, %v6455_v62   ;;  %1385 = vperm.xlu0 %5636, %v6458_v63  }
  0xab   : > { %1074 = vperm.xlu1 %5637, %v944_v0   ;;  %1071 = vperm.xlu0 %5636, %v943_v1   ;;  %v5690_v0 = vld [vmem:[%s9096_s5 + $0x8] sm:$0xff]  }
  0xaf   : > { %1394 = vperm.xlu1 %5637, %v6465_v3   ;;  %1391 = vperm.xlu0 %5636, %v6468_v6  }
  0xb2   : > { %v1302_v15 = vpop.permute.xlu1 %1301  ;;  %v982_v16 = vpop.permute.xlu0 %981 }
  0xb3   : > { %2861 = vperm.xlu1 %5637, %v2826_v11   ;;  %2858 = vperm.xlu0 %5636, %v2825_v14   ;;  %vm1396_vm8 = vcmp.eq.s32.totalorder %v1302_v15, %v6475_v8  ;;  %vm1397_vm9 = vcmp.eq.s32.totalorder %v1302_v15, %v6483_v2  ;;  %vm1077_vm14 = vcmp.eq.s32.totalorder %v982_v16, %v6483_v2  ;;  %v5702_v14 = vld [vmem:[%s9096_s5 + $0x38] sm:$0xff]  }
  0xb4   : > { %v6497_v18 = vsel %vm1396_vm8, 1.0, %v9124_v10  ;;  %vm1076_vm1 = vcmp.eq.s32.totalorder %v982_v16, %v6475_v8  ;;  %v6520_v30 = vsel %vm1397_vm9, 1.0, %v9124_v10 }
  0xb5   : > { %9200 = vst [vmem:[#allocation4_spill] sm:$0xff] %v6497_v18  ;;  %9206 = vst [vmem:[#allocation6_spill] sm:$0xff] %v6520_v30 }
  0xb6   : > { %v1305_v19 = vpop.permute.xlu1 %1304  ;;  %v985_v21 = vpop.permute.xlu0 %984 }
  0xb7   : > { %vm1398_vm10 = vcmp.eq.s32.totalorder %v1305_v19, %v6475_v8  ;;  %vm1078_vm11 = vcmp.eq.s32.totalorder %v985_v21, %v6475_v8  ;;  %vm1079_vm12 = vcmp.eq.s32.totalorder %v985_v21, %v6483_v2  ;;  %2867 = vperm.xlu1 %5637, %v2828_v5   ;;  %2864 = vperm.xlu0 %5636, %v2827_v17   ;;  %v2833_v17 = vsel %vm2801_vm13, 1, %v5861_v4 }
  0xb8   : > { %v6501_v24 = vsel %vm1398_vm10, 1.0, %v9124_v10  ;;  %vm6505_vm15 = vmpackc.low %vm1398_vm10, %vm1396_vm8  ;;  %vm1399_vm0 = vcmp.eq.s32.totalorder %v1305_v19, %v6483_v2 }
  0xb9   : > { %9201 = vst [vmem:[#allocation5_spill] sm:$0xff] %v6501_v24  ;;  %vm6513_vm2 = vmpackc.low %vm1079_vm12, %vm1077_vm14  ;;  %v6525_v31 = vsel %vm1399_vm0, 1.0, %v9124_v10  ;;  %vm2802_vm12 = vcmp.ge.s32.totalorder %v6260_v37, 256  ;;  %v5691_v37 = vld [vmem:[%s9096_s5 + $0x50] sm:$0xff]  }
  0xba   : > { %9207 = vst [vmem:[#allocation7_spill] sm:$0xff] %v6525_v31  ;;  %vm6529_vm3 = vmpackc.low %vm1078_vm11, %vm1076_vm1  ;;  %4759 = vmatprep.mubr.msk.bf16.mxu0 %vm6513_vm2, %v9117_v34  ;;  %v991_v39 = vpop.permute.xlu1 %990  ;;  %v988_v40 = vpop.permute.xlu0 %987  ;;  %v2834_v15 = vsel %vm2802_vm12, 1, %v5861_v4 }
  0xbb   : > { %vm4678_vm6 = vmpackc.low %vm1399_vm0, %vm1397_vm9  ;;  %vm1083_vm7 = vcmp.eq.s32.totalorder %v991_v39, %v6483_v2  ;;  %vm1081_vm8 = vcmp.eq.s32.totalorder %v988_v40, %v6483_v2  ;;  %4761 = vmatmul.mubr.msk.bf16.vlgmr.msra.gmra.mrb[32].mxu0 %vm6529_vm3, %v9117_v34  ;;  %2873 = vperm.xlu1 %5637, %v2830_v9   ;;  %vm1082_vm9 = vcmp.eq.s32.totalorder %v991_v39, %v6475_v8  ;;  %v5692_v9 = vld [vmem:[%s9096_s5 + $0x10] sm:$0xff]  }
  0xbc   : > { %4679 = vmatprep.mubr.msk.bf16.mxu1 %vm4678_vm6, %v9117_v34  ;;  %vm6556_vm10 = vmpackc.low %vm1083_vm7, %vm1081_vm8  ;;  %2870 = vperm.xlu0 %5636, %v2829_v43   ;;  %vm1080_vm11 = vcmp.eq.s32.totalorder %v988_v40, %v6475_v8  ;;  %vm2804_vm7 = vcmp.ge.s32.totalorder %v6286_v47, 256  ;;  %vm2803_vm8 = vcmp.ge.s32.totalorder %v6289_v48, 256 }
  0xbd   : > { %4681 = vmatmul.mubr.msk.bf16.vlgmr.msra.gmra.mrb[0].mxu1 %vm6505_vm15, %v9117_v34  ;;  %4763 = vmatprep.mubr.msk.bf16.mxu0 %vm6556_vm10, %v9117_v34  ;;  %vm6602_vm5 = vmpackc.low %vm1082_vm9, %vm1080_vm11  ;;  %v2836_v47 = vsel %vm2804_vm7, 1, %v5861_v4  ;;  %v2835_v48 = vsel %vm2803_vm8, 1, %v5861_v4 }
  0xbe   : > { %v1311_v50 = vpop.permute.xlu1 %1310  ;;  %v1308_v53 = vpop.permute.xlu0 %1307  ;;  %5166 = vmatpush3.bf16.msra.mxu0 %v5688_v44  ;;  %5597 = vmatpush3.bf16.msra.mxu1 %v5688_v44  ;;  %v5693_v44 = vld [vmem:[%s9096_s5 + $0x58] sm:$0xff]  }
  0xbf   : > { %vm1402_vm14 = vcmp.eq.s32.totalorder %v1311_v50, %v6475_v8  ;;  %vm1403_vm15 = vcmp.eq.s32.totalorder %v1311_v50, %v6483_v2  ;;  %vm1400_vm0 = vcmp.eq.s32.totalorder %v1308_v53, %v6475_v8  ;;  %vm1401_vm1 = vcmp.eq.s32.totalorder %v1308_v53, %v6483_v2  ;;  %2879 = vperm.xlu1 %5637, %v2832_v29  }
  0xc0   : > { %v6582_v54 = vsel %vm1402_vm14, 1.0, %v9124_v10  ;;  %v6585_v55 = vsel %vm1403_vm15, 1.0, %v9124_v10  ;;  %v6590_v58 = vsel %vm1400_vm0, 1.0, %v9124_v10  ;;  %v6593_v61 = vsel %vm1401_vm1, 1.0, %v9124_v10  ;;  %vm4682_vm4 = vmpackc.low %vm1403_vm15, %vm1401_vm1  ;;  %5590 = vmatprep.subr.bf16.mxu1 %v5689_v27  ;;  %2876 = vperm.xlu0 %5636, %v2831_v49  }
  0xc1   : > { %9212 = vst [vmem:[#allocation8_spill] sm:$0xff] %v6582_v54  ;;  %9213 = vst [vmem:[#allocation9_spill] sm:$0xff] %v6585_v55  ;;  %4683 = vmatprep.mubr.msk.bf16.mxu1 %vm4682_vm4, %v9117_v34  ;;  %5167 = vmatprep.subr.bf16.mxu0 %v5689_v27  ;;  %vm2806_vm15 = vcmp.ge.s32.totalorder %v6318_v59, 256  ;;  %v9224_v27 = vmov 0  ;;  %v5694_v59 = vld [vmem:[%s9096_s5 + $0x18] sm:$0xff]   ;;  %v9282_v49 = vmov 0 }
  0xc2   : > { %9214 = vst [vmem:[#allocation10_spill] sm:$0xff] %v6590_v58  ;;  %9215 = vst [vmem:[#allocation11_spill] sm:$0xff] %v6593_v61  ;;  %v997_v16 = vpop.permute.xlu1 %996  ;;  %v994_v5 = vpop.permute.xlu0 %993  ;;  %5168 = vmatpush3.bf16.msra.mxu0 %v5690_v0  ;;  %5598 = vmatpush3.bf16.msra.mxu1 %v5690_v0  ;;  %v2838_v50 = vsel %vm2806_vm15, 1, %v5861_v4 }
  0xc3   : > { %vm4684_vm6 = vmpackc.low %vm1402_vm14, %vm1400_vm0  ;;  %vm1087_vm9 = vcmp.eq.s32.totalorder %v997_v16, %v6483_v2  ;;  %vm1085_vm11 = vcmp.eq.s32.totalorder %v994_v5, %v6483_v2  ;;  %4765 = vmatmul.mubr.msk.bf16.gmra.mrb[36].mxu0 %vm6602_vm5, %v9117_v34  ;;  %2885 = vperm.xlu1 %5637, %v2834_v15   ;;  %vm1086_vm13 = vcmp.eq.s32.totalorder %v997_v16, %v6475_v8  ;;  %vm2805_vm0 = vcmp.ge.s32.totalorder %v6321_v60, 256 }
  0xc4   : > { %vm6631_vm12 = vmpackc.low %vm1087_vm9, %vm1085_vm11  ;;  %2882 = vperm.xlu0 %5636, %v2833_v17   ;;  %vm1084_vm14 = vcmp.eq.s32.totalorder %v994_v5, %v6475_v8  ;;  %5591 = vmatprep.subr.bf16.mxu1 %v5691_v37  ;;  %v2837_v15 = vsel %vm2805_vm0, 1, %v5861_v4  ;;  %v9226_v60 = vmov 0  ;;  %v5695_v17 = vld [vmem:[%s9096_s5 + $0x60] sm:$0xff]  }
  0xc5   : > { %4685 = vmatmul.mubr.msk.bf16.gmra.mrb[4].mxu1 %vm4684_vm6, %v9117_v34  ;;  %4767 = vmatprep.mubr.msk.bf16.mxu0 %vm6631_vm12, %v9117_v34  ;;  %vm6675_vm9 = vmpackc.low %vm1086_vm13, %vm1084_vm14  ;;  %vm2808_vm13 = vcmp.ge.s32.totalorder %v6350_v12, 256  ;;  %vm2807_vm14 = vcmp.ge.s32.totalorder %v6353_v13, 256 }
  0xc6   : > { %v1317_v19 = vpop.permute.xlu1 %1316  ;;  %v1314_v21 = vpop.permute.xlu0 %1313  ;;  %5169 = vmatprep.subr.bf16.mxu0 %v5691_v37  ;;  %v9225_v27 = vsel %vm6675_vm9, 4294967295, %v9224_v27  ;;  %5599 = vmatpush3.bf16.msra.mxu1 %v5692_v9  ;;  %v2840_v12 = vsel %vm2808_vm13, 1, %v5861_v4  ;;  %v2839_v13 = vsel %vm2807_vm14, 1, %v5861_v4 }
  0xc7   : > { %vm1406_vm1 = vcmp.eq.s32.totalorder %v1317_v19, %v6475_v8  ;;  %vm1407_vm4 = vcmp.eq.s32.totalorder %v1317_v19, %v6483_v2  ;;  %vm1404_vm6 = vcmp.eq.s32.totalorder %v1314_v21, %v6475_v8  ;;  %vm1405_vm7 = vcmp.eq.s32.totalorder %v1314_v21, %v6483_v2  ;;  %2891 = vperm.xlu1 %5637, %v2836_v47   ;;  %v5696_v21 = vld [vmem:[%s9096_s5 + $0x20] sm:$0xff]  }
  0xc8   : > { %v6655_v25 = vsel %vm1406_vm1, 1.0, %v9124_v10  ;;  %v6658_v39 = vsel %vm1407_vm4, 1.0, %v9124_v10  ;;  %v6663_v40 = vsel %vm1404_vm6, 1.0, %v9124_v10  ;;  %v6666_v43 = vsel %vm1405_vm7, 1.0, %v9124_v10  ;;  %vm4686_vm8 = vmpackc.low %vm1407_vm4, %vm1405_vm7  ;;  %2888 = vperm.xlu0 %5636, %v2835_v48   ;;  %5170 = vmatpush3.bf16.msra.mxu0 %v5692_v9 }
  0xc9   : > { %9220 = vst [vmem:[#allocation12_spill] sm:$0xff] %v6655_v25  ;;  %9221 = vst [vmem:[#allocation13_spill] sm:$0xff] %v6658_v39  ;;  %4687 = vmatprep.mubr.msk.bf16.mxu1 %vm4686_vm8, %v9117_v34  ;;  %5592 = vmatprep.subr.bf16.mxu1 %v5693_v44  ;;  %vm2810_vm7 = vcmp.ge.s32.totalorder %v6370_v22, 256  ;;  %v9232_v9 = vmov 0  ;;  %v5697_v22 = vld [vmem:[%s9096_s5 + $0x68] sm:$0xff]  }
  0xca   : > { %9222 = vst [vmem:[#allocation14_spill] sm:$0xff] %v6663_v40  ;;  %9223 = vst [vmem:[#allocation15_spill] sm:$0xff] %v6666_v43  ;;  %v1003_v53 = vpop.permute.xlu1 %1002  ;;  %v1000_v0 = vpop.permute.xlu0 %999  ;;  %5171 = vmatprep.subr.bf16.mxu0 %v5693_v44  ;;  %5600 = vmatpush3.bf16.msra.mxu1 %v5694_v59  ;;  %v9302_v43 = vmov 0  ;;  %v9334_v40 = vmov 0 }
  0xcb   : > { %vm4688_vm11 = vmpackc.low %vm1406_vm1, %vm1404_vm6  ;;  %vm1091_vm4 = vcmp.eq.s32.totalorder %v1003_v53, %v6483_v2  ;;  %vm1089_vm15 = vcmp.eq.s32.totalorder %v1000_v0, %v6483_v2  ;;  %4769 = vmatmul.mubr.msk.bf16.gmra.mrb[40].mxu0 %vm6675_vm9, %v9117_v34  ;;  %2897 = vperm.xlu1 %5637, %v2838_v50   ;;  %vm1090_vm0 = vcmp.eq.s32.totalorder %v1003_v53, %v6475_v8  ;;  %v9242_v50 = vmov 0 }
  0xcc   : > { %vm6704_vm1 = vmpackc.low %vm1091_vm4, %vm1089_vm15  ;;  %2894 = vperm.xlu0 %5636, %v2837_v15   ;;  %vm1088_vm6 = vcmp.eq.s32.totalorder %v1000_v0, %v6475_v8  ;;  %5172 = vmatpush3.bf16.msra.mxu0 %v5694_v59  ;;  %v2842_v15 = vsel %vm2810_vm7, 1, %v5861_v4 }
  0xcd   : > { %v9227_v60 = vsel %vm6704_vm1, 4294967295, %v9226_v60  ;;  %4689 = vmatmul.mubr.msk.bf16.gmra.mrb[8].mxu1 %vm4688_vm11, %v9117_v34  ;;  %4771 = vmatprep.mubr.msk.bf16.mxu0 %vm6704_vm1, %v9117_v34  ;;  %vm6748_vm8 = vmpackc.low %vm1090_vm0, %vm1088_vm6  ;;  %vm9234_vm6 = vcmp.ge.s32.totalorder %v6373_v23, 256  ;;  %v9235_v23 = vmov 0 }
  0xce   : > { %v1323_v16 = vpop.permute.xlu1 %1322  ;;  %v1320_v5 = vpop.permute.xlu0 %1319  ;;  %v9233_v9 = vsel %vm6748_vm8, 4294967295, %v9232_v9  ;;  %v2841_v59 = vsel %vm9234_vm6, 1, %v5861_v4  ;;  %5593 = vmatprep.subr.bf16.mxu1 %v5695_v17  ;;  %5173 = vmatprep.subr.bf16.mxu0 %v5695_v17 }
  0xcf   : > { %vm1410_vm11 = vcmp.eq.s32.totalorder %v1323_v16, %v6475_v8  ;;  %vm1411_vm13 = vcmp.eq.s32.totalorder %v1323_v16, %v6483_v2  ;;  %vm1408_vm14 = vcmp.eq.s32.totalorder %v1320_v5, %v6475_v8  ;;  %vm1409_vm4 = vcmp.eq.s32.totalorder %v1320_v5, %v6483_v2  ;;  %2903 = vperm.xlu1 %5637, %v2840_v12   ;;  %v5698_v16 = vld [vmem:[%s9096_s5 + $0x28] sm:$0xff]  }
  0xd0   : > { %v6728_v37 = vsel %vm1410_vm11, 1.0, %v9124_v10  ;;  %v6731_v47 = vsel %vm1411_vm13, 1.0, %v9124_v10  ;;  %v6736_v48 = vsel %vm1408_vm14, 1.0, %v9124_v10  ;;  %v6739_v19 = vsel %vm1409_vm4, 1.0, %v9124_v10  ;;  %vm4690_vm15 = vmpackc.low %vm1411_vm13, %vm1409_vm4  ;;  %2900 = vperm.xlu0 %5636, %v2839_v13   ;;  %5174 = vmatpush3.bf16.msra.mxu0 %v5696_v21 }
  0xd1   : > { %9228 = vst [vmem:[#allocation16_spill] sm:$0xff] %v6728_v37  ;;  %9229 = vst [vmem:[#allocation17_spill] sm:$0xff] %v6731_v47  ;;  %4691 = vmatprep.mubr.msk.bf16.mxu1 %vm4690_vm15, %v9117_v34  ;;  %vm2812_vm13 = vcmp.ge.s32.totalorder %v6401_v35, 256  ;;  %vm2811_vm4 = vcmp.ge.s32.totalorder %v6404_v36, 256  ;;  %5601 = vmatpush3.bf16.msra.mxu1 %v5696_v21 }
  0xd2   : > { %9230 = vst [vmem:[#allocation18_spill] sm:$0xff] %v6736_v48  ;;  %9231 = vst [vmem:[#allocation19_spill] sm:$0xff] %v6739_v19  ;;  %v1009_v53 = vpop.permute.xlu1 %1008  ;;  %v1006_v0 = vpop.permute.xlu0 %1005  ;;  %v2844_v35 = vsel %vm2812_vm13, 1, %v5861_v4  ;;  %v2843_v36 = vsel %vm2811_vm4, 1, %v5861_v4  ;;  %5594 = vmatprep.subr.bf16.mxu1 %v5697_v22  ;;  %5175 = vmatprep.subr.bf16.mxu0 %v5697_v22 }
  0xd3   : > { %vm4692_vm0 = vmpackc.low %vm1410_vm11, %vm1408_vm14  ;;  %vm1095_vm15 = vcmp.eq.s32.totalorder %v1009_v53, %v6483_v2  ;;  %vm1093_vm7 = vcmp.eq.s32.totalorder %v1006_v0, %v6483_v2  ;;  %4773 = vmatmul.mubr.msk.bf16.gmra.mrb[44].mxu0 %vm6748_vm8, %v9117_v34  ;;  %2909 = vperm.xlu1 %5637, %v2842_v15   ;;  %vm1092_vm6 = vcmp.eq.s32.totalorder %v1006_v0, %v6475_v8  ;;  %vm2815_vm8 = vcmp.ge.s32.totalorder %v6425_v46, 256 }
  0xd4   : > { %vm6777_vm11 = vmpackc.low %vm1095_vm15, %vm1093_vm7  ;;  %2906 = vperm.xlu0 %5636, %v2841_v59   ;;  %v5699_v59 = vld [vmem:[%s9096_s5 + $0x70] sm:$0xff]   ;;  %5176 = vmatpush3.bf16.msra.mxu0 %v5698_v16  ;;  %v2847_v46 = vsel %vm2815_vm8, 1, %v5861_v4 }
  0xd5   : > { %v9236_v23 = vsel %vm6777_vm11, 4294967295, %v9235_v23  ;;  %4693 = vmatmul.mubr.msk.bf16.gmra.mrb[12].mxu1 %vm4692_vm0, %v9117_v34  ;;  %4775 = vmatprep.mubr.msk.bf16.mxu0 %vm6777_vm11, %v9117_v34  ;;  %vm2816_vm11 = vcmp.ge.s32.totalorder %v6422_v45, 256 }
  0xd6   : > { %v1329_v12 = vpop.permute.xlu1 %1328  ;;  %v1326_v13 = vpop.permute.xlu0 %1325  ;;  %5602 = vmatpush3.bf16.msra.mxu1 %v5698_v16  ;;  %v2848_v45 = vsel %vm2816_vm11, 1, %v5861_v4  ;;  %5177 = vmatprep.subr.bf16.mxu0 %v5699_v59 }
  0xd7   : > { %vm9101_vm0 = vcmp.eq.s32.totalorder %v1329_v12, %v6475_v8  ;;  %vm1415_vm13 = vcmp.eq.s32.totalorder %v1329_v12, %v6483_v2  ;;  %vm1412_vm4 = vcmp.eq.s32.totalorder %v1326_v13, %v6475_v8  ;;  %vm1413_vm14 = vcmp.eq.s32.totalorder %v1326_v13, %v6483_v2  ;;  %2915 = vperm.xlu1 %5637, %v2844_v35   ;;  %v5701_v13 = vld [vmem:[%s9096_s5 + $0x78] sm:$0xff]  }
  0xd8   : > { %v6801_v5 = vsel %vm9101_vm0, 1.0, %v9124_v10  ;;  %v6804_v17 = vsel %vm1415_vm13, 1.0, %v9124_v10  ;;  %v6809_v21 = vsel %vm1412_vm4, 1.0, %v9124_v10  ;;  %v6812_v15 = vsel %vm1413_vm14, 1.0, %v9124_v10  ;;  %vm4694_vm7 = vmpackc.low %vm1415_vm13, %vm1413_vm14  ;;  %2912 = vperm.xlu0 %5636, %v2843_v36   ;;  %5595 = vmatprep.subr.bf16.mxu1 %v5699_v59 }
  0xd9   : > { %9237 = vst [vmem:[#allocation20_spill] sm:$0xff] %v6801_v5  ;;  %9238 = vst [vmem:[#allocation21_spill] sm:$0xff] %v6804_v17  ;;  %vm9241_vm0 = vcmp.eq.s32.totalorder %v1009_v53, %v6475_v8  ;;  %4695 = vmatprep.mubr.msk.bf16.mxu1 %vm4694_vm7, %v9117_v34  ;;  %vm9244_vm14 = vcmp.ge.s32.totalorder %v6412_v41, 256  ;;  %vm9246_vm13 = vcmp.ge.s32.totalorder %v6415_v42, 256  ;;  %v5700_v41 = vld [vmem:[%s9096_s5 + $0x30] sm:$0xff]   ;;  %v9247_v42 = vmov 0 }
  0xda   : > { %9239 = vst [vmem:[#allocation22_spill] sm:$0xff] %v6809_v21  ;;  %9240 = vst [vmem:[#allocation23_spill] sm:$0xff] %v6812_v15  ;;  %v2846_v22 = vsel %vm9244_vm14, 1, %v5861_v4  ;;  %v1015_v53 = vpop.permute.xlu1 %1014  ;;  %v1012_v0 = vpop.permute.xlu0 %1011  ;;  %v2845_v35 = vsel %vm9246_vm13, 1, %v5861_v4  ;;  %5178 = vmatpush3.bf16.msra.mxu0 %v5700_v41  ;;  %5603 = vmatpush3.bf16.msra.mxu1 %v5700_v41  ;;  %v9300_v17 = vmov 0 }
  0xdb   : > { %vm6821_vm15 = vmpackc.low %vm9241_vm0, %vm1092_vm6  ;;  %vm9245_vm6 = vcmp.eq.s32.totalorder %v1329_v12, %v6475_v8  ;;  %vm1099_vm7 = vcmp.eq.s32.totalorder %v1015_v53, %v6483_v2  ;;  %vm1097_vm14 = vcmp.eq.s32.totalorder %v1012_v0, %v6483_v2  ;;  %2921 = vperm.xlu1 %5637, %v2846_v22   ;;  %vm1096_vm13 = vcmp.eq.s32.totalorder %v1012_v0, %v6475_v8 }
  0xdc   : > { %v9243_v50 = vsel %vm6821_vm15, 4294967295, %v9242_v50  ;;  %vm4696_vm0 = vmpackc.low %vm9245_vm6, %vm1412_vm4  ;;  %4777 = vmatmul.mubr.msk.bf16.gmra.mrb[48].mxu0 %vm6821_vm15, %v9117_v34  ;;  %2918 = vperm.xlu0 %5636, %v2845_v35   ;;  %vm2819_vm15 = vcmp.ge.s32.totalorder %v6448_v57, 256 }
  0xdd   : > { %vm6850_vm4 = vmpackc.low %vm1099_vm7, %vm1097_vm14  ;;  %4697 = vmatmul.mubr.msk.bf16.gmra.mrb[16].mxu1 %vm4696_vm0, %v9117_v34  ;;  %5596 = vmatprep.subr.bf16.mxu1 %v5701_v13 }
  0xde   : > { %v9248_v42 = vsel %vm6850_vm4, 4294967295, %v9247_v42  ;;  %4779 = vmatprep.mubr.msk.bf16.mxu0 %vm6850_vm4, %v9117_v34  ;;  %v1335_v36 = vpop.permute.xlu1 %1334  ;;  %v1332_v12 = vpop.permute.xlu0 %1331  ;;  %vm2820_vm4 = vcmp.ge.s32.totalorder %v6445_v56, 256  ;;  %5179 = vmatprep.subr.bf16.mxu0 %v5701_v13  ;;  %v2851_v56 = vsel %vm2819_vm15, 1, %v5861_v4 }
  0xdf   : > { %vm9104_vm8 = vcmp.eq.s32.totalorder %v1335_v36, %v6475_v8  ;;  %vm1419_vm11 = vcmp.eq.s32.totalorder %v1335_v36, %v6483_v2  ;;  %vm1416_vm0 = vcmp.eq.s32.totalorder %v1332_v12, %v6475_v8  ;;  %vm1417_vm6 = vcmp.eq.s32.totalorder %v1332_v12, %v6483_v2  ;;  %2927 = vperm.xlu1 %5637, %v2848_v45  }
  0xe0   : > { %v6874_v16 = vsel %vm9104_vm8, 1.0, %v9124_v10  ;;  %v6877_v59 = vsel %vm1419_vm11, 1.0, %v9124_v10  ;;  %v6882_v22 = vsel %vm1416_vm0, 1.0, %v9124_v10  ;;  %v6885_v35 = vsel %vm1417_vm6, 1.0, %v9124_v10  ;;  %vm4698_vm14 = vmpackc.low %vm1419_vm11, %vm1417_vm6  ;;  %2924 = vperm.xlu0 %5636, %v2847_v46   ;;  %5180 = vmatpush3.bf16.msra.mxu0 %v5702_v14 }
  0xe1   : > { %9249 = vst [vmem:[#allocation24_spill] sm:$0xff] %v6874_v16  ;;  %9250 = vst [vmem:[#allocation25_spill] sm:$0xff] %v6877_v59  ;;  %vm9253_vm8 = vcmp.eq.s32.totalorder %v1015_v53, %v6475_v8  ;;  %4699 = vmatprep.mubr.msk.bf16.mxu1 %vm4698_vm14, %v9117_v34  ;;  %vm9256_vm6 = vcmp.ge.s32.totalorder %v6432_v51, 256  ;;  %vm9258_vm11 = vcmp.ge.s32.totalorder %v6435_v52, 256  ;;  %v9259_v51 = vmov 0  ;;  %5604 = vmatpush3.bf16.msra.mxu1 %v5702_v14 }
  0xe2   : > { %9251 = vst [vmem:[#allocation26_spill] sm:$0xff] %v6882_v22  ;;  %9252 = vst [vmem:[#allocation27_spill] sm:$0xff] %v6885_v35  ;;  %v2850_v41 = vsel %vm9256_vm6, 1, %v5861_v4  ;;  %v1021_v53 = vpop.permute.xlu1 %1020  ;;  %v1018_v0 = vpop.permute.xlu0 %1017  ;;  %v2849_v45 = vsel %vm9258_vm11, 1, %v5861_v4  ;;  %v2852_v52 = vsel %vm2820_vm4, 1, %v5861_v4  ;;  %v9295_v35 = vmov 0.0  }
  0xe3   : > { %vm6894_vm7 = vmpackc.low %vm9253_vm8, %vm1096_vm13  ;;  %vm9257_vm13 = vcmp.eq.s32.totalorder %v1335_v36, %v6475_v8  ;;  %vm1103_vm14 = vcmp.eq.s32.totalorder %v1021_v53, %v6483_v2  ;;  %vm1101_vm6 = vcmp.eq.s32.totalorder %v1018_v0, %v6483_v2  ;;  %2933 = vperm.xlu1 %5637, %v2850_v41   ;;  %vm1100_vm11 = vcmp.eq.s32.totalorder %v1018_v0, %v6475_v8 }
  0xe4   : > { %v9255_v33 = vsel %vm6894_vm7, 4294967295, %v9254_v33  ;;  %vm4700_vm8 = vmpackc.low %vm9257_vm13, %vm1416_vm0  ;;  %4781 = vmatmul.mubr.msk.bf16.gmra.mrb[52].mxu0 %vm6894_vm7, %v9117_v34  ;;  %2930 = vperm.xlu0 %5636, %v2849_v45   ;;  %v9266_v41 = vmov 0 }
  0xe5   : > { %vm6920_vm0 = vmpackc.low %vm1103_vm14, %vm1101_vm6  ;;  %4701 = vmatmul.mubr.msk.bf16.gmra.mrb[20].mxu1 %vm4700_vm8, %v9117_v34  ;;  %vm9265_vm14 = vcmp.eq.s32.totalorder %v1021_v53, %v6475_v8 }
  0xe6   : > { %v9260_v51 = vsel %vm6920_vm0, 4294967295, %v9259_v51  ;;  %4783 = vmatprep.mubr.msk.bf16.mxu0 %vm6920_vm0, %v9117_v34  ;;  %v1341_v57 = vpop.permute.xlu1 %1340  ;;  %v1338_v46 = vpop.permute.xlu0 %1337  ;;  %vm6956_vm0 = vmpackc.low %vm9265_vm14, %vm1100_vm11  ;;  %vm9269_vm11 = vcmp.ge.s32.totalorder %v6458_v63, 256  ;;  %vm2824_vm14 = vcmp.ge.s32.totalorder %v6465_v3, 256 }
  0xe7   : > { %vm1422_vm8 = vcmp.eq.s32.totalorder %v1341_v57, %v6475_v8  ;;  %vm1423_vm4 = vcmp.eq.s32.totalorder %v1341_v57, %v6483_v2  ;;  %vm1420_vm15 = vcmp.eq.s32.totalorder %v1338_v46, %v6475_v8  ;;  %vm1421_vm13 = vcmp.eq.s32.totalorder %v1338_v46, %v6483_v2  ;;  %2939 = vperm.xlu1 %5637, %v2852_v52  }
  0xe8   : > { %v6941_v36 = vsel %vm1422_vm8, 1.0, %v9124_v10  ;;  %v6944_v12 = vsel %vm1423_vm4, 1.0, %v9124_v10  ;;  %v6947_v13 = vsel %vm1420_vm15, 1.0, %v9124_v10  ;;  %v6950_v14 = vsel %vm1421_vm13, 1.0, %v9124_v10  ;;  %vm4702_vm6 = vmpackc.low %vm1423_vm4, %vm1421_vm13  ;;  %2936 = vperm.xlu0 %5636, %v2851_v56  }
  0xe9   : > { %9261 = vst [vmem:[#allocation28_spill] sm:$0xff] %v6941_v36  ;;  %9262 = vst [vmem:[#allocation29_spill] sm:$0xff] %v6944_v12  ;;  %v9267_v41 = vsel %vm6956_vm0, 4294967295, %v9266_v41  ;;  %4703 = vmatprep.mubr.msk.bf16.mxu1 %vm4702_vm6, %v9117_v34  ;;  %vm9268_vm13 = vcmp.ge.s32.totalorder %v6455_v62, 256  ;;  %v2853_v44 = vsel %vm9269_vm11, 1, %v5861_v4  ;;  %vm2823_vm6 = vcmp.ge.s32.totalorder %v6468_v6, 256 }
  0xea   : > { %9263 = vst [vmem:[#allocation30_spill] sm:$0xff] %v6947_v13  ;;  %9264 = vst [vmem:[#allocation31_spill] sm:$0xff] %v6950_v14  ;;  %v2854_v52 = vsel %vm9268_vm13, 1, %v5861_v4  ;;  %v1027_v53 = vpop.permute.xlu1 %1026  ;;  %v1024_v0 = vpop.permute.xlu0 %1023  ;;  %v9270_v62 = vmov 0  ;;  %v2856_v63 = vsel %vm2824_vm14, 1, %v5861_v4  ;;  %v2855_v56 = vsel %vm2823_vm6, 1, %v5861_v4 }
  0xeb   : > { %vm4704_vm4 = vmpackc.low %vm1422_vm8, %vm1420_vm15  ;;  %vm1107_vm7 = vcmp.eq.s32.totalorder %v1027_v53, %v6483_v2  ;;  %vm1105_vm1 = vcmp.eq.s32.totalorder %v1024_v0, %v6483_v2  ;;  %2945 = vperm.xlu1 %5637, %v2854_v52   ;;  %vm1106_vm8 = vcmp.eq.s32.totalorder %v1027_v53, %v6475_v8  ;;  %vm1104_vm15 = vcmp.eq.s32.totalorder %v1024_v0, %v6475_v8 }
  0xec   : > { %4785 = vmatmul.mubr.msk.bf16.gmra.mrb[56].mxu0 %vm6956_vm0, %v9117_v34  ;;  %vm6980_vm13 = vmpackc.low %vm1107_vm7, %vm1105_vm1  ;;  %2942 = vperm.xlu0 %5636, %v2853_v44   ;;  %v9278_v53 = vmov 0 }
  0xed   : > { %v9271_v62 = vsel %vm6980_vm13, 4294967295, %v9270_v62  ;;  %4705 = vmatmul.mubr.msk.bf16.gmra.mrb[24].mxu1 %vm4704_vm4, %v9117_v34  ;;  %4787 = vmatprep.mubr.msk.bf16.mxu0 %vm6980_vm13, %v9117_v34  ;;  %vm7014_vm6 = vmpackc.low %vm1106_vm8, %vm1104_vm15 }
  0xee   : > { %v1347_v3 = vpop.permute.xlu1 %1346  ;;  %v1344_v6 = vpop.permute.xlu0 %1343 }
  0xef   : > { %vm1426_vm1 = vcmp.eq.s32.totalorder %v1347_v3, %v6475_v8  ;;  %vm1427_vm7 = vcmp.eq.s32.totalorder %v1347_v3, %v6483_v2  ;;  %vm1424_vm4 = vcmp.eq.s32.totalorder %v1344_v6, %v6475_v8  ;;  %vm1425_vm11 = vcmp.eq.s32.totalorder %v1344_v6, %v6483_v2  ;;  %2951 = vperm.xlu1 %5637, %v2856_v63  }
  0xf0   : > { %v6999_v44 = vsel %vm1426_vm1, 1.0, %v9124_v10  ;;  %v7002_v57 = vsel %vm1427_vm7, 1.0, %v9124_v10  ;;  %v7005_v52 = vsel %vm1424_vm4, 1.0, %v9124_v10  ;;  %v7008_v4 = vsel %vm1425_vm11, 1.0, %v9124_v10  ;;  %vm4706_vm14 = vmpackc.low %vm1427_vm7, %vm1425_vm11  ;;  %2948 = vperm.xlu0 %5636, %v2855_v56  }
  0xf1   : > { %9272 = vst [vmem:[#allocation32_spill] sm:$0xff] %v6999_v44  ;;  %9273 = vst [vmem:[#allocation33_spill] sm:$0xff] %v7002_v57  ;;  %v9276_v6 = vmov 0  ;;  %4707 = vmatprep.mubr.msk.bf16.mxu1 %vm4706_vm14, %v9117_v34  ;;  %v9292_v57 = vmov 1.0|1.0  }
  0xf2   : > { %9274 = vst [vmem:[#allocation34_spill] sm:$0xff] %v7005_v52  ;;  %9275 = vst [vmem:[#allocation35_spill] sm:$0xff] %v7008_v4  ;;  %v9277_v6 = vsel %vm7014_vm6, 4294967295, %v9276_v6  ;;  %v1033_v63 = vpop.permute.xlu1 %1032  ;;  %v1030_v0 = vpop.permute.xlu0 %1029 }
  0xf3   : > { %vm4708_vm7 = vmpackc.low %vm1426_vm1, %vm1424_vm4  ;;  %vm1111_vm11 = vcmp.eq.s32.totalorder %v1033_v63, %v6483_v2  ;;  %vm1109_vm8 = vcmp.eq.s32.totalorder %v1030_v0, %v6483_v2  ;;  %vm1110_vm1 = vcmp.eq.s32.totalorder %v1033_v63, %v6475_v8  ;;  %vm1108_vm4 = vcmp.eq.s32.totalorder %v1030_v0, %v6475_v8 }
  0xf4   : > { %4789 = vmatmul.mubr.msk.bf16.gmra.mrb[60].mxu0 %vm7014_vm6, %v9117_v34  ;;  %vm7030_vm15 = vmpackc.low %vm1111_vm11, %vm1109_vm8 }
  0xf5   : > { %v9279_v53 = vsel %vm7030_vm15, 4294967295, %v9278_v53  ;;  %4709 = vmatmul.mubr.msk.bf16.gmra.mrb[28].mxu1 %vm4708_vm7, %v9117_v34  ;;  %4791 = vmatprep.mubr.msk.bf16.mxu0 %vm7030_vm15, %v9117_v34  ;;  %vm7056_vm15 = vmpackc.low %vm1110_vm1, %vm1108_vm4 }
  0xf6   : > { %v1353_v3 = vpop.permute.xlu1 %1352  ;;  %v1350_v56 = vpop.permute.xlu0 %1349  ;;  %v9283_v49 = vsel %vm7056_vm15, 4294967295, %v9282_v49 }
  0xf7   : > { %vm1430_vm14 = vcmp.eq.s32.totalorder %v1353_v3, %v6475_v8  ;;  %vm1431_vm6 = vcmp.eq.s32.totalorder %v1353_v3, %v6483_v2  ;;  %vm1428_vm11 = vcmp.eq.s32.totalorder %v1350_v56, %v6475_v8  ;;  %vm1429_vm8 = vcmp.eq.s32.totalorder %v1350_v56, %v6483_v2 }
  0xf8   : > { %v7045_v45 = vsel %vm1430_vm14, 1.0, %v9124_v10  ;;  %v7048_v46 = vsel %vm1431_vm6, 1.0, %v9124_v10  ;;  %v7051_v63 = vsel %vm1428_vm11, 1.0, %v9124_v10  ;;  %v7054_v0 = vsel %vm1429_vm8, 1.0, %v9124_v10  ;;  %vm4710_vm7 = vmpackc.low %vm1431_vm6, %vm1429_vm8 }
  0xf9   : > { %9280 = vst [vmem:[#allocation36_spill] sm:$0xff] %v7048_v46  ;;  %9281 = vst [vmem:[#allocation37_spill] sm:$0xff] %v7054_v0  ;;  %4711 = vmatprep.mubr.msk.bf16.mxu1 %vm4710_vm7, %v9117_v34 }
  0xfa   : > { %vm4712_vm13 = vmpackc.low %vm1430_vm14, %vm1428_vm11  ;;  %v1039_v29 = vpop.permute.xlu1 %1038  ;;  %v1036_v11 = vpop.permute.xlu0 %1035 }
  0xfb   : > { %vm1115_vm0 = vcmp.eq.s32.totalorder %v1039_v29, %v6483_v2  ;;  %vm1113_vm9 = vcmp.eq.s32.totalorder %v1036_v11, %v6483_v2  ;;  %vm1114_vm1 = vcmp.eq.s32.totalorder %v1039_v29, %v6475_v8  ;;  %vm1112_vm4 = vcmp.eq.s32.totalorder %v1036_v11, %v6475_v8 }
  0xfc   : > { %4793 = vmatmul.mubr.msk.bf16.gmra.mrb[64].mxu0 %vm7056_vm15, %v9117_v34  ;;  %vm7070_vm6 = vmpackc.low %vm1115_vm0, %vm1113_vm9 }
  0xfd   : > { %v9285_v26 = vsel %vm7070_vm6, 4294967295, %v9284_v26  ;;  %4713 = vmatmul.mubr.msk.bf16.gmra.mrb[32].mxu1 %vm4712_vm13, %v9117_v34  ;;  %4795 = vmatprep.mubr.msk.bf16.mxu0 %vm7070_vm6, %v9117_v34  ;;  %vm7096_vm8 = vmpackc.low %vm1114_vm1, %vm1112_vm4  ;;  %v9290_v34 = vmov 0 }
  0xfe   : > { %v1359_v56 = vpop.permute.xlu1 %1358  ;;  %v1356_v3 = vpop.permute.xlu0 %1355  ;;  %v9291_v34 = vsel %vm7096_vm8, 4294967295, %v9290_v34 }
  0xff   : > { %vm1434_vm14 = vcmp.eq.s32.totalorder %v1359_v56, %v6475_v8  ;;  %vm1435_vm11 = vcmp.eq.s32.totalorder %v1359_v56, %v6483_v2  ;;  %vm1432_vm9 = vcmp.eq.s32.totalorder %v1356_v3, %v6475_v8  ;;  %vm1433_vm0 = vcmp.eq.s32.totalorder %v1356_v3, %v6483_v2 }
 0x100   : > { %v7085_v7 = vsel %vm1434_vm14, 1.0, %v9124_v10  ;;  %v7088_v4 = vsel %vm1435_vm11, 1.0, %v9124_v10  ;;  %v7091_v29 = vsel %vm1432_vm9, 1.0, %v9124_v10  ;;  %v7094_v11 = vsel %vm1433_vm0, 1.0, %v9124_v10  ;;  %vm4714_vm13 = vmpackc.low %vm1435_vm11, %vm1433_vm0 }
 0x101   : > { %9286 = vst [vmem:[#allocation38_spill] sm:$0xff] %v7085_v7  ;;  %9287 = vst [vmem:[#allocation39_spill] sm:$0xff] %v7088_v4  ;;  %4715 = vmatprep.mubr.msk.bf16.mxu1 %vm4714_vm13, %v9292_v57  ;;  %v9293_v10 = vmov 0 }
 0x102   : > { %9288 = vst [vmem:[#allocation40_spill] sm:$0xff] %v7091_v29  ;;  %9289 = vst [vmem:[#allocation41_spill] sm:$0xff] %v7094_v11  ;;  %v1045_v14 = vpop.permute.xlu1 %1044  ;;  %v1042_v12 = vpop.permute.xlu0 %1041 }
 0x103   : > { %vm4716_vm7 = vmpackc.low %vm1434_vm14, %vm1432_vm9  ;;  %vm1119_vm6 = vcmp.eq.s32.totalorder %v1045_v14, %v6483_v2  ;;  %vm1117_vm15 = vcmp.eq.s32.totalorder %v1042_v12, %v6483_v2  ;;  %vm1118_vm4 = vcmp.eq.s32.totalorder %v1045_v14, %v6475_v8  ;;  %vm1116_vm14 = vcmp.eq.s32.totalorder %v1042_v12, %v6475_v8 }
 0x104   : > { %4797 = vmatmul.mubr.msk.bf16.gmra.mrb[68].mxu0 %vm7096_vm8, %v9292_v57  ;;  %vm7110_vm1 = vmpackc.low %vm1119_vm6, %vm1117_vm15 }
 0x105   : > { %v9294_v10 = vsel %vm7110_vm1, 4294967295, %v9293_v10  ;;  %4717 = vmatmul.mubr.msk.bf16.gmra.mrb[36].mxu1 %vm4716_vm7, %v9292_v57  ;;  %4799 = vmatprep.mubr.msk.bf16.mxu0 %vm7110_vm1, %v9292_v57  ;;  %vm7136_vm13 = vmpackc.low %vm1118_vm4, %vm1116_vm14 }
 0x106   : > { %v1365_v56 = vpop.permute.xlu1 %1364  ;;  %v1362_v3 = vpop.permute.xlu0 %1361  ;;  %v9301_v17 = vsel %vm7136_vm13, 4294967295, %v9300_v17 }
 0x107   : > { %vm1438_vm11 = vcmp.eq.s32.totalorder %v1365_v56, %v6475_v8  ;;  %vm1439_vm9 = vcmp.eq.s32.totalorder %v1365_v56, %v6483_v2  ;;  %vm1436_vm15 = vcmp.eq.s32.totalorder %v1362_v3, %v6475_v8  ;;  %vm1437_vm6 = vcmp.eq.s32.totalorder %v1362_v3, %v6483_v2 }
 0x108   : > { %v7125_v59 = vsel %vm1438_vm11, 1.0, %v9295_v35  ;;  %v7128_v15 = vsel %vm1439_vm9, 1.0, %v9295_v35  ;;  %v7131_v14 = vsel %vm1436_vm15, 1.0, %v9295_v35  ;;  %v7134_v12 = vsel %vm1437_vm6, 1.0, %v9295_v35  ;;  %vm4718_vm0 = vmpackc.low %vm1439_vm9, %vm1437_vm6 }
 0x109   : > { %9296 = vst [vmem:[#allocation42_spill] sm:$0xff] %v7125_v59  ;;  %9297 = vst [vmem:[#allocation43_spill] sm:$0xff] %v7128_v15  ;;  %4719 = vmatprep.mubr.msk.bf16.mxu1 %vm4718_vm0, %v9292_v57 }
 0x10a   : > { %9298 = vst [vmem:[#allocation44_spill] sm:$0xff] %v7131_v14  ;;  %9299 = vst [vmem:[#allocation45_spill] sm:$0xff] %v7134_v12  ;;  %v1051_v19 = vpop.permute.xlu1 %1050  ;;  %v1048_v47 = vpop.permute.xlu0 %1047 }
 0x10b   : > { %vm4720_vm7 = vmpackc.low %vm1438_vm11, %vm1436_vm15  ;;  %vm1123_vm1 = vcmp.eq.s32.totalorder %v1051_v19, %v6483_v2  ;;  %vm1121_vm8 = vcmp.eq.s32.totalorder %v1048_v47, %v6483_v2  ;;  %vm1122_vm14 = vcmp.eq.s32.totalorder %v1051_v19, %v6475_v8  ;;  %vm1120_vm11 = vcmp.eq.s32.totalorder %v1048_v47, %v6475_v8 }
 0x10c   : > { %4801 = vmatmul.mubr.msk.bf16.gmra.mrb[72].mxu0 %vm7136_vm13, %v9292_v57  ;;  %vm7150_vm4 = vmpackc.low %vm1123_vm1, %vm1121_vm8 }
 0x10d   : > { %v9303_v43 = vsel %vm7150_vm4, 4294967295, %v9302_v43  ;;  %4721 = vmatmul.mubr.msk.bf16.gmra.mrb[40].mxu1 %vm4720_vm7, %v9292_v57  ;;  %4803 = vmatprep.mubr.msk.bf16.mxu0 %vm7150_vm4, %v9292_v57  ;;  %vm7176_vm0 = vmpackc.low %vm1122_vm14, %vm1120_vm11 }
 0x10e   : > { %v1371_v56 = vpop.permute.xlu1 %1370  ;;  %v1368_v3 = vpop.permute.xlu0 %1367 }
 0x10f   : > { %vm1442_vm9 = vcmp.eq.s32.totalorder %v1371_v56, %v6475_v8  ;;  %vm1443_vm15 = vcmp.eq.s32.totalorder %v1371_v56, %v6483_v2  ;;  %vm1440_vm8 = vcmp.eq.s32.totalorder %v1368_v3, %v6475_v8  ;;  %vm1441_vm1 = vcmp.eq.s32.totalorder %v1368_v3, %v6483_v2 }
 0x110   : > { %v7165_v39 = vsel %vm1442_vm9, 1.0, %v9295_v35  ;;  %v7168_v12 = vsel %vm1443_vm15, 1.0, %v9295_v35  ;;  %v7171_v19 = vsel %vm1440_vm8, 1.0, %v9295_v35  ;;  %v7174_v47 = vsel %vm1441_vm1, 1.0, %v9295_v35  ;;  %vm4722_vm6 = vmpackc.low %vm1443_vm15, %vm1441_vm1 }
 0x111   : > { %9304 = vst [vmem:[#allocation46_spill] sm:$0xff] %v7165_v39  ;;  %9305 = vst [vmem:[#allocation47_spill] sm:$0xff] %v7168_v12  ;;  %4723 = vmatprep.mubr.msk.bf16.mxu1 %vm4722_vm6, %v9292_v57 }
 0x112   : > { %9306 = vst [vmem:[#allocation48_spill] sm:$0xff] %v7171_v19  ;;  %9307 = vst [vmem:[#allocation49_spill] sm:$0xff] %v7174_v47  ;;  %v1057_v61 = vpop.permute.xlu1 %1056  ;;  %v1054_v55 = vpop.permute.xlu0 %1053 }
 0x113   : > { %vm4724_vm7 = vmpackc.low %vm1442_vm9, %vm1440_vm8  ;;  %vm1127_vm4 = vcmp.eq.s32.totalorder %v1057_v61, %v6483_v2  ;;  %vm1125_vm13 = vcmp.eq.s32.totalorder %v1054_v55, %v6483_v2  ;;  %vm1126_vm11 = vcmp.eq.s32.totalorder %v1057_v61, %v6475_v8  ;;  %vm1124_vm9 = vcmp.eq.s32.totalorder %v1054_v55, %v6475_v8  ;;  %v7204_v47 = vpop.f32.mrb[0].mxu0  ;;  %v7240_v61 = vld [vmem:[%s9099_s8] sm:$0xff]  }
 0x114   : > { %4805 = vmatmul.mubr.msk.bf16.gmra.mrb[76].mxu0 %vm7176_vm0, %v9292_v57  ;;  %vm7190_vm14 = vmpackc.low %vm1127_vm4, %vm1125_vm13  ;;  %v7220_v31 = vpop.f32.mrb[1].mxu0  ;;  %5553 = vmatprep.subr.bf16.mxu0 %v7240_v61 }
 0x115   : > { %4725 = vmatmul.mubr.msk.bf16.gmra.mrb[44].mxu1 %vm4724_vm7, %v9292_v57  ;;  %4807 = vmatprep.mubr.msk.bf16.mxu0 %vm7190_vm14, %v9292_v57  ;;  %vm7224_vm6 = vmpackc.low %vm1126_vm11, %vm1124_vm9  ;;  %v7233_v52 = vpop.f32.mrb[2].mxu0 }
 0x116   : > { %v1377_v56 = vpop.permute.xlu1 %1376  ;;  %v1374_v3 = vpop.permute.xlu0 %1373 }
 0x117   : > { %vm1446_vm15 = vcmp.eq.s32.totalorder %v1377_v56, %v6475_v8  ;;  %vm1447_vm8 = vcmp.eq.s32.totalorder %v1377_v56, %v6483_v2  ;;  %vm1444_vm13 = vcmp.eq.s32.totalorder %v1374_v3, %v6475_v8  ;;  %vm1445_vm4 = vcmp.eq.s32.totalorder %v1374_v3, %v6483_v2  ;;  %v7247_v46 = vpop.f32.mrb[3].mxu0 }
 0x118   : > { %v7209_v12 = vsel %vm1446_vm15, 1.0, %v9295_v35  ;;  %v7212_v4 = vsel %vm1447_vm8, 1.0, %v9295_v35  ;;  %v7215_v55 = vsel %vm1444_vm13, 1.0, %v9295_v35  ;;  %v7218_v30 = vsel %vm1445_vm4, 1.0, %v9295_v35  ;;  %vm4726_vm1 = vmpackc.low %vm1447_vm8, %vm1445_vm4 }
 0x119   : > { %9312 = vst [vmem:[#allocation50_spill] sm:$0xff] %v7209_v12  ;;  %9313 = vst [vmem:[#allocation51_spill] sm:$0xff] %v7212_v4  ;;  %4727 = vmatprep.mubr.msk.bf16.mxu1 %vm4726_vm1, %v9292_v57  ;;  %v9318_v56 = vmov 0  ;;  %v7264_v4 = vpop.f32.mrb[4].mxu0 }
 0x11a   : > { %9314 = vst [vmem:[#allocation52_spill] sm:$0xff] %v7215_v55  ;;  %9315 = vst [vmem:[#allocation53_spill] sm:$0xff] %v7218_v30  ;;  %v1063_v44 = vpop.permute.xlu1 %1062  ;;  %v1060_v13 = vpop.permute.xlu0 %1059  ;;  %v9326_v55 = vmov 0 }
 0x11b   : > { %vm4728_vm7 = vmpackc.low %vm1446_vm15, %vm1444_vm13  ;;  %vm1131_vm11 = vcmp.eq.s32.totalorder %v1063_v44, %v6483_v2  ;;  %vm1129_vm9 = vcmp.eq.s32.totalorder %v1060_v13, %v6483_v2  ;;  %vm1130_vm15 = vcmp.eq.s32.totalorder %v1063_v44, %v6475_v8  ;;  %vm1128_vm13 = vcmp.eq.s32.totalorder %v1060_v13, %v6475_v8  ;;  %v7280_v21 = vpop.f32.mrb[5].mxu0 }
 0x11c   : > { %4809 = vmatmul.mubr.msk.bf16.gmra.mrb[80].mxu0 %vm7224_vm6, %v9292_v57  ;;  %vm7249_vm8 = vmpackc.low %vm1131_vm11, %vm1129_vm9  ;;  %v7293_v12 = vpop.f32.mrb[6].mxu0 }
 0x11d   : > { %v9319_v56 = vsel %vm7249_vm8, 4294967295, %v9318_v56  ;;  %4729 = vmatmul.mubr.msk.bf16.gmra.mrb[48].mxu1 %vm4728_vm7, %v9292_v57  ;;  %4811 = vmatprep.mubr.msk.bf16.mxu0 %vm7249_vm8, %v9292_v57  ;;  %vm7284_vm8 = vmpackc.low %vm1130_vm15, %vm1128_vm13  ;;  %v7302_v44 = vpop.f32.mrb[7].mxu0 }
 0x11e   : > { %v1383_v0 = vpop.permute.xlu1 %1382  ;;  %v1380_v30 = vpop.permute.xlu0 %1379 }
 0x11f   : > { %vm1450_vm4 = vcmp.eq.s32.totalorder %v1383_v0, %v6475_v8  ;;  %vm1451_vm1 = vcmp.eq.s32.totalorder %v1383_v0, %v6483_v2  ;;  %vm1448_vm11 = vcmp.eq.s32.totalorder %v1380_v30, %v6475_v8  ;;  %vm1449_vm9 = vcmp.eq.s32.totalorder %v1380_v30, %v6483_v2 }
 0x120   : > { %v7269_v36 = vsel %vm1450_vm4, 1.0, %v9295_v35  ;;  %v7272_v22 = vsel %vm1451_vm1, 1.0, %v9295_v35  ;;  %v7275_v13 = vsel %vm1448_vm11, 1.0, %v9295_v35  ;;  %v7278_v16 = vsel %vm1449_vm9, 1.0, %v9295_v35  ;;  %vm4730_vm7 = vmpackc.low %vm1451_vm1, %vm1449_vm9 }
 0x121   : > { %9320 = vst [vmem:[#allocation54_spill] sm:$0xff] %v7269_v36  ;;  %9321 = vst [vmem:[#allocation55_spill] sm:$0xff] %v7272_v22  ;;  %v9324_v30 = vmov 0  ;;  %4731 = vmatprep.mubr.msk.bf16.mxu1 %vm4730_vm7, %v9292_v57 }
 0x122   : > { %9322 = vst [vmem:[#allocation56_spill] sm:$0xff] %v7275_v13  ;;  %9323 = vst [vmem:[#allocation57_spill] sm:$0xff] %v7278_v16  ;;  %v9325_v30 = vsel %vm7284_vm8, 4294967295, %v9324_v30  ;;  %v1069_v48 = vpop.permute.xlu1 %1068  ;;  %v1066_v37 = vpop.permute.xlu0 %1065 }
 0x123   : > { %vm4732_vm1 = vmpackc.low %vm1450_vm4, %vm1448_vm11  ;;  %vm1135_vm15 = vcmp.eq.s32.totalorder %v1069_v48, %v6483_v2  ;;  %vm1133_vm13 = vcmp.eq.s32.totalorder %v1066_v37, %v6483_v2  ;;  %vm1134_vm4 = vcmp.eq.s32.totalorder %v1069_v48, %v6475_v8  ;;  %vm1132_vm11 = vcmp.eq.s32.totalorder %v1066_v37, %v6475_v8  ;;  %v7318_v16 = vpop.f32.mrb[8].mxu0 }
 0x124   : > { %4813 = vmatmul.mubr.msk.bf16.gmra.mrb[84].mxu0 %vm7284_vm8, %v9292_v57  ;;  %vm7304_vm9 = vmpackc.low %vm1135_vm15, %vm1133_vm13  ;;  %v7334_v19 = vpop.f32.mrb[9].mxu0 }
 0x125   : > { %v9327_v55 = vsel %vm7304_vm9, 4294967295, %v9326_v55  ;;  %4733 = vmatmul.mubr.msk.bf16.gmra.mrb[52].mxu1 %vm4732_vm1, %v9292_v57  ;;  %4815 = vmatprep.mubr.msk.bf16.mxu0 %vm7304_vm9, %v9292_v57  ;;  %vm7338_vm9 = vmpackc.low %vm1134_vm4, %vm1132_vm11  ;;  %v7347_v25 = vpop.f32.mrb[10].mxu0 }
 0x126   : > { %v1389_v0 = vpop.permute.xlu1 %1388  ;;  %v1386_v5 = vpop.permute.xlu0 %1385 }
 0x127   : > { %vm1454_vm7 = vcmp.eq.s32.totalorder %v1389_v0, %v6475_v8  ;;  %vm1455_vm8 = vcmp.eq.s32.totalorder %v1389_v0, %v6483_v2  ;;  %vm1452_vm15 = vcmp.eq.s32.totalorder %v1386_v5, %v6475_v8  ;;  %vm1453_vm13 = vcmp.eq.s32.totalorder %v1386_v5, %v6483_v2  ;;  %v7356_v48 = vpop.f32.mrb[11].mxu0 }
 0x128   : > { %v7323_v22 = vsel %vm1454_vm7, 1.0, %v9295_v35  ;;  %v7326_v13 = vsel %vm1455_vm8, 1.0, %v9295_v35  ;;  %v7329_v37 = vsel %vm1452_vm15, 1.0, %v9295_v35  ;;  %v7332_v36 = vsel %vm1453_vm13, 1.0, %v9295_v35  ;;  %vm4734_vm1 = vmpackc.low %vm1455_vm8, %vm1453_vm13 }
 0x129   : > { %9328 = vst [vmem:[#allocation58_spill] sm:$0xff] %v7323_v22  ;;  %9329 = vst [vmem:[#allocation59_spill] sm:$0xff] %v7326_v13  ;;  %v9332_v5 = vmov 0  ;;  %4735 = vmatprep.mubr.msk.bf16.mxu1 %vm4734_vm1, %v9292_v57 }
 0x12a   : > { %9330 = vst [vmem:[#allocation60_spill] sm:$0xff] %v7329_v37  ;;  %9331 = vst [vmem:[#allocation61_spill] sm:$0xff] %v7332_v36  ;;  %v9333_v5 = vsel %vm7338_vm9, 4294967295, %v9332_v5  ;;  %v1075_v14 = vpop.permute.xlu1 %1074  ;;  %v1072_v59 = vpop.permute.xlu0 %1071 }
 0x12b   : > { %vm4736_vm8 = vmpackc.low %vm1454_vm7, %vm1452_vm15  ;;  %vm1139_vm4 = vcmp.eq.s32.totalorder %v1075_v14, %v6483_v2  ;;  %vm1137_vm11 = vcmp.eq.s32.totalorder %v1072_v59, %v6483_v2  ;;  %vm1138_vm7 = vcmp.eq.s32.totalorder %v1075_v14, %v6475_v8  ;;  %vm1136_vm15 = vcmp.eq.s32.totalorder %v1072_v59, %v6475_v8  ;;  %v7372_v36 = vpop.f32.mrb[12].mxu0 }
 0x12c   : > { %4817 = vmatmul.mubr.msk.bf16.gmra.mrb[88].mxu0 %vm7338_vm9, %v9292_v57  ;;  %vm7358_vm13 = vmpackc.low %vm1139_vm4, %vm1137_vm11  ;;  %v7388_v58 = vpop.f32.mrb[13].mxu0 }
 0x12d   : > { %v9335_v40 = vsel %vm7358_vm13, 4294967295, %v9334_v40  ;;  %4737 = vmatmul.mubr.msk.bf16.gmra.mrb[56].mxu1 %vm4736_vm8, %v9292_v57  ;;  %4819 = vmatprep.mubr.msk.bf16.mxu0 %vm7358_vm13, %v9292_v57  ;;  %vm7392_vm13 = vmpackc.low %vm1138_vm7, %vm1136_vm15  ;;  %v7401_v29 = vpop.f32.mrb[14].mxu0  ;;  %vm9347_vm7 = vnez %v9248_v42  ;;  %vm9348_vm15 = vnez %v9255_v33 }
 0x12e   : > { %v1395_v0 = vpop.permute.xlu1 %1394  ;;  %v1392_v39 = vpop.permute.xlu0 %1391 }
 0x12f   : > { %vm1458_vm1 = vcmp.eq.s32.totalorder %v1395_v0, %v6475_v8  ;;  %vm1459_vm9 = vcmp.eq.s32.totalorder %v1395_v0, %v6483_v2  ;;  %vm1456_vm4 = vcmp.eq.s32.totalorder %v1392_v39, %v6475_v8  ;;  %vm1457_vm11 = vcmp.eq.s32.totalorder %v1392_v39, %v6483_v2  ;;  %v7420_v8 = vld [vmem:[%s9098_s7] ss:$0 sm:$0xff] }
 0x130   : > { %v7377_v13 = vsel %vm1458_vm1, 1.0, %v9295_v35  ;;  %v7380_v37 = vsel %vm1459_vm9, 1.0, %v9295_v35  ;;  %v7383_v59 = vsel %vm1456_vm4, 1.0, %v9295_v35  ;;  %v7386_v22 = vsel %vm1457_vm11, 1.0, %v9295_v35  ;;  %vm4738_vm8 = vmpackc.low %vm1459_vm9, %vm1457_vm11  ;;  %v7408_v35 = vpop.f32.mrb[15].mxu0 }
 0x131   : > { %9336 = vst [vmem:[#allocation62_spill] sm:$0xff] %v7377_v13  ;;  %9337 = vst [vmem:[#allocation63_spill] sm:$0xff] %v7380_v37  ;;  %4739 = vmatprep.mubr.msk.bf16.mxu1 %vm4738_vm8, %v9292_v57  ;;  %v5539_v14 = vpop.f32.mrb[16].mxu0  ;;  %vm9351_vm11 = vnez %v9271_v62  ;;  %vm9352_vm8 = vnez %v9277_v6  ;;  %v7561_v11 = vadd.f32 %v7204_v47, %v7420_v8  ;;  %v7565_v3 = vadd.f32 %v7233_v52, %v7420_v8 }
 0x132   : > { %9338 = vst [vmem:[#allocation64_spill] sm:$0xff] %v7383_v59  ;;  %9339 = vst [vmem:[#allocation65_spill] sm:$0xff] %v7386_v22  ;;  %v7423_v0 = vadd.f32 %v5539_v14, %v7420_v8  ;;  %v850_v54 = vpop.f32.mrb[17].mxu0  ;;  %v5704_v22 = vld [vmem:[%s9099_s8 + $0x8] sm:$0xff]  }
 0x133   : > { %vm4740_vm9 = vmpackc.low %vm1458_vm1, %vm1456_vm4  ;;  %v7426_v39 = vadd.f32 %v7420_v8, %v850_v54  ;;  %v5540_v28 = vpop.f32.mrb[18].mxu0  ;;  %vm9349_vm1 = vnez %v9260_v51  ;;  %vm9350_vm4 = vnez %v9267_v41 }
 0x134   : > { %4821 = vmatmul.mubr.msk.bf16.gmra.mrb[92].mxu0 %vm7392_vm13, %v9292_v57  ;;  %v7432_v20 = vadd.f32 %v5540_v28, %v7420_v8  ;;  %v853_v37 = vpop.f32.mrb[19].mxu0 }
 0x135   : > { %4839 = vmatprep.mubr.msk.bf16.mxu0 %vm6513_vm2, %v9292_v57  ;;  %4741 = vmatmul.mubr.msk.bf16.gmra.mrb[60].mxu1 %vm4740_vm9, %v9292_v57  ;;  %v7438_v14 = vadd.f32 %v7420_v8, %v853_v37  ;;  %v5543_v54 = vpop.f32.mrb[20].mxu0  ;;  %vm9342_vm2 = vnez %v9225_v27  ;;  %vm9353_vm9 = vnez %v9279_v53 }
 0x136   : > { %4843 = vmatprep.mubr.msk.bf16.mxu1 %vm6556_vm10, %v9292_v57  ;;  %v7448_v28 = vadd.f32 %v5543_v54, %v7420_v8  ;;  %v866_v32 = vpop.f32.mrb[21].mxu0  ;;  %vm9344_vm10 = vnez %v9233_v9 }
 0x137   : > { %v7451_v37 = vadd.f32 %v7420_v8, %v866_v32  ;;  %v5544_v59 = vpop.f32.mrb[22].mxu0 }
 0x138   : > { %v869_v1 = vpop.f32.mrb[23].mxu0 }
 0x139   : > { %v7457_v13 = vadd.f32 %v7420_v8, %v869_v1 }
 0x13b   : > { %v5547_v38 = vpop.f32.mrb[24].mxu0 }
 0x13c   : > { %4841 = vmatmul.mubr.msk.bf16.vlgmr.msra.gmra.mrb[96].mxu0 %vm6529_vm3, %v9292_v57  ;;  %vm9343_vm3 = vnez %v9227_v60  ;;  %v882_v54 = vpop.f32.mrb[25].mxu0 }
 0x13d   : > { %5554 = vmatpush3.bf16.msra.mxu0 %v7240_v61  ;;  %4845 = vmatmul.mubr.msk.bf16.vlgmr.msra.gmra.mrb[64].mxu1 %vm6602_vm5, %v9292_v57  ;;  %v7454_v61 = vadd.f32 %v5544_v59, %v7420_v8  ;;  %v7469_v59 = vadd.f32 %v7420_v8, %v882_v54  ;;  %v5548_v32 = vpop.f32.mrb[26].mxu0  ;;  %vm9345_vm5 = vnez %v9236_v23 }
 0x13e   : > { %5555 = vmatprep.subr.bf16.mxu0 %v5704_v22  ;;  %4847 = vmatprep.mubr.msk.bf16.mxu1 %vm6631_vm12, %v9292_v57  ;;  %v7472_v1 = vadd.f32 %v5548_v32, %v7420_v8  ;;  %v885_v7 = vpop.f32.mrb[27].mxu0  ;;  %vm9346_vm12 = vnez %v9243_v50  ;;  %v7549_v50 = vadd.f32 %v7420_v8, %v7247_v46 }
 0x13f   : > { %v7475_v27 = vadd.f32 %v7420_v8, %v885_v7 }
 0x141   : > { %5556 = vmatpush3.bf16.msra.mxu0 %v5704_v22  ;;  %v7466_v22 = vadd.f32 %v5547_v38, %v7420_v8 }
 0x143   : > { %v5551_v60 = vpop.f32.mrb[28].mxu0 }
 0x144   : > { %v7484_v38 = vadd.f32 %v5551_v60, %v7420_v8  ;;  %v898_v54 = vpop.f32.mrb[29].mxu0 }
 0x145   : > { %4849 = vmatmul.mubr.msk.bf16.gmra.mrb[68].mxu1 %vm9342_vm2, %v9292_v57  ;;  %v7487_v32 = vadd.f32 %v7420_v8, %v898_v54  ;;  %v5552_v18 = vpop.f32.mrb[30].mxu0  ;;  %vm9354_vm2 = vnez %v9283_v49 }
 0x146   : > { %4851 = vmatprep.mubr.msk.bf16.mxu1 %vm9343_vm3, %v9292_v57  ;;  %v7490_v7 = vadd.f32 %v5552_v18, %v7420_v8  ;;  %v901_v24 = vpop.f32.mrb[31].mxu0  ;;  %vm9355_vm3 = vnez %v9285_v26 }
 0x147   : > { %v7493_v9 = vadd.f32 %v7420_v8, %v901_v24 }
 0x14d   : > { %4853 = vmatmul.mubr.msk.bf16.gmra.mrb[72].mxu1 %vm9344_vm10, %v9292_v57  ;;  %vm9356_vm10 = vnez %v9291_v34 }
 0x14e   : > { %4855 = vmatprep.mubr.msk.bf16.mxu1 %vm9345_vm5, %v9292_v57  ;;  %vm9357_vm5 = vnez %v9294_v10  ;;  %v7545_v10 = vadd.f32 %v7420_v8, %v7220_v31 }
 0x155   : > { %4857 = vmatmul.mubr.msk.bf16.gmra.mrb[76].mxu1 %vm9346_vm12, %v9292_v57  ;;  %vm9358_vm12 = vnez %v9301_v17 }
 0x156   : > { %4859 = vmatprep.mubr.msk.bf16.mxu1 %vm9347_vm7, %v9292_v57  ;;  %vm9359_vm7 = vnez %v9303_v43 }
 0x15d   : > { %4861 = vmatmul.mubr.msk.bf16.gmra.mrb[80].mxu1 %vm9348_vm15, %v9292_v57  ;;  %vm9362_vm15 = vnez %v9327_v55 }
 0x15e   : > { %4863 = vmatprep.mubr.msk.bf16.mxu1 %vm9349_vm1, %v9292_v57  ;;  %vm9363_vm1 = vnez %v9333_v5  ;;  %v7599_v5 = vadd.f32 %v7293_v12, %v7420_v8 }
 0x165   : > { %4865 = vmatmul.mubr.msk.bf16.gmra.mrb[84].mxu1 %vm9350_vm4, %v9292_v57  ;;  %vm9364_vm4 = vnez %v9335_v40 }
 0x166   : > { %4867 = vmatprep.mubr.msk.bf16.mxu1 %vm9351_vm11, %v9292_v57 }
 0x16d   : > { %4869 = vmatmul.mubr.msk.bf16.gmra.mrb[88].mxu1 %vm9352_vm8, %v9292_v57 }
 0x16e   : > { %4871 = vmatprep.mubr.msk.bf16.mxu1 %vm9353_vm9, %v9292_v57 }
 0x175   : > { %4873 = vmatmul.mubr.msk.bf16.gmra.mrb[92].mxu1 %vm9354_vm2, %v9292_v57 }
 0x176   : > { %4875 = vmatprep.mubr.msk.bf16.mxu1 %vm9355_vm3, %v9292_v57 }
 0x17d   : > { %4877 = vmatmul.mubr.msk.bf16.gmra.mrb[96].mxu1 %vm9356_vm10, %v9292_v57 }
 0x17e   : > { %4879 = vmatprep.mubr.msk.bf16.mxu1 %vm9357_vm5, %v9292_v57 }
 0x185   : > { %4881 = vmatmul.mubr.msk.bf16.gmra.mrb[100].mxu1 %vm9358_vm12, %v9292_v57 }
 0x186   : > { %4883 = vmatprep.mubr.msk.bf16.mxu1 %vm9359_vm7, %v9292_v57 }
 0x18d   : > { %4885 = vmatmul.mubr.msk.bf16.gmra.mrb[104].mxu1 %vm7176_vm0, %v9292_v57  ;;  %vm9360_vm0 = vnez %v9319_v56 }
 0x18e   : > { %4887 = vmatprep.mubr.msk.bf16.mxu1 %vm7190_vm14, %v9292_v57  ;;  %v5069_v18 = vpop.f32.mrb[32].mxu0  ;;  %vm2551_vm14 = vcmask 261120  }
 0x18f   : > { %v5070_v24 = vpop.f32.mrb[33].mxu0 }
 0x190   : > { %v4957_v26 = vpop.f32.mrb[0].mxu1  ;;  %v5071_v33 = vadd.f32 %v5070_v24, %v5069_v18  ;;  %v5072_v34 = vpop.f32.mrb[34].mxu0 }
 0x191   : > { %v4958_v49 = vpop.f32.mrb[1].mxu1  ;;  %v5073_v43 = vpop.f32.mrb[35].mxu0 }
 0x192   : > { %v4959_v23 = vadd.f32 %v4958_v49, %v4957_v26  ;;  %v2072_v17 = vadd.f32 %v5071_v33, %v7545_v10  ;;  %v4960_v15 = vpop.f32.mrb[2].mxu1  ;;  %v5074_v42 = vadd.f32 %v5073_v43, %v5072_v34 }
 0x193   : > { %v4961_v51 = vpop.f32.mrb[3].mxu1 }
 0x194   : > { %v2487_v41 = vmul.f32 %v4959_v23, %v2072_v17  ;;  %v4962_v62 = vadd.f32 %v4961_v51, %v4960_v15  ;;  %v2075_v31 = vadd.f32 %v5074_v42, %v7549_v50 }
 0x195   : > { %4889 = vmatmul.mubr.msk.bf16.gmra.mrb[108].mxu1 %vm7224_vm6, %v9292_v57  ;;  %vm9361_vm6 = vnez %v9325_v30  ;;  %v7582_v30 = vadd.f32 %v7420_v8, %v7302_v44 }
 0x196   : > { %v2488_v6 = vmul.f32 %v4962_v62, %v2075_v31  ;;  %4891 = vmatprep.mubr.msk.bf16.mxu1 %vm9360_vm0, %v9292_v57  ;;  %v5075_v46 = vpop.f32.mrb[36].mxu0 }
 0x197   : > { %v5076_v53 = vpop.f32.mrb[37].mxu0 }
 0x198   : > { %v2519_v60 = vpack.c.bf16 %v2488_v6, %v2487_v41  ;;  %v4963_v54 = vpop.f32.mrb[4].mxu1  ;;  %v5077_v18 = vadd.f32 %v5076_v53, %v5075_v46  ;;  %v5078_v24 = vpop.f32.mrb[38].mxu0  ;;  %v7578_v41 = vadd.f32 %v7420_v8, %v7280_v21 }
 0x199   : > { %v4964_v26 = vpop.f32.mrb[5].mxu1  ;;  %v5079_v33 = vpop.f32.mrb[39].mxu0 }
 0x19a   : > { %v4965_v34 = vadd.f32 %v4964_v26, %v4963_v54  ;;  %v2080_v56 = vadd.f32 %v5077_v18, %v7561_v11  ;;  %v4966_v49 = vpop.f32.mrb[6].mxu1  ;;  %v5080_v43 = vadd.f32 %v5079_v33, %v5078_v24  ;;  %5557 = vmatprep.mubr.msk.bf16.mxu0 %vm2551_vm14, %v2519_v60 }
 0x19b   : > { %v4967_v23 = vpop.f32.mrb[7].mxu1 }
 0x19c   : > { %v2489_v47 = vmul.f32 %v4965_v34, %v2080_v56  ;;  %v4968_v17 = vadd.f32 %v4967_v23, %v4966_v49  ;;  %v2083_v15 = vadd.f32 %v5080_v43, %v7565_v3  ;;  %v7595_v43 = vadd.f32 %v7264_v4, %v7420_v8 }
 0x19d   : > { %4893 = vmatmul.mubr.msk.bf16.gmra.mrb[112].mxu1 %vm9361_vm6, %v9292_v57 }
 0x19e   : > { %v2490_v42 = vmul.f32 %v4968_v17, %v2083_v15  ;;  %4895 = vmatprep.mubr.msk.bf16.mxu1 %vm9362_vm15, %v9292_v57  ;;  %v5081_v52 = vpop.f32.mrb[40].mxu0 }
 0x19f   : > { %v5082_v51 = vpop.f32.mrb[41].mxu0 }
 0x1a0   : > { %v2520_v62 = vpack.c.bf16 %v2490_v42, %v2489_v47  ;;  %v4969_v31 = vpop.f32.mrb[8].mxu1  ;;  %v5083_v6 = vadd.f32 %v5082_v51, %v5081_v52  ;;  %v5084_v46 = vpop.f32.mrb[42].mxu0 }
 0x1a1   : > { %v4970_v53 = vpop.f32.mrb[9].mxu1  ;;  %v5085_v60 = vpop.f32.mrb[43].mxu0 }
 0x1a2   : > { %v4971_v54 = vadd.f32 %v4970_v53, %v4969_v31  ;;  %v2088_v55 = vadd.f32 %v5083_v6, %v7578_v41  ;;  %v4972_v18 = vpop.f32.mrb[10].mxu1  ;;  %v5086_v24 = vadd.f32 %v5085_v60, %v5084_v46  ;;  %5558 = vmatmul.mubr.msk.bf16.vlgmr.msra.gmra.mrb[100].mxu0 %vm2551_vm14, %v2520_v62 }
 0x1a3   : > { %v4973_v26 = vpop.f32.mrb[11].mxu1 }
 0x1a4   : > { %v2491_v21 = vmul.f32 %v4971_v54, %v2088_v55  ;;  %v4974_v33 = vadd.f32 %v4973_v26, %v4972_v18  ;;  %v2091_v34 = vadd.f32 %v5086_v24, %v7582_v30  ;;  %v7609_v55 = vadd.f32 %v7420_v8, %v7334_v19 }
 0x1a5   : > { %4897 = vmatmul.mubr.msk.bf16.gmra.mrb[116].mxu1 %vm9363_vm1, %v9292_v57 }
 0x1a6   : > { %v2492_v56 = vmul.f32 %v4974_v33, %v2091_v34  ;;  %4899 = vmatprep.mubr.msk.bf16.mxu1 %vm9364_vm4, %v9292_v57  ;;  %v5087_v44 = vpop.f32.mrb[44].mxu0 }
 0x1a7   : > { %v5088_v49 = vpop.f32.mrb[45].mxu0 }
 0x1a8   : > { %v2521_v23 = vpack.c.bf16 %v2492_v56, %v2491_v21  ;;  %v4975_v47 = vpop.f32.mrb[12].mxu1  ;;  %v5089_v17 = vadd.f32 %v5088_v49, %v5087_v44  ;;  %v5090_v15 = vpop.f32.mrb[46].mxu0  ;;  %v7613_v56 = vadd.f32 %v7420_v8, %v7356_v48 }
 0x1a9   : > { %v4976_v42 = vpop.f32.mrb[13].mxu1  ;;  %v5091_v52 = vpop.f32.mrb[47].mxu0 }
 0x1aa   : > { %v4977_v51 = vadd.f32 %v4976_v42, %v4975_v47  ;;  %v2096_v40 = vadd.f32 %v5089_v17, %v7595_v43  ;;  %v4978_v62 = vpop.f32.mrb[14].mxu1  ;;  %v5092_v31 = vadd.f32 %v5091_v52, %v5090_v15  ;;  %5561 = vmatprep.mubr.msk.bf16.mxu0 %vm2551_vm14, %v2521_v23 }
 0x1ab   : > { %v4979_v6 = vpop.f32.mrb[15].mxu1 }
 0x1ac   : > { %v2493_v4 = vmul.f32 %v4977_v51, %v2096_v40  ;;  %v4980_v46 = vadd.f32 %v4979_v6, %v4978_v62  ;;  %v2099_v53 = vadd.f32 %v5092_v31, %v7599_v5  ;;  %v7620_v51 = vadd.f32 %v7318_v16, %v7420_v8 }
 0x1ad   : > { %4901 = vmatmul.mubr.msk.bf16.gmra.mrb[120].mxu1 %vm7392_vm13, %v9292_v57 }
 0x1ae   : > { %v2494_v60 = vmul.f32 %v4980_v46, %v2099_v53  ;;  %v7624_v46 = vadd.f32 %v7347_v25, %v7420_v8 }
 0x1af   : > { %v5093_v54 = vpop.f32.mrb[48].mxu0 }
 0x1b0   : > { %v5094_v12 = vpop.f32.mrb[49].mxu0  ;;  %v2522_v18 = vpack.c.bf16 %v2494_v60, %v2493_v4  ;;  %v4981_v24 = vpop.f32.mrb[16].mxu1 }
 0x1b1   : > { %v5095_v26 = vadd.f32 %v5094_v12, %v5093_v54  ;;  %v5096_v21 = vpop.f32.mrb[50].mxu0  ;;  %v4982_v33 = vpop.f32.mrb[17].mxu1 }
 0x1b2   : > { %v5097_v34 = vpop.f32.mrb[51].mxu0  ;;  %v4983_v44 = vadd.f32 %v4982_v33, %v4981_v24  ;;  %v4984_v2 = vpop.f32.mrb[18].mxu1  ;;  %5562 = vmatmul.mubr.msk.bf16.gmra.mrb[104].mxu0 %vm2551_vm14, %v2522_v18 }
 0x1b3   : > { %v2104_v57 = vadd.f32 %v5095_v26, %v7609_v55  ;;  %v5098_v49 = vadd.f32 %v5097_v34, %v5096_v21  ;;  %v4985_v23 = vpop.f32.mrb[19].mxu1 }
 0x1b4   : > { %v4986_v47 = vadd.f32 %v4985_v23, %v4984_v2 }
 0x1b5   : > { %v2495_v19 = vmul.f32 %v4983_v44, %v2104_v57  ;;  %v2107_v17 = vadd.f32 %v5098_v49, %v7613_v56  ;;  %v7631_v44 = vadd.f32 %v7420_v8, %v7388_v58 }
 0x1b7   : > { %v2496_v15 = vmul.f32 %v4986_v47, %v2107_v17  ;;  %v5099_v42 = vpop.f32.mrb[52].mxu0  ;;  %v7635_v47 = vadd.f32 %v7420_v8, %v7408_v35 }
 0x1b8   : > { %v5100_v52 = vpop.f32.mrb[53].mxu0  ;;  %v4987_v40 = vpop.f32.mrb[20].mxu1 }
 0x1b9   : > { %v2523_v48 = vpack.c.bf16 %v2496_v15, %v2495_v19  ;;  %v5101_v62 = vadd.f32 %v5100_v52, %v5099_v42  ;;  %v5102_v31 = vpop.f32.mrb[54].mxu0  ;;  %v4988_v6 = vpop.f32.mrb[21].mxu1 }
 0x1ba   : > { %v5103_v4 = vpop.f32.mrb[55].mxu0  ;;  %v4989_v53 = vadd.f32 %v4988_v6, %v4987_v40  ;;  %v4990_v54 = vpop.f32.mrb[22].mxu1 }
 0x1bb   : > { %v2112_v60 = vadd.f32 %v5101_v62, %v7620_v51  ;;  %v5104_v12 = vadd.f32 %v5103_v4, %v5102_v31  ;;  %5565 = vmatprep.mubr.msk.bf16.mxu0 %vm2551_vm14, %v2523_v48  ;;  %v4991_v18 = vpop.f32.mrb[23].mxu1 }
 0x1bc   : > { %v4992_v24 = vadd.f32 %v4991_v18, %v4990_v54 }
 0x1bd   : > { %v2497_v16 = vmul.f32 %v4989_v53, %v2112_v60  ;;  %v2115_v26 = vadd.f32 %v5104_v12, %v7624_v46  ;;  %v7642_v53 = vadd.f32 %v7372_v36, %v7420_v8 }
 0x1bf   : > { %v2498_v21 = vmul.f32 %v4992_v24, %v2115_v26  ;;  %v5105_v33 = vpop.f32.mrb[56].mxu0  ;;  %v7646_v24 = vadd.f32 %v7401_v29, %v7420_v8 }
 0x1c0   : > { %v5106_v34 = vpop.f32.mrb[57].mxu0  ;;  %v4993_v57 = vpop.f32.mrb[24].mxu1 }
 0x1c1   : > { %v2524_v25 = vpack.c.bf16 %v2498_v21, %v2497_v16  ;;  %v5107_v2 = vadd.f32 %v5106_v34, %v5105_v33  ;;  %v5108_v49 = vpop.f32.mrb[58].mxu0  ;;  %v4994_v23 = vpop.f32.mrb[25].mxu1 }
 0x1c2   : > { %v5109_v19 = vpop.f32.mrb[59].mxu0  ;;  %v4995_v17 = vadd.f32 %v4994_v23, %v4993_v57  ;;  %v4996_v42 = vpop.f32.mrb[26].mxu1 }
 0x1c3   : > { %v2120_v15 = vadd.f32 %v5107_v2, %v7631_v44  ;;  %v5110_v52 = vadd.f32 %v5109_v19, %v5108_v49  ;;  %5566 = vmatmul.mubr.msk.bf16.gmra.mrb[108].mxu0 %vm2551_vm14, %v2524_v25  ;;  %v4997_v48 = vpop.f32.mrb[27].mxu1 }
 0x1c4   : > { %v4998_v40 = vadd.f32 %v4997_v48, %v4996_v42 }
 0x1c5   : > { %v2499_v58 = vmul.f32 %v4995_v17, %v2120_v15  ;;  %v2123_v62 = vadd.f32 %v5110_v52, %v7635_v47 }
 0x1c7   : > { %v2500_v31 = vmul.f32 %v4998_v40, %v2123_v62  ;;  %v5111_v6 = vpop.f32.mrb[60].mxu0 }
 0x1c8   : > { %v5112_v4 = vpop.f32.mrb[61].mxu0  ;;  %v4999_v60 = vpop.f32.mrb[28].mxu1 }
 0x1c9   : > { %v2525_v35 = vpack.c.bf16 %v2500_v31, %v2499_v58  ;;  %v5113_v54 = vadd.f32 %v5112_v4, %v5111_v6  ;;  %v5114_v12 = vpop.f32.mrb[62].mxu0  ;;  %v5000_v18 = vpop.f32.mrb[29].mxu1 }
 0x1ca   : > { %v5115_v16 = vpop.f32.mrb[63].mxu0  ;;  %v5001_v26 = vadd.f32 %v5000_v18, %v4999_v60  ;;  %v5002_v33 = vpop.f32.mrb[30].mxu1 }
 0x1cb   : > { %v2128_v21 = vadd.f32 %v5113_v54, %v7642_v53  ;;  %v5116_v34 = vadd.f32 %v5115_v16, %v5114_v12  ;;  %5569 = vmatprep.mubr.msk.bf16.mxu0 %vm2551_vm14, %v2525_v35  ;;  %v5003_v25 = vpop.f32.mrb[31].mxu1 }
 0x1cc   : > { %v5004_v57 = vadd.f32 %v5003_v25, %v5002_v33 }
 0x1cd   : > { %v2501_v36 = vmul.f32 %v5001_v26, %v2128_v21  ;;  %v2131_v2 = vadd.f32 %v5116_v34, %v7646_v24 }
 0x1cf   : > { %v2502_v49 = vmul.f32 %v5004_v57, %v2131_v2  ;;  %v5117_v23 = vpop.f32.mrb[64].mxu0 }
 0x1d0   : > { %v5118_v19 = vpop.f32.mrb[65].mxu0  ;;  %v5005_v15 = vpop.f32.mrb[32].mxu1 }
 0x1d1   : > { %v2526_v17 = vpack.c.bf16 %v2502_v49, %v2501_v36  ;;  %v5119_v42 = vadd.f32 %v5118_v19, %v5117_v23  ;;  %v5120_v29 = vpop.f32.mrb[66].mxu0  ;;  %v5006_v8 = vpop.f32.mrb[33].mxu1 }
 0x1d2   : > { %v5121_v52 = vpop.f32.mrb[67].mxu0  ;;  %v5007_v48 = vadd.f32 %v5006_v8, %v5005_v15  ;;  %v5008_v40 = vpop.f32.mrb[34].mxu1 }
 0x1d3   : > { %v2136_v58 = vadd.f32 %v5119_v42, %v7426_v39  ;;  %v5122_v62 = vadd.f32 %v5121_v52, %v5120_v29  ;;  %5570 = vmatmul.mubr.msk.bf16.gmra.mrb[112].mxu0 %vm2551_vm14, %v2526_v17  ;;  %v5009_v31 = vpop.f32.mrb[35].mxu1 }
 0x1d4   : > { %v5010_v4 = vadd.f32 %v5009_v31, %v5008_v40 }
 0x1d5   : > { %v2503_v6 = vmul.f32 %v5007_v48, %v2136_v58  ;;  %v2139_v35 = vadd.f32 %v5122_v62, %v7438_v14 }
 0x1d7   : > { %v2504_v60 = vmul.f32 %v5010_v4, %v2139_v35  ;;  %v5123_v54 = vpop.f32.mrb[68].mxu0 }
 0x1d8   : > { %v5124_v12 = vpop.f32.mrb[69].mxu0  ;;  %v5011_v16 = vpop.f32.mrb[36].mxu1 }
 0x1d9   : > { %v2527_v18 = vpack.c.bf16 %v2504_v60, %v2503_v6  ;;  %v5125_v26 = vadd.f32 %v5124_v12, %v5123_v54  ;;  %v5126_v21 = vpop.f32.mrb[70].mxu0  ;;  %v5012_v33 = vpop.f32.mrb[37].mxu1 }
 0x1da   : > { %v5127_v34 = vpop.f32.mrb[71].mxu0  ;;  %v5013_v25 = vadd.f32 %v5012_v33, %v5011_v16  ;;  %v5014_v57 = vpop.f32.mrb[38].mxu1 }
 0x1db   : > { %v2144_v36 = vadd.f32 %v5125_v26, %v7423_v0  ;;  %v5128_v2 = vadd.f32 %v5127_v34, %v5126_v21  ;;  %5573 = vmatprep.mubr.msk.bf16.mxu0 %vm2551_vm14, %v2527_v18  ;;  %v5015_v49 = vpop.f32.mrb[39].mxu1 }
 0x1dc   : > { %v5016_v19 = vadd.f32 %v5015_v49, %v5014_v57 }
 0x1dd   : > { %v2505_v23 = vmul.f32 %v5013_v25, %v2144_v36  ;;  %v2147_v17 = vadd.f32 %v5128_v2, %v7432_v20 }
 0x1df   : > { %v2506_v15 = vmul.f32 %v5016_v19, %v2147_v17  ;;  %v5129_v42 = vpop.f32.mrb[72].mxu0 }
 0x1e0   : > { %v5130_v29 = vpop.f32.mrb[73].mxu0  ;;  %v5017_v52 = vpop.f32.mrb[40].mxu1 }
 0x1e1   : > { %v2528_v8 = vpack.c.bf16 %v2506_v15, %v2505_v23  ;;  %v5131_v48 = vadd.f32 %v5130_v29, %v5129_v42  ;;  %v5132_v58 = vpop.f32.mrb[74].mxu0  ;;  %v5018_v40 = vpop.f32.mrb[41].mxu1 }
 0x1e2   : > { %v5133_v62 = vpop.f32.mrb[75].mxu0  ;;  %v5019_v31 = vadd.f32 %v5018_v40, %v5017_v52  ;;  %v5020_v4 = vpop.f32.mrb[42].mxu1 }
 0x1e3   : > { %v2152_v6 = vadd.f32 %v5131_v48, %v7451_v37  ;;  %v5134_v35 = vadd.f32 %v5133_v62, %v5132_v58  ;;  %5574 = vmatmul.mubr.msk.bf16.gmra.mrb[116].mxu0 %vm2551_vm14, %v2528_v8  ;;  %v5021_v60 = vpop.f32.mrb[43].mxu1 }
 0x1e4   : > { %v5022_v12 = vadd.f32 %v5021_v60, %v5020_v4 }
 0x1e5   : > { %v2507_v54 = vmul.f32 %v5019_v31, %v2152_v6  ;;  %v2155_v18 = vadd.f32 %v5134_v35, %v7457_v13 }
 0x1e7   : > { %v2508_v16 = vmul.f32 %v5022_v12, %v2155_v18  ;;  %v5135_v26 = vpop.f32.mrb[76].mxu0 }
 0x1e8   : > { %v5136_v21 = vpop.f32.mrb[77].mxu0  ;;  %v5023_v34 = vpop.f32.mrb[44].mxu1 }
 0x1e9   : > { %v2529_v33 = vpack.c.bf16 %v2508_v16, %v2507_v54  ;;  %v5137_v25 = vadd.f32 %v5136_v21, %v5135_v26  ;;  %v5138_v36 = vpop.f32.mrb[78].mxu0  ;;  %v5024_v57 = vpop.f32.mrb[45].mxu1 }
 0x1ea   : > { %v5139_v2 = vpop.f32.mrb[79].mxu0  ;;  %v5025_v49 = vadd.f32 %v5024_v57, %v5023_v34  ;;  %v5026_v19 = vpop.f32.mrb[46].mxu1 }
 0x1eb   : > { %v2160_v23 = vadd.f32 %v5137_v25, %v7448_v28  ;;  %v5140_v17 = vadd.f32 %v5139_v2, %v5138_v36  ;;  %5577 = vmatprep.mubr.msk.bf16.mxu0 %vm2551_vm14, %v2529_v33  ;;  %v5027_v15 = vpop.f32.mrb[47].mxu1 }
 0x1ec   : > { %v5028_v29 = vadd.f32 %v5027_v15, %v5026_v19 }
 0x1ed   : > { %v2509_v42 = vmul.f32 %v5025_v49, %v2160_v23  ;;  %v2163_v8 = vadd.f32 %v5140_v17, %v7454_v61 }
 0x1ef   : > { %v2510_v52 = vmul.f32 %v5028_v29, %v2163_v8  ;;  %v5141_v48 = vpop.f32.mrb[80].mxu0 }
 0x1f0   : > { %v5142_v58 = vpop.f32.mrb[81].mxu0  ;;  %v5029_v62 = vpop.f32.mrb[48].mxu1 }
 0x1f1   : > { %v2530_v40 = vpack.c.bf16 %v2510_v52, %v2509_v42  ;;  %v5143_v31 = vadd.f32 %v5142_v58, %v5141_v48  ;;  %v5144_v6 = vpop.f32.mrb[82].mxu0  ;;  %v5030_v4 = vpop.f32.mrb[49].mxu1 }
 0x1f2   : > { %v5145_v35 = vpop.f32.mrb[83].mxu0  ;;  %v5031_v60 = vadd.f32 %v5030_v4, %v5029_v62  ;;  %v5032_v12 = vpop.f32.mrb[50].mxu1 }
 0x1f3   : > { %v2168_v54 = vadd.f32 %v5143_v31, %v7469_v59  ;;  %v5146_v18 = vadd.f32 %v5145_v35, %v5144_v6  ;;  %5578 = vmatmul.mubr.msk.bf16.gmra.mrb[120].mxu0 %vm2551_vm14, %v2530_v40  ;;  %v5033_v16 = vpop.f32.mrb[51].mxu1 }
 0x1f4   : > { %v5034_v21 = vadd.f32 %v5033_v16, %v5032_v12 }
 0x1f5   : > { %v2511_v26 = vmul.f32 %v5031_v60, %v2168_v54  ;;  %v2171_v33 = vadd.f32 %v5146_v18, %v7475_v27 }
 0x1f7   : > { %v2512_v34 = vmul.f32 %v5034_v21, %v2171_v33  ;;  %v5147_v25 = vpop.f32.mrb[84].mxu0 }
 0x1f8   : > { %v5148_v36 = vpop.f32.mrb[85].mxu0  ;;  %v5035_v2 = vpop.f32.mrb[52].mxu1 }
 0x1f9   : > { %v2531_v57 = vpack.c.bf16 %v2512_v34, %v2511_v26  ;;  %v5149_v49 = vadd.f32 %v5148_v36, %v5147_v25  ;;  %v5150_v23 = vpop.f32.mrb[86].mxu0  ;;  %v5036_v19 = vpop.f32.mrb[53].mxu1 }
 0x1fa   : > { %v5151_v17 = vpop.f32.mrb[87].mxu0  ;;  %v5037_v15 = vadd.f32 %v5036_v19, %v5035_v2  ;;  %v5038_v29 = vpop.f32.mrb[54].mxu1 }
 0x1fb   : > { %v2176_v42 = vadd.f32 %v5149_v49, %v7466_v22  ;;  %v5152_v8 = vadd.f32 %v5151_v17, %v5150_v23  ;;  %5581 = vmatprep.mubr.msk.bf16.mxu0 %vm2551_vm14, %v2531_v57  ;;  %v5039_v52 = vpop.f32.mrb[55].mxu1 }
 0x1fc   : > { %v5040_v58 = vadd.f32 %v5039_v52, %v5038_v29 }
 0x1fd   : > { %v2513_v48 = vmul.f32 %v5037_v15, %v2176_v42  ;;  %v2179_v40 = vadd.f32 %v5152_v8, %v7472_v1 }
 0x1ff   : > { %v2514_v62 = vmul.f32 %v5040_v58, %v2179_v40  ;;  %v5153_v31 = vpop.f32.mrb[88].mxu0 }
 0x200   : > { %v5154_v6 = vpop.f32.mrb[89].mxu0  ;;  %v5041_v35 = vpop.f32.mrb[56].mxu1 }
 0x201   : > { %v2532_v4 = vpack.c.bf16 %v2514_v62, %v2513_v48  ;;  %v5155_v60 = vadd.f32 %v5154_v6, %v5153_v31  ;;  %v5156_v54 = vpop.f32.mrb[90].mxu0  ;;  %v5042_v12 = vpop.f32.mrb[57].mxu1 }
 0x202   : > { %v5157_v18 = vpop.f32.mrb[91].mxu0  ;;  %v5043_v16 = vadd.f32 %v5042_v12, %v5041_v35  ;;  %v5044_v21 = vpop.f32.mrb[58].mxu1 }
 0x203   : > { %v2184_v26 = vadd.f32 %v5155_v60, %v7487_v32  ;;  %v5158_v33 = vadd.f32 %v5157_v18, %v5156_v54  ;;  %5582 = vmatmul.mubr.msk.bf16.gmra.mrb[124].mxu0 %vm2551_vm14, %v2532_v4  ;;  %v5045_v34 = vpop.f32.mrb[59].mxu1 }
 0x204   : > { %v5046_v36 = vadd.f32 %v5045_v34, %v5044_v21 }
 0x205   : > { %v2515_v25 = vmul.f32 %v5043_v16, %v2184_v26  ;;  %v2187_v57 = vadd.f32 %v5158_v33, %v7493_v9 }
 0x207   : > { %v2516_v2 = vmul.f32 %v5046_v36, %v2187_v57  ;;  %v5159_v49 = vpop.f32.mrb[92].mxu0 }
 0x208   : > { %v5160_v23 = vpop.f32.mrb[93].mxu0  ;;  %v5047_v17 = vpop.f32.mrb[60].mxu1 }
 0x209   : > { %v2533_v19 = vpack.c.bf16 %v2516_v2, %v2515_v25  ;;  %v5161_v15 = vadd.f32 %v5160_v23, %v5159_v49  ;;  %v5162_v42 = vpop.f32.mrb[94].mxu0  ;;  %v5048_v29 = vpop.f32.mrb[61].mxu1 }
 0x20a   : > { %v5163_v8 = vpop.f32.mrb[95].mxu0  ;;  %v5049_v52 = vadd.f32 %v5048_v29, %v5047_v17  ;;  %v5050_v58 = vpop.f32.mrb[62].mxu1 }
 0x20b   : > { %v2192_v48 = vadd.f32 %v5161_v15, %v7484_v38  ;;  %v5164_v40 = vadd.f32 %v5163_v8, %v5162_v42  ;;  %5585 = vmatprep.mubr.msk.bf16.mxu0 %vm2551_vm14, %v2533_v19  ;;  %v5051_v62 = vpop.f32.mrb[63].mxu1 }
 0x20c   : > { %v5052_v6 = vadd.f32 %v5051_v62, %v5050_v58 }
 0x20d   : > { %v2517_v31 = vmul.f32 %v5049_v52, %v2192_v48  ;;  %v2195_v4 = vadd.f32 %v5164_v40, %v7490_v7 }
 0x20f   : > { %v2518_v35 = vmul.f32 %v5052_v6, %v2195_v4  ;;  %v5181_v60 = vpop.f32.mrb[96].mxu0 }
 0x210   : > { %v5182_v54 = vpop.f32.mrb[97].mxu0  ;;  %v5187_v18 = vpop.f32.mrb[64].mxu1 }
 0x211   : > { %v2534_v12 = vpack.c.bf16 %v2518_v35, %v2517_v31  ;;  %v5183_v16 = vadd.f32 %v5182_v54, %v5181_v60  ;;  %v5184_v26 = vpop.f32.mrb[98].mxu0  ;;  %v5188_v21 = vpop.f32.mrb[65].mxu1 }
 0x212   : > { %v5185_v33 = vpop.f32.mrb[99].mxu0  ;;  %v5189_v25 = vadd.f32 %v5188_v21, %v5187_v18  ;;  %v5190_v36 = vpop.f32.mrb[66].mxu1 }
 0x213   : > { %v7676_v34 = vadd.f32 %v5183_v16, %v7545_v10  ;;  %v5186_v57 = vadd.f32 %v5185_v33, %v5184_v26  ;;  %5586 = vmatmul.mubr.msk.bf16.gmra.mrb[128].mxu0 %vm2551_vm14, %v2534_v12  ;;  %v5191_v2 = vpop.f32.mrb[67].mxu1 }
 0x214   : > { %v7680_v49 = vadd.f32 %v5189_v25, %v7561_v11  ;;  %v5192_v19 = vadd.f32 %v5191_v2, %v5190_v36 }
 0x215   : > { %9365 = vst [vmem:[#allocation66_spill] sm:$0xff] %v7676_v34  ;;  %v7683_v23 = vadd.f32 %v5186_v57, %v7549_v50 }
 0x216   : > { %9366 = vst [vmem:[#allocation67_spill] sm:$0xff] %v7680_v49  ;;  %v7686_v17 = vadd.f32 %v5192_v19, %v7565_v3 }
 0x217   : > { %9367 = vst [vmem:[#allocation68_spill] sm:$0xff] %v7683_v23 }
 0x218   : > { %9368 = vst [vmem:[#allocation69_spill] sm:$0xff] %v7686_v17  ;;  %v5193_v15 = vpop.f32.mrb[68].mxu1 }
 0x219   : > { %v5194_v42 = vpop.f32.mrb[69].mxu1 }
 0x21a   : > { %v5195_v10 = vadd.f32 %v5194_v42, %v5193_v15  ;;  %v5196_v29 = vpop.f32.mrb[70].mxu1 }
 0x21b   : > { %v5197_v8 = vpop.f32.mrb[71].mxu1 }
 0x21c   : > { %v7689_v52 = vadd.f32 %v5195_v10, %v7578_v41  ;;  %v5198_v48 = vadd.f32 %v5197_v8, %v5196_v29 }
 0x21e   : > { %9369 = vst [vmem:[#allocation70_spill] sm:$0xff] %v7689_v52  ;;  %v7692_v58 = vadd.f32 %v5198_v48, %v7582_v30 }
 0x220   : > { %9370 = vst [vmem:[#allocation71_spill] sm:$0xff] %v7692_v58  ;;  %v5199_v11 = vpop.f32.mrb[72].mxu1  ;;  %v3017_v58 = vld [vmem:[#allocation3] sm:$0x1] }
 0x221   : > { %v5200_v40 = vpop.f32.mrb[73].mxu1 }
 0x222   : > { %v5201_v50 = vadd.f32 %v5200_v40, %v5199_v11  ;;  %v5202_v62 = vpop.f32.mrb[74].mxu1 }
 0x223   : > { %v5203_v31 = vpop.f32.mrb[75].mxu1 }
 0x224   : > { %v7695_v3 = vadd.f32 %v5201_v50, %v7595_v43  ;;  %v5204_v6 = vadd.f32 %v5203_v31, %v5202_v62 }
 0x226   : > { %9371 = vst [vmem:[#allocation72_spill] sm:$0xff] %v7695_v3  ;;  %v7698_v4 = vadd.f32 %v5204_v6, %v7599_v5 }
 0x228   : > { %9372 = vst [vmem:[#allocation73_spill] sm:$0xff] %v7698_v4  ;;  %v5205_v35 = vpop.f32.mrb[76].mxu1 }
 0x229   : > { %v5206_v60 = vpop.f32.mrb[77].mxu1 }
 0x22a   : > { %v5207_v41 = vadd.f32 %v5206_v60, %v5205_v35  ;;  %v5208_v54 = vpop.f32.mrb[78].mxu1 }
 0x22b   : > { %v5209_v12 = vpop.f32.mrb[79].mxu1 }
 0x22c   : > { %v7701_v30 = vadd.f32 %v5207_v41, %v7609_v55  ;;  %v5210_v18 = vadd.f32 %v5209_v12, %v5208_v54 }
 0x22e   : > { %9373 = vst [vmem:[#allocation74_spill] sm:$0xff] %v7701_v30  ;;  %v7704_v16 = vadd.f32 %v5210_v18, %v7613_v56 }
 0x230   : > { %9374 = vst [vmem:[#allocation75_spill] sm:$0xff] %v7704_v16  ;;  %v5211_v26 = vpop.f32.mrb[80].mxu1 }
 0x231   : > { %v5212_v21 = vpop.f32.mrb[81].mxu1 }
 0x232   : > { %v5213_v43 = vadd.f32 %v5212_v21, %v5211_v26  ;;  %v5214_v33 = vpop.f32.mrb[82].mxu1 }
 0x233   : > { %v5215_v25 = vpop.f32.mrb[83].mxu1 }
 0x234   : > { %v7707_v5 = vadd.f32 %v5213_v43, %v7620_v51  ;;  %v5216_v36 = vadd.f32 %v5215_v25, %v5214_v33 }
 0x236   : > { %9375 = vst [vmem:[#allocation76_spill] sm:$0xff] %v7707_v5  ;;  %v7710_v57 = vadd.f32 %v5216_v36, %v7624_v46 }
 0x238   : > { %9376 = vst [vmem:[#allocation77_spill] sm:$0xff] %v7710_v57  ;;  %v5217_v2 = vpop.f32.mrb[84].mxu1 }
 0x239   : > { %v5218_v19 = vpop.f32.mrb[85].mxu1 }
 0x23a   : > { %v5219_v55 = vadd.f32 %v5218_v19, %v5217_v2  ;;  %v5220_v15 = vpop.f32.mrb[86].mxu1 }
 0x23b   : > { %v5221_v42 = vpop.f32.mrb[87].mxu1 }
 0x23c   : > { %v7713_v56 = vadd.f32 %v5219_v55, %v7631_v44  ;;  %v5222_v10 = vadd.f32 %v5221_v42, %v5220_v15 }
 0x23e   : > { %9377 = vst [vmem:[#allocation78_spill] sm:$0xff] %v7713_v56  ;;  %v7716_v29 = vadd.f32 %v5222_v10, %v7635_v47 }
 0x240   : > { %9378 = vst [vmem:[#allocation79_spill] sm:$0xff] %v7716_v29  ;;  %v5223_v8 = vpop.f32.mrb[88].mxu1 }
 0x241   : > { %v5224_v48 = vpop.f32.mrb[89].mxu1 }
 0x242   : > { %v5225_v51 = vadd.f32 %v5224_v48, %v5223_v8  ;;  %v5226_v11 = vpop.f32.mrb[90].mxu1 }
 0x243   : > { %v5227_v40 = vpop.f32.mrb[91].mxu1 }
 0x244   : > { %v7719_v46 = vadd.f32 %v5225_v51, %v7642_v53  ;;  %v5228_v50 = vadd.f32 %v5227_v40, %v5226_v11 }
 0x246   : > { %9379 = vst [vmem:[#allocation80_spill] sm:$0xff] %v7719_v46  ;;  %v7722_v62 = vadd.f32 %v5228_v50, %v7646_v24 }
 0x248   : > { %9380 = vst [vmem:[#allocation81_spill] sm:$0xff] %v7722_v62  ;;  %v5229_v31 = vpop.f32.mrb[92].mxu1 }
 0x249   : > { %v5230_v6 = vpop.f32.mrb[93].mxu1 }
 0x24a   : > { %v5231_v44 = vadd.f32 %v5230_v6, %v5229_v31  ;;  %v5232_v35 = vpop.f32.mrb[94].mxu1 }
 0x24b   : > { %v5233_v60 = vpop.f32.mrb[95].mxu1 }
 0x24c   : > { %v7725_v47 = vadd.f32 %v5231_v44, %v7426_v39  ;;  %v5234_v41 = vadd.f32 %v5233_v60, %v5232_v35 }
 0x24e   : > { %v7728_v54 = vadd.f32 %v5234_v41, %v7438_v14  ;;  %v2859_v41 = vpop.permute.xlu0 %2858 }
 0x24f   : > { %vm2953_vm11 = vcmp.eq.s32.totalorder %v2859_v41, 1 }
 0x250   : > { %9381 = vst [vmem:[#allocation82_spill] sm:$0xff] %v7728_v54  ;;  %v5235_v12 = vpop.f32.mrb[96].mxu1 }
 0x251   : > { %v5236_v18 = vpop.f32.mrb[97].mxu1 }
 0x252   : > { %v5237_v53 = vadd.f32 %v5236_v18, %v5235_v12  ;;  %v5238_v26 = vpop.f32.mrb[98].mxu1 }
 0x253   : > { %v5239_v21 = vpop.f32.mrb[99].mxu1 }
 0x254   : > { %v7731_v24 = vadd.f32 %v5237_v53, %v7423_v0  ;;  %v5240_v43 = vadd.f32 %v5239_v21, %v5238_v26  ;;  %v2862_v53 = vpop.permute.xlu1 %2861 }
 0x255   : > { %vm2954_vm13 = vcmp.eq.s32.totalorder %v2862_v53, 1 }
 0x256   : > { %9382 = vst [vmem:[#allocation83_spill] sm:$0xff] %v7731_v24  ;;  %v7734_v33 = vadd.f32 %v5240_v43, %v7432_v20 }
 0x258   : > { %9383 = vst [vmem:[#allocation84_spill] sm:$0xff] %v7734_v33  ;;  %v5241_v25 = vpop.f32.mrb[100].mxu1 }
 0x259   : > { %v5242_v36 = vpop.f32.mrb[101].mxu1 }
 0x25a   : > { %v5243_v39 = vadd.f32 %v5242_v36, %v5241_v25  ;;  %v5244_v2 = vpop.f32.mrb[102].mxu1  ;;  %v2865_v36 = vpop.permute.xlu0 %2864 }
 0x25b   : > { %v5245_v19 = vpop.f32.mrb[103].mxu1  ;;  %vm2955_vm9 = vcmp.eq.s32.totalorder %v2865_v36, 1 }
 0x25c   : > { %v7737_v14 = vadd.f32 %v5243_v39, %v7451_v37  ;;  %v5246_v55 = vadd.f32 %v5245_v19, %v5244_v2  ;;  %v2868_v19 = vpop.permute.xlu1 %2867 }
 0x25d   : > { %vm2956_vm8 = vcmp.eq.s32.totalorder %v2868_v19, 1 }
 0x25e   : > { %9384 = vst [vmem:[#allocation85_spill] sm:$0xff] %v7737_v14  ;;  %v7740_v15 = vadd.f32 %v5246_v55, %v7457_v13 }
 0x260   : > { %9385 = vst [vmem:[#allocation86_spill] sm:$0xff] %v7740_v15  ;;  %v5247_v42 = vpop.f32.mrb[104].mxu1 }
 0x261   : > { %v5248_v10 = vpop.f32.mrb[105].mxu1 }
 0x262   : > { %v5249_v0 = vadd.f32 %v5248_v10, %v5247_v42  ;;  %v5250_v8 = vpop.f32.mrb[106].mxu1 }
 0x263   : > { %v5251_v48 = vpop.f32.mrb[107].mxu1 }
 0x264   : > { %v7743_v20 = vadd.f32 %v5249_v0, %v7448_v28  ;;  %v5252_v51 = vadd.f32 %v5251_v48, %v5250_v8  ;;  %v2871_v48 = vpop.permute.xlu0 %2870 }
 0x265   : > { %vm2957_vm3 = vcmp.eq.s32.totalorder %v2871_v48, 1 }
 0x266   : > { %9386 = vst [vmem:[#allocation87_spill] sm:$0xff] %v7743_v20  ;;  %v7746_v11 = vadd.f32 %v5252_v51, %v7454_v61 }
 0x268   : > { %9387 = vst [vmem:[#allocation88_spill] sm:$0xff] %v7746_v11  ;;  %v5253_v40 = vpop.f32.mrb[108].mxu1 }
 0x269   : > { %v5254_v50 = vpop.f32.mrb[109].mxu1 }
 0x26a   : > { %v5255_v37 = vadd.f32 %v5254_v50, %v5253_v40  ;;  %v5256_v31 = vpop.f32.mrb[110].mxu1 }
 0x26b   : > { %v5257_v6 = vpop.f32.mrb[111].mxu1 }
 0x26c   : > { %v7749_v13 = vadd.f32 %v5255_v37, %v7469_v59  ;;  %v5258_v44 = vadd.f32 %v5257_v6, %v5256_v31 }
 0x26e   : > { %9388 = vst [vmem:[#allocation89_spill] sm:$0xff] %v7749_v13  ;;  %v7752_v35 = vadd.f32 %v5258_v44, %v7475_v27 }
 0x270   : > { %9389 = vst [vmem:[#allocation90_spill] sm:$0xff] %v7752_v35  ;;  %v5259_v60 = vpop.f32.mrb[112].mxu1 }
 0x271   : > { %v5260_v28 = vpop.f32.mrb[113].mxu1 }
 0x272   : > { %v5261_v12 = vadd.f32 %v5260_v28, %v5259_v60  ;;  %v5262_v18 = vpop.f32.mrb[114].mxu1 }
 0x273   : > { %v5263_v61 = vpop.f32.mrb[115].mxu1 }
 0x274   : > { %v7755_v26 = vadd.f32 %v5261_v12, %v7466_v22  ;;  %v5264_v21 = vadd.f32 %v5263_v61, %v5262_v18 }
 0x275   : > { %v5559_v43 = vpop.f32.mrb[100].mxu0 }
 0x276   : > { %9390 = vst [vmem:[#allocation91_spill] sm:$0xff] %v7755_v26  ;;  %v7758_v25 = vadd.f32 %v5264_v21, %v7472_v1  ;;  %v2634_v59 = vpop.f32.mrb[101].mxu0  ;;  %v2874_v1 = vpop.permute.xlu1 %2873  ;;  %v2763_v50 = vmul.f32 0.35355338, %v5559_v43 }
 0x277   : > { %v5560_v39 = vpop.f32.mrb[102].mxu0  ;;  %v2761_v37 = vmul.f32 0.35355338, %v2634_v59  ;;  %vm2958_vm2 = vcmp.eq.s32.totalorder %v2874_v1, 1 }
 0x278   : > { %9391 = vst [vmem:[#allocation92_spill] sm:$0xff] %v7758_v25  ;;  %v5265_v27 = vpop.f32.mrb[116].mxu1  ;;  %v2637_v2 = vpop.f32.mrb[103].mxu0  ;;  %v2764_v6 = vmul.f32 0.35355338, %v5560_v39 }
 0x279   : > { %v5266_v55 = vpop.f32.mrb[117].mxu1  ;;  %v2762_v28 = vmul.f32 0.35355338, %v2637_v2  ;;  %v7769_v21 = vsel %vm2955_vm9, -1e+30, %v2763_v50 }
 0x27a   : > { %v5267_v42 = vadd.f32 %v5266_v55, %v5265_v27  ;;  %v5268_v10 = vpop.f32.mrb[118].mxu1  ;;  %v2880_v61 = vpop.permute.xlu1 %2879  ;;  %v7771_v43 = vsel %vm2953_vm11, -1e+30, %v2761_v37  ;;  %v7773_v39 = vsel %vm2956_vm8, -1e+30, %v2764_v6 }
 0x27b   : > { %v5269_v0 = vpop.f32.mrb[119].mxu1  ;;  %vm2960_vm5 = vcmp.eq.s32.totalorder %v2880_v61, 1  ;;  %v3018_v53 = vsel %vm2551_vm14, %v7771_v43, -inf }
 0x27c   : > { %v7761_v8 = vadd.f32 %v5267_v42, %v7487_v32  ;;  %v5270_v22 = vadd.f32 %v5269_v0, %v5268_v10  ;;  %v2877_v32 = vpop.permute.xlu0 %2876  ;;  %v3020_v0 = vsel %vm2551_vm14, %v7769_v21, -inf }
 0x27d   : > { %vm2959_vm10 = vcmp.eq.s32.totalorder %v2877_v32, 1 }
 0x27e   : > { %9392 = vst [vmem:[#allocation93_spill] sm:$0xff] %v7761_v8  ;;  %v7764_v51 = vadd.f32 %v5270_v22, %v7493_v9 }
 0x280   : > { %9393 = vst [vmem:[#allocation94_spill] sm:$0xff] %v7764_v51  ;;  %v5271_v40 = vpop.f32.mrb[120].mxu1  ;;  %v2883_v61 = vpop.permute.xlu0 %2882 }
 0x281   : > { %v5272_v31 = vpop.f32.mrb[121].mxu1  ;;  %vm2961_vm7 = vcmp.eq.s32.totalorder %v2883_v61, 1 }
 0x282   : > { %v5273_v44 = vadd.f32 %v5272_v31, %v5271_v40  ;;  %v5274_v60 = vpop.f32.mrb[122].mxu1  ;;  %v3021_v31 = vsel %vm2551_vm14, %v7773_v39, -inf }
 0x283   : > { %v5275_v12 = vpop.f32.mrb[123].mxu1 }
 0x284   : > { %v7767_v18 = vadd.f32 %v5273_v44, %v7484_v38  ;;  %v5276_v9 = vadd.f32 %v5275_v12, %v5274_v60  ;;  %v7779_v38 = vsel %vm2954_vm13, -1e+30, %v2762_v28 }
 0x285   : > { %v5563_v59 = vpop.f32.mrb[104].mxu0  ;;  %v3019_v28 = vsel %vm2551_vm14, %v7779_v38, -inf }
 0x286   : > { %9394 = vst [vmem:[#allocation95_spill] sm:$0xff] %v7767_v18  ;;  %v7776_v41 = vadd.f32 %v5276_v9, %v7490_v7  ;;  %v2767_v27 = vmul.f32 0.35355338, %v5563_v59  ;;  %v2650_v36 = vpop.f32.mrb[105].mxu0  ;;  %v2886_v59 = vpop.permute.xlu1 %2885 }
 0x287   : > { %v2765_v2 = vmul.f32 0.35355338, %v2650_v36  ;;  %v5564_v19 = vpop.f32.mrb[106].mxu0  ;;  %vm2962_vm6 = vcmp.eq.s32.totalorder %v2886_v59, 1 }
 0x288   : > { %9395 = vst [vmem:[#allocation96_spill] sm:$0xff] %v7776_v41  ;;  %v7781_v55 = vsel %vm2959_vm10, -1e+30, %v2767_v27  ;;  %v2768_v42 = vmul.f32 0.35355338, %v5564_v19  ;;  %v2653_v10 = vpop.f32.mrb[107].mxu0  ;;  %v2889_v27 = vpop.permute.xlu0 %2888 }
 0x289   : > { %v3026_v7 = vsel %vm2551_vm14, %v7781_v55, -inf  ;;  %v7787_v22 = vsel %vm2957_vm3, -1e+30, %v2765_v2  ;;  %v2766_v48 = vmul.f32 0.35355338, %v2653_v10  ;;  %vm2963_vm12 = vcmp.eq.s32.totalorder %v2889_v27, 1 }
 0x28a   : > { %v3027_v40 = vmax.f32 %v3020_v0, %v3026_v7  ;;  %v3022_v50 = vsel %vm2551_vm14, %v7787_v22, -inf  ;;  %v7793_v37 = vsel %vm2960_vm5, -1e+30, %v2768_v42  ;;  %v2892_v2 = vpop.permute.xlu1 %2891 }
 0x28b   : > { %v3023_v6 = vmax.f32 %v3018_v53, %v3022_v50  ;;  %v3028_v44 = vsel %vm2551_vm14, %v7793_v37, -inf  ;;  %v7800_v60 = vsel %vm2958_vm2, -1e+30, %v2766_v48  ;;  %vm2964_vm0 = vcmp.eq.s32.totalorder %v2892_v2, 1 }
 0x28c   : > { %v3029_v12 = vmax.f32 %v3021_v31, %v3028_v44  ;;  %v3024_v32 = vsel %vm2551_vm14, %v7800_v60, -inf }
 0x28d   : > { %v3025_v9 = vmax.f32 %v3019_v28, %v3024_v32 }
 0x296   : > { %v5567_v36 = vpop.f32.mrb[108].mxu0 }
 0x297   : > { %v2771_v19 = vmul.f32 0.35355338, %v5567_v36  ;;  %v2666_v42 = vpop.f32.mrb[109].mxu0 }
 0x298   : > { %v2769_v10 = vmul.f32 0.35355338, %v2666_v42  ;;  %v5568_v1 = vpop.f32.mrb[110].mxu0 }
 0x299   : > { %v7806_v0 = vsel %vm2963_vm12, -1e+30, %v2771_v19  ;;  %v2772_v7 = vmul.f32 0.35355338, %v5568_v1  ;;  %v2669_v48 = vpop.f32.mrb[111].mxu0  ;;  %v2898_v1 = vpop.permute.xlu1 %2897 }
 0x29a   : > { %v3034_v53 = vsel %vm2551_vm14, %v7806_v0, -inf  ;;  %v7810_v50 = vsel %vm2961_vm7, -1e+30, %v2769_v10  ;;  %v2770_v31 = vmul.f32 0.35355338, %v2669_v48  ;;  %v2895_v10 = vpop.permute.xlu0 %2894  ;;  %vm2966_vm13 = vcmp.eq.s32.totalorder %v2898_v1, 1 }
 0x29b   : > { %v3035_v44 = vmax.f32 %v3027_v40, %v3034_v53  ;;  %v3030_v28 = vsel %vm2551_vm14, %v7810_v50, -inf  ;;  %v7814_v32 = vsel %vm2964_vm0, -1e+30, %v2772_v7  ;;  %vm2965_vm1 = vcmp.eq.s32.totalorder %v2895_v10, 1 }
 0x29c   : > { %v3031_v27 = vmax.f32 %v3023_v6, %v3030_v28  ;;  %v3036_v61 = vsel %vm2551_vm14, %v7814_v32, -inf  ;;  %v7818_v36 = vsel %vm2962_vm6, -1e+30, %v2770_v31 }
 0x29d   : > { %v3037_v2 = vmax.f32 %v3029_v12, %v3036_v61  ;;  %v3032_v19 = vsel %vm2551_vm14, %v7818_v36, -inf  ;;  %v2904_v48 = vpop.permute.xlu1 %2903 }
 0x29e   : > { %v3033_v42 = vmax.f32 %v3025_v9, %v3032_v19  ;;  %v2901_v59 = vpop.permute.xlu0 %2900  ;;  %vm2968_vm4 = vcmp.eq.s32.totalorder %v2904_v48, 1 }
 0x29f   : > { %vm2967_vm15 = vcmp.eq.s32.totalorder %v2901_v59, 1 }
 0x2a2   : > { %v2907_v41 = vpop.permute.xlu0 %2906 }
 0x2a3   : > { %vm2969_vm8 = vcmp.eq.s32.totalorder %v2907_v41, 1 }
 0x2a6   : > { %v5571_v40 = vpop.f32.mrb[112].mxu0  ;;  %v2913_v1 = vpop.permute.xlu0 %2912 }
 0x2a7   : > { %v2775_v53 = vmul.f32 0.35355338, %v5571_v40  ;;  %v2682_v62 = vpop.f32.mrb[113].mxu0  ;;  %vm2971_vm11 = vcmp.eq.s32.totalorder %v2913_v1, 1 }
 0x2a8   : > { %v2773_v7 = vmul.f32 0.35355338, %v2682_v62  ;;  %v5572_v6 = vpop.f32.mrb[114].mxu0 }
 0x2a9   : > { %v7822_v28 = vsel %vm2967_vm15, -1e+30, %v2775_v53  ;;  %v2776_v31 = vmul.f32 0.35355338, %v5572_v6  ;;  %v2685_v46 = vpop.f32.mrb[115].mxu0 }
 0x2aa   : > { %9396 = vst [vmem:[#allocation97_spill] sm:$0xff] %v7822_v28  ;;  %v3042_v12 = vsel %vm2551_vm14, %v7822_v28, -inf  ;;  %v7826_v9 = vsel %vm2965_vm1, -1e+30, %v2773_v7  ;;  %v2774_v61 = vmul.f32 0.35355338, %v2685_v46  ;;  %v2910_v46 = vpop.permute.xlu1 %2909  ;;  %v2919_v51 = vpop.permute.xlu0 %2918 }
 0x2ab   : > { %9397 = vst [vmem:[#allocation98_spill] sm:$0xff] %v7826_v9  ;;  %v3043_v19 = vmax.f32 %v3035_v44, %v3042_v12  ;;  %v3038_v40 = vsel %vm2551_vm14, %v7826_v9, -inf  ;;  %v7830_v59 = vsel %vm2968_vm4, -1e+30, %v2776_v31  ;;  %vm2970_vm2 = vcmp.eq.s32.totalorder %v2910_v46, 1 }
 0x2ac   : > { %9398 = vst [vmem:[#allocation99_spill] sm:$0xff] %v7830_v59  ;;  %v3039_v62 = vmax.f32 %v3031_v27, %v3038_v40  ;;  %v3044_v10 = vsel %vm2551_vm14, %v7830_v59, -inf  ;;  %v7834_v53 = vsel %vm2966_vm13, -1e+30, %v2774_v61  ;;  %vm2973_vm10 = vcmp.eq.s32.totalorder %v2919_v51, 1 }
 0x2ad   : > { %9399 = vst [vmem:[#allocation100_spill] sm:$0xff] %v7834_v53  ;;  %v3045_v48 = vmax.f32 %v3037_v2, %v3044_v10  ;;  %v3040_v6 = vsel %vm2551_vm14, %v7834_v53, -inf }
 0x2ae   : > { %v3041_v7 = vmax.f32 %v3033_v42, %v3040_v6  ;;  %v2916_v12 = vpop.permute.xlu1 %2915  ;;  %v2925_v46 = vpop.permute.xlu0 %2924 }
 0x2af   : > { %vm2972_vm9 = vcmp.eq.s32.totalorder %v2916_v12, 1  ;;  %vm2975_vm3 = vcmp.eq.s32.totalorder %v2925_v46, 1 }
 0x2b2   : > { %v2931_v25 = vpop.permute.xlu0 %2930 }
 0x2b3   : > { %vm2977_vm0 = vcmp.eq.s32.totalorder %v2931_v25, 1 }
 0x2b6   : > { %v5575_v44 = vpop.f32.mrb[116].mxu0 }
 0x2b7   : > { %v2779_v18 = vmul.f32 0.35355338, %v5575_v44  ;;  %v2698_v29 = vpop.f32.mrb[117].mxu0 }
 0x2b8   : > { %v2777_v31 = vmul.f32 0.35355338, %v2698_v29  ;;  %v5576_v27 = vpop.f32.mrb[118].mxu0 }
 0x2b9   : > { %v7838_v40 = vsel %vm2971_vm11, -1e+30, %v2779_v18  ;;  %v2780_v61 = vmul.f32 0.35355338, %v5576_v27  ;;  %v2701_v56 = vpop.f32.mrb[119].mxu0 }
 0x2ba   : > { %v3050_v2 = vsel %vm2551_vm14, %v7838_v40, -inf  ;;  %v7842_v42 = vsel %vm2969_vm8, -1e+30, %v2777_v31  ;;  %v2778_v10 = vmul.f32 0.35355338, %v2701_v56  ;;  %v2922_v56 = vpop.permute.xlu1 %2921  ;;  %vm3088_vm8 = vcmask 253952  }
 0x2bb   : > { %v3051_v6 = vmax.f32 %v3043_v19, %v3050_v2  ;;  %v3046_v44 = vsel %vm2551_vm14, %v7842_v42, -inf  ;;  %v7846_v1 = vsel %vm2972_vm9, -1e+30, %v2780_v61  ;;  %vm2974_vm12 = vcmp.eq.s32.totalorder %v2922_v56, 1  ;;  %v2937_v56 = vpop.permute.xlu0 %2936 }
 0x2bc   : > { %v3047_v29 = vmax.f32 %v3039_v62, %v3046_v44  ;;  %v3052_v18 = vsel %vm2551_vm14, %v7846_v1, -inf  ;;  %v7850_v41 = vsel %vm2970_vm2, -1e+30, %v2778_v10  ;;  %vm2979_vm7 = vcmp.eq.s32.totalorder %v2937_v56, 1 }
 0x2bd   : > { %v3053_v12 = vmax.f32 %v3045_v48, %v3052_v18  ;;  %v3048_v27 = vsel %vm2551_vm14, %v7850_v41, -inf }
 0x2be   : > { %v3049_v31 = vmax.f32 %v3041_v7, %v3048_v27  ;;  %v2928_v2 = vpop.permute.xlu1 %2927 }
 0x2bf   : > { %vm2976_vm5 = vcmp.eq.s32.totalorder %v2928_v2, 1  ;;  %v2943_v35 = vpop.permute.xlu0 %2942 }
 0x2c0   : > { %vm2981_vm4 = vcmp.eq.s32.totalorder %v2943_v35, 1 }
 0x2c6   : > { %v5579_v19 = vpop.f32.mrb[120].mxu0 }
 0x2c7   : > { %v2783_v8 = vmul.f32 0.35355338, %v5579_v19  ;;  %v2714_v57 = vpop.f32.mrb[121].mxu0 }
 0x2c8   : > { %v2781_v61 = vmul.f32 0.35355338, %v2714_v57  ;;  %v5580_v62 = vpop.f32.mrb[122].mxu0 }
 0x2c9   : > { %v7854_v44 = vsel %vm2975_vm3, -1e+30, %v2783_v8  ;;  %v2784_v10 = vmul.f32 0.35355338, %v5580_v62  ;;  %v2717_v5 = vpop.f32.mrb[123].mxu0 }
 0x2ca   : > { %v3058_v48 = vsel %vm2551_vm14, %v7854_v44, -inf  ;;  %v7858_v7 = vsel %vm2973_vm10, -1e+30, %v2781_v61  ;;  %v2782_v18 = vmul.f32 0.35355338, %v2717_v5  ;;  %v2934_v5 = vpop.permute.xlu1 %2933 }
 0x2cb   : > { %v3059_v27 = vmax.f32 %v3051_v6, %v3058_v48  ;;  %v3054_v19 = vsel %vm2551_vm14, %v7858_v7, -inf  ;;  %v7862_v46 = vsel %vm2976_vm5, -1e+30, %v2784_v10  ;;  %vm2978_vm15 = vcmp.eq.s32.totalorder %v2934_v5, 1  ;;  %v2949_v5 = vpop.permute.xlu0 %2948 }
 0x2cc   : > { %v3055_v57 = vmax.f32 %v3047_v29, %v3054_v19  ;;  %v3060_v8 = vsel %vm2551_vm14, %v7862_v46, -inf  ;;  %v7866_v51 = vsel %vm2974_vm12, -1e+30, %v2782_v18  ;;  %vm2983_vm1 = vcmp.eq.s32.totalorder %v2949_v5, 1 }
 0x2cd   : > { %v3061_v2 = vmax.f32 %v3053_v12, %v3060_v8  ;;  %v3056_v62 = vsel %vm2551_vm14, %v7866_v51, -inf }
 0x2ce   : > { %v3057_v61 = vmax.f32 %v3049_v31, %v3056_v62  ;;  %v2940_v48 = vpop.permute.xlu1 %2939 }
 0x2cf   : > { %vm2980_vm6 = vcmp.eq.s32.totalorder %v2940_v48, 1 }
 0x2d6   : > { %v5583_v6 = vpop.f32.mrb[124].mxu0 }
 0x2d7   : > { %v2787_v26 = vmul.f32 0.35355338, %v5583_v6  ;;  %v2730_v16 = vpop.f32.mrb[125].mxu0 }
 0x2d8   : > { %v2785_v10 = vmul.f32 0.35355338, %v2730_v16  ;;  %v5584_v29 = vpop.f32.mrb[126].mxu0 }
 0x2d9   : > { %v7870_v19 = vsel %vm2979_vm7, -1e+30, %v2787_v26  ;;  %v2788_v18 = vmul.f32 0.35355338, %v5584_v29  ;;  %v2733_v30 = vpop.f32.mrb[127].mxu0 }
 0x2da   : > { %v3066_v12 = vsel %vm2551_vm14, %v7870_v19, -inf  ;;  %v7874_v31 = vsel %vm2977_vm0, -1e+30, %v2785_v10  ;;  %v2786_v8 = vmul.f32 0.35355338, %v2733_v30  ;;  %v2946_v30 = vpop.permute.xlu1 %2945 }
 0x2db   : > { %v3067_v62 = vmax.f32 %v3059_v27, %v3066_v12  ;;  %v3062_v6 = vsel %vm2551_vm14, %v7874_v31, -inf  ;;  %v7878_v56 = vsel %vm2980_vm6, -1e+30, %v2788_v18  ;;  %vm2982_vm11 = vcmp.eq.s32.totalorder %v2946_v30, 1 }
 0x2dc   : > { %v3063_v16 = vmax.f32 %v3055_v57, %v3062_v6  ;;  %v3068_v26 = vsel %vm2551_vm14, %v7878_v56, -inf  ;;  %v7882_v25 = vsel %vm2978_vm15, -1e+30, %v2786_v8 }
 0x2dd   : > { %v3069_v48 = vmax.f32 %v3061_v2, %v3068_v26  ;;  %v3064_v29 = vsel %vm2551_vm14, %v7882_v25, -inf }
 0x2de   : > { %v3065_v10 = vmax.f32 %v3057_v61, %v3064_v29  ;;  %v2952_v12 = vpop.permute.xlu1 %2951 }
 0x2df   : > { %vm2984_vm13 = vcmp.eq.s32.totalorder %v2952_v12, 1 }
 0x2e6   : > { %v5587_v27 = vpop.f32.mrb[128].mxu0 }
 0x2e7   : > { %v2791_v13 = vmul.f32 0.35355338, %v5587_v27  ;;  %v2746_v4 = vpop.f32.mrb[129].mxu0 }
 0x2e8   : > { %v2789_v18 = vmul.f32 0.35355338, %v2746_v4  ;;  %v5588_v57 = vpop.f32.mrb[130].mxu0 }
 0x2e9   : > { %v7886_v6 = vsel %vm2983_vm1, -1e+30, %v2791_v13  ;;  %v2792_v8 = vmul.f32 0.35355338, %v5588_v57  ;;  %v2749_v3 = vpop.f32.mrb[131].mxu0 }
 0x2ea   : > { %9400 = vst [vmem:[#allocation101_spill] sm:$0xff] %v7886_v6  ;;  %v3074_v2 = vsel %vm2551_vm14, %v7886_v6, -inf  ;;  %v7890_v61 = vsel %vm2981_vm4, -1e+30, %v2789_v18  ;;  %v2790_v26 = vmul.f32 0.35355338, %v2749_v3 }
 0x2eb   : > { %v3075_v29 = vmax.f32 %v3067_v62, %v3074_v2  ;;  %v3070_v27 = vsel %vm2551_vm14, %v7890_v61, -inf  ;;  %v7894_v5 = vsel %vm2984_vm13, -1e+30, %v2792_v8 }
 0x2ec   : > { %9401 = vst [vmem:[#allocation102_spill] sm:$0xff] %v7894_v5  ;;  %v3071_v4 = vmax.f32 %v3063_v16, %v3070_v27  ;;  %v3076_v13 = vsel %vm2551_vm14, %v7894_v5, -inf  ;;  %v7898_v35 = vsel %vm2982_vm11, -1e+30, %v2790_v26 }
 0x2ed   : > { %9402 = vst [vmem:[#allocation103_spill] sm:$0xff] %v7898_v35  ;;  %v3077_v12 = vmax.f32 %v3069_v48, %v3076_v13  ;;  %v3072_v57 = vsel %vm2551_vm14, %v7898_v35, -inf }
 0x2ee   : > { %v3073_v18 = vmax.f32 %v3065_v10, %v3072_v57 }
 0x2ef   : > { %v3079_v11 = vmax.f32 %v3075_v29, %v3077_v12 }
 0x2f0   : > { %v3078_v3 = vmax.f32 %v3071_v4, %v3073_v18 }
 0x2f2   : > { %v3080_v30 = vmax.f32 %v3078_v3, %v3079_v11 }
 0x2f4   : > { %v3081_v62 = vrot.slane %v3080_v30, 4 }
 0x2f6   : > { %v3082_v2 = vmax.f32 %v3080_v30, %v3081_v62 }
 0x2f8   : > { %v3083_v59 = vrot.slane %v3082_v2, 2 }
 0x2fa   : > { %v3084_v20 = vmax.f32 %v3082_v2, %v3083_v59 }
 0x2fc   : > { %v3085_v8 = vrot.slane %v3084_v20, 1 }
 0x2fe   : > { %v3086_v16 = vmax.f32 %v3084_v20, %v3085_v8 }
 0x300   : > { %v3090_v27 = vsub.f32 %v3086_v16, %v3017_v58  ;;  %v7902_v28 = vmax.f32 %v3017_v58, %v3086_v16 }
 0x302   : > { %v3091_v26 = vsel %vm3088_vm8, %v3090_v27, -inf  ;;  %3089 = vst.msk [vmem:[#allocation3] sm:$0x1] %vm3088_vm8, %v7902_v28 }
 0x303   : > { %3092 = vmax.xlane.f32.xlu0 %v3091_v26 }
 0x390   : > { %v3093_v48 = vpop.xlane.xlu0 %3092 }
 0x391   : > { %v3094_v10 = vrot.slane %v3093_v48, 4 }
 0x393   : > { %v3095_v29 = vmax.f32 %v3093_v48, %v3094_v10 }
 0x395   : > { %v3096_v4 = vrot.slane %v3095_v29, 2 }
 0x397   : > { %v3097_v11 = vmax.f32 %v3095_v29, %v3096_v4 }
 0x399   : > { %v3098_v13 = vrot.slane %v3097_v11, 1 }
 0x39b   : > { %v3099_v12 = vmax.f32 %v3097_v11, %v3098_v13 }
 0x39d   : > { %5605 = vpush %v3099_v12 }
 0x3ce   : > { %s5606_s13 = spop %5605 }
 0x3cf   : > { %p3101_p6 = scmp.gt.f32.partialorder %s5606_s13, 0.0 }
 0x3d0   : > { %v3105_v20 = vsub.f32 (%p3101_p6), %v3017_v58, %v7902_v28  ;;  %v9403_v57 = vlaneseq (%p3101_p6)  ;;  %v3108_v30 = vld [vmem:[%s9100_s9] sm:$0xff] (%p3101_p6)  ;;  %v3109_v62 = vld [vmem:[%s9100_s9 + $0x8] sm:$0xff] (%p3101_p6)  ;;  %v3110_v2 = vld [vmem:[%s9100_s9 + $0x10] sm:$0xff] (%p3101_p6) }
 0x3d1   : > { %3104 = sbr.rel (!%p3101_p6) target bundleno = 1027 (0x403), region = 64  ;;  %v3111_v58 = vld [vmem:[%s9100_s9 + $0x18] sm:$0xff] (%p3101_p6)  ;;  %v3112_v8 = vld [vmem:[%s9100_s9 + $0x20] sm:$0xff] (%p3101_p6)  ;;  %v3113_v16 = vld [vmem:[%s9100_s9 + $0x28] sm:$0xff] (%p3101_p6) }
 0x3d2   : > { %v3106_v59 = vmul.f32 (%p3101_p6), 1.442695, %v3105_v20  ;;  %v3142_v18 = vshrl.u32 (%p3101_p6), %v9403_v57, 7  ;;  %v3114_v27 = vld [vmem:[%s9100_s9 + $0x30] sm:$0xff] (%p3101_p6)  ;;  %v3115_v26 = vld [vmem:[%s9100_s9 + $0x38] sm:$0xff] (%p3101_p6)  ;;  %v3116_v10 = vld [vmem:[%s9100_s9 + $0x40] sm:$0xff] (%p3101_p6) }
 0x3d3   : > { %v3117_v29 = vld [vmem:[%s9100_s9 + $0x48] sm:$0xff] (%p3101_p6)  ;;  %v3118_v4 = vld [vmem:[%s9100_s9 + $0x50] sm:$0xff] (%p3101_p6)  ;;  %v3119_v11 = vld [vmem:[%s9100_s9 + $0x58] sm:$0xff] (%p3101_p6) }
 0x3d4   : > { %5705 = vpow2.f32 (%p3101_p6), %v3106_v59  ;;  %v3143_v3 = vsub.s32 (%p3101_p6), 0, %v3142_v18  ;;  %v3120_v12 = vld [vmem:[%s9100_s9 + $0x60] sm:$0xff] (%p3101_p6)  ;;  %v3121_v20 = vld [vmem:[%s9100_s9 + $0x68] sm:$0xff] (%p3101_p6)  ;;  %v3122_v59 = vld [vmem:[%s9100_s9 + $0x70] sm:$0xff] (%p3101_p6) }
 0x3d5   : > { %v3123_v57 = vld [vmem:[%s9100_s9 + $0x78] sm:$0xff] (%p3101_p6)  ;;  %v3124_v18 = vld [vmem:[%s9100_s9 + $0x80] sm:$0xff] (%p3101_p6)  ;;  %v3129_v49 = vld [vmem:[%s9100_s9 + $0xa8] sm:$0xff] (%p3101_p6) }
 0x3d6   : > { %v3127_v5 = vld [vmem:[%s9100_s9 + $0x98] sm:$0xff] (%p3101_p6)  ;;  %v3128_v17 = vld [vmem:[%s9100_s9 + $0xa0] sm:$0xff] (%p3101_p6)  ;;  %v3130_v33 = vld [vmem:[%s9100_s9 + $0xb0] sm:$0xff] (%p3101_p6) }
 0x3d7   : > { %v3132_v24 = vld [vmem:[%s9100_s9 + $0xc0] sm:$0xff] (%p3101_p6)  ;;  %v3133_v23 = vld [vmem:[%s9100_s9 + $0xc8] sm:$0xff] (%p3101_p6)  ;;  %v3134_v34 = vld [vmem:[%s9100_s9 + $0xd0] sm:$0xff] (%p3101_p6) }
 0x3d8   : > { %v3210_v9 = vld [vmem:[#allocation2] sm:$0xff]  ;;  %v3212_v54 = vld [vmem:[#allocation2 + $0x10] sm:$0xff]  ;;  %v3213_v35 = vld [vmem:[#allocation2 + $0x18] sm:$0xff] }
 0x3de   : > { %v5706_v48 = vpop.eup %5705 }
 0x3df   : > { %v7943_v13 = vrot.slane %v5706_v48, %v3143_v3  ;;  %v3125_v3 = vld [vmem:[%s9100_s9 + $0x88] sm:$0xff]  ;;  %v3126_v48 = vld [vmem:[%s9100_s9 + $0x90] sm:$0xff] }
 0x3e1   : > { %v3146_v52 = vmul.f32 %v7943_v13, %v3108_v30  ;;  %v3147_v15 = vmul.f32 %v7943_v13, %v3109_v62  ;;  %v3148_v6 = vmul.f32 %v7943_v13, %v3110_v2  ;;  %v3149_v14 = vmul.f32 %v7943_v13, %v3111_v58  ;;  %v3131_v30 = vld [vmem:[%s9100_s9 + $0xb8] sm:$0xff] }
 0x3e2   : > { %v3150_v62 = vmul.f32 %v7943_v13, %v3112_v8  ;;  %v3151_v2 = vmul.f32 %v7943_v13, %v3113_v16  ;;  %v3152_v58 = vmul.f32 %v7943_v13, %v3114_v27  ;;  %v3153_v53 = vmul.f32 %v7943_v13, %v3115_v26  ;;  %v3135_v8 = vld [vmem:[%s9100_s9 + $0xd8] sm:$0xff] }
 0x3e3   : > { %3178 = vst.msk [vmem:[%s9100_s9] sm:$0xff] %vm2551_vm14, %v3146_v52  ;;  %3179 = vst.msk [vmem:[%s9100_s9 + $0x8] sm:$0xff] %vm2551_vm14, %v3147_v15  ;;  %v3154_v16 = vmul.f32 %v7943_v13, %v3116_v10  ;;  %v3155_v27 = vmul.f32 %v7943_v13, %v3117_v29  ;;  %v3156_v52 = vmul.f32 %v7943_v13, %v3118_v4  ;;  %v3136_v15 = vld [vmem:[%s9100_s9 + $0xe0] sm:$0xff]  ;;  %v3139_v10 = vld [vmem:[%s9100_s9 + $0xf8] sm:$0xff] }
 0x3e4   : > { %3180 = vst.msk [vmem:[%s9100_s9 + $0x10] sm:$0xff] %vm2551_vm14, %v3148_v6  ;;  %3181 = vst.msk [vmem:[%s9100_s9 + $0x18] sm:$0xff] %vm2551_vm14, %v3149_v14  ;;  %v3157_v26 = vmul.f32 %v7943_v13, %v3119_v11  ;;  %v3137_v6 = vld [vmem:[%s9100_s9 + $0xe8] sm:$0xff]  ;;  %v3138_v14 = vld [vmem:[%s9100_s9 + $0xf0] sm:$0xff]  ;;  %v3158_v29 = vmul.f32 %v7943_v13, %v3120_v12  ;;  %v3159_v4 = vmul.f32 %v7943_v13, %v3121_v20 }
 0x3e5   : > { %3182 = vst.msk [vmem:[%s9100_s9 + $0x20] sm:$0xff] %vm2551_vm14, %v3150_v62  ;;  %3183 = vst.msk [vmem:[%s9100_s9 + $0x28] sm:$0xff] %vm2551_vm14, %v3151_v2  ;;  %v3160_v11 = vmul.f32 %v7943_v13, %v3122_v59  ;;  %v3161_v62 = vmul.f32 %v7943_v13, %v3123_v57  ;;  %v3211_v2 = vld [vmem:[#allocation2 + $0x8] sm:$0xff]  ;;  %v3163_v12 = vmul.f32 %v7943_v13, %v3125_v3  ;;  %v3214_v57 = vld [vmem:[#allocation2 + $0x20] sm:$0xff] }
 0x3e6   : > { %3184 = vst.msk [vmem:[%s9100_s9 + $0x30] sm:$0xff] %vm2551_vm14, %v3152_v58  ;;  %3185 = vst.msk [vmem:[%s9100_s9 + $0x38] sm:$0xff] %vm2551_vm14, %v3153_v53  ;;  %v3162_v53 = vmul.f32 %v7943_v13, %v3124_v18  ;;  %v3164_v20 = vmul.f32 %v7943_v13, %v3126_v48  ;;  %v3165_v59 = vmul.f32 %v7943_v13, %v3127_v5  ;;  %v3215_v58 = vld [vmem:[#allocation2 + $0x28] sm:$0xff] }
 0x3e7   : > { %3186 = vst.msk [vmem:[%s9100_s9 + $0x40] sm:$0xff] %vm2551_vm14, %v3154_v16  ;;  %3187 = vst.msk [vmem:[%s9100_s9 + $0x48] sm:$0xff] %vm2551_vm14, %v3155_v27  ;;  %v3216_v16 = vld [vmem:[#allocation2 + $0x30] sm:$0xff]  ;;  %v3217_v27 = vld [vmem:[#allocation2 + $0x38] sm:$0xff]  ;;  %v3166_v5 = vmul.f32 %v7943_v13, %v3128_v17  ;;  %v3167_v18 = vmul.f32 %v7943_v13, %v3129_v49  ;;  %v3168_v3 = vmul.f32 %v7943_v13, %v3130_v33 }
 0x3e8   : > { %3188 = vst.msk [vmem:[%s9100_s9 + $0x50] sm:$0xff] %vm2551_vm14, %v3156_v52  ;;  %3189 = vst.msk [vmem:[%s9100_s9 + $0x58] sm:$0xff] %vm2551_vm14, %v3157_v26  ;;  %v3169_v48 = vmul.f32 %v7943_v13, %v3131_v30  ;;  %v3218_v52 = vld [vmem:[#allocation2 + $0x40] sm:$0xff]  ;;  %v3219_v26 = vld [vmem:[#allocation2 + $0x48] sm:$0xff]  ;;  %v3170_v49 = vmul.f32 %v7943_v13, %v3132_v24  ;;  %v3171_v17 = vmul.f32 %v7943_v13, %v3133_v23 }
 0x3e9   : > { %3190 = vst.msk [vmem:[%s9100_s9 + $0x60] sm:$0xff] %vm2551_vm14, %v3158_v29  ;;  %3191 = vst.msk [vmem:[%s9100_s9 + $0x68] sm:$0xff] %vm2551_vm14, %v3159_v4  ;;  %v3220_v29 = vld [vmem:[#allocation2 + $0x50] sm:$0xff]  ;;  %v3172_v33 = vmul.f32 %v7943_v13, %v3134_v34  ;;  %v3173_v30 = vmul.f32 %v7943_v13, %v3135_v8  ;;  %v3221_v4 = vld [vmem:[#allocation2 + $0x58] sm:$0xff]  ;;  %v3174_v34 = vmul.f32 %v7943_v13, %v3136_v15 }
 0x3ea   : > { %3192 = vst.msk [vmem:[%s9100_s9 + $0x70] sm:$0xff] %vm2551_vm14, %v3160_v11  ;;  %3193 = vst.msk [vmem:[%s9100_s9 + $0x78] sm:$0xff] %vm2551_vm14, %v3161_v62  ;;  %v3222_v11 = vld [vmem:[#allocation2 + $0x60] sm:$0xff]  ;;  %v3223_v62 = vld [vmem:[#allocation2 + $0x68] sm:$0xff]  ;;  %v3175_v23 = vmul.f32 %v7943_v13, %v3137_v6  ;;  %v3176_v24 = vmul.f32 %v7943_v13, %v3138_v14  ;;  %v3177_v8 = vmul.f32 %v7943_v13, %v3139_v10 }
 0x3eb   : > { %3194 = vst.msk [vmem:[%s9100_s9 + $0x80] sm:$0xff] %vm2551_vm14, %v3162_v53  ;;  %3195 = vst.msk [vmem:[%s9100_s9 + $0x88] sm:$0xff] %vm2551_vm14, %v3163_v12  ;;  %v3224_v53 = vld [vmem:[#allocation2 + $0x70] sm:$0xff]  ;;  %v3225_v12 = vld [vmem:[#allocation2 + $0x78] sm:$0xff]  ;;  %v3242_v15 = vmul.f32 %v3210_v9, %v7943_v13  ;;  %v3243_v6 = vmul.f32 %v3211_v2, %v7943_v13  ;;  %v3244_v14 = vmul.f32 %v3212_v54, %v7943_v13 }
 0x3ec   : > { %3196 = vst.msk [vmem:[%s9100_s9 + $0x90] sm:$0xff] %vm2551_vm14, %v3164_v20  ;;  %3197 = vst.msk [vmem:[%s9100_s9 + $0x98] sm:$0xff] %vm2551_vm14, %v3165_v59  ;;  %v3226_v20 = vld [vmem:[#allocation2 + $0x80] sm:$0xff]  ;;  %v3245_v10 = vmul.f32 %v3213_v35, %v7943_v13  ;;  %v3227_v59 = vld [vmem:[#allocation2 + $0x88] sm:$0xff]  ;;  %v3246_v54 = vmul.f32 %v3214_v57, %v7943_v13  ;;  %v3247_v9 = vmul.f32 %v3215_v58, %v7943_v13 }
 0x3ed   : > { %3198 = vst.msk [vmem:[%s9100_s9 + $0xa0] sm:$0xff] %vm2551_vm14, %v3166_v5  ;;  %3199 = vst.msk [vmem:[%s9100_s9 + $0xa8] sm:$0xff] %vm2551_vm14, %v3167_v18  ;;  %v3228_v5 = vld [vmem:[#allocation2 + $0x90] sm:$0xff]  ;;  %v3229_v18 = vld [vmem:[#allocation2 + $0x98] sm:$0xff]  ;;  %v3248_v35 = vmul.f32 %v3216_v16, %v7943_v13  ;;  %v3249_v2 = vmul.f32 %v3217_v27, %v7943_v13  ;;  %v3251_v57 = vmul.f32 %v3219_v26, %v7943_v13 }
 0x3ee   : > { %3200 = vst.msk [vmem:[%s9100_s9 + $0xb0] sm:$0xff] %vm2551_vm14, %v3168_v3  ;;  %3201 = vst.msk [vmem:[%s9100_s9 + $0xb8] sm:$0xff] %vm2551_vm14, %v3169_v48  ;;  %v3230_v3 = vld [vmem:[#allocation2 + $0xa0] sm:$0xff]  ;;  %v3231_v48 = vld [vmem:[#allocation2 + $0xa8] sm:$0xff]  ;;  %v3252_v58 = vmul.f32 %v3220_v29, %v7943_v13  ;;  %v3253_v16 = vmul.f32 %v3221_v4, %v7943_v13  ;;  %v3256_v26 = vmul.f32 %v3224_v53, %v7943_v13 }
 0x3ef   : > { %3202 = vst.msk [vmem:[%s9100_s9 + $0xc0] sm:$0xff] %vm2551_vm14, %v3170_v49  ;;  %3203 = vst.msk [vmem:[%s9100_s9 + $0xc8] sm:$0xff] %vm2551_vm14, %v3171_v17  ;;  %v3232_v49 = vld [vmem:[#allocation2 + $0xb0] sm:$0xff]  ;;  %v3250_v17 = vmul.f32 %v3218_v52, %v7943_v13  ;;  %v3233_v27 = vld [vmem:[#allocation2 + $0xb8] sm:$0xff]  ;;  %v3255_v52 = vmul.f32 %v3223_v62, %v7943_v13  ;;  %v3257_v29 = vmul.f32 %v3225_v12, %v7943_v13 }
 0x3f0   : > { %3204 = vst.msk [vmem:[%s9100_s9 + $0xd0] sm:$0xff] %vm2551_vm14, %v3172_v33  ;;  %3205 = vst.msk [vmem:[%s9100_s9 + $0xd8] sm:$0xff] %vm2551_vm14, %v3173_v30  ;;  %v3234_v33 = vld [vmem:[#allocation2 + $0xc0] sm:$0xff]  ;;  %v3235_v30 = vld [vmem:[#allocation2 + $0xc8] sm:$0xff]  ;;  %v3260_v62 = vmul.f32 %v3228_v5, %v7943_v13  ;;  %v3261_v53 = vmul.f32 %v3229_v18, %v7943_v13 }
 0x3f1   : > { %3206 = vst.msk [vmem:[%s9100_s9 + $0xe0] sm:$0xff] %vm2551_vm14, %v3174_v34  ;;  %3207 = vst.msk [vmem:[%s9100_s9 + $0xe8] sm:$0xff] %vm2551_vm14, %v3175_v23  ;;  %v3254_v34 = vmul.f32 %v3222_v11, %v7943_v13  ;;  %v3236_v4 = vld [vmem:[#allocation2 + $0xd0] sm:$0xff]  ;;  %v3237_v23 = vld [vmem:[#allocation2 + $0xd8] sm:$0xff]  ;;  %v3259_v11 = vmul.f32 %v3227_v59, %v7943_v13  ;;  %v3265_v59 = vmul.f32 %v3233_v27, %v7943_v13 }
 0x3f2   : > { %3208 = vst.msk [vmem:[%s9100_s9 + $0xf0] sm:$0xff] %vm2551_vm14, %v3176_v24  ;;  %3209 = vst.msk [vmem:[%s9100_s9 + $0xf8] sm:$0xff] %vm2551_vm14, %v3177_v8  ;;  %v3238_v24 = vld [vmem:[#allocation2 + $0xe0] sm:$0xff]  ;;  %v3258_v8 = vmul.f32 %v3226_v20, %v7943_v13  ;;  %v3239_v12 = vld [vmem:[#allocation2 + $0xe8] sm:$0xff]  ;;  %v3263_v20 = vmul.f32 %v3231_v48, %v7943_v13  ;;  %v3266_v5 = vmul.f32 %v3234_v33, %v7943_v13 }
 0x3f3   : > { %3274 = vst.msk [vmem:[#allocation2] sm:$0xff] %vm2551_vm14, %v3242_v15  ;;  %3275 = vst.msk [vmem:[#allocation2 + $0x8] sm:$0xff] %vm2551_vm14, %v3243_v6  ;;  %v3240_v15 = vld [vmem:[#allocation2 + $0xf0] sm:$0xff]  ;;  %v3241_v6 = vld [vmem:[#allocation2 + $0xf8] sm:$0xff]  ;;  %v3267_v18 = vmul.f32 %v3235_v30, %v7943_v13 }
 0x3f4   : > { %3276 = vst.msk [vmem:[#allocation2 + $0x10] sm:$0xff] %vm2551_vm14, %v3244_v14  ;;  %3277 = vst.msk [vmem:[#allocation2 + $0x18] sm:$0xff] %vm2551_vm14, %v3245_v10  ;;  %v3262_v14 = vmul.f32 %v3230_v3, %v7943_v13  ;;  %v3264_v10 = vmul.f32 %v3232_v49, %v7943_v13  ;;  %v3272_v3 = vmul.f32 %v3240_v15, %v7943_v13 }
 0x3f5   : > { %3278 = vst.msk [vmem:[#allocation2 + $0x20] sm:$0xff] %vm2551_vm14, %v3246_v54  ;;  %3279 = vst.msk [vmem:[#allocation2 + $0x28] sm:$0xff] %vm2551_vm14, %v3247_v9  ;;  %v3268_v54 = vmul.f32 %v3236_v4, %v7943_v13  ;;  %v3269_v9 = vmul.f32 %v3237_v23, %v7943_v13  ;;  %v3273_v48 = vmul.f32 %v3241_v6, %v7943_v13 }
 0x3f6   : > { %3280 = vst.msk [vmem:[#allocation2 + $0x30] sm:$0xff] %vm2551_vm14, %v3248_v35  ;;  %3281 = vst.msk [vmem:[#allocation2 + $0x38] sm:$0xff] %vm2551_vm14, %v3249_v2  ;;  %v3270_v35 = vmul.f32 %v3238_v24, %v7943_v13  ;;  %v3271_v2 = vmul.f32 %v3239_v12, %v7943_v13 }
 0x3f7   : > { %3282 = vst.msk [vmem:[#allocation2 + $0x40] sm:$0xff] %vm2551_vm14, %v3250_v17  ;;  %3283 = vst.msk [vmem:[#allocation2 + $0x48] sm:$0xff] %vm2551_vm14, %v3251_v57 }
 0x3f8   : > { %3284 = vst.msk [vmem:[#allocation2 + $0x50] sm:$0xff] %vm2551_vm14, %v3252_v58  ;;  %3285 = vst.msk [vmem:[#allocation2 + $0x58] sm:$0xff] %vm2551_vm14, %v3253_v16 }
 0x3f9   : > { %3286 = vst.msk [vmem:[#allocation2 + $0x60] sm:$0xff] %vm2551_vm14, %v3254_v34  ;;  %3287 = vst.msk [vmem:[#allocation2 + $0x68] sm:$0xff] %vm2551_vm14, %v3255_v52 }
 0x3fa   : > { %3288 = vst.msk [vmem:[#allocation2 + $0x70] sm:$0xff] %vm2551_vm14, %v3256_v26  ;;  %3289 = vst.msk [vmem:[#allocation2 + $0x78] sm:$0xff] %vm2551_vm14, %v3257_v29 }
 0x3fb   : > { %3290 = vst.msk [vmem:[#allocation2 + $0x80] sm:$0xff] %vm2551_vm14, %v3258_v8  ;;  %3291 = vst.msk [vmem:[#allocation2 + $0x88] sm:$0xff] %vm2551_vm14, %v3259_v11 }
 0x3fc   : > { %3292 = vst.msk [vmem:[#allocation2 + $0x90] sm:$0xff] %vm2551_vm14, %v3260_v62  ;;  %3293 = vst.msk [vmem:[#allocation2 + $0x98] sm:$0xff] %vm2551_vm14, %v3261_v53 }
 0x3fd   : > { %3294 = vst.msk [vmem:[#allocation2 + $0xa0] sm:$0xff] %vm2551_vm14, %v3262_v14  ;;  %3295 = vst.msk [vmem:[#allocation2 + $0xa8] sm:$0xff] %vm2551_vm14, %v3263_v20 }
 0x3fe   : > { %3296 = vst.msk [vmem:[#allocation2 + $0xb0] sm:$0xff] %vm2551_vm14, %v3264_v10  ;;  %3297 = vst.msk [vmem:[#allocation2 + $0xb8] sm:$0xff] %vm2551_vm14, %v3265_v59 }
 0x3ff   : > { %3298 = vst.msk [vmem:[#allocation2 + $0xc0] sm:$0xff] %vm2551_vm14, %v3266_v5  ;;  %3299 = vst.msk [vmem:[#allocation2 + $0xc8] sm:$0xff] %vm2551_vm14, %v3267_v18 }
 0x400   : > { %3300 = vst.msk [vmem:[#allocation2 + $0xd0] sm:$0xff] %vm2551_vm14, %v3268_v54  ;;  %3301 = vst.msk [vmem:[#allocation2 + $0xd8] sm:$0xff] %vm2551_vm14, %v3269_v9 }
 0x401   : > { %3302 = vst.msk [vmem:[#allocation2 + $0xe0] sm:$0xff] %vm2551_vm14, %v3270_v35  ;;  %3303 = vst.msk [vmem:[#allocation2 + $0xe8] sm:$0xff] %vm2551_vm14, %v3271_v2 }
 0x402   : > { %3304 = vst.msk [vmem:[#allocation2 + $0xf0] sm:$0xff] %vm2551_vm14, %v3272_v3  ;;  %3305 = vst.msk [vmem:[#allocation2 + $0xf8] sm:$0xff] %vm2551_vm14, %v3273_v48 }
 0x403 PF: > { %v9404_v13 = vpack.c.bf16 %v7045_v45, %v7051_v63  ;;  %v9405_v49 = vld [vmem:[#allocation5_spill] sm:$0xff]  ;;  %v9406_v17 = vld [vmem:[#allocation4_spill] sm:$0xff]  ;;  %v9408_v58 = vlaneseq  ;;  %v9409_v33 = vld [vmem:[#allocation38_spill] sm:$0xff]  ;;  %p4920_p7 = scmp.ne.s32.totalorder %s5849_s30, 1 }
 0x404   : > { %v9407_v57 = vpack.c.bf16 %v9405_v49, %v9406_v17  ;;  %v9410_v30 = vld [vmem:[#allocation40_spill] sm:$0xff]  ;;  %v9413_v26 = vld [vmem:[#allocation10_spill] sm:$0xff] }
 0x405   : > { %3488 = vxpose.xlu0.c.b16.start [1/8] %v9404_v13, 128  ;;  %v3308_v16 = vshrl.u32 %v9408_v58, 7  ;;  %v9411_v34 = vpack.c.bf16 %v9409_v33, %v9410_v30  ;;  %v9412_v52 = vld [vmem:[#allocation8_spill] sm:$0xff]  ;;  %v9415_v62 = vld [vmem:[#allocation42_spill] sm:$0xff] }
 0x406   : > { %3456 = vxpose.xlu1.c.b16.start [1/8] %v9407_v57, 128  ;;  %v9414_v29 = vpack.c.bf16 %v9412_v52, %v9413_v26  ;;  %v9419_v12 = vld [vmem:[#allocation14_spill] sm:$0xff]  ;;  %v9422_v54 = vld [vmem:[#allocation48_spill] sm:$0xff] }
 0x407   : > { %v3309_v27 = vsub.s32 0, %v3308_v16  ;;  %v9421_v18 = vld [vmem:[#allocation46_spill] sm:$0xff]  ;;  %v9428_v33 = vld [vmem:[#allocation52_spill] sm:$0xff] }
 0x408   : > { %v9423_v9 = vpack.c.bf16 %v9421_v18, %v9422_v54  ;;  %v9425_v35 = vld [vmem:[#allocation18_spill] sm:$0xff]  ;;  %v9430_v30 = vld [vmem:[#allocation20_spill] sm:$0xff] }
 0x409   : > { %3489 = vxpose.xlu0.c.b16.cont [2/8] %v9411_v34, 128  ;;  %v8243_v4 = vrot.slane %v7902_v28, %v3309_v27  ;;  %v9427_v27 = vld [vmem:[#allocation50_spill] sm:$0xff]  ;;  %v9444_v54 = vld [vmem:[#allocation60_spill] sm:$0xff] }
 0x40a   : > { %3457 = vxpose.xlu1.c.b16.cont [2/8] %v9414_v29, 128 }
 0x40b   : > { %v3328_v45 = vsub.f32 %v7842_v42, %v8243_v4  ;;  %v3329_v63 = vsub.f32 %v7850_v41, %v8243_v4  ;;  %v3312_v23 = vsub.f32 %v7771_v43, %v8243_v4  ;;  %v3313_v24 = vsub.f32 %v7779_v38, %v8243_v4  ;;  %v9416_v41 = vld [vmem:[#allocation44_spill] sm:$0xff] }
 0x40c   : > { %v3330_v8 = vsub.f32 %v7838_v40, %v8243_v4  ;;  %v3331_v11 = vsub.f32 %v7846_v1, %v8243_v4  ;;  %v3314_v28 = vsub.f32 %v7769_v21, %v8243_v4  ;;  %v3315_v42 = vsub.f32 %v7773_v39, %v8243_v4  ;;  %v9418_v43 = vld [vmem:[#allocation12_spill] sm:$0xff] }
 0x40d   : > { %v9417_v53 = vpack.c.bf16 %v9415_v62, %v9416_v41  ;;  %v9420_v15 = vpack.c.bf16 %v9418_v43, %v9419_v12  ;;  %v3376_v38 = vmul.f32 1.442695, %v3328_v45  ;;  %v3378_v6 = vmul.f32 1.442695, %v3329_v63  ;;  %v9437_v62 = vld [vmem:[#allocation26_spill] sm:$0xff] }
 0x40e   : > { %v3344_v40 = vmul.f32 1.442695, %v3312_v23  ;;  %v3332_v1 = vsub.f32 %v7858_v7, %v8243_v4  ;;  %v3346_v14 = vmul.f32 1.442695, %v3313_v24  ;;  %v3333_v21 = vsub.f32 %v7866_v51, %v8243_v4  ;;  %v9424_v7 = vld [vmem:[#allocation16_spill] sm:$0xff] }
 0x40f   : > { %3490 = vxpose.xlu0.c.b16.cont [3/8] %v9417_v53, 128  ;;  %3458 = vxpose.xlu1.c.b16.cont [3/8] %v9420_v15, 128  ;;  %5707 = vpow2.f32 %v3376_v38  ;;  %v3380_v39 = vmul.f32 1.442695, %v3330_v8  ;;  %v3382_v20 = vmul.f32 1.442695, %v3331_v11  ;;  %v3348_v10 = vmul.f32 1.442695, %v3314_v28 }
 0x410   : > { %5709 = vpow2.f32 %v3378_v6  ;;  %v3316_v59 = vsub.f32 %v7787_v22, %v8243_v4  ;;  %v3317_v5 = vsub.f32 %v7800_v60, %v8243_v4  ;;  %v9426_v2 = vpack.c.bf16 %v9424_v7, %v9425_v35  ;;  %v9434_v11 = vld [vmem:[#allocation56_spill] sm:$0xff]  ;;  %v9439_v15 = vld [vmem:[#allocation103_spill] sm:$0xff]  ;;  %v9447_v35 = vld [vmem:[#allocation30_spill] sm:$0xff] }
 0x411   : > { %5711 = vpow2.f32 %v3344_v40  ;;  %v3350_v51 = vmul.f32 1.442695, %v3315_v42  ;;  %v3384_v3 = vmul.f32 1.442695, %v3332_v1  ;;  %v3334_v48 = vsub.f32 %v7854_v44, %v8243_v4  ;;  %v9436_v42 = vld [vmem:[#allocation24_spill] sm:$0xff]  ;;  %v9440_v1 = vld [vmem:[#allocation82_spill] sm:$0xff] }
 0x412   : > { %5713 = vpow2.f32 %v3346_v14  ;;  %v3386_v13 = vmul.f32 1.442695, %v3333_v21  ;;  %v3335_v22 = vsub.f32 %v7862_v46, %v8243_v4  ;;  %v3318_v60 = vsub.f32 %v7781_v55, %v8243_v4  ;;  %v9431_v55 = vld [vmem:[#allocation22_spill] sm:$0xff]  ;;  %v9446_v7 = vld [vmem:[#allocation28_spill] sm:$0xff] }
 0x413   : > { %3491 = vxpose.xlu0.c.b16.cont [4/8] %v9423_v9, 128  ;;  %3459 = vxpose.xlu1.c.b16.cont [4/8] %v9426_v2, 128  ;;  %5715 = vpow2.f32 %v3380_v39  ;;  %v3352_v49 = vmul.f32 1.442695, %v3316_v59  ;;  %v3354_v17 = vmul.f32 1.442695, %v3317_v5  ;;  %v3319_v57 = vsub.f32 %v7793_v37, %v8243_v4  ;;  %v9441_v21 = vld [vmem:[#allocation98_spill] sm:$0xff] }
 0x414   : > { %5717 = vpow2.f32 %v3382_v20  ;;  %v3388_v58 = vmul.f32 1.442695, %v3334_v48  ;;  %v3336_v16 = vsub.f32 %v7874_v31, %v8243_v4  ;;  %v3337_v44 = vsub.f32 %v7882_v25, %v8243_v4  ;;  %v9449_v48 = vld [vmem:[#allocation68_spill] sm:$0xff] }
 0x415   : > { %v9429_v46 = vpack.c.bf16 %v9427_v27, %v9428_v33  ;;  %v9432_v34 = vpack.c.bf16 %v9430_v30, %v9431_v55  ;;  %5719 = vpow2.f32 %v3348_v10  ;;  %v3320_v37 = vsub.f32 %v7810_v50, %v8243_v4  ;;  %v9442_v10 = vld [vmem:[#allocation66_spill] sm:$0xff]  ;;  %v9452_v33 = vld [vmem:[#allocation84_spill] sm:$0xff]  ;;  %v9453_v55 = vld [vmem:[#allocation67_spill] sm:$0xff] }
 0x416   : > { %v3321_v52 = vsub.f32 %v7818_v36, %v8243_v4  ;;  %v3338_v31 = vsub.f32 %v7870_v19, %v8243_v4  ;;  %5721 = vpow2.f32 %v3350_v51  ;;  %v3390_v25 = vmul.f32 1.442695, %v3335_v22  ;;  %v9433_v19 = vld [vmem:[#allocation54_spill] sm:$0xff] }
 0x417   : > { %3492 = vxpose.xlu0.c.b16.cont [5/8] %v9429_v46, 128  ;;  %3460 = vxpose.xlu1.c.b16.cont [5/8] %v9432_v34, 128  ;;  %v3356_v26 = vmul.f32 1.442695, %v3318_v60  ;;  %v3339_v29 = vsub.f32 %v7878_v56, %v8243_v4  ;;  %5723 = vpow2.f32 %v3384_v3  ;;  %v3358_v45 = vmul.f32 1.442695, %v3319_v57  ;;  %v9450_v60 = vld [vmem:[#allocation83_spill] sm:$0xff]  ;;  %v9451_v57 = vld [vmem:[#allocation100_spill] sm:$0xff] }
 0x418   : > { %v3392_v63 = vmul.f32 1.442695, %v3336_v16  ;;  %v3394_v23 = vmul.f32 1.442695, %v3337_v44  ;;  %5725 = vpow2.f32 %v3386_v13  ;;  %v3360_v24 = vmul.f32 1.442695, %v3320_v37 }
 0x419   : > { %v3322_v50 = vsub.f32 %v7806_v0, %v8243_v4  ;;  %v3323_v36 = vsub.f32 %v7814_v32, %v8243_v4  ;;  %v5708_v8 = vpop.eup %5707  ;;  %v9435_v28 = vpack.c.bf16 %v9433_v19, %v9434_v11  ;;  %v9438_v56 = vpack.c.bf16 %v9436_v42, %v9437_v62  ;;  %v9460_v11 = vld [vmem:[#allocation69_spill] sm:$0xff] }
 0x41a   : > { %5727 = vpow2.f32 %v3352_v49  ;;  %v3362_v41 = vmul.f32 1.442695, %v3321_v52  ;;  %v3396_v53 = vmul.f32 1.442695, %v3338_v31  ;;  %v8317_v43 = vmul.f32 1.442695, %v3339_v29  ;;  %v5710_v12 = vpop.eup %5709 }
 0x41b   : > { %3493 = vxpose.xlu0.c.b16.cont [6/8] %v9435_v28, 128  ;;  %3461 = vxpose.xlu1.c.b16.cont [6/8] %v9438_v56, 128  ;;  %v3793_v0 = vmul.f32 %v5708_v8, %v7725_v47  ;;  %5729 = vpow2.f32 %v3354_v17  ;;  %v3340_v32 = vsub.f32 %v7890_v61, %v8243_v4  ;;  %v3341_v38 = vsub.f32 %v9439_v15, %v8243_v4  ;;  %v5712_v6 = vpop.eup %5711  ;;  %v9443_v61 = vld [vmem:[#allocation58_spill] sm:$0xff]  ;;  %v9462_v56 = vld [vmem:[#allocation101_spill] sm:$0xff] }
 0x41c   : > { %v3448_v40 = vpack.c.bf16 %v5710_v12, %v5708_v8  ;;  %v3794_v14 = vmul.f32 %v5710_v12, %v9440_v1  ;;  %5731 = vpow2.f32 %v3388_v58  ;;  %v3324_v39 = vsub.f32 %v9441_v21, %v8243_v4  ;;  %v5714_v20 = vpop.eup %5713  ;;  %v9466_v21 = vld [vmem:[#allocation97_spill] sm:$0xff] }
 0x41d   : > { %v3777_v59 = vmul.f32 %v5712_v6, %v9442_v10  ;;  %5733 = vpow2.f32 %v3390_v25  ;;  %v3364_v47 = vmul.f32 1.442695, %v3322_v50  ;;  %v8328_v5 = vmul.f32 1.442695, %v3323_v36  ;;  %v5716_v18 = vpop.eup %5715  ;;  %v9454_v25 = vld [vmem:[#allocation62_spill] sm:$0xff]  ;;  %v9467_v10 = vld [vmem:[#allocation36_spill] sm:$0xff] }
 0x41e   : > { %v9445_v9 = vpack.c.bf16 %v9443_v61, %v9444_v54  ;;  %v9448_v2 = vpack.c.bf16 %v9446_v7, %v9447_v35  ;;  %v3817_v51 = vpack.c.bf16 %v3794_v14, %v3793_v0  ;;  %v3440_v3 = vpack.c.bf16 %v5714_v20, %v5712_v6  ;;  %v5718_v22 = vpop.eup %5717  ;;  %5295 = vmatprep.subr.bf16.mxu0 %v3448_v40  ;;  %v9458_v50 = vld [vmem:[#allocation34_spill] sm:$0xff]  ;;  %v9470_v61 = vld [vmem:[#allocation7_spill] sm:$0xff] }
 0x41f   : > { %v3778_v13 = vmul.f32 %v5714_v20, %v9449_v48  ;;  %5735 = vpow2.f32 %v3356_v26  ;;  %v3795_v49 = vmul.f32 %v5716_v18, %v9450_v60  ;;  %v3400_v17 = vmul.f32 1.442695, %v3340_v32  ;;  %v5720_v16 = vpop.eup %5719  ;;  %v9455_v26 = vld [vmem:[#allocation64_spill] sm:$0xff]  ;;  %v9465_v14 = vld [vmem:[#allocation102_spill] sm:$0xff]  ;;  %v9473_v35 = vld [vmem:[#allocation71_spill] sm:$0xff] }
 0x420   : > { %3494 = vxpose.xlu0.c.b16.cont [7/8] %v9445_v9, 128  ;;  %3462 = vxpose.xlu1.c.b16.cont [7/8] %v9448_v2, 128  ;;  %5737 = vpow2.f32 %v3358_v45  ;;  %v3325_v58 = vsub.f32 %v9451_v57, %v8243_v4  ;;  %v3449_v27 = vpack.c.bf16 %v5718_v22, %v5716_v18  ;;  %v3796_v46 = vmul.f32 %v5718_v22, %v9452_v33  ;;  %v5722_v30 = vpop.eup %5721  ;;  %v9457_v45 = vld [vmem:[#allocation32_spill] sm:$0xff]  ;;  %v9471_v54 = vld [vmem:[#allocation6_spill] sm:$0xff] }
 0x421   : > { %5407 = vmatprep.subr.bf16.mxu1 %v3817_v51  ;;  %5296 = vmatpush3.bf16.msra.mxu0 %v3440_v3  ;;  %v3809_v44 = vpack.c.bf16 %v3778_v13, %v3777_v59  ;;  %5739 = vpow2.f32 %v3392_v63  ;;  %v3779_v34 = vmul.f32 %v5720_v16, %v9453_v55  ;;  %v3402_v37 = vmul.f32 1.442695, %v3341_v38  ;;  %v5724_v31 = vpop.eup %5723  ;;  %v9463_v38 = vld [vmem:[#allocation86_spill] sm:$0xff]  ;;  %v9468_v59 = vld [vmem:[#allocation37_spill] sm:$0xff]  ;;  %v9474_v51 = vld [vmem:[#allocation87_spill] sm:$0xff] }
 0x422   : > { %5741 = vpow2.f32 %v3394_v23  ;;  %v3368_v52 = vmul.f32 1.442695, %v3324_v39  ;;  %v9456_v29 = vpack.c.bf16 %v9454_v25, %v9455_v26  ;;  %v9459_v36 = vpack.c.bf16 %v9457_v45, %v9458_v50  ;;  %v5726_v63 = vpop.eup %5725  ;;  %5297 = vmatprep.subr.bf16.mxu0 %v3449_v27  ;;  %v9461_v23 = vld [vmem:[#allocation85_spill] sm:$0xff]  ;;  %v9475_v13 = vld [vmem:[#allocation99_spill] sm:$0xff] }
 0x423   : > { %v3818_v8 = vpack.c.bf16 %v3796_v46, %v3795_v49  ;;  %v3441_v19 = vpack.c.bf16 %v5722_v30, %v5720_v16  ;;  %v3780_v28 = vmul.f32 %v5722_v30, %v9460_v11  ;;  %5743 = vpow2.f32 %v3360_v24  ;;  %5408 = vmatpush3.bf16.msra.mxu1 %v3809_v44  ;;  %v9464_v24 = vld [vmem:[#allocation70_spill] sm:$0xff]  ;;  %v9477_v44 = vld [vmem:[#allocation72_spill] sm:$0xff]  ;;  %v9479_v55 = vld [vmem:[#allocation41_spill] sm:$0xff] }
 0x424   : > { %3495 = vxpose.xlu0.c.b16.end [8/8] %v9456_v29, 128  ;;  %3463 = vxpose.xlu1.c.b16.end [8/8] %v9459_v36, 128  ;;  %v3797_v42 = vmul.f32 %v5724_v31, %v9461_v23  ;;  %5745 = vpow2.f32 %v3362_v41  ;;  %v3370_v62 = vmul.f32 1.442695, %v3325_v58  ;;  %v3342_v12 = vsub.f32 %v9462_v56, %v8243_v4  ;;  %v5728_v0 = vpop.eup %5727  ;;  %v9476_v58 = vld [vmem:[#allocation88_spill] sm:$0xff]  ;;  %v9484_v45 = vld [vmem:[#allocation73_spill] sm:$0xff]  ;;  %v9487_v56 = vld [vmem:[#allocation74_spill] sm:$0xff] }
 0x425   : > { %5409 = vmatprep.subr.bf16.mxu1 %v3818_v8  ;;  %5298 = vmatpush3.bf16.msra.mxu0 %v3441_v19  ;;  %v3810_v32 = vpack.c.bf16 %v3780_v28, %v3779_v34  ;;  %v3450_v15 = vpack.c.bf16 %v5726_v63, %v5724_v31  ;;  %v3798_v6 = vmul.f32 %v5726_v63, %v9463_v38  ;;  %5747 = vpow2.f32 %v3396_v53  ;;  %v5730_v40 = vpop.eup %5729  ;;  %v9482_v31 = vld [vmem:[#allocation11_spill] sm:$0xff]  ;;  %v9486_v63 = vld [vmem:[#allocation90_spill] sm:$0xff]  ;;  %v9491_v38 = vld [vmem:[#allocation13_spill] sm:$0xff] }
 0x426   : > { %v3781_v1 = vmul.f32 %v5728_v0, %v9464_v24  ;;  %5749 = vpow2.f32 %v8317_v43  ;;  %v3343_v41 = vsub.f32 %v9465_v14, %v8243_v4  ;;  %v3326_v39 = vsub.f32 %v9466_v21, %v8243_v4  ;;  %v5732_v20 = vpop.eup %5731  ;;  %v9495_v21 = vld [vmem:[#allocation91_spill] sm:$0xff] }
 0x427   : > { %v9469_v18 = vpack.c.bf16 %v9467_v10, %v9468_v59  ;;  %v9472_v9 = vpack.c.bf16 %v9470_v61, %v9471_v54  ;;  %v3819_v53 = vpack.c.bf16 %v3798_v6, %v3797_v42  ;;  %v3442_v7 = vpack.c.bf16 %v5730_v40, %v5728_v0  ;;  %v5734_v43 = vpop.eup %5733  ;;  %5410 = vmatpush3.bf16.msra.mxu1 %v3810_v32  ;;  %v9488_v0 = vld [vmem:[#allocation43_spill] sm:$0xff]  ;;  %v9489_v32 = vld [vmem:[#allocation45_spill] sm:$0xff] }
 0x428   : > { %v3782_v2 = vmul.f32 %v5730_v40, %v9473_v35  ;;  %5751 = vpow2.f32 %v3364_v47  ;;  %5299 = vmatprep.subr.bf16.mxu0 %v3450_v15  ;;  %v3799_v3 = vmul.f32 %v5732_v20, %v9474_v51  ;;  %v3404_v48 = vmul.f32 1.442695, %v3342_v12  ;;  %v9498_v35 = vld [vmem:[#allocation47_spill] sm:$0xff]  ;;  %v9501_v51 = vld [vmem:[#allocation17_spill] sm:$0xff] }
 0x429   : > { %3504 = vxpose.xlu0.c.b16.start [1/8] %v9469_v18, 128  ;;  %3472 = vxpose.xlu1.c.b16.start [1/8] %v9472_v9, 128  ;;  %5753 = vpow2.f32 %v8328_v5  ;;  %v3327_v22 = vsub.f32 %v9475_v13, %v8243_v4  ;;  %v5736_v60 = vpop.eup %5735  ;;  %v3451_v57 = vpack.c.bf16 %v5734_v43, %v5732_v20  ;;  %v3800_v16 = vmul.f32 %v5734_v43, %v9476_v58  ;;  %v9478_v5 = vld [vmem:[#allocation39_spill] sm:$0xff]  ;;  %v9481_v4 = vld [vmem:[#allocation9_spill] sm:$0xff]  ;;  %v9496_v18 = vld [vmem:[#allocation92_spill] sm:$0xff] }
 0x42a   : > { %5411 = vmatprep.subr.bf16.mxu1 %v3819_v53  ;;  %5300 = vmatpush3.bf16.msra.mxu0 %v3442_v7  ;;  %v3811_v49 = vpack.c.bf16 %v3782_v2, %v3781_v1  ;;  %5755 = vpow2.f32 %v3400_v17  ;;  %v5738_v47 = vpop.eup %5737  ;;  %v3783_v27 = vmul.f32 %v5736_v60, %v9477_v44  ;;  %v3406_v33 = vmul.f32 1.442695, %v3343_v41  ;;  %v9494_v1 = vld [vmem:[#allocation75_spill] sm:$0xff]  ;;  %v9497_v9 = vld [vmem:[#allocation76_spill] sm:$0xff]  ;;  %v9499_v2 = vld [vmem:[#allocation49_spill] sm:$0xff] }
 0x42b   : > { %5757 = vpow2.f32 %v3402_v37  ;;  %v3372_v46 = vmul.f32 1.442695, %v3326_v39  ;;  %v5740_v30 = vpop.eup %5739  ;;  %v9480_v34 = vpack.c.bf16 %v9478_v5, %v9479_v55  ;;  %v9483_v25 = vpack.c.bf16 %v9481_v4, %v9482_v31  ;;  %5301 = vmatprep.subr.bf16.mxu0 %v3451_v57  ;;  %v9485_v37 = vld [vmem:[#allocation89_spill] sm:$0xff]  ;;  %v9507_v5 = vld [vmem:[#allocation78_spill] sm:$0xff]  ;;  %v9508_v4 = vld [vmem:[#allocation51_spill] sm:$0xff] }
 0x42c   : > { %v3820_v26 = vpack.c.bf16 %v3800_v16, %v3799_v3  ;;  %v3443_v29 = vpack.c.bf16 %v5738_v47, %v5736_v60  ;;  %v3784_v50 = vmul.f32 %v5738_v47, %v9484_v45  ;;  %5759 = vpow2.f32 %v3368_v52  ;;  %v5742_v17 = vpop.eup %5741  ;;  %5412 = vmatpush3.bf16.msra.mxu1 %v3811_v49  ;;  %v9502_v3 = vld [vmem:[#allocation19_spill] sm:$0xff]  ;;  %v9504_v60 = vld [vmem:[#allocation77_spill] sm:$0xff] }
 0x42d   : > { %3505 = vxpose.xlu0.c.b16.cont [2/8] %v9480_v34, 128  ;;  %3473 = vxpose.xlu1.c.b16.cont [2/8] %v9483_v25, 128  ;;  %v3801_v36 = vmul.f32 %v5740_v30, %v9485_v37  ;;  %5761 = vpow2.f32 %v3370_v62  ;;  %v3374_v8 = vmul.f32 1.442695, %v3327_v22  ;;  %v5744_v19 = vpop.eup %5743  ;;  %v3452_v28 = vpack.c.bf16 %v5742_v17, %v5740_v30  ;;  %v9492_v62 = vld [vmem:[#allocation15_spill] sm:$0xff]  ;;  %v9505_v58 = vld [vmem:[#allocation93_spill] sm:$0xff] }
 0x42e   : > { %5413 = vmatprep.subr.bf16.mxu1 %v3820_v26  ;;  %5302 = vmatpush3.bf16.msra.mxu0 %v3443_v29  ;;  %v3812_v11 = vpack.c.bf16 %v3784_v50, %v3783_v27  ;;  %v3802_v23 = vmul.f32 %v5742_v17, %v9486_v63  ;;  %5763 = vpow2.f32 %v3404_v48  ;;  %v5746_v42 = vpop.eup %5745  ;;  %v3785_v12 = vmul.f32 %v5744_v19, %v9487_v56  ;;  %v9509_v31 = vld [vmem:[#allocation53_spill] sm:$0xff]  ;;  %v9512_v29 = vld [vmem:[#allocation23_spill] sm:$0xff] }
 0x42f   : > { %5765 = vpow2.f32 %v3406_v33  ;;  %v5748_v52 = vpop.eup %5747  ;;  %v9490_v15 = vpack.c.bf16 %v9488_v0, %v9489_v32  ;;  %v9493_v6 = vpack.c.bf16 %v9491_v38, %v9492_v62  ;;  %v3444_v24 = vpack.c.bf16 %v5746_v42, %v5744_v19  ;;  %5303 = vmatprep.subr.bf16.mxu0 %v3452_v28  ;;  %v9506_v33 = vld [vmem:[#allocation94_spill] sm:$0xff]  ;;  %v9511_v26 = vld [vmem:[#allocation21_spill] sm:$0xff]  ;;  %v9514_v37 = vld [vmem:[#allocation79_spill] sm:$0xff] }
 0x430   : > { %v3821_v40 = vpack.c.bf16 %v3802_v23, %v3801_v36  ;;  %v3786_v14 = vmul.f32 %v5746_v42, %v9494_v1  ;;  %5767 = vpow2.f32 %v3372_v46  ;;  %v5750_v41 = vpop.eup %5749  ;;  %5414 = vmatpush3.bf16.msra.mxu1 %v3812_v11  ;;  %v3803_v39 = vmul.f32 %v5748_v52, %v9495_v21  ;;  %v9515_v19 = vld [vmem:[#allocation95_spill] sm:$0xff]  ;;  %v9516_v42 = vld [vmem:[#allocation96_spill] sm:$0xff]  ;;  %v9521_v62 = vld [vmem:[#allocation25_spill] sm:$0xff] }
 0x431   : > { %3506 = vxpose.xlu0.c.b16.cont [3/8] %v9490_v15, 128  ;;  %3474 = vxpose.xlu1.c.b16.cont [3/8] %v9493_v6, 128  ;;  %5769 = vpow2.f32 %v3374_v8  ;;  %v3453_v59 = vpack.c.bf16 %v5750_v41, %v5748_v52  ;;  %v3804_v61 = vmul.f32 %v5750_v41, %v9496_v18  ;;  %v9500_v43 = vpack.c.bf16 %v9498_v35, %v9499_v2  ;;  %v9517_v52 = vld [vmem:[#allocation80_spill] sm:$0xff]  ;;  %v9518_v32 = vld [vmem:[#allocation55_spill] sm:$0xff]  ;;  %v9519_v15 = vld [vmem:[#allocation57_spill] sm:$0xff] }
 0x432   : > { %v5752_v20 = vpop.eup %5751  ;;  %5415 = vmatprep.subr.bf16.mxu1 %v3821_v40  ;;  %5304 = vmatpush3.bf16.msra.mxu0 %v3444_v24  ;;  %v3813_v10 = vpack.c.bf16 %v3786_v14, %v3785_v12  ;;  %v9503_v48 = vpack.c.bf16 %v9501_v51, %v9502_v3  ;;  %v9510_v25 = vpack.c.bf16 %v9508_v4, %v9509_v31  ;;  %v9522_v6 = vld [vmem:[#allocation27_spill] sm:$0xff]  ;;  %v9524_v14 = vld [vmem:[#allocation81_spill] sm:$0xff] }
 0x433   : > { %v5754_v54 = vpop.eup %5753  ;;  %v3787_v53 = vmul.f32 %v5752_v20, %v9497_v9  ;;  %v3822_v13 = vpack.c.bf16 %v3804_v61, %v3803_v39  ;;  %5305 = vmatprep.subr.bf16.mxu0 %v3453_v59  ;;  %v9513_v45 = vpack.c.bf16 %v9511_v26, %v9512_v29  ;;  %v9520_v38 = vpack.c.bf16 %v9518_v32, %v9519_v15  ;;  %v9525_v39 = vld [vmem:[#allocation59_spill] sm:$0xff]  ;;  %v9528_v59 = vld [vmem:[#allocation29_spill] sm:$0xff] }
 0x434   : > { %v5756_v7 = vpop.eup %5755  ;;  %v3445_v22 = vpack.c.bf16 %v5754_v54, %v5752_v20  ;;  %v3788_v49 = vmul.f32 %v5754_v54, %v9504_v60  ;;  %5416 = vmatpush3.bf16.msra.mxu1 %v3813_v10  ;;  %v9523_v40 = vpack.c.bf16 %v9521_v62, %v9522_v6  ;;  %v9526_v20 = vld [vmem:[#allocation61_spill] sm:$0xff]  ;;  %v9529_v18 = vld [vmem:[#allocation31_spill] sm:$0xff] }
 0x435   : > { %3507 = vxpose.xlu0.c.b16.cont [4/8] %v9500_v43, 128  ;;  %3475 = vxpose.xlu1.c.b16.cont [4/8] %v9503_v48, 128  ;;  %v5758_v57 = vpop.eup %5757  ;;  %v3805_v16 = vmul.f32 %v5756_v7, %v9505_v58  ;;  %v9527_v10 = vpack.c.bf16 %v9525_v39, %v9526_v20  ;;  %v9530_v61 = vpack.c.bf16 %v9528_v59, %v9529_v18  ;;  %v9531_v54 = vld [vmem:[#allocation63_spill] sm:$0xff]  ;;  %v9532_v9 = vld [vmem:[#allocation65_spill] sm:$0xff] }
 0x436   : > { %v5760_v47 = vpop.eup %5759  ;;  %5417 = vmatprep.subr.bf16.mxu1 %v3822_v13  ;;  %5306 = vmatpush3.bf16.msra.mxu0 %v3445_v22  ;;  %v3814_v44 = vpack.c.bf16 %v3788_v49, %v3787_v53  ;;  %v3454_v27 = vpack.c.bf16 %v5758_v57, %v5756_v7  ;;  %v3806_v46 = vmul.f32 %v5758_v57, %v9506_v33  ;;  %v9534_v7 = vld [vmem:[#allocation33_spill] sm:$0xff]  ;;  %v9535_v35 = vld [vmem:[#allocation35_spill] sm:$0xff] }
 0x437   : > { %v5762_v30 = vpop.eup %5761  ;;  %v3789_v55 = vmul.f32 %v5760_v47, %v9507_v5  ;;  %v9533_v53 = vpack.c.bf16 %v9531_v54, %v9532_v9  ;;  %v9536_v2 = vpack.c.bf16 %v9534_v7, %v9535_v35  ;;  %v3409_v15 = vld [vmem:[#allocation2 + $0x8] sm:$0xff]  ;;  %v3747_v18 = vld [vmem:[%s9100_s9 + $0x10] sm:$0xff]  ;;  %v3411_v35 = vld [vmem:[#allocation2 + $0x18] sm:$0xff] }
 0x438   : > { %v5764_v34 = vpop.eup %5763  ;;  %v3823_v50 = vpack.c.bf16 %v3806_v46, %v3805_v16  ;;  %v3446_v17 = vpack.c.bf16 %v5762_v30, %v5760_v47  ;;  %v3790_v36 = vmul.f32 %v5762_v30, %v9514_v37  ;;  %5418 = vmatpush3.bf16.msra.mxu1 %v3814_v44  ;;  %5307 = vmatprep.subr.bf16.mxu0 %v3454_v27  ;;  %v3746_v62 = vld [vmem:[%s9100_s9 + $0x8] sm:$0xff] }
 0x439   : > { %3508 = vxpose.xlu0.c.b16.cont [5/8] %v9510_v25, 128  ;;  %3476 = vxpose.xlu1.c.b16.cont [5/8] %v9513_v45, 128  ;;  %v5766_v8 = vpop.eup %5765  ;;  %v3807_v11 = vmul.f32 %v5764_v34, %v9515_v19 }
 0x43a   : > { %v5768_v28 = vpop.eup %5767  ;;  %5419 = vmatprep.subr.bf16.mxu1 %v3823_v50  ;;  %5308 = vmatpush3.bf16.msra.mxu0 %v3446_v17  ;;  %v3815_v63 = vpack.c.bf16 %v3790_v36, %v3789_v55  ;;  %v3455_v23 = vpack.c.bf16 %v5766_v8, %v5764_v34  ;;  %v3808_v56 = vmul.f32 %v5766_v8, %v9516_v42  ;;  %v3745_v42 = vld [vmem:[%s9100_s9] sm:$0xff] }
 0x43b   : > { %v5770_v12 = vpop.eup %5769  ;;  %v3791_v0 = vmul.f32 %v5768_v28, %v9517_v52 }
 0x43c   : > { %v3824_v24 = vpack.c.bf16 %v3808_v56, %v3807_v11  ;;  %v3447_v1 = vpack.c.bf16 %v5770_v12, %v5768_v28  ;;  %v3792_v41 = vmul.f32 %v5770_v12, %v9524_v14  ;;  %5420 = vmatpush3.bf16.msra.mxu1 %v3815_v63  ;;  %5309 = vmatprep.subr.bf16.mxu0 %v3455_v23  ;;  %v3408_v63 = vld [vmem:[#allocation2] sm:$0xff] }
 0x43d   : > { %3509 = vxpose.xlu0.c.b16.cont [6/8] %v9520_v38, 128  ;;  %3477 = vxpose.xlu1.c.b16.cont [6/8] %v9523_v40, 128 }
 0x43e   : > { %5421 = vmatprep.subr.bf16.mxu1 %v3824_v24  ;;  %5310 = vmatpush3.bf16.msra.mxu0 %v3447_v1  ;;  %v3816_v21 = vpack.c.bf16 %v3792_v41, %v3791_v0 }
 0x440   : > { %5422 = vmatpush3.bf16.msra.mxu1 %v3816_v21 }
 0x441   : > { %3510 = vxpose.xlu0.c.b16.cont [7/8] %v9527_v10, 128  ;;  %3478 = vxpose.xlu1.c.b16.cont [7/8] %v9530_v61, 128  ;;  %v3410_v10 = vld [vmem:[#allocation2 + $0x10] sm:$0xff] }
 0x445   : > { %3511 = vxpose.xlu0.c.b16.end [8/8] %v9533_v53, 128  ;;  %3479 = vxpose.xlu1.c.b16.end [8/8] %v9536_v2, 128 }
 0x46e   : > { %v3496_v43 = vpop.trf.xlu0  ;;  %v3464_v51 = vpop.trf.xlu1 }
 0x46f   : > { %3552 = vmatprep.mubr.bf16.mxu0 %v3496_v43  ;;  %3857 = vmatprep.mubr.bf16.mxu1 %v3496_v43  ;;  %v3748_v43 = vld [vmem:[%s9100_s9 + $0x18] sm:$0xff] }
 0x470   : > { %3553 = vmatmul.mubr.bf16.vlgmr.msra.gmra.mrb[132].mxu0 %v3464_v51  ;;  %3858 = vmatmul.mubr.bf16.vlgmr.msra.gmra.mrb[124].mxu1 %v3464_v51 }
 0x472   : > { %v3497_v3 = vpop.trf.xlu0  ;;  %v3465_v48 = vpop.trf.xlu1 }
 0x473   : > { %3560 = vmatprep.mubr.bf16.mxu0 %v3497_v3  ;;  %3865 = vmatprep.mubr.bf16.mxu1 %v3497_v3 }
 0x476   : > { %v3498_v13 = vpop.trf.xlu0  ;;  %v3466_v22 = vpop.trf.xlu1 }
 0x478   : > { %3561 = vmatmul.mubr.bf16.gmra.mrb[136].mxu0 %v3465_v48  ;;  %3866 = vmatmul.mubr.bf16.gmra.mrb[128].mxu1 %v3465_v48 }
 0x479   : > { %3568 = vmatprep.mubr.bf16.mxu0 %v3498_v13  ;;  %3873 = vmatprep.mubr.bf16.mxu1 %v3498_v13 }
 0x47a   : > { %v3499_v60 = vpop.trf.xlu0  ;;  %v3467_v49 = vpop.trf.xlu1 }
 0x47e   : > { %v3500_v57 = vpop.trf.xlu0  ;;  %v3468_v58 = vpop.trf.xlu1 }
 0x480   : > { %3569 = vmatmul.mubr.bf16.gmra.mrb[140].mxu0 %v3466_v22  ;;  %3874 = vmatmul.mubr.bf16.gmra.mrb[132].mxu1 %v3466_v22 }
 0x481   : > { %3576 = vmatprep.mubr.bf16.mxu0 %v3499_v60  ;;  %3881 = vmatprep.mubr.bf16.mxu1 %v3499_v60 }
 0x482   : > { %v3501_v16 = vpop.trf.xlu0  ;;  %v3469_v47 = vpop.trf.xlu1 }
 0x486   : > { %v3502_v44 = vpop.trf.xlu0  ;;  %v3470_v27 = vpop.trf.xlu1 }
 0x488   : > { %3577 = vmatmul.mubr.bf16.gmra.mrb[144].mxu0 %v3467_v49  ;;  %3882 = vmatmul.mubr.bf16.gmra.mrb[136].mxu1 %v3467_v49 }
 0x489   : > { %3584 = vmatprep.mubr.bf16.mxu0 %v3500_v57  ;;  %3889 = vmatprep.mubr.bf16.mxu1 %v3500_v57 }
 0x48a   : > { %v3503_v33 = vpop.trf.xlu0  ;;  %v3471_v46 = vpop.trf.xlu1 }
 0x48f   : > { %v3512_v30 = vpop.trf.xlu0  ;;  %v3480_v5 = vpop.trf.xlu1 }
 0x490   : > { %3585 = vmatmul.mubr.bf16.gmra.mrb[148].mxu0 %v3468_v58  ;;  %3890 = vmatmul.mubr.bf16.gmra.mrb[140].mxu1 %v3468_v58 }
 0x491   : > { %3592 = vmatprep.mubr.bf16.mxu0 %v3501_v16  ;;  %3897 = vmatprep.mubr.bf16.mxu1 %v3501_v16  ;;  %v3412_v16 = vld [vmem:[#allocation2 + $0x20] sm:$0xff] }
 0x493   : > { %v3513_v55 = vpop.trf.xlu0  ;;  %v3481_v34 = vpop.trf.xlu1 }
 0x497   : > { %v3514_v4 = vpop.trf.xlu0  ;;  %v3482_v31 = vpop.trf.xlu1 }
 0x498   : > { %3593 = vmatmul.mubr.bf16.gmra.mrb[152].mxu0 %v3469_v47  ;;  %3898 = vmatmul.mubr.bf16.gmra.mrb[144].mxu1 %v3469_v47 }
 0x499   : > { %3600 = vmatprep.mubr.bf16.mxu0 %v3502_v44  ;;  %3905 = vmatprep.mubr.bf16.mxu1 %v3502_v44  ;;  %v3749_v44 = vld [vmem:[%s9100_s9 + $0x20] sm:$0xff] }
 0x49b   : > { %v3515_v25 = vpop.trf.xlu0  ;;  %v3483_v26 = vpop.trf.xlu1 }
 0x49f   : > { %v3516_v29 = vpop.trf.xlu0  ;;  %v3484_v45 = vpop.trf.xlu1 }
 0x4a0   : > { %3601 = vmatmul.mubr.bf16.gmra.mrb[156].mxu0 %v3470_v27  ;;  %3906 = vmatmul.mubr.bf16.gmra.mrb[148].mxu1 %v3470_v27 }
 0x4a1   : > { %3608 = vmatprep.mubr.bf16.mxu0 %v3503_v33  ;;  %3913 = vmatprep.mubr.bf16.mxu1 %v3503_v33 }
 0x4a3   : > { %v3517_v50 = vpop.trf.xlu0  ;;  %v3485_v17 = vpop.trf.xlu1 }
 0x4a7   : > { %v3518_v37 = vpop.trf.xlu0  ;;  %v3486_v36 = vpop.trf.xlu1 }
 0x4a8   : > { %3609 = vmatmul.mubr.bf16.gmra.mrb[160].mxu0 %v3471_v46  ;;  %3914 = vmatmul.mubr.bf16.gmra.mrb[152].mxu1 %v3471_v46 }
 0x4a9   : > { %3616 = vmatprep.mubr.bf16.mxu0 %v3512_v30  ;;  %3921 = vmatprep.mubr.bf16.mxu1 %v3512_v30 }
 0x4ab   : > { %v3519_v8 = vpop.trf.xlu0  ;;  %v3487_v19 = vpop.trf.xlu1 }
 0x4b0   : > { %3617 = vmatmul.mubr.bf16.gmra.mrb[164].mxu0 %v3480_v5  ;;  %3922 = vmatmul.mubr.bf16.gmra.mrb[156].mxu1 %v3480_v5 }
 0x4b1   : > { %3624 = vmatprep.mubr.bf16.mxu0 %v3513_v55  ;;  %3929 = vmatprep.mubr.bf16.mxu1 %v3513_v55  ;;  %v3413_v55 = vld [vmem:[#allocation2 + $0x28] sm:$0xff] }
 0x4b8   : > { %3625 = vmatmul.mubr.bf16.gmra.mrb[168].mxu0 %v3481_v34  ;;  %3930 = vmatmul.mubr.bf16.gmra.mrb[160].mxu1 %v3481_v34 }
 0x4b9   : > { %3632 = vmatprep.mubr.bf16.mxu0 %v3514_v4  ;;  %3937 = vmatprep.mubr.bf16.mxu1 %v3514_v4  ;;  %v3750_v4 = vld [vmem:[%s9100_s9 + $0x28] sm:$0xff] }
 0x4c0   : > { %3633 = vmatmul.mubr.bf16.gmra.mrb[172].mxu0 %v3482_v31  ;;  %3938 = vmatmul.mubr.bf16.gmra.mrb[164].mxu1 %v3482_v31 }
 0x4c1   : > { %3640 = vmatprep.mubr.bf16.mxu0 %v3515_v25  ;;  %3945 = vmatprep.mubr.bf16.mxu1 %v3515_v25 }
 0x4c8   : > { %3641 = vmatmul.mubr.bf16.gmra.mrb[176].mxu0 %v3483_v26  ;;  %3946 = vmatmul.mubr.bf16.gmra.mrb[168].mxu1 %v3483_v26 }
 0x4c9   : > { %3648 = vmatprep.mubr.bf16.mxu0 %v3516_v29  ;;  %3953 = vmatprep.mubr.bf16.mxu1 %v3516_v29 }
 0x4d0   : > { %3649 = vmatmul.mubr.bf16.gmra.mrb[180].mxu0 %v3484_v45  ;;  %3954 = vmatmul.mubr.bf16.gmra.mrb[172].mxu1 %v3484_v45 }
 0x4d1   : > { %3656 = vmatprep.mubr.bf16.mxu0 %v3517_v50  ;;  %3961 = vmatprep.mubr.bf16.mxu1 %v3517_v50 }
 0x4d8   : > { %3657 = vmatmul.mubr.bf16.gmra.mrb[184].mxu0 %v3485_v17  ;;  %3962 = vmatmul.mubr.bf16.gmra.mrb[176].mxu1 %v3485_v17 }
 0x4d9   : > { %3664 = vmatprep.mubr.bf16.mxu0 %v3518_v37  ;;  %3969 = vmatprep.mubr.bf16.mxu1 %v3518_v37 }
 0x4e0   : > { %3665 = vmatmul.mubr.bf16.gmra.mrb[188].mxu0 %v3486_v36  ;;  %3970 = vmatmul.mubr.bf16.gmra.mrb[180].mxu1 %v3486_v36 }
 0x4e1   : > { %3672 = vmatprep.mubr.bf16.mxu0 %v3519_v8  ;;  %3977 = vmatprep.mubr.bf16.mxu1 %v3519_v8  ;;  %v3414_v8 = vld [vmem:[#allocation2 + $0x30] sm:$0xff] }
 0x4e8   : > { %3673 = vmatmul.mubr.bf16.gmra.mrb[192].mxu0 %v3487_v19  ;;  %3978 = vmatmul.mubr.bf16.gmra.mrb[184].mxu1 %v3487_v19 }
 0x543   : > { %v5311_v11 = vpop.f32.mrb[132].mxu0  ;;  %v5423_v28 = vpop.f32.mrb[124].mxu1 }
 0x544   : > { %v5312_v23 = vpop.f32.mrb[133].mxu0  ;;  %v5424_v56 = vpop.f32.mrb[125].mxu1 }
 0x545   : > { %v5313_v12 = vadd.f32 %v5312_v23, %v5311_v11  ;;  %v5425_v52 = vadd.f32 %v5424_v56, %v5423_v28  ;;  %v5314_v0 = vpop.f32.mrb[134].mxu0  ;;  %v5426_v32 = vpop.f32.mrb[126].mxu1  ;;  %v3751_v11 = vld [vmem:[%s9100_s9 + $0x30] sm:$0xff] }
 0x546   : > { %v5315_v38 = vpop.f32.mrb[135].mxu0  ;;  %v5427_v6 = vpop.f32.mrb[127].mxu1 }
 0x547   : > { %v3681_v40 = vadd.f32 %v5313_v12, %v3408_v63  ;;  %v3986_v24 = vadd.f32 %v5425_v52, %v3745_v42  ;;  %v5316_v1 = vadd.f32 %v5315_v38, %v5314_v0  ;;  %v5428_v14 = vadd.f32 %v5427_v6, %v5426_v32  ;;  %v3415_v12 = vld [vmem:[#allocation2 + $0x38] sm:$0xff] }
 0x548   : > { %v3752_v0 = vld [vmem:[%s9100_s9 + $0x38] sm:$0xff] }
 0x549   : > { %3713 = vst.msk [vmem:[#allocation2] sm:$0xff] %vm2551_vm14, %v3681_v40  ;;  %4018 = vst.msk [vmem:[%s9100_s9] sm:$0xff] %vm2551_vm14, %v3986_v24  ;;  %v3682_v41 = vadd.f32 %v5316_v1, %v3409_v15  ;;  %v3987_v21 = vadd.f32 %v5428_v14, %v3746_v62 }
 0x54b   : > { %3714 = vst.msk [vmem:[#allocation2 + $0x8] sm:$0xff] %vm2551_vm14, %v3682_v41  ;;  %4019 = vst.msk [vmem:[%s9100_s9 + $0x8] sm:$0xff] %vm2551_vm14, %v3987_v21  ;;  %v5317_v39 = vpop.f32.mrb[136].mxu0  ;;  %v5429_v20 = vpop.f32.mrb[128].mxu1  ;;  %v3416_v41 = vld [vmem:[#allocation2 + $0x40] sm:$0xff] }
 0x54c   : > { %v5318_v59 = vpop.f32.mrb[137].mxu0  ;;  %v5430_v61 = vpop.f32.mrb[129].mxu1 }
 0x54d   : > { %v5319_v54 = vadd.f32 %v5318_v59, %v5317_v39  ;;  %v5431_v9 = vadd.f32 %v5430_v61, %v5429_v20  ;;  %v5320_v53 = vpop.f32.mrb[138].mxu0  ;;  %v5432_v7 = vpop.f32.mrb[130].mxu1  ;;  %v3753_v39 = vld [vmem:[%s9100_s9 + $0x40] sm:$0xff] }
 0x54e   : > { %v5321_v2 = vpop.f32.mrb[139].mxu0  ;;  %v5433_v51 = vpop.f32.mrb[131].mxu1 }
 0x54f   : > { %v3683_v3 = vadd.f32 %v5319_v54, %v3410_v10  ;;  %v3988_v48 = vadd.f32 %v5431_v9, %v3747_v18  ;;  %v5322_v13 = vadd.f32 %v5321_v2, %v5320_v53  ;;  %v5434_v22 = vadd.f32 %v5433_v51, %v5432_v7  ;;  %v3417_v54 = vld [vmem:[#allocation2 + $0x48] sm:$0xff] }
 0x550   : > { %v3754_v53 = vld [vmem:[%s9100_s9 + $0x48] sm:$0xff] }
 0x551   : > { %3715 = vst.msk [vmem:[#allocation2 + $0x10] sm:$0xff] %vm2551_vm14, %v3683_v3  ;;  %4020 = vst.msk [vmem:[%s9100_s9 + $0x10] sm:$0xff] %vm2551_vm14, %v3988_v48  ;;  %v3684_v60 = vadd.f32 %v5322_v13, %v3411_v35  ;;  %v3989_v49 = vadd.f32 %v5434_v22, %v3748_v43 }
 0x553   : > { %3716 = vst.msk [vmem:[#allocation2 + $0x18] sm:$0xff] %vm2551_vm14, %v3684_v60  ;;  %4021 = vst.msk [vmem:[%s9100_s9 + $0x18] sm:$0xff] %vm2551_vm14, %v3989_v49  ;;  %v5323_v57 = vpop.f32.mrb[140].mxu0  ;;  %v5435_v58 = vpop.f32.mrb[132].mxu1  ;;  %v3418_v60 = vld [vmem:[#allocation2 + $0x50] sm:$0xff] }
 0x554   : > { %v5324_v47 = vpop.f32.mrb[141].mxu0  ;;  %v5436_v27 = vpop.f32.mrb[133].mxu1 }
 0x555   : > { %v5325_v33 = vadd.f32 %v5324_v47, %v5323_v57  ;;  %v5437_v46 = vadd.f32 %v5436_v27, %v5435_v58  ;;  %v5326_v30 = vpop.f32.mrb[142].mxu0  ;;  %v5438_v5 = vpop.f32.mrb[134].mxu1  ;;  %v3755_v57 = vld [vmem:[%s9100_s9 + $0x50] sm:$0xff] }
 0x556   : > { %v5327_v34 = vpop.f32.mrb[143].mxu0  ;;  %v5439_v31 = vpop.f32.mrb[135].mxu1 }
 0x557   : > { %v3685_v25 = vadd.f32 %v5325_v33, %v3412_v16  ;;  %v3990_v26 = vadd.f32 %v5437_v46, %v3749_v44  ;;  %v5328_v29 = vadd.f32 %v5327_v34, %v5326_v30  ;;  %v5440_v45 = vadd.f32 %v5439_v31, %v5438_v5  ;;  %v3419_v33 = vld [vmem:[#allocation2 + $0x58] sm:$0xff] }
 0x558   : > { %v3756_v30 = vld [vmem:[%s9100_s9 + $0x58] sm:$0xff] }
 0x559   : > { %3717 = vst.msk [vmem:[#allocation2 + $0x20] sm:$0xff] %vm2551_vm14, %v3685_v25  ;;  %4022 = vst.msk [vmem:[%s9100_s9 + $0x20] sm:$0xff] %vm2551_vm14, %v3990_v26  ;;  %v3686_v50 = vadd.f32 %v5328_v29, %v3413_v55  ;;  %v3991_v17 = vadd.f32 %v5440_v45, %v3750_v4 }
 0x55b   : > { %3718 = vst.msk [vmem:[#allocation2 + $0x28] sm:$0xff] %vm2551_vm14, %v3686_v50  ;;  %4023 = vst.msk [vmem:[%s9100_s9 + $0x28] sm:$0xff] %vm2551_vm14, %v3991_v17  ;;  %v5329_v37 = vpop.f32.mrb[144].mxu0  ;;  %v5441_v36 = vpop.f32.mrb[136].mxu1  ;;  %v3420_v50 = vld [vmem:[#allocation2 + $0x60] sm:$0xff] }
 0x55c   : > { %v5330_v19 = vpop.f32.mrb[145].mxu0  ;;  %v5442_v28 = vpop.f32.mrb[137].mxu1 }
 0x55d   : > { %v5331_v63 = vadd.f32 %v5330_v19, %v5329_v37  ;;  %v5443_v23 = vadd.f32 %v5442_v28, %v5441_v36  ;;  %v5332_v42 = vpop.f32.mrb[146].mxu0  ;;  %v5444_v56 = vpop.f32.mrb[138].mxu1  ;;  %v3757_v37 = vld [vmem:[%s9100_s9 + $0x60] sm:$0xff] }
 0x55e   : > { %v5333_v52 = vpop.f32.mrb[147].mxu0  ;;  %v5445_v32 = vpop.f32.mrb[139].mxu1 }
 0x55f   : > { %v3687_v15 = vadd.f32 %v5331_v63, %v3414_v8  ;;  %v3992_v38 = vadd.f32 %v5443_v23, %v3751_v11  ;;  %v5334_v62 = vadd.f32 %v5333_v52, %v5332_v42  ;;  %v5446_v6 = vadd.f32 %v5445_v32, %v5444_v56  ;;  %v3421_v63 = vld [vmem:[#allocation2 + $0x68] sm:$0xff] }
 0x560   : > { %v3758_v42 = vld [vmem:[%s9100_s9 + $0x68] sm:$0xff] }
 0x561   : > { %3719 = vst.msk [vmem:[#allocation2 + $0x30] sm:$0xff] %vm2551_vm14, %v3687_v15  ;;  %4024 = vst.msk [vmem:[%s9100_s9 + $0x30] sm:$0xff] %vm2551_vm14, %v3992_v38  ;;  %v3688_v40 = vadd.f32 %v5334_v62, %v3415_v12  ;;  %v3993_v24 = vadd.f32 %v5446_v6, %v3752_v0 }
 0x563   : > { %3720 = vst.msk [vmem:[#allocation2 + $0x38] sm:$0xff] %vm2551_vm14, %v3688_v40  ;;  %4025 = vst.msk [vmem:[%s9100_s9 + $0x38] sm:$0xff] %vm2551_vm14, %v3993_v24  ;;  %v5335_v1 = vpop.f32.mrb[148].mxu0  ;;  %v5447_v14 = vpop.f32.mrb[140].mxu1  ;;  %v3422_v40 = vld [vmem:[#allocation2 + $0x70] sm:$0xff] }
 0x564   : > { %v5336_v21 = vpop.f32.mrb[149].mxu0  ;;  %v5448_v20 = vpop.f32.mrb[141].mxu1 }
 0x565   : > { %v5337_v10 = vadd.f32 %v5336_v21, %v5335_v1  ;;  %v5449_v59 = vadd.f32 %v5448_v20, %v5447_v14  ;;  %v5338_v18 = vpop.f32.mrb[150].mxu0  ;;  %v5450_v61 = vpop.f32.mrb[142].mxu1  ;;  %v3759_v1 = vld [vmem:[%s9100_s9 + $0x70] sm:$0xff] }
 0x566   : > { %v5339_v9 = vpop.f32.mrb[151].mxu0  ;;  %v5451_v7 = vpop.f32.mrb[143].mxu1 }
 0x567   : > { %v3689_v35 = vadd.f32 %v5337_v10, %v3416_v41  ;;  %v3994_v2 = vadd.f32 %v5449_v59, %v3753_v39  ;;  %v5340_v43 = vadd.f32 %v5339_v9, %v5338_v18  ;;  %v5452_v51 = vadd.f32 %v5451_v7, %v5450_v61  ;;  %v3423_v10 = vld [vmem:[#allocation2 + $0x78] sm:$0xff] }
 0x568   : > { %v3760_v18 = vld [vmem:[%s9100_s9 + $0x78] sm:$0xff] }
 0x569   : > { %3721 = vst.msk [vmem:[#allocation2 + $0x40] sm:$0xff] %vm2551_vm14, %v3689_v35  ;;  %4026 = vst.msk [vmem:[%s9100_s9 + $0x40] sm:$0xff] %vm2551_vm14, %v3994_v2  ;;  %v3690_v3 = vadd.f32 %v5340_v43, %v3417_v54  ;;  %v3995_v48 = vadd.f32 %v5452_v51, %v3754_v53 }
 0x56b   : > { %3722 = vst.msk [vmem:[#allocation2 + $0x48] sm:$0xff] %vm2551_vm14, %v3690_v3  ;;  %4027 = vst.msk [vmem:[%s9100_s9 + $0x48] sm:$0xff] %vm2551_vm14, %v3995_v48  ;;  %v5341_v13 = vpop.f32.mrb[152].mxu0  ;;  %v5453_v22 = vpop.f32.mrb[144].mxu1  ;;  %v3424_v3 = vld [vmem:[#allocation2 + $0x80] sm:$0xff] }
 0x56c   : > { %v5342_v49 = vpop.f32.mrb[153].mxu0  ;;  %v5454_v58 = vpop.f32.mrb[145].mxu1 }
 0x56d   : > { %v5343_v16 = vadd.f32 %v5342_v49, %v5341_v13  ;;  %v5455_v47 = vadd.f32 %v5454_v58, %v5453_v22  ;;  %v5344_v44 = vpop.f32.mrb[154].mxu0  ;;  %v5456_v27 = vpop.f32.mrb[146].mxu1  ;;  %v3761_v13 = vld [vmem:[%s9100_s9 + $0x80] sm:$0xff] }
 0x56e   : > { %v5345_v46 = vpop.f32.mrb[155].mxu0  ;;  %v5457_v5 = vpop.f32.mrb[147].mxu1 }
 0x56f   : > { %v3691_v55 = vadd.f32 %v5343_v16, %v3418_v60  ;;  %v3996_v34 = vadd.f32 %v5455_v47, %v3755_v57  ;;  %v5346_v4 = vadd.f32 %v5345_v46, %v5344_v44  ;;  %v5458_v31 = vadd.f32 %v5457_v5, %v5456_v27  ;;  %v3425_v16 = vld [vmem:[#allocation2 + $0x88] sm:$0xff] }
 0x570   : > { %v3762_v44 = vld [vmem:[%s9100_s9 + $0x88] sm:$0xff] }
 0x571   : > { %3723 = vst.msk [vmem:[#allocation2 + $0x50] sm:$0xff] %vm2551_vm14, %v3691_v55  ;;  %4028 = vst.msk [vmem:[%s9100_s9 + $0x50] sm:$0xff] %vm2551_vm14, %v3996_v34  ;;  %v3692_v25 = vadd.f32 %v5346_v4, %v3419_v33  ;;  %v3997_v26 = vadd.f32 %v5458_v31, %v3756_v30 }
 0x573   : > { %3724 = vst.msk [vmem:[#allocation2 + $0x58] sm:$0xff] %vm2551_vm14, %v3692_v25  ;;  %4029 = vst.msk [vmem:[%s9100_s9 + $0x58] sm:$0xff] %vm2551_vm14, %v3997_v26  ;;  %v5347_v29 = vpop.f32.mrb[156].mxu0  ;;  %v5459_v45 = vpop.f32.mrb[148].mxu1  ;;  %v3426_v25 = vld [vmem:[#allocation2 + $0x90] sm:$0xff] }
 0x574   : > { %v5348_v17 = vpop.f32.mrb[157].mxu0  ;;  %v5460_v36 = vpop.f32.mrb[149].mxu1 }
 0x575   : > { %v5349_v8 = vadd.f32 %v5348_v17, %v5347_v29  ;;  %v5461_v19 = vadd.f32 %v5460_v36, %v5459_v45  ;;  %v5350_v11 = vpop.f32.mrb[158].mxu0  ;;  %v5462_v28 = vpop.f32.mrb[150].mxu1  ;;  %v3763_v29 = vld [vmem:[%s9100_s9 + $0x90] sm:$0xff] }
 0x576   : > { %v5351_v23 = vpop.f32.mrb[159].mxu0  ;;  %v5463_v56 = vpop.f32.mrb[151].mxu1 }
 0x577   : > { %v3693_v12 = vadd.f32 %v5349_v8, %v3420_v50  ;;  %v3998_v52 = vadd.f32 %v5461_v19, %v3757_v37  ;;  %v5352_v0 = vadd.f32 %v5351_v23, %v5350_v11  ;;  %v5464_v32 = vadd.f32 %v5463_v56, %v5462_v28  ;;  %v3427_v8 = vld [vmem:[#allocation2 + $0x98] sm:$0xff] }
 0x578   : > { %v3764_v11 = vld [vmem:[%s9100_s9 + $0x98] sm:$0xff] }
 0x579   : > { %3725 = vst.msk [vmem:[#allocation2 + $0x60] sm:$0xff] %vm2551_vm14, %v3693_v12  ;;  %4030 = vst.msk [vmem:[%s9100_s9 + $0x60] sm:$0xff] %vm2551_vm14, %v3998_v52  ;;  %v3694_v15 = vadd.f32 %v5352_v0, %v3421_v63  ;;  %v3999_v38 = vadd.f32 %v5464_v32, %v3758_v42 }
 0x57b   : > { %3726 = vst.msk [vmem:[#allocation2 + $0x68] sm:$0xff] %vm2551_vm14, %v3694_v15  ;;  %4031 = vst.msk [vmem:[%s9100_s9 + $0x68] sm:$0xff] %vm2551_vm14, %v3999_v38  ;;  %v5353_v62 = vpop.f32.mrb[160].mxu0  ;;  %v5465_v6 = vpop.f32.mrb[152].mxu1  ;;  %v3428_v15 = vld [vmem:[#allocation2 + $0xa0] sm:$0xff] }
 0x57c   : > { %v5354_v24 = vpop.f32.mrb[161].mxu0  ;;  %v5466_v14 = vpop.f32.mrb[153].mxu1 }
 0x57d   : > { %v5355_v41 = vadd.f32 %v5354_v24, %v5353_v62  ;;  %v5467_v21 = vadd.f32 %v5466_v14, %v5465_v6  ;;  %v5356_v39 = vpop.f32.mrb[162].mxu0  ;;  %v5468_v20 = vpop.f32.mrb[154].mxu1  ;;  %v3765_v62 = vld [vmem:[%s9100_s9 + $0xa0] sm:$0xff] }
 0x57e   : > { %v5357_v59 = vpop.f32.mrb[163].mxu0  ;;  %v5469_v61 = vpop.f32.mrb[155].mxu1 }
 0x57f   : > { %v3695_v54 = vadd.f32 %v5355_v41, %v3422_v40  ;;  %v4000_v9 = vadd.f32 %v5467_v21, %v3759_v1  ;;  %v5358_v53 = vadd.f32 %v5357_v59, %v5356_v39  ;;  %v5470_v7 = vadd.f32 %v5469_v61, %v5468_v20  ;;  %v3429_v41 = vld [vmem:[#allocation2 + $0xa8] sm:$0xff] }
 0x580   : > { %v3766_v39 = vld [vmem:[%s9100_s9 + $0xa8] sm:$0xff] }
 0x581   : > { %3727 = vst.msk [vmem:[#allocation2 + $0x70] sm:$0xff] %vm2551_vm14, %v3695_v54  ;;  %4032 = vst.msk [vmem:[%s9100_s9 + $0x70] sm:$0xff] %vm2551_vm14, %v4000_v9  ;;  %v3696_v35 = vadd.f32 %v5358_v53, %v3423_v10  ;;  %v4001_v2 = vadd.f32 %v5470_v7, %v3760_v18 }
 0x583   : > { %3728 = vst.msk [vmem:[#allocation2 + $0x78] sm:$0xff] %vm2551_vm14, %v3696_v35  ;;  %4033 = vst.msk [vmem:[%s9100_s9 + $0x78] sm:$0xff] %vm2551_vm14, %v4001_v2  ;;  %v5359_v43 = vpop.f32.mrb[164].mxu0  ;;  %v5471_v51 = vpop.f32.mrb[156].mxu1  ;;  %v3430_v35 = vld [vmem:[#allocation2 + $0xb0] sm:$0xff] }
 0x584   : > { %v5360_v48 = vpop.f32.mrb[165].mxu0  ;;  %v5472_v22 = vpop.f32.mrb[157].mxu1 }
 0x585   : > { %v5361_v60 = vadd.f32 %v5360_v48, %v5359_v43  ;;  %v5473_v49 = vadd.f32 %v5472_v22, %v5471_v51  ;;  %v5362_v57 = vpop.f32.mrb[166].mxu0  ;;  %v5474_v58 = vpop.f32.mrb[158].mxu1  ;;  %v3767_v43 = vld [vmem:[%s9100_s9 + $0xb0] sm:$0xff] }
 0x586   : > { %v5363_v47 = vpop.f32.mrb[167].mxu0  ;;  %v5475_v27 = vpop.f32.mrb[159].mxu1 }
 0x587   : > { %v3697_v33 = vadd.f32 %v5361_v60, %v3424_v3  ;;  %v4002_v46 = vadd.f32 %v5473_v49, %v3761_v13  ;;  %v5364_v30 = vadd.f32 %v5363_v47, %v5362_v57  ;;  %v5476_v5 = vadd.f32 %v5475_v27, %v5474_v58  ;;  %v3431_v60 = vld [vmem:[#allocation2 + $0xb8] sm:$0xff] }
 0x588   : > { %v3768_v57 = vld [vmem:[%s9100_s9 + $0xb8] sm:$0xff] }
 0x589   : > { %3729 = vst.msk [vmem:[#allocation2 + $0x80] sm:$0xff] %vm2551_vm14, %v3697_v33  ;;  %4034 = vst.msk [vmem:[%s9100_s9 + $0x80] sm:$0xff] %vm2551_vm14, %v4002_v46  ;;  %v3698_v55 = vadd.f32 %v5364_v30, %v3425_v16  ;;  %v4003_v34 = vadd.f32 %v5476_v5, %v3762_v44 }
 0x58b   : > { %3730 = vst.msk [vmem:[#allocation2 + $0x88] sm:$0xff] %vm2551_vm14, %v3698_v55  ;;  %4035 = vst.msk [vmem:[%s9100_s9 + $0x88] sm:$0xff] %vm2551_vm14, %v4003_v34  ;;  %v5365_v4 = vpop.f32.mrb[168].mxu0  ;;  %v5477_v31 = vpop.f32.mrb[160].mxu1  ;;  %v3432_v55 = vld [vmem:[#allocation2 + $0xc0] sm:$0xff] }
 0x58c   : > { %v5366_v26 = vpop.f32.mrb[169].mxu0  ;;  %v5478_v45 = vpop.f32.mrb[161].mxu1 }
 0x58d   : > { %v5367_v50 = vadd.f32 %v5366_v26, %v5365_v4  ;;  %v5479_v17 = vadd.f32 %v5478_v45, %v5477_v31  ;;  %v5368_v37 = vpop.f32.mrb[170].mxu0  ;;  %v5480_v36 = vpop.f32.mrb[162].mxu1  ;;  %v3769_v4 = vld [vmem:[%s9100_s9 + $0xc0] sm:$0xff] }
 0x58e   : > { %v5369_v19 = vpop.f32.mrb[171].mxu0  ;;  %v5481_v28 = vpop.f32.mrb[163].mxu1 }
 0x58f   : > { %v3699_v63 = vadd.f32 %v5367_v50, %v3426_v25  ;;  %v4004_v23 = vadd.f32 %v5479_v17, %v3763_v29  ;;  %v5370_v42 = vadd.f32 %v5369_v19, %v5368_v37  ;;  %v5482_v56 = vadd.f32 %v5481_v28, %v5480_v36  ;;  %v3433_v50 = vld [vmem:[#allocation2 + $0xc8] sm:$0xff] }
 0x590   : > { %v3770_v37 = vld [vmem:[%s9100_s9 + $0xc8] sm:$0xff] }
 0x591   : > { %3731 = vst.msk [vmem:[#allocation2 + $0x90] sm:$0xff] %vm2551_vm14, %v3699_v63  ;;  %4036 = vst.msk [vmem:[%s9100_s9 + $0x90] sm:$0xff] %vm2551_vm14, %v4004_v23  ;;  %v3700_v12 = vadd.f32 %v5370_v42, %v3427_v8  ;;  %v4005_v52 = vadd.f32 %v5482_v56, %v3764_v11 }
 0x593   : > { %3732 = vst.msk [vmem:[#allocation2 + $0x98] sm:$0xff] %vm2551_vm14, %v3700_v12  ;;  %4037 = vst.msk [vmem:[%s9100_s9 + $0x98] sm:$0xff] %vm2551_vm14, %v4005_v52  ;;  %v5371_v0 = vpop.f32.mrb[172].mxu0  ;;  %v5483_v32 = vpop.f32.mrb[164].mxu1  ;;  %v3434_v12 = vld [vmem:[#allocation2 + $0xd0] sm:$0xff] }
 0x594   : > { %v5372_v38 = vpop.f32.mrb[173].mxu0  ;;  %v5484_v6 = vpop.f32.mrb[165].mxu1 }
 0x595   : > { %v5373_v40 = vadd.f32 %v5372_v38, %v5371_v0  ;;  %v5485_v24 = vadd.f32 %v5484_v6, %v5483_v32  ;;  %v5374_v1 = vpop.f32.mrb[174].mxu0  ;;  %v5486_v14 = vpop.f32.mrb[166].mxu1  ;;  %v3771_v0 = vld [vmem:[%s9100_s9 + $0xd0] sm:$0xff] }
 0x596   : > { %v5375_v21 = vpop.f32.mrb[175].mxu0  ;;  %v5487_v20 = vpop.f32.mrb[167].mxu1 }
 0x597   : > { %v3701_v10 = vadd.f32 %v5373_v40, %v3428_v15  ;;  %v4006_v59 = vadd.f32 %v5485_v24, %v3765_v62  ;;  %v5376_v18 = vadd.f32 %v5375_v21, %v5374_v1  ;;  %v5488_v61 = vadd.f32 %v5487_v20, %v5486_v14  ;;  %v3435_v40 = vld [vmem:[#allocation2 + $0xd8] sm:$0xff] }
 0x598   : > { %v3772_v1 = vld [vmem:[%s9100_s9 + $0xd8] sm:$0xff] }
 0x599   : > { %3733 = vst.msk [vmem:[#allocation2 + $0xa0] sm:$0xff] %vm2551_vm14, %v3701_v10  ;;  %4038 = vst.msk [vmem:[%s9100_s9 + $0xa0] sm:$0xff] %vm2551_vm14, %v4006_v59  ;;  %v3702_v54 = vadd.f32 %v5376_v18, %v3429_v41  ;;  %v4007_v9 = vadd.f32 %v5488_v61, %v3766_v39 }
 0x59b   : > { %3734 = vst.msk [vmem:[#allocation2 + $0xa8] sm:$0xff] %vm2551_vm14, %v3702_v54  ;;  %4039 = vst.msk [vmem:[%s9100_s9 + $0xa8] sm:$0xff] %vm2551_vm14, %v4007_v9  ;;  %v5377_v53 = vpop.f32.mrb[176].mxu0  ;;  %v5489_v7 = vpop.f32.mrb[168].mxu1  ;;  %v3436_v54 = vld [vmem:[#allocation2 + $0xe0] sm:$0xff] }
 0x59c   : > { %v5378_v2 = vpop.f32.mrb[177].mxu0  ;;  %v5490_v51 = vpop.f32.mrb[169].mxu1 }
 0x59d   : > { %v5379_v3 = vadd.f32 %v5378_v2, %v5377_v53  ;;  %v5491_v48 = vadd.f32 %v5490_v51, %v5489_v7  ;;  %v5380_v13 = vpop.f32.mrb[178].mxu0  ;;  %v5492_v22 = vpop.f32.mrb[170].mxu1  ;;  %v3773_v53 = vld [vmem:[%s9100_s9 + $0xe0] sm:$0xff] }
 0x59e   : > { %v5381_v49 = vpop.f32.mrb[179].mxu0  ;;  %v5493_v58 = vpop.f32.mrb[171].mxu1 }
 0x59f   : > { %v3703_v16 = vadd.f32 %v5379_v3, %v3430_v35  ;;  %v4008_v47 = vadd.f32 %v5491_v48, %v3767_v43  ;;  %v5382_v44 = vadd.f32 %v5381_v49, %v5380_v13  ;;  %v5494_v27 = vadd.f32 %v5493_v58, %v5492_v22  ;;  %v3437_v3 = vld [vmem:[#allocation2 + $0xe8] sm:$0xff] }
 0x5a0   : > { %v3774_v13 = vld [vmem:[%s9100_s9 + $0xe8] sm:$0xff] }
 0x5a1   : > { %3735 = vst.msk [vmem:[#allocation2 + $0xb0] sm:$0xff] %vm2551_vm14, %v3703_v16  ;;  %4040 = vst.msk [vmem:[%s9100_s9 + $0xb0] sm:$0xff] %vm2551_vm14, %v4008_v47  ;;  %v3704_v33 = vadd.f32 %v5382_v44, %v3431_v60  ;;  %v4009_v46 = vadd.f32 %v5494_v27, %v3768_v57 }
 0x5a3   : > { %3736 = vst.msk [vmem:[#allocation2 + $0xb8] sm:$0xff] %vm2551_vm14, %v3704_v33  ;;  %4041 = vst.msk [vmem:[%s9100_s9 + $0xb8] sm:$0xff] %vm2551_vm14, %v4009_v46  ;;  %v5383_v30 = vpop.f32.mrb[180].mxu0  ;;  %v5495_v5 = vpop.f32.mrb[172].mxu1  ;;  %v3438_v33 = vld [vmem:[#allocation2 + $0xf0] sm:$0xff] }
 0x5a4   : > { %v5384_v34 = vpop.f32.mrb[181].mxu0  ;;  %v5496_v31 = vpop.f32.mrb[173].mxu1 }
 0x5a5   : > { %v5385_v25 = vadd.f32 %v5384_v34, %v5383_v30  ;;  %v5497_v26 = vadd.f32 %v5496_v31, %v5495_v5  ;;  %v5386_v29 = vpop.f32.mrb[182].mxu0  ;;  %v5498_v45 = vpop.f32.mrb[174].mxu1  ;;  %v3775_v30 = vld [vmem:[%s9100_s9 + $0xf0] sm:$0xff] }
 0x5a6   : > { %v5387_v17 = vpop.f32.mrb[183].mxu0  ;;  %v5499_v36 = vpop.f32.mrb[175].mxu1 }
 0x5a7   : > { %v3705_v8 = vadd.f32 %v5385_v25, %v3432_v55  ;;  %v4010_v19 = vadd.f32 %v5497_v26, %v3769_v4  ;;  %v5388_v11 = vadd.f32 %v5387_v17, %v5386_v29  ;;  %v5500_v28 = vadd.f32 %v5499_v36, %v5498_v45  ;;  %v3439_v25 = vld [vmem:[#allocation2 + $0xf8] sm:$0xff] }
 0x5a8   : > { %v3776_v29 = vld [vmem:[%s9100_s9 + $0xf8] sm:$0xff] }
 0x5a9   : > { %3737 = vst.msk [vmem:[#allocation2 + $0xc0] sm:$0xff] %vm2551_vm14, %v3705_v8  ;;  %4042 = vst.msk [vmem:[%s9100_s9 + $0xc0] sm:$0xff] %vm2551_vm14, %v4010_v19  ;;  %v3706_v63 = vadd.f32 %v5388_v11, %v3433_v50  ;;  %v4011_v23 = vadd.f32 %v5500_v28, %v3770_v37  ;;  %v8688_v11 = vld [vmem:[#allocation2] sm:$0xff] (!%p4920_p7)  ;;  %v8690_v28 = vld [vmem:[#allocation2 + $0x8] sm:$0xff] (!%p4920_p7) }
 0x5aa   : > { %vm4150_vm9 = vcmp.gt.f32.partialorder (!%p4920_p7), %v8688_v11, 0.0  ;;  %vm4151_vm2 = vcmp.gt.f32.partialorder (!%p4920_p7), %v8690_v28, 0.0 }
 0x5ab   : > { %3738 = vst.msk [vmem:[#allocation2 + $0xc8] sm:$0xff] %vm2551_vm14, %v3706_v63  ;;  %4043 = vst.msk [vmem:[%s9100_s9 + $0xc8] sm:$0xff] %vm2551_vm14, %v4011_v23  ;;  %v5389_v42 = vpop.f32.mrb[184].mxu0  ;;  %v5501_v56 = vpop.f32.mrb[176].mxu1  ;;  %v4086_v63 = vmax.f32 (!%p4920_p7), %v8688_v11, 1e-30 }
 0x5ac   : > { %v5390_v52 = vpop.f32.mrb[185].mxu0  ;;  %v5502_v32 = vpop.f32.mrb[177].mxu1  ;;  %v4087_v23 = vmax.f32 (!%p4920_p7), %v8690_v28, 1e-30 }
 0x5ad   : > { %v5391_v15 = vadd.f32 %v5390_v52, %v5389_v42  ;;  %v5503_v38 = vadd.f32 %v5502_v32, %v5501_v56  ;;  %v5392_v62 = vpop.f32.mrb[186].mxu0  ;;  %v5504_v6 = vpop.f32.mrb[178].mxu1  ;;  %v8694_v42 = vld [vmem:[#allocation2 + $0x10] sm:$0xff] (!%p4920_p7)  ;;  %5771 = vrcp.f32 (!%p4920_p7), %v4086_v63  ;;  %v8699_v52 = vld [vmem:[#allocation2 + $0x20] sm:$0xff] (!%p4920_p7) }
 0x5ae   : > { %v5393_v24 = vpop.f32.mrb[187].mxu0  ;;  %v5505_v14 = vpop.f32.mrb[179].mxu1  ;;  %v4088_v56 = vmax.f32 (!%p4920_p7), %v8694_v42, 1e-30  ;;  %5773 = vrcp.f32 (!%p4920_p7), %v4087_v23  ;;  %v4090_v32 = vmax.f32 (!%p4920_p7), %v8699_v52, 1e-30 }
 0x5af   : > { %v3707_v41 = vadd.f32 %v5391_v15, %v3434_v12  ;;  %v4012_v21 = vadd.f32 %v5503_v38, %v3771_v0  ;;  %v5394_v39 = vadd.f32 %v5393_v24, %v5392_v62  ;;  %v5506_v20 = vadd.f32 %v5505_v14, %v5504_v6  ;;  %v8697_v12 = vld [vmem:[#allocation2 + $0x18] sm:$0xff] (!%p4920_p7)  ;;  %v8703_v15 = vld [vmem:[#allocation2 + $0x28] sm:$0xff] (!%p4920_p7)  ;;  %v8705_v38 = vld [vmem:[#allocation2 + $0x30] sm:$0xff] (!%p4920_p7) }
 0x5b0   : > { %v4089_v0 = vmax.f32 (!%p4920_p7), %v8697_v12, 1e-30  ;;  %5775 = vrcp.f32 (!%p4920_p7), %v4088_v56  ;;  %v4091_v62 = vmax.f32 (!%p4920_p7), %v8703_v15, 1e-30  ;;  %v4092_v6 = vmax.f32 (!%p4920_p7), %v8705_v38, 1e-30 }
 0x5b1   : > { %3739 = vst.msk [vmem:[#allocation2 + $0xd0] sm:$0xff] %vm2551_vm14, %v3707_v41  ;;  %4044 = vst.msk [vmem:[%s9100_s9 + $0xd0] sm:$0xff] %vm2551_vm14, %v4012_v21  ;;  %v3708_v10 = vadd.f32 %v5394_v39, %v3435_v40  ;;  %v4013_v59 = vadd.f32 %v5506_v20, %v3772_v1  ;;  %v8709_v40 = vld [vmem:[#allocation2 + $0x38] sm:$0xff] (!%p4920_p7)  ;;  %v8711_v24 = vld [vmem:[#allocation2 + $0x40] sm:$0xff] (!%p4920_p7)  ;;  %vm4152_vm3 = vcmp.gt.f32.partialorder (!%p4920_p7), %v8694_v42, 0.0  ;;  %vm4153_vm10 = vcmp.gt.f32.partialorder (!%p4920_p7), %v8697_v12, 0.0 }
 0x5b2   : > { %5777 = vrcp.f32 (!%p4920_p7), %v4089_v0  ;;  %v4093_v1 = vmax.f32 (!%p4920_p7), %v8709_v40, 1e-30  ;;  %v4094_v14 = vmax.f32 (!%p4920_p7), %v8711_v24, 1e-30  ;;  %v8715_v41 = vld [vmem:[#allocation2 + $0x48] sm:$0xff] (!%p4920_p7)  ;;  %v8717_v21 = vld [vmem:[#allocation2 + $0x50] sm:$0xff] (!%p4920_p7) }
 0x5b3   : > { %3740 = vst.msk [vmem:[#allocation2 + $0xd8] sm:$0xff] %vm2551_vm14, %v3708_v10  ;;  %4045 = vst.msk [vmem:[%s9100_s9 + $0xd8] sm:$0xff] %vm2551_vm14, %v4013_v59  ;;  %v5395_v18 = vpop.f32.mrb[188].mxu0  ;;  %v5507_v61 = vpop.f32.mrb[180].mxu1  ;;  %5779 = vrcp.f32 (!%p4920_p7), %v4090_v32  ;;  %v4095_v39 = vmax.f32 (!%p4920_p7), %v8715_v41, 1e-30 }
 0x5b4   : > { %v5396_v9 = vpop.f32.mrb[189].mxu0  ;;  %v5508_v7 = vpop.f32.mrb[181].mxu1  ;;  %5781 = vrcp.f32 (!%p4920_p7), %v4091_v62  ;;  %v4096_v20 = vmax.f32 (!%p4920_p7), %v8717_v21, 1e-30  ;;  %v4182_v10 = vld [vmem:[%s9100_s9] sm:$0xff] (!%p4920_p7)  ;;  %v8726_v59 = vld [vmem:[#allocation2 + $0x58] sm:$0xff] (!%p4920_p7) }
 0x5b5   : > { %v5397_v35 = vadd.f32 %v5396_v9, %v5395_v18  ;;  %v5509_v2 = vadd.f32 %v5508_v7, %v5507_v61  ;;  %v5398_v43 = vpop.f32.mrb[190].mxu0  ;;  %v5510_v51 = vpop.f32.mrb[182].mxu1  ;;  %5783 = vrcp.f32 (!%p4920_p7), %v4092_v6  ;;  %v8728_v18 = vld [vmem:[#allocation2 + $0x60] sm:$0xff] (!%p4920_p7)  ;;  %v4183_v61 = vld [vmem:[%s9100_s9 + $0x8] sm:$0xff] (!%p4920_p7)  ;;  %v4184_v7 = vld [vmem:[%s9100_s9 + $0x10] sm:$0xff] (!%p4920_p7)  ;;  %vm4154_vm5 = vcmp.gt.f32.partialorder (!%p4920_p7), %v8699_v52, 0.0 }
 0x5b6   : > { %v5399_v48 = vpop.f32.mrb[191].mxu0  ;;  %v5511_v22 = vpop.f32.mrb[183].mxu1  ;;  %5785 = vrcp.f32 (!%p4920_p7), %v4093_v1  ;;  %v4098_v9 = vmax.f32 (!%p4920_p7), %v8728_v18, 1e-30  ;;  %vm4155_vm12 = vcmp.gt.f32.partialorder (!%p4920_p7), %v8703_v15, 0.0  ;;  %vm4156_vm7 = vcmp.gt.f32.partialorder (!%p4920_p7), %v8705_v38, 0.0 }
 0x5b7   : > { %v3709_v60 = vadd.f32 %v5397_v35, %v3436_v54  ;;  %v4014_v49 = vadd.f32 %v5509_v2, %v3773_v53  ;;  %v5400_v57 = vadd.f32 %v5399_v48, %v5398_v43  ;;  %v5512_v58 = vadd.f32 %v5511_v22, %v5510_v51  ;;  %v5772_v53 = vpop.eup (!%p4920_p7), %5771  ;;  %v8742_v35 = vld [vmem:[#allocation2 + $0x68] sm:$0xff] (!%p4920_p7)  ;;  %v8744_v2 = vld [vmem:[#allocation2 + $0x70] sm:$0xff] (!%p4920_p7)  ;;  %v8823_v32 = vld [vmem:[#allocation2 + $0xa0] sm:$0xff] (!%p4920_p7) }
 0x5b8   : > { %5787 = vrcp.f32 (!%p4920_p7), %v4094_v14  ;;  %v4097_v54 = vmax.f32 (!%p4920_p7), %v8726_v59, 1e-30  ;;  %v5774_v43 = vpop.eup (!%p4920_p7), %5773  ;;  %v4214_v51 = vmul.f32 (!%p4920_p7), %v5772_v53, %v4182_v10  ;;  %v4099_v48 = vmax.f32 (!%p4920_p7), %v8742_v35, 1e-30  ;;  %v4191_v23 = vld [vmem:[%s9100_s9 + $0x48] sm:$0xff] (!%p4920_p7)  ;;  %v4192_v52 = vld [vmem:[%s9100_s9 + $0x50] sm:$0xff] (!%p4920_p7) }
 0x5b9   : > { %3741 = vst.msk [vmem:[#allocation2 + $0xe0] sm:$0xff] %vm2551_vm14, %v3709_v60  ;;  %4046 = vst.msk [vmem:[%s9100_s9 + $0xe0] sm:$0xff] %vm2551_vm14, %v4014_v49  ;;  %v3710_v16 = vadd.f32 %v5400_v57, %v3437_v3  ;;  %v4015_v47 = vadd.f32 %v5512_v58, %v3774_v13  ;;  %5789 = vrcp.f32 (!%p4920_p7), %v4095_v39  ;;  %v4185_v3 = vld [vmem:[%s9100_s9 + $0x18] sm:$0xff] (!%p4920_p7)  ;;  %v4215_v60 = vmul.f32 (!%p4920_p7), %v5774_v43, %v4183_v61  ;;  %v4186_v49 = vld [vmem:[%s9100_s9 + $0x20] sm:$0xff] (!%p4920_p7) }
 0x5ba   : > { %5791 = vrcp.f32 (!%p4920_p7), %v4096_v20  ;;  %v8751_v13 = vld [vmem:[#allocation2 + $0x78] sm:$0xff] (!%p4920_p7)  ;;  %v5776_v22 = vpop.eup (!%p4920_p7), %5775  ;;  %vm4157_vm0 = vcmp.gt.f32.partialorder (!%p4920_p7), %v8709_v40, 0.0  ;;  %v4100_v57 = vmax.f32 (!%p4920_p7), %v8744_v2, 1e-30  ;;  %v8758_v58 = vld [vmem:[#allocation2 + $0x80] sm:$0xff] (!%p4920_p7)  ;;  %vm4158_vm6 = vcmp.gt.f32.partialorder (!%p4920_p7), %v8711_v24, 0.0 }
 0x5bb   : > { %3742 = vst.msk [vmem:[#allocation2 + $0xe8] sm:$0xff] %vm2551_vm14, %v3710_v16  ;;  %4047 = vst.msk [vmem:[%s9100_s9 + $0xe8] sm:$0xff] %vm2551_vm14, %v4015_v47  ;;  %v5401_v44 = vpop.f32.mrb[192].mxu0  ;;  %v5513_v27 = vpop.f32.mrb[184].mxu1  ;;  %5793 = vrcp.f32 (!%p4920_p7), %v4097_v54  ;;  %v4246_v47 = vsel (!%p4920_p7), %vm4150_vm9, %v4214_v51, 0.0  ;;  %vm4159_vm15 = vcmp.gt.f32.partialorder (!%p4920_p7), %v8715_v41, 0.0 }
 0x5bc   : > { %v5402_v46 = vpop.f32.mrb[193].mxu0  ;;  %v5514_v5 = vpop.f32.mrb[185].mxu1  ;;  %5795 = vrcp.f32 (!%p4920_p7), %v4098_v9  ;;  %4278 = vst.msk [vmem:[%s9100_s9] sm:$0xff] (!%p4920_p7), %vm2551_vm14, %v4246_v47  ;;  %vm4160_vm1 = vcmp.gt.f32.partialorder (!%p4920_p7), %v8717_v21, 0.0  ;;  %vm4161_vm4 = vcmp.gt.f32.partialorder (!%p4920_p7), %v8726_v59, 0.0  ;;  %v4193_v1 = vld [vmem:[%s9100_s9 + $0x58] sm:$0xff] (!%p4920_p7) }
 0x5bd   : > { %v5403_v55 = vadd.f32 %v5402_v46, %v5401_v44  ;;  %v5515_v34 = vadd.f32 %v5514_v5, %v5513_v27  ;;  %v5404_v4 = vpop.f32.mrb[194].mxu0  ;;  %v5516_v31 = vpop.f32.mrb[186].mxu1  ;;  %4053 = sbr.rel (%p4920_p7) target bundleno = 1507 (0x5e3), region = 68  ;;  %v4216_v44 = vmul.f32 (!%p4920_p7), %v5776_v22, %v4184_v7  ;;  %v4187_v27 = vld [vmem:[%s9100_s9 + $0x28] sm:$0xff] (!%p4920_p7)  ;;  %5797 = vrcp.f32 (!%p4920_p7), %v4099_v48  ;;  %v4194_v61 = vld [vmem:[%s9100_s9 + $0x60] sm:$0xff] (!%p4920_p7)  ;;  %v8858_v43 = vld [vmem:[#allocation2 + $0xb0] sm:$0xff] (!%p4920_p7) }
 0x5be   : > { %v5405_v26 = vpop.f32.mrb[195].mxu0  ;;  %v5517_v45 = vpop.f32.mrb[187].mxu1  ;;  %v8766_v46 = vld [vmem:[#allocation2 + $0x88] sm:$0xff] (!%p4920_p7)  ;;  %v4247_v5 = vsel (!%p4920_p7), %vm4151_vm2, %v4215_v60, 0.0  ;;  %5799 = vrcp.f32 (!%p4920_p7), %v4100_v57  ;;  %vm4162_vm13 = vcmp.gt.f32.partialorder (!%p4920_p7), %v8728_v18, 0.0  ;;  %vm4163_vm11 = vcmp.gt.f32.partialorder (!%p4920_p7), %v8742_v35, 0.0 }
 0x5bf   : > { %v3711_v50 = vadd.f32 %v5403_v55, %v3438_v33  ;;  %v4016_v17 = vadd.f32 %v5515_v34, %v3775_v30  ;;  %v5406_v37 = vadd.f32 %v5405_v26, %v5404_v4  ;;  %v5518_v36 = vadd.f32 %v5517_v45, %v5516_v31  ;;  %v5778_v16 = vpop.eup (!%p4920_p7), %5777  ;;  %v4188_v34 = vld [vmem:[%s9100_s9 + $0x30] sm:$0xff] (!%p4920_p7)  ;;  %4279 = vst.msk [vmem:[%s9100_s9 + $0x8] sm:$0xff] (!%p4920_p7), %vm2551_vm14, %v4247_v5  ;;  %v4189_v26 = vld [vmem:[%s9100_s9 + $0x38] sm:$0xff] (!%p4920_p7)  ;;  %v8836_v39 = vld [vmem:[#allocation2 + $0xa8] sm:$0xff] (!%p4920_p7) }
 0x5c0   : > { %v4101_v33 = vmax.f32 (!%p4920_p7), %v8751_v13, 1e-30  ;;  %v5780_v30 = vpop.eup (!%p4920_p7), %5779  ;;  %v4217_v55 = vmul.f32 (!%p4920_p7), %v5778_v16, %v4185_v3  ;;  %v4248_v31 = vsel (!%p4920_p7), %vm4152_vm3, %v4216_v44, 0.0  ;;  %v8788_v45 = vld [vmem:[#allocation2 + $0x90] sm:$0xff] (!%p4920_p7)  ;;  %v4195_v40 = vld [vmem:[%s9100_s9 + $0x68] sm:$0xff] (!%p4920_p7)  ;;  %v8871_v60 = vld [vmem:[#allocation2 + $0xb8] sm:$0xff] (!%p4920_p7) }
 0x5c1   : > { %3743 = vst.msk [vmem:[#allocation2 + $0xf0] sm:$0xff] %vm2551_vm14, %v3711_v50  ;;  %4048 = vst.msk [vmem:[%s9100_s9 + $0xf0] sm:$0xff] %vm2551_vm14, %v4016_v17  ;;  %v3712_v8 = vadd.f32 %v5406_v37, %v3439_v25  ;;  %v4017_v19 = vadd.f32 %v5518_v36, %v3776_v29  ;;  %v5782_v4 = vpop.eup (!%p4920_p7), %5781  ;;  %v4218_v25 = vmul.f32 (!%p4920_p7), %v5780_v30, %v4186_v49  ;;  %v4102_v29 = vmax.f32 (!%p4920_p7), %v8758_v58, 1e-30  ;;  %v4190_v36 = vld [vmem:[%s9100_s9 + $0x40] sm:$0xff] (!%p4920_p7)  ;;  %v4196_v48 = vld [vmem:[%s9100_s9 + $0x70] sm:$0xff] (!%p4920_p7) }
 0x5c2   : > { %5801 = vrcp.f32 (!%p4920_p7), %v4101_v33  ;;  %v5784_v50 = vpop.eup (!%p4920_p7), %5783  ;;  %4280 = vst.msk [vmem:[%s9100_s9 + $0x10] sm:$0xff] (!%p4920_p7), %vm2551_vm14, %v4248_v31  ;;  %v4249_v17 = vsel (!%p4920_p7), %vm4153_vm10, %v4217_v55, 0.0  ;;  %v4219_v37 = vmul.f32 (!%p4920_p7), %v5782_v4, %v4187_v27  ;;  %v4104_v0 = vmax.f32 (!%p4920_p7), %v8788_v45, 1e-30  ;;  %v4197_v16 = vld [vmem:[%s9100_s9 + $0x78] sm:$0xff] (!%p4920_p7)  ;;  %v8890_v33 = vld [vmem:[#allocation2 + $0xc0] sm:$0xff] (!%p4920_p7) }
 0x5c3   : > { %3744 = vst.msk [vmem:[#allocation2 + $0xf8] sm:$0xff] %vm2551_vm14, %v3712_v8  ;;  %4049 = vst.msk [vmem:[%s9100_s9 + $0xf8] sm:$0xff] %vm2551_vm14, %v4017_v19  ;;  %v4103_v8 = vmax.f32 (!%p4920_p7), %v8766_v46, 1e-30  ;;  %v8801_v19 = vld [vmem:[#allocation2 + $0x98] sm:$0xff] (!%p4920_p7)  ;;  %v5786_v11 = vpop.eup (!%p4920_p7), %5785  ;;  %v4250_v28 = vsel (!%p4920_p7), %vm4154_vm5, %v4218_v25, 0.0  ;;  %v4220_v63 = vmul.f32 (!%p4920_p7), %v5784_v50, %v4188_v34  ;;  %5803 = vrcp.f32 (!%p4920_p7), %v4102_v29 }
 0x5c4   : > { %4281 = vst.msk [vmem:[%s9100_s9 + $0x18] sm:$0xff] %vm2551_vm14, %v4249_v17  ;;  %v5788_v42 = vpop.eup %5787  ;;  %4282 = vst.msk [vmem:[%s9100_s9 + $0x20] sm:$0xff] %vm2551_vm14, %v4250_v28  ;;  %v4251_v56 = vsel %vm4155_vm12, %v4219_v37, 0.0  ;;  %v4221_v12 = vmul.f32 %v5786_v11, %v4189_v26  ;;  %v4105_v14 = vmax.f32 %v8801_v19, 1e-30  ;;  %vm4164_vm8 = vcmp.gt.f32.partialorder %v8744_v2, 0.0 }
 0x5c5   : > { %5805 = vrcp.f32 %v4103_v8  ;;  %v5790_v62 = vpop.eup %5789  ;;  %4283 = vst.msk [vmem:[%s9100_s9 + $0x28] sm:$0xff] %vm2551_vm14, %v4251_v56  ;;  %v4252_v15 = vsel %vm4156_vm7, %v4220_v63, 0.0  ;;  %v4222_v6 = vmul.f32 %v5788_v42, %v4190_v36  ;;  %v4106_v7 = vmax.f32 %v8823_v32, 1e-30  ;;  %v4198_v59 = vld [vmem:[%s9100_s9 + $0x80] sm:$0xff]  ;;  %v8903_v4 = vld [vmem:[#allocation2 + $0xc8] sm:$0xff] }
 0x5c6   : > { %v5792_v20 = vpop.eup %5791  ;;  %4284 = vst.msk [vmem:[%s9100_s9 + $0x30] sm:$0xff] %vm2551_vm14, %v4252_v15  ;;  %v4253_v38 = vsel %vm4157_vm0, %v4221_v12, 0.0  ;;  %v4223_v10 = vmul.f32 %v5790_v62, %v4191_v23  ;;  %5807 = vrcp.f32 %v4104_v0  ;;  %v4107_v22 = vmax.f32 %v8836_v39, 1e-30  ;;  %v4199_v25 = vld [vmem:[%s9100_s9 + $0x88] sm:$0xff]  ;;  %v8914_v26 = vld [vmem:[#allocation2 + $0xd0] sm:$0xff] }
 0x5c7   : > { %v5794_v54 = vpop.eup %5793  ;;  %4285 = vst.msk [vmem:[%s9100_s9 + $0x38] sm:$0xff] %vm2551_vm14, %v4253_v38  ;;  %v4254_v9 = vsel %vm4158_vm6, %v4222_v6, 0.0  ;;  %v4224_v53 = vmul.f32 %v5792_v20, %v4192_v52  ;;  %5809 = vrcp.f32 %v4105_v14  ;;  %v4108_v21 = vmax.f32 %v8858_v43, 1e-30  ;;  %v8924_v17 = vld [vmem:[#allocation2 + $0xd8] sm:$0xff]  ;;  %v4200_v2 = vld [vmem:[%s9100_s9 + $0x90] sm:$0xff] }
 0x5c8   : > { %v5796_v51 = vpop.eup %5795  ;;  %4286 = vst.msk [vmem:[%s9100_s9 + $0x40] sm:$0xff] %vm2551_vm14, %v4254_v9  ;;  %v4255_v24 = vsel %vm4159_vm15, %v4223_v10, 0.0  ;;  %v4225_v3 = vmul.f32 %v5794_v54, %v4193_v1  ;;  %5811 = vrcp.f32 %v4106_v7  ;;  %vm4165_vm9 = vcmp.gt.f32.partialorder %v8751_v13, 0.0  ;;  %v8937_v28 = vld [vmem:[#allocation2 + $0xe0] sm:$0xff]  ;;  %v4201_v13 = vld [vmem:[%s9100_s9 + $0x98] sm:$0xff]  ;;  %v8948_v42 = vld [vmem:[#allocation2 + $0xe8] sm:$0xff] }
 0x5c9   : > { %v5798_v49 = vpop.eup %5797  ;;  %4287 = vst.msk [vmem:[%s9100_s9 + $0x48] sm:$0xff] %vm2551_vm14, %v4255_v24  ;;  %v4256_v41 = vsel %vm4160_vm1, %v4224_v53, 0.0  ;;  %v4226_v57 = vmul.f32 %v5796_v51, %v4194_v61  ;;  %5813 = vrcp.f32 %v4107_v22  ;;  %v4109_v34 = vmax.f32 %v8871_v60, 1e-30  ;;  %v8954_v0 = vld [vmem:[#allocation2 + $0xf0] sm:$0xff]  ;;  %v4203_v20 = vld [vmem:[%s9100_s9 + $0xa8] sm:$0xff] }
 0x5ca   : > { %v5800_v47 = vpop.eup %5799  ;;  %4288 = vst.msk [vmem:[%s9100_s9 + $0x50] sm:$0xff] %vm2551_vm14, %v4256_v41  ;;  %v4257_v44 = vsel %vm4161_vm4, %v4225_v3, 0.0  ;;  %v4227_v27 = vmul.f32 %v5798_v49, %v4195_v40  ;;  %5815 = vrcp.f32 %v4108_v21  ;;  %vm4166_vm2 = vcmp.gt.f32.partialorder %v8758_v58, 0.0  ;;  %v4202_v58 = vld [vmem:[%s9100_s9 + $0xa0] sm:$0xff]  ;;  %v8974_v38 = vld [vmem:[#allocation2 + $0xf8] sm:$0xff] }
 0x5cb   : > { %4289 = vst.msk [vmem:[%s9100_s9 + $0x58] sm:$0xff] %vm2551_vm14, %v4257_v44  ;;  %v4258_v5 = vsel %vm4162_vm13, %v4226_v57, 0.0  ;;  %v4228_v55 = vmul.f32 %v5800_v47, %v4196_v48  ;;  %5817 = vrcp.f32 %v4109_v34  ;;  %v4110_v35 = vmax.f32 %v8890_v33, 1e-30  ;;  %v4205_v51 = vld [vmem:[%s9100_s9 + $0xb8] sm:$0xff]  ;;  %v4206_v49 = vld [vmem:[%s9100_s9 + $0xc0] sm:$0xff] }
 0x5cc   : > { %v5802_v30 = vpop.eup %5801  ;;  %4290 = vst.msk [vmem:[%s9100_s9 + $0x60] sm:$0xff] %vm2551_vm14, %v4258_v5  ;;  %v4259_v18 = vsel %vm4163_vm11, %v4227_v27, 0.0  ;;  %vm4167_vm3 = vcmp.gt.f32.partialorder %v8766_v46, 0.0  ;;  %v4111_v11 = vmax.f32 %v8903_v4, 1e-30  ;;  %vm4168_vm10 = vcmp.gt.f32.partialorder %v8788_v45, 0.0 }
 0x5cd   : > { %v4229_v31 = vmul.f32 %v5802_v30, %v4197_v16  ;;  %v5804_v29 = vpop.eup %5803  ;;  %4291 = vst.msk [vmem:[%s9100_s9 + $0x68] sm:$0xff] %vm2551_vm14, %v4259_v18  ;;  %v4260_v50 = vsel %vm4164_vm8, %v4228_v55, 0.0  ;;  %5819 = vrcp.f32 %v4110_v35  ;;  %v4112_v23 = vmax.f32 %v8914_v26, 1e-30  ;;  %v4204_v45 = vld [vmem:[%s9100_s9 + $0xb0] sm:$0xff]  ;;  %v4209_v27 = vld [vmem:[%s9100_s9 + $0xd8] sm:$0xff] }
 0x5ce   : > { %4292 = vst.msk [vmem:[%s9100_s9 + $0x70] sm:$0xff] %vm2551_vm14, %v4260_v50  ;;  %v4230_v8 = vmul.f32 %v5804_v29, %v4198_v59  ;;  %vm4169_vm5 = vcmp.gt.f32.partialorder %v8801_v19, 0.0  ;;  %5821 = vrcp.f32 %v4111_v11  ;;  %v4113_v52 = vmax.f32 %v8924_v17, 1e-30  ;;  %v4210_v30 = vld [vmem:[%s9100_s9 + $0xe0] sm:$0xff]  ;;  %v4211_v34 = vld [vmem:[%s9100_s9 + $0xe8] sm:$0xff] }
 0x5cf   : > { %v5806_v37 = vpop.eup %5805  ;;  %v4261_v36 = vsel %vm4165_vm9, %v4229_v31, 0.0  ;;  %5823 = vrcp.f32 %v4112_v23  ;;  %v4114_v1 = vmax.f32 %v8937_v28, 1e-30  ;;  %v4115_v46 = vmax.f32 %v8948_v42, 1e-30 }
 0x5d0   : > { %4293 = vst.msk [vmem:[%s9100_s9 + $0x78] sm:$0xff] %vm2551_vm14, %v4261_v36  ;;  %v4231_v63 = vmul.f32 %v5806_v37, %v4199_v25  ;;  %v5808_v56 = vpop.eup %5807  ;;  %v4262_v12 = vsel %vm4166_vm2, %v4230_v8, 0.0  ;;  %5825 = vrcp.f32 %v4113_v52  ;;  %vm4170_vm12 = vcmp.gt.f32.partialorder %v8823_v32, 0.0  ;;  %v4212_v25 = vld [vmem:[%s9100_s9 + $0xf0] sm:$0xff]  ;;  %v4213_v36 = vld [vmem:[%s9100_s9 + $0xf8] sm:$0xff] }
 0x5d1   : > { %v5810_v62 = vpop.eup %5809  ;;  %4294 = vst.msk [vmem:[%s9100_s9 + $0x80] sm:$0xff] %vm2551_vm14, %v4262_v12  ;;  %v4232_v6 = vmul.f32 %v5808_v56, %v4200_v2  ;;  %5827 = vrcp.f32 %v4114_v1  ;;  %v4116_v54 = vmax.f32 %v8954_v0, 1e-30  ;;  %vm4171_vm7 = vcmp.gt.f32.partialorder %v8836_v39, 0.0 }
 0x5d2   : > { %v4263_v15 = vsel %vm4167_vm3, %v4231_v63, 0.0  ;;  %v4233_v14 = vmul.f32 %v5810_v62, %v4201_v13  ;;  %v5812_v10 = vpop.eup %5811  ;;  %5829 = vrcp.f32 %v4115_v46  ;;  %v4117_v19 = vmax.f32 %v8974_v38, 1e-30 }
 0x5d3   : > { %4295 = vst.msk [vmem:[%s9100_s9 + $0x88] sm:$0xff] %vm2551_vm14, %v4263_v15  ;;  %v4264_v61 = vsel %vm4168_vm10, %v4232_v6, 0.0  ;;  %v5814_v9 = vpop.eup %5813  ;;  %v4234_v40 = vmul.f32 %v5812_v10, %v4202_v58  ;;  %5831 = vrcp.f32 %v4116_v54  ;;  %vm4172_vm0 = vcmp.gt.f32.partialorder %v8858_v43, 0.0  ;;  %v4207_v43 = vld [vmem:[%s9100_s9 + $0xc8] sm:$0xff] }
 0x5d4   : > { %4296 = vst.msk [vmem:[%s9100_s9 + $0x90] sm:$0xff] %vm2551_vm14, %v4264_v61  ;;  %v4265_v53 = vsel %vm4169_vm5, %v4233_v14, 0.0  ;;  %v4235_v7 = vmul.f32 %v5814_v9, %v4203_v20  ;;  %v5816_v24 = vpop.eup %5815  ;;  %vm4173_vm6 = vcmp.gt.f32.partialorder %v8871_v60, 0.0  ;;  %5833 = vrcp.f32 %v4117_v19  ;;  %v4208_v60 = vld [vmem:[%s9100_s9 + $0xd0] sm:$0xff] }
 0x5d5   : > { %4297 = vst.msk [vmem:[%s9100_s9 + $0x98] sm:$0xff] %vm2551_vm14, %v4265_v53  ;;  %v4266_v39 = vsel %vm4170_vm12, %v4234_v40, 0.0  ;;  %v5818_v3 = vpop.eup %5817  ;;  %v4236_v22 = vmul.f32 %v5816_v24, %v4204_v45  ;;  %vm4174_vm15 = vcmp.gt.f32.partialorder %v8890_v33, 0.0  ;;  %vm4175_vm1 = vcmp.gt.f32.partialorder %v8903_v4, 0.0 }
 0x5d6   : > { %4298 = vst.msk [vmem:[%s9100_s9 + $0xa0] sm:$0xff] %vm2551_vm14, %v4266_v39  ;;  %v4267_v48 = vsel %vm4171_vm7, %v4235_v7, 0.0  ;;  %v4237_v32 = vmul.f32 %v5818_v3, %v4205_v51  ;;  %vm4176_vm4 = vcmp.gt.f32.partialorder %v8914_v26, 0.0  ;;  %vm4177_vm13 = vcmp.gt.f32.partialorder %v8924_v17, 0.0 }
 0x5d7   : > { %4299 = vst.msk [vmem:[%s9100_s9 + $0xa8] sm:$0xff] %vm2551_vm14, %v4267_v48  ;;  %v5820_v41 = vpop.eup %5819  ;;  %v4268_v57 = vsel %vm4172_vm0, %v4236_v22, 0.0  ;;  %vm4178_vm11 = vcmp.gt.f32.partialorder %v8937_v28, 0.0  ;;  %vm4179_vm8 = vcmp.gt.f32.partialorder %v8948_v42, 0.0  ;;  %vm4180_vm9 = vcmp.gt.f32.partialorder %v8954_v0, 0.0 }
 0x5d8   : > { %v5822_v16 = vpop.eup %5821  ;;  %4300 = vst.msk [vmem:[%s9100_s9 + $0xb0] sm:$0xff] %vm2551_vm14, %v4268_v57  ;;  %v4269_v47 = vsel %vm4173_vm6, %v4237_v32, 0.0  ;;  %v4238_v44 = vmul.f32 %v5820_v41, %v4206_v49  ;;  %vm4181_vm2 = vcmp.gt.f32.partialorder %v8974_v38, 0.0 }
 0x5d9   : > { %v5824_v21 = vpop.eup %5823  ;;  %4301 = vst.msk [vmem:[%s9100_s9 + $0xb8] sm:$0xff] %vm2551_vm14, %v4269_v47  ;;  %v4239_v33 = vmul.f32 %v5822_v16, %v4207_v43 }
 0x5da   : > { %v5826_v5 = vpop.eup %5825  ;;  %v4270_v55 = vsel %vm4174_vm15, %v4238_v44, 0.0  ;;  %v4240_v59 = vmul.f32 %v5824_v21, %v4208_v60 }
 0x5db   : > { %v5828_v4 = vpop.eup %5827  ;;  %4302 = vst.msk [vmem:[%s9100_s9 + $0xc0] sm:$0xff] %vm2551_vm14, %v4270_v55  ;;  %v4271_v18 = vsel %vm4175_vm1, %v4239_v33, 0.0  ;;  %v4241_v31 = vmul.f32 %v5826_v5, %v4209_v27 }
 0x5dc   : > { %v5830_v26 = vpop.eup %5829  ;;  %4303 = vst.msk [vmem:[%s9100_s9 + $0xc8] sm:$0xff] %vm2551_vm14, %v4271_v18  ;;  %v4272_v29 = vsel %vm4176_vm4, %v4240_v59, 0.0  ;;  %v4242_v50 = vmul.f32 %v5828_v4, %v4210_v30 }
 0x5dd   : > { %v5832_v35 = vpop.eup %5831  ;;  %4304 = vst.msk [vmem:[%s9100_s9 + $0xd0] sm:$0xff] %vm2551_vm14, %v4272_v29  ;;  %v4273_v17 = vsel %vm4177_vm13, %v4241_v31, 0.0  ;;  %v4243_v37 = vmul.f32 %v5830_v26, %v4211_v34 }
 0x5de   : > { %4305 = vst.msk [vmem:[%s9100_s9 + $0xd8] sm:$0xff] %vm2551_vm14, %v4273_v17  ;;  %v4274_v8 = vsel %vm4178_vm11, %v4242_v50, 0.0  ;;  %v4244_v2 = vmul.f32 %v5832_v35, %v4212_v25  ;;  %v5834_v11 = vpop.eup %5833 }
 0x5df   : > { %4306 = vst.msk [vmem:[%s9100_s9 + $0xe0] sm:$0xff] %vm2551_vm14, %v4274_v8  ;;  %v4275_v28 = vsel %vm4179_vm8, %v4243_v37, 0.0  ;;  %v4245_v13 = vmul.f32 %v5834_v11, %v4213_v36 }
 0x5e0   : > { %4307 = vst.msk [vmem:[%s9100_s9 + $0xe8] sm:$0xff] %vm2551_vm14, %v4275_v28  ;;  %v4276_v63 = vsel %vm4180_vm9, %v4244_v2, 0.0 }
 0x5e1   : > { %4308 = vst.msk [vmem:[%s9100_s9 + $0xf0] sm:$0xff] %vm2551_vm14, %v4276_v63  ;;  %v4277_v23 = vsel %vm4181_vm2, %v4245_v13, 0.0 }
 0x5e2   : > { %4309 = vst.msk [vmem:[%s9100_s9 + $0xf8] sm:$0xff] %vm2551_vm14, %v4277_v23 }
 0x5e3 PF: > { %s19_s11 = sadd.s32 1, %s5857_s11   ;;  %s9537_s30 = smov %s5853_s10 }
 0x5e4   : > { %p16_p8 = scmp.ge.s32.totalorder %s19_s11, 4   ;;  %s9538_s10 = smov %s9540_s12 }
 0x5e6   :  { %18 = sbr.rel (!%p16_p8) target bundleno = 2 (0x2), region = 122 }

</bundles_post_ra>
